<compile_context>
chip_gen: v5e
topology: v5e:2x2
jax: 0.10.0
libtpu: 0.0.40
codegen_flags: <defaults>
</compile_context>

<pallas_src>
import jax
import jax.numpy as jnp
from jax import lax
from jax.experimental import pallas as pl
from jax.experimental.pallas import tpu as pltpu

EPS = 1e-12               # F.normalize default eps (clamp applied to the norm)
LANES = 128
ROW_W = 3 * LANES         # 384: one row of the [M, 384] view = 128 xyz triples
MAX_SUB_TILE = 1024       # rows / grid step  (1024 x 384 f32 = 1.5 MiB per buffer)
MIN_SUB_TILE = 256        # don't shrink below ~32K vectors per step (v7x guidance)
TARGET_STEPS = 4          # aim for >= 4 grid steps (2 TCs on v7x + pipeline depth)
SMALL_N_FALLBACK = 512    # below this, the fused jnp expression wins


def _direct_norm_kernel(x_ref, o_ref):
    # x_ref block: [SUB_TILE, 384].  Each row holds 128 interleaved (px,py,pz)
    # triples, i.e. lanes (3k, 3k+1, 3k+2) form one direction vector.
    x = x_ref[...].astype(jnp.float32)
    sq = x * x

    # 1) Sum of squares of {l-1, l, l+1}: correct exactly at the *center* lane
    #    (phase == 1) of every triple.  Symmetric in roll direction.
    nbr_a = pltpu.roll(sq, 1, axis=1)           # sq one lane away (XLU)
    nbr_b = pltpu.roll(sq, ROW_W - 1, axis=1)   # sq one lane the other way (XLU)
    center_sum = nbr_a + sq + nbr_b

    # Lane phase = lane index mod 3 (channel id).  Computed via f32 floor
    # (avoids vector integer rem); exact for lane indices 0..383.
    lane = lax.broadcasted_iota(jnp.int32, sq.shape, 1).astype(jnp.float32)
    phase = lane - 3.0 * jnp.floor(lane * (1.0 / 3.0))
    is_center = jnp.logical_and(phase > 0.5, phase < 1.5)

    # 2) Keep the norm^2 only at center lanes, then spread it to both edge
    #    lanes of the triple with +/-1 lane rotations.  Exactly one of the
    #    three terms is non-zero per lane; wrap-around lands on zeroed edge
    #    lanes, so it never contaminates a neighbouring triple.
    c = jnp.where(is_center, center_sum, 0.0)
    ssq = c + pltpu.roll(c, 1, axis=1) + pltpu.roll(c, ROW_W - 1, axis=1)

    # 1 / max(||v||, EPS) == rsqrt(max(||v||^2, EPS^2))   (EUP slot)
    inv = lax.rsqrt(jnp.maximum(ssq, EPS * EPS))
    o_ref[...] = (x * inv).astype(o_ref.dtype)


def _round_up(v, m):
    return ((v + m - 1) // m) * m


def _normalize_jnp(x):
    xf = x.astype(jnp.float32)
    ssq = jnp.sum(xf * xf, axis=1, keepdims=True)
    return (xf * lax.rsqrt(jnp.maximum(ssq, EPS * EPS))).astype(x.dtype)


def hailing_direct_norm(x):
    """F.normalize(x) for x: [N, 3]  (p=2, dim=1, eps=1e-12)."""
    n, c = x.shape
    assert c == 3, "HailingDirectNorm expects [N, 3] direction vectors"

    # Small-N fast path: let XLA fuse the elementwise expression for free.
    if n < SMALL_N_FALLBACK:
        return _normalize_jnp(x)

    # Channel-interleaved, lane-dense view: [N, 3] -> [M, 384].  The reshape of
    # the contiguous row-major buffer is a free bitcast (no HBM pass).
    n_pad = _round_up(n, LANES)
    x_in = x if n_pad == n else jnp.pad(x, ((0, n_pad - n), (0, 0)))
    # TODO(synk): for ragged N the jnp.pad is one extra pass over the input;
    # could be folded into the kernel with a manual ragged DMA if it matters.
    m = n_pad // LANES
    xf = x_in.reshape(m, ROW_W)

    # Multiple of 8 (or == m), capped so each step moves >= ~32K vectors and
    # the grid still has several parallel steps for megacore sharding.
    sub_tile = min(MAX_SUB_TILE, m,
                   max(MIN_SUB_TILE, _round_up(pl.cdiv(m, TARGET_STEPS), 8)))
    grid = (pl.cdiv(m, sub_tile),)

    out = pl.pallas_call(
        _direct_norm_kernel,
        out_shape=jax.ShapeDtypeStruct((m, ROW_W), x.dtype),
        grid=grid,
        in_specs=[pl.BlockSpec((sub_tile, ROW_W), lambda i: (i, 0))],
        out_specs=pl.BlockSpec((sub_tile, ROW_W), lambda i: (i, 0)),
        compiler_params=pltpu.CompilerParams(
            dimension_semantics=("parallel",),
        ),
    )(xf)

    out = out.reshape(n_pad, 3)
    return out if n_pad == n else out[:n]


def _reference(x):
    xf = x.astype(jnp.float32)
    norm = jnp.sqrt(jnp.sum(xf * xf, axis=1, keepdims=True))
    return (xf / jnp.maximum(norm, EPS)).astype(x.dtype)


if __name__ == "__main__":
    key = jax.random.PRNGKey(0)

    # Cases: (a) multi-step Pallas grid with a ragged last sublane block,
    # (b) Pallas path with a ragged N (pad path), (c) small-N jnp fast path.
    # Row 0 is zeroed each time to exercise the eps clamp (zero vector -> 0).
    for n in (40960, 1571, 37):
        key, sub = jax.random.split(key)
        x = jax.random.normal(sub, (n, 3), dtype=jnp.float32)
        x = x.at[0].set(0.0)

        y = hailing_direct_norm(x)
        jax.block_until_ready(y)

        y_ref = _reference(x)
        assert y.shape == x.shape and y.dtype == x.dtype
        err = float(jnp.max(jnp.abs(y - y_ref)))
        assert err < 1e-5, (n, err)

    print("KERNEL_OK")
</pallas_src>

<mosaic_0001>
module attributes {stable_mosaic.version = 11 : i64} {
  func.func @_direct_norm_kernel(%arg0: i32, %arg1: memref<256x384xf32, #tpu.memory_space<vmem>>, %arg2: memref<256x384xf32, #tpu.memory_space<vmem>>) attributes {dimension_semantics = [#tpu.dimension_semantics<parallel>], iteration_bounds = array<i64: 2>, scalar_prefetch = 0 : i64, scratch_operands = 0 : i64, tpu.core_type = #tpu.core_type<tc>, window_params = [{transform_indices = @transform_0, window_bounds = array<i64: 256, 384>}, {transform_indices = @transform_1, window_bounds = array<i64: 256, 384>}]} {
    %c0 = arith.constant 0 : index
    %c0_0 = arith.constant 0 : index
    %0 = vector.load %arg1[%c0, %c0_0] : memref<256x384xf32, #tpu.memory_space<vmem>>, vector<256x384xf32>
    %1 = arith.mulf %0, %0 : vector<256x384xf32>
    %c1_i32 = arith.constant 1 : i32
    %2 = tpu.dynamic_rotate %1 by %c1_i32 dim 1 : vector<256x384xf32>, i32 -> vector<256x384xf32>
    %c383_i32 = arith.constant 383 : i32
    %3 = tpu.dynamic_rotate %1 by %c383_i32 dim 1 : vector<256x384xf32>, i32 -> vector<256x384xf32>
    %4 = arith.addf %2, %1 : vector<256x384xf32>
    %5 = arith.addf %4, %3 : vector<256x384xf32>
    %6 = tpu.iota {dimensions = array<i32: 1>} : vector<256x384xi32>
    %7 = arith.sitofp %6 : vector<256x384xi32> to vector<256x384xf32>
    %cst = arith.constant 0.333333343 : f32
    %8 = vector.broadcast %cst : f32 to vector<256x384xf32>
    %9 = arith.mulf %7, %8 : vector<256x384xf32>
    %10 = math.floor %9 : vector<256x384xf32>
    %cst_1 = arith.constant 3.000000e+00 : f32
    %11 = vector.broadcast %cst_1 : f32 to vector<256x384xf32>
    %12 = arith.mulf %11, %10 : vector<256x384xf32>
    %13 = arith.subf %7, %12 : vector<256x384xf32>
    %cst_2 = arith.constant 5.000000e-01 : f32
    %14 = vector.broadcast %cst_2 : f32 to vector<256x384xf32>
    %15 = arith.cmpf ogt, %13, %14 : vector<256x384xf32>
    %cst_3 = arith.constant 1.500000e+00 : f32
    %16 = vector.broadcast %cst_3 : f32 to vector<256x384xf32>
    %17 = arith.cmpf olt, %13, %16 : vector<256x384xf32>
    %18 = arith.andi %15, %17 : vector<256x384xi1>
    %cst_4 = arith.constant 0.000000e+00 : f32
    %19 = vector.broadcast %cst_4 : f32 to vector<256x384xf32>
    %20 = arith.select %18, %5, %19 : vector<256x384xi1>, vector<256x384xf32>
    %c1_i32_5 = arith.constant 1 : i32
    %21 = tpu.dynamic_rotate %20 by %c1_i32_5 dim 1 : vector<256x384xf32>, i32 -> vector<256x384xf32>
    %22 = arith.addf %20, %21 : vector<256x384xf32>
    %c383_i32_6 = arith.constant 383 : i32
    %23 = tpu.dynamic_rotate %20 by %c383_i32_6 dim 1 : vector<256x384xf32>, i32 -> vector<256x384xf32>
    %24 = arith.addf %22, %23 : vector<256x384xf32>
    %cst_7 = arith.constant 1.000000e-24 : f32
    %25 = vector.broadcast %cst_7 : f32 to vector<256x384xf32>
    %26 = arith.maximumf %24, %25 : vector<256x384xf32>
    %27 = math.rsqrt %26 : vector<256x384xf32>
    %28 = arith.mulf %0, %27 : vector<256x384xf32>
    %c0_8 = arith.constant 0 : index
    %c0_9 = arith.constant 0 : index
    %29 = vector.load %arg2[%c0_8, %c0_9] : memref<256x384xf32, #tpu.memory_space<vmem>>, vector<256x384xf32>
    tpu.vector_store %arg2[%c0_8, %c0_9], %28 {strides = array<i32>} : memref<256x384xf32, #tpu.memory_space<vmem>>, vector<256x384xf32>,
    return
  }
  func.func @transform_0(%arg0: i32) -> (i32, i32) {
    %c0_i32 = arith.constant 0 : i32
    %c0_i32_0 = arith.constant 0 : i32
    return %arg0, %c0_i32 : i32, i32
  }
  func.func @transform_1(%arg0: i32) -> (i32, i32) {
    %c0_i32 = arith.constant 0 : i32
    %c0_i32_0 = arith.constant 0 : i32
    return %arg0, %c0_i32 : i32, i32
  }
}

</mosaic_0001>

<bundles_post_ra>
// kernel: tpu_custom_call.1
= control target key start
LH: loop header
LB: loop body
LE: loop exit
PB: predicated region body
PF: predicated region fallthrough
CT: control target
= control target key end

     0   :  { %6 = vsyncpa [#allocation3], 0  ;;  %s9740_s0 = inlined_call_operand.hbm [shape: f32[320,384], index: 0, kind: input, shape index: {}]   ;;  %s9741_s1 = inlined_call_operand.hbm [shape: f32[320,384], index: 1, kind: output, shape index: {}]  }
   0x1   :  { %8 = vsyncpa [#allocation3 + $0x1], 0 }
   0x2   :  { %9 = vsyncpa [#allocation4], 0 }
   0x3   :  { %11 = vsyncpa [#allocation4 + $0x1], 0  ;;  %s3851_s6 = smov 0   ;;  %s3853_s7 = smov 0  }
   0x4   :  { %s3855_s8 = smov 0   ;;  %s3857_s9 = smov 0  }
   0x5 LB: > { %s3872_s10 = sadd.s32 4294967295, %s3831_s9   ;;  %s3358_s11 = sadd.s32 4294967294, %s3831_s9   ;;  %s3831_s9 = sphi %s3857_s9, %s11588_s9   ;;  %s3827_s8 = sphi %s3855_s8, %s11587_s8   ;;  %s3823_s7 = sphi %s3853_s7, %s11586_s7   ;;  %s3819_s6 = sphi %s3851_s6, %s11585_s6  }
   0x6   : > { %s3876_s12 = sadd.s32 1, %s3831_s9   ;;  %s24_s13 = sadd.s32 1, %s3827_s8 }
   0x7   : > { %s21_s14 = ssub.s32 %s3831_s9, %s3876_s12  ;;  %p31_p0 = scmp.ne.s32.totalorder %s3827_s8, %s3823_s7 }
   0x8   : > { %p22_p1 = scmp.eq.s32.totalorder %s21_s14, 0  ;;  %p32_p2 = scmp.eq.s32.totalorder %s3831_s9, 0 }
   0x9   : > { %p37_p3 = scmp.ne.s32.totalorder %s3823_s7, %s3819_s6  ;;  %p38_p4 = scmp.eq.s32.totalorder %s3872_s10, 0 }
   0xa   : > { %s3888_s15 = scalar_select %p22_p1, %s3827_s8, %s24_s13  }
   0xb   : > { %p33_p5 = por %p32_p2, %p31_p0  ;;  %p3890_p6 = por %p38_p4, %p37_p3 }
   0xc   : > { %p61_p7 = scmp.eq.s32.totalorder %s3872_s10, 1  ;;  %p67_p8 = scmp.eq.s32.totalorder %s3358_s11, 1 }
   0xd   : > { %p9742_p11 = scmp.ge.s32.totalorder %s3831_s9, 2 }
   0xe   : > { %p3895_p9 = por %p61_p7, %p31_p0  ;;  %p3899_p10 = por %p67_p8, %p37_p3 }
   0xf   : > { %83 = sbr.rel (%p9742_p11) target bundleno = 61 (0x3d), region = 16 }
  0x14   : > { %86 = sbr.rel (!%p33_p5) target bundleno = 61 (0x3d), region = 20  ;;  %s87_s19 = sand.u32 (%p33_p5), 1, %s3827_s8  }
  0x15   : > { %s3361_s20 = sshll.u32 (%p33_p5), %s3831_s9, 5  ;;  %s3378_s21 = smul.u32 (%p33_p5), 768, %s87_s19 }
  0x16   : > { %s93_s22 = ssub.s32 (%p33_p5), 40, %s3361_s20  ;;  %s3908_s26 = scalar_lea.sflag (%p33_p5), [#allocation3], %s87_s19 }
  0x17   : > { %p94_p12 = scmp.lt.s32.totalorder (%p33_p5), %s93_s22, 32  ;;  %s91_s27 = scalar_lea.vmem (%p33_p5), [#allocation2], %s3378_s21 }
  0x19   : > { %s11590_s22 = smov (!%p94_p12, %s93_s22), 32 }
  0x1a   : > { %s3363_s23 = smul.u32 24, %s11590_s22 }
  0x1c   : > { %s98_s24 = ssub.s32 768, %s3363_s23 }
  0x1d   : > { %s99_s25 = sshll.u32 %s98_s24, 4 }
  0x1e   : > { %100 = vsyncadd %s3908_s26, %s99_s25  ;;  %p3911_p13 = scmp.ne.s32.totalorder %s3363_s23, 0  ;;  %s3379_s29 = smul.u32 768, %s3831_s9 }
  0x1f   : > { %s3916_s30 = sshll.u32 %s91_s27, 4  ;;  %s3918_s2 = smul.u32 384, %s11590_s22  ;;  %s109_s30 = int_to_ptr.vmem [resolvable:$true] %s3916_s30 }
  0x20   : > { %s104_s5 = scalar_lea.hbm %s9740_s0, %s3379_s29  ;;  %s3726_s24 = scalar_lea.hbm %s9740_s0, 960 }
  0x21   : > { %s106_s11 = sshll.u32 %s104_s5, 4  ;;  %s3717_s14 = sshrl.u32 %s3918_s2, 4  ;;  %s3924_s11 = int_to_ptr.hbm [resolvable:$true] %s106_s11 }
  0x22   : > { %s3715_s13 = sshra.s32 %s3924_s11, 4  ;;  %s3753_s19 = sshll.u32 %s3717_s14, 4  ;;  %s3716_s13 = int_to_ptr.hbm [resolvable:$true] %s3715_s13 }
  0x23   : > { %p3719_p0 = scmp.ne.s32.totalorder %s3753_s19, %s3918_s2  ;;  %s3720_s20 = sadd.s32 1, %s3717_s14 }
  0x24   : > { %p3727_p4 = scmp.lt.s32.totalorder %s3716_s13, %s9740_s0 }
  0x25   : > { %s11592_s20 = smov (!%p3719_p0, %s3720_s20), %s3717_s14 }
  0x26   : > { %s3722_s21 = scalar_lea.hbm %s3716_s13, %s11592_s20 }
  0x27   : > { %p3723_p1 = scmp.ne.s32.totalorder %s3716_s13, %s3722_s21  ;;  %p3728_p5 = scmp.lt.s32.totalorder %s3726_s24, %s3722_s21 }
  0x29   : > { %p3724_p2 = pnand %p3723_p1, %p3911_p13  ;;  %p3729_p7 = por %p3728_p5, %p3727_p4 }
  0x2b   : > { %p3725_p3 = pneg %p3724_p2 }
  0x2d   : > { %p3730_p8 = pnand %p3729_p7, %p3725_p3 }
  0x2f   : > { %3733 = shalt.err (!%p3730_p8)
}
  0x30   : > { %s3734_s29 = sshra.s32 %s109_s30, 4  ;;  %s3833_s4 = smov [#allocation2]   ;;  %s3735_s29 = int_to_ptr.vmem [resolvable:$true] %s3734_s29 }
  0x31   : > { %s3741_s3 = scalar_lea.vmem %s3735_s29, %s11592_s20  ;;  %s3745_s5 = scalar_lea.vmem %s3833_s4, 1536 }
  0x32   : > { %p3742_p12 = scmp.ne.s32.totalorder %s3735_s29, %s3741_s3  ;;  %p3747_p2 = scmp.lt.s32.totalorder %s3745_s5, %s3741_s3 }
  0x34   : > { %p3743_p0 = pnand %p3742_p12, %p3911_p13 }
  0x36   : > { %p3744_p1 = pneg %p3743_p0 }
  0x38   : > { %p3749_p11 = pnand %p3747_p2, %p3744_p1 }
  0x3a   : > { %3752 = shalt.err (!%p3749_p11)
}
  0x3b   : > { %s3834_s13 = smov 384   ;;  %s3835_s14 = smov 24  }
  0x3c   : > { %114 = dma.hbm_to_vmem [thread:$0]  (%p3911_p13), %s3924_s11, %s3918_s2, %s109_s30, %s3908_s26, %s3834_s13, %s3834_s13, %s3835_s14  }
  0x3d PF: > { %p3368_p3 = scmp.ge.s32.totalorder %s3831_s9, 1  ;;  %p116_p4 = scmp.lt.s32.totalorder %s3831_s9, 3 }
  0x3f   : > { %p117_p5 = pnand %p3368_p3, %p116_p4 }
  0x41   : > { %120 = sbr.rel (%p117_p5) target bundleno = 1432 (0x598), region = 24 }
  0x46   : > { %s3951_s19 = sand.u32 1, %s3823_s7  }
  0x47   : > { %s3380_s20 = smul.u32 768, %s3951_s19  ;;  %s123_s21 = scalar_lea.sflag [#allocation3], %s3951_s19 }
  0x49   : > { %s3957_s28 = scalar_lea.vmem [#allocation2], %s3380_s20 }
  0x4a   : > { %3810 = dma.done.wait (%p3890_p6), %s123_s21, 12288  }
  0x4b   : > { %3812 = vsyncadd (%p3890_p6), %s123_s21, 4294955008  ;;  %v170_v0 = vld [vmem:[%s3957_s28 + $0x60] sm:$0xff]  ;;  %v164_v1 = vld [vmem:[%s3957_s28 + $0x30] sm:$0xff]  ;;  %s3836_s16 = smov 1   ;;  %s3837_s26 = smov 127  }
  0x4c   : > { %v158_v2 = vld [vmem:[%s3957_s28] sm:$0xff]  ;;  %v3966_v3 = vmul.f32 %v170_v0, %v170_v0  ;;  %v3968_v4 = vmul.f32 %v164_v1, %v164_v1  ;;  %v173_v6 = vld [vmem:[%s3957_s28 + $0x78] sm:$0xff]  ;;  %v167_v7 = vld [vmem:[%s3957_s28 + $0x48] sm:$0xff]  ;;  %s7454_s30 = scalar_lea.vmem [#allocation5], %s3380_s20  ;;  %s3261_s2 = scalar_lea.sflag [#allocation4], %s3951_s19 }
  0x4d   : > { %v3970_v5 = vmul.f32 %v158_v2, %v158_v2  ;;  %v161_v8 = vld [vmem:[%s3957_s28 + $0x18] sm:$0xff]  ;;  %v3981_v9 = vmul.f32 %v173_v6, %v173_v6  ;;  %v3983_v10 = vmul.f32 %v167_v7, %v167_v7  ;;  %v182_v12 = vld [vmem:[%s3957_s28 + $0xc0] sm:$0xff]  ;;  %v179_v13 = vld [vmem:[%s3957_s28 + $0xa8] sm:$0xff]  ;;  %s3369_s11 = sshll.u32 (%p3895_p9), %s3872_s10, 5 }
  0x4e   : > { %358 = vrot.lane.b32.xlu2 %v3966_v3, %s3836_s16  ;;  %354 = vrot.lane.b32.xlu1 %v3968_v4, %s3836_s16  ;;  %v3985_v11 = vmul.f32 %v161_v8, %v161_v8  ;;  %v176_v14 = vld [vmem:[%s3957_s28 + $0x90] sm:$0xff]  ;;  %v3996_v15 = vmul.f32 %v182_v12, %v182_v12  ;;  %v3998_v16 = vmul.f32 %v179_v13, %v179_v13  ;;  %v191_v18 = vld [vmem:[%s3957_s28 + $0x108] sm:$0xff]  ;;  %s3269_s22 = ssub.s32 (%p3895_p9), 40, %s3369_s11 }
  0x4f   : > { %350 = vrot.lane.b32.xlu0 %v3970_v5, %s3836_s16  ;;  %10341 = vst [vmem:[#allocation8_spill] sm:$0xff] %v3983_v10  ;;  %v4000_v17 = vmul.f32 %v176_v14, %v176_v14  ;;  %v188_v19 = vld [vmem:[%s3957_s28 + $0xf0] sm:$0xff]  ;;  %v185_v20 = vld [vmem:[%s3957_s28 + $0xd8] sm:$0xff]  ;;  %v4011_v21 = vmul.f32 %v191_v18, %v191_v18  ;;  %v194_v26 = vld [vmem:[%s3957_s28 + $0x120] sm:$0xff]  ;;  %p3270_p6 = scmp.lt.s32.totalorder (%p3895_p9), %s3269_s22, 32 }
  0x50   : > { %v4013_v22 = vmul.f32 %v188_v19, %v188_v19  ;;  %v4015_v23 = vmul.f32 %v185_v20, %v185_v20  ;;  %v200_v24 = vld [vmem:[%s3957_s28 + $0x150] sm:$0xff]  ;;  %v197_v25 = vld [vmem:[%s3957_s28 + $0x138] sm:$0xff]  ;;  %v4030_v29 = vmul.f32 %v194_v26, %v194_v26  ;;  %v206_v31 = vld [vmem:[%s3957_s28 + $0x180] sm:$0xff] }
  0x51   : > { %10342 = vst [vmem:[#allocation9_spill] sm:$0xff] %v4000_v17  ;;  %v4026_v27 = vmul.f32 %v200_v24, %v200_v24  ;;  %v4028_v28 = vmul.f32 %v197_v25, %v197_v25  ;;  %v209_v30 = vld [vmem:[%s3957_s28 + $0x198] sm:$0xff]  ;;  %v203_v32 = vld [vmem:[%s3957_s28 + $0x168] sm:$0xff]  ;;  %v4043_v34 = vmul.f32 %v206_v31, %v206_v31  ;;  %v218_v36 = vld [vmem:[%s3957_s28 + $0x1e0] sm:$0xff] }
  0x52   : > { %10343 = vst [vmem:[#allocation10_spill] sm:$0xff] %v4015_v23  ;;  %v4041_v33 = vmul.f32 %v209_v30, %v209_v30  ;;  %v4045_v35 = vmul.f32 %v203_v32, %v203_v32  ;;  %v215_v37 = vld [vmem:[%s3957_s28 + $0x1c8] sm:$0xff]  ;;  %v212_v38 = vld [vmem:[%s3957_s28 + $0x1b0] sm:$0xff]  ;;  %v4056_v39 = vmul.f32 %v218_v36, %v218_v36  ;;  %v221_v44 = vld [vmem:[%s3957_s28 + $0x1f8] sm:$0xff] }
  0x53   : > { %10344 = vst [vmem:[#allocation11_spill] sm:$0xff] %v4026_v27  ;;  %v4058_v40 = vmul.f32 %v215_v37, %v215_v37  ;;  %v4060_v41 = vmul.f32 %v212_v38, %v212_v38  ;;  %v227_v42 = vld [vmem:[%s3957_s28 + $0x228] sm:$0xff]  ;;  %v224_v43 = vld [vmem:[%s3957_s28 + $0x210] sm:$0xff]  ;;  %v4075_v47 = vmul.f32 %v221_v44, %v221_v44  ;;  %v233_v49 = vld [vmem:[%s3957_s28 + $0x258] sm:$0xff] }
  0x54   : > { %10345 = vst [vmem:[#allocation12_spill] sm:$0xff] %v4028_v28  ;;  %v4071_v45 = vmul.f32 %v227_v42, %v227_v42  ;;  %v4073_v46 = vmul.f32 %v224_v43, %v224_v43  ;;  %v236_v48 = vld [vmem:[%s3957_s28 + $0x270] sm:$0xff]  ;;  %v230_v50 = vld [vmem:[%s3957_s28 + $0x240] sm:$0xff]  ;;  %v4088_v52 = vmul.f32 %v233_v49, %v233_v49  ;;  %v245_v54 = vld [vmem:[%s3957_s28 + $0x2b8] sm:$0xff] }
  0x55   : > { %10346 = vst [vmem:[#allocation13_spill] sm:$0xff] %v4030_v29  ;;  %v4086_v51 = vmul.f32 %v236_v48, %v236_v48  ;;  %v4090_v53 = vmul.f32 %v230_v50, %v230_v50  ;;  %v242_v55 = vld [vmem:[%s3957_s28 + $0x2a0] sm:$0xff]  ;;  %v239_v56 = vld [vmem:[%s3957_s28 + $0x288] sm:$0xff]  ;;  %v4101_v57 = vmul.f32 %v245_v54, %v245_v54  ;;  %v248_v62 = vld [vmem:[%s3957_s28 + $0x2d0] sm:$0xff] }
  0x56   : > { %360 = vrot.lane.b32.xlu2 %v3981_v9, %s3836_s16  ;;  %356 = vrot.lane.b32.xlu1 %v3983_v10, %s3836_s16  ;;  %10347 = vst [vmem:[#allocation14_spill] sm:$0xff] %v4041_v33  ;;  %v4103_v58 = vmul.f32 %v242_v55, %v242_v55  ;;  %v4105_v59 = vmul.f32 %v239_v56, %v239_v56  ;;  %v251_v60 = vld [vmem:[%s3957_s28 + $0x2e8] sm:$0xff]  ;;  %v165_v2 = vld [vmem:[%s3957_s28 + $0x38] sm:$0xff] }
  0x57   : > { %352 = vrot.lane.b32.xlu0 %v3985_v11, %s3836_s16  ;;  %10348 = vst [vmem:[#allocation15_spill] sm:$0xff] %v4043_v34  ;;  %v159_v61 = vld [vmem:[%s3957_s28 + $0x8] sm:$0xff]  ;;  %v4116_v63 = vmul.f32 %v251_v60, %v251_v60  ;;  %v4120_v1 = vmul.f32 %v248_v62, %v248_v62  ;;  %v168_v6 = vld [vmem:[%s3957_s28 + $0x50] sm:$0xff]  ;;  %v162_v7 = vld [vmem:[%s3957_s28 + $0x20] sm:$0xff]  ;;  %v4131_v8 = vmul.f32 %v165_v2, %v165_v2 }
  0x58   : > { %10349 = vst [vmem:[#allocation16_spill] sm:$0xff] %v4045_v35  ;;  %v4118_v0 = vmul.f32 %v159_v61, %v159_v61  ;;  %v4133_v12 = vmul.f32 %v168_v6, %v168_v6  ;;  %v4135_v13 = vmul.f32 %v162_v7, %v162_v7  ;;  %v174_v14 = vld [vmem:[%s3957_s28 + $0x80] sm:$0xff]  ;;  %v177_v18 = vld [vmem:[%s3957_s28 + $0x98] sm:$0xff]  ;;  %v171_v20 = vld [vmem:[%s3957_s28 + $0x68] sm:$0xff] }
  0x59   : > { %10350 = vst [vmem:[#allocation17_spill] sm:$0xff] %v4056_v39  ;;  %v4148_v24 = vmul.f32 %v174_v14, %v174_v14  ;;  %v4150_v25 = vmul.f32 %v177_v18, %v177_v18  ;;  %v4152_v26 = vmul.f32 %v171_v20, %v171_v20  ;;  %v183_v30 = vld [vmem:[%s3957_s28 + $0xc8] sm:$0xff]  ;;  %v186_v31 = vld [vmem:[%s3957_s28 + $0xe0] sm:$0xff]  ;;  %v180_v36 = vld [vmem:[%s3957_s28 + $0xb0] sm:$0xff] }
  0x5a   : > { %10351 = vst [vmem:[#allocation18_spill] sm:$0xff] %v4058_v40  ;;  %v4165_v37 = vmul.f32 %v183_v30, %v183_v30  ;;  %v4167_v38 = vmul.f32 %v186_v31, %v186_v31  ;;  %v4169_v42 = vmul.f32 %v180_v36, %v180_v36  ;;  %v192_v43 = vld [vmem:[%s3957_s28 + $0x110] sm:$0xff]  ;;  %v195_v44 = vld [vmem:[%s3957_s28 + $0x128] sm:$0xff]  ;;  %v189_v49 = vld [vmem:[%s3957_s28 + $0xf8] sm:$0xff] }
  0x5b   : > { %10352 = vst [vmem:[#allocation19_spill] sm:$0xff] %v4060_v41  ;;  %v4182_v50 = vmul.f32 %v192_v43, %v192_v43  ;;  %v4184_v54 = vmul.f32 %v195_v44, %v195_v44  ;;  %v4186_v55 = vmul.f32 %v189_v49, %v189_v49  ;;  %v201_v56 = vld [vmem:[%s3957_s28 + $0x158] sm:$0xff]  ;;  %v204_v60 = vld [vmem:[%s3957_s28 + $0x170] sm:$0xff]  ;;  %v198_v2 = vld [vmem:[%s3957_s28 + $0x140] sm:$0xff] }
  0x5c   : > { %10353 = vst [vmem:[#allocation20_spill] sm:$0xff] %v4071_v45  ;;  %v4203_v7 = vmul.f32 %v201_v56, %v201_v56  ;;  %v4205_v14 = vmul.f32 %v204_v60, %v204_v60  ;;  %v4207_v18 = vmul.f32 %v198_v2, %v198_v2  ;;  %v210_v20 = vld [vmem:[%s3957_s28 + $0x1a0] sm:$0xff]  ;;  %v213_v30 = vld [vmem:[%s3957_s28 + $0x1b8] sm:$0xff]  ;;  %v207_v43 = vld [vmem:[%s3957_s28 + $0x188] sm:$0xff] }
  0x5d   : > { %10354 = vst [vmem:[#allocation21_spill] sm:$0xff] %v4073_v46  ;;  %v4224_v49 = vmul.f32 %v210_v20, %v210_v20  ;;  %v4226_v56 = vmul.f32 %v213_v30, %v213_v30  ;;  %v4228_v60 = vmul.f32 %v207_v43, %v207_v43  ;;  %v219_v2 = vld [vmem:[%s3957_s28 + $0x1e8] sm:$0xff]  ;;  %v216_v43 = vld [vmem:[%s3957_s28 + $0x1d0] sm:$0xff] }
  0x5e   : > { %366 = vrot.lane.b32.xlu2 %v3996_v15, %s3836_s16  ;;  %364 = vrot.lane.b32.xlu1 %v3998_v16, %s3836_s16  ;;  %10355 = vst [vmem:[#allocation22_spill] sm:$0xff] %v4075_v47 }
  0x5f   : > { %362 = vrot.lane.b32.xlu0 %v4000_v17, %s3836_s16  ;;  %10356 = vst [vmem:[#allocation23_spill] sm:$0xff] %v4086_v51 }
  0x60   : > { %10357 = vst [vmem:[#allocation24_spill] sm:$0xff] %v4088_v52 }
  0x61   : > { %10358 = vst [vmem:[#allocation25_spill] sm:$0xff] %v4090_v53 }
  0x62   : > { %10359 = vst [vmem:[#allocation26_spill] sm:$0xff] %v4101_v57 }
  0x63   : > { %10360 = vst [vmem:[#allocation27_spill] sm:$0xff] %v4103_v58 }
  0x64   : > { %10361 = vst [vmem:[#allocation28_spill] sm:$0xff] %v4105_v59 }
  0x65   : > { %10362 = vst [vmem:[#allocation29_spill] sm:$0xff] %v4116_v63 }
  0x66   : > { %372 = vrot.lane.b32.xlu2 %v4011_v21, %s3836_s16  ;;  %370 = vrot.lane.b32.xlu1 %v4013_v22, %s3836_s16  ;;  %10363 = vst [vmem:[#allocation30_spill] sm:$0xff] %v4118_v0 }
  0x67   : > { %368 = vrot.lane.b32.xlu0 %v4015_v23, %s3836_s16  ;;  %10364 = vst [vmem:[#allocation31_spill] sm:$0xff] %v4120_v1 }
  0x68   : > { %10365 = vst [vmem:[#allocation32_spill] sm:$0xff] %v4131_v8 }
  0x69   : > { %10366 = vst [vmem:[#allocation33_spill] sm:$0xff] %v4133_v12 }
  0x6a   : > { %10367 = vst [vmem:[#allocation34_spill] sm:$0xff] %v4135_v13 }
  0x6b   : > { %10369 = vst [vmem:[#allocation36_spill] sm:$0xff] %v4148_v24 }
  0x6c   : > { %10370 = vst [vmem:[#allocation37_spill] sm:$0xff] %v4150_v25 }
  0x6d   : > { %10371 = vst [vmem:[#allocation38_spill] sm:$0xff] %v4152_v26 }
  0x6e   : > { %378 = vrot.lane.b32.xlu2 %v4026_v27, %s3836_s16  ;;  %376 = vrot.lane.b32.xlu1 %v4028_v28, %s3836_s16  ;;  %10373 = vst [vmem:[#allocation40_spill] sm:$0xff] %v4165_v37 }
  0x6f   : > { %374 = vrot.lane.b32.xlu0 %v4030_v29, %s3836_s16  ;;  %10374 = vst [vmem:[#allocation41_spill] sm:$0xff] %v4167_v38 }
  0x70   : > { %10375 = vst [vmem:[#allocation42_spill] sm:$0xff] %v4169_v42 }
  0x71   : > { %10377 = vst [vmem:[#allocation44_spill] sm:$0xff] %v4182_v50 }
  0x72   : > { %10378 = vst [vmem:[#allocation45_spill] sm:$0xff] %v4184_v54 }
  0x73   : > { %10379 = vst [vmem:[#allocation46_spill] sm:$0xff] %v4186_v55 }
  0x74   : > { %10383 = vst [vmem:[#allocation50_spill] sm:$0xff] %v4203_v7 }
  0x75   : > { %10384 = vst [vmem:[#allocation51_spill] sm:$0xff] %v4205_v14 }
  0x76   : > { %384 = vrot.lane.b32.xlu2 %v4041_v33, %s3836_s16  ;;  %382 = vrot.lane.b32.xlu1 %v4043_v34, %s3836_s16  ;;  %10385 = vst [vmem:[#allocation52_spill] sm:$0xff] %v4207_v18 }
  0x77   : > { %380 = vrot.lane.b32.xlu0 %v4045_v35, %s3836_s16  ;;  %10389 = vst [vmem:[#allocation56_spill] sm:$0xff] %v4224_v49 }
  0x78   : > { %10390 = vst [vmem:[#allocation57_spill] sm:$0xff] %v4226_v56 }
  0x79   : > { %10391 = vst [vmem:[#allocation58_spill] sm:$0xff] %v4228_v60 }
  0x7e   : > { %390 = vrot.lane.b32.xlu2 %v4056_v39, %s3836_s16  ;;  %388 = vrot.lane.b32.xlu1 %v4058_v40, %s3836_s16 }
  0x7f   : > { %386 = vrot.lane.b32.xlu0 %v4060_v41, %s3836_s16 }
  0x86   : > { %396 = vrot.lane.b32.xlu2 %v4071_v45, %s3836_s16  ;;  %394 = vrot.lane.b32.xlu1 %v4073_v46, %s3836_s16 }
  0x87   : > { %392 = vrot.lane.b32.xlu0 %v4075_v47, %s3836_s16 }
  0x8e   : > { %402 = vrot.lane.b32.xlu2 %v4086_v51, %s3836_s16  ;;  %400 = vrot.lane.b32.xlu1 %v4088_v52, %s3836_s16 }
  0x8f   : > { %398 = vrot.lane.b32.xlu0 %v4090_v53, %s3836_s16 }
  0x96   : > { %408 = vrot.lane.b32.xlu2 %v4101_v57, %s3836_s16  ;;  %406 = vrot.lane.b32.xlu1 %v4103_v58, %s3836_s16 }
  0x97   : > { %404 = vrot.lane.b32.xlu0 %v4105_v59, %s3836_s16 }
  0x9e   : > { %412 = vrot.lane.b32.xlu1 %v4116_v63, %s3836_s16  ;;  %414 = vrot.lane.b32.xlu2 %v4118_v0, %s3836_s16 }
  0x9f   : > { %410 = vrot.lane.b32.xlu0 %v4120_v1, %s3836_s16 }
  0xa6   : > { %418 = vrot.lane.b32.xlu1 %v4131_v8, %s3836_s16  ;;  %420 = vrot.lane.b32.xlu2 %v4133_v12, %s3836_s16 }
  0xa7   : > { %416 = vrot.lane.b32.xlu0 %v4135_v13, %s3836_s16 }
  0xa8   : > { %v4145_v19 = vpop.permute.xlu2 %358 }
  0xa9   : > { %10368 = vst [vmem:[#allocation35_spill] sm:$0xff] %v4145_v19 }
  0xae   : > { %424 = vrot.lane.b32.xlu1 %v4148_v24, %s3836_s16  ;;  %426 = vrot.lane.b32.xlu2 %v4150_v25, %s3836_s16 }
  0xaf   : > { %422 = vrot.lane.b32.xlu0 %v4152_v26, %s3836_s16 }
  0xb0   : > { %v4162_v32 = vpop.permute.xlu2 %360 }
  0xb1   : > { %10372 = vst [vmem:[#allocation39_spill] sm:$0xff] %v4162_v32  ;;  %v4249_v32 = vmul.f32 %v216_v43, %v216_v43  ;;  %v225_v43 = vld [vmem:[%s3957_s28 + $0x218] sm:$0xff] }
  0xb3   : > { %10397 = vst [vmem:[#allocation64_spill] sm:$0xff] %v4249_v32 }
  0xb6   : > { %430 = vrot.lane.b32.xlu1 %v4165_v37, %s3836_s16  ;;  %432 = vrot.lane.b32.xlu2 %v4167_v38, %s3836_s16 }
  0xb7   : > { %428 = vrot.lane.b32.xlu0 %v4169_v42, %s3836_s16 }
  0xb8   : > { %v4179_v48 = vpop.permute.xlu2 %366 }
  0xb9   : > { %10376 = vst [vmem:[#allocation43_spill] sm:$0xff] %v4179_v48  ;;  %v4245_v48 = vmul.f32 %v219_v2, %v219_v2 }
  0xbb   : > { %10395 = vst [vmem:[#allocation62_spill] sm:$0xff] %v4245_v48 }
  0xbe   : > { %436 = vrot.lane.b32.xlu1 %v4182_v50, %s3836_s16  ;;  %438 = vrot.lane.b32.xlu2 %v4184_v54, %s3836_s16 }
  0xbf   : > { %434 = vrot.lane.b32.xlu0 %v4186_v55, %s3836_s16 }
  0xc0   : > { %v4196_v61 = vpop.permute.xlu2 %372  ;;  %v4198_v62 = vpop.permute.xlu1 %354 }
  0xc1   : > { %10380 = vst [vmem:[#allocation47_spill] sm:$0xff] %v4196_v61  ;;  %v4201_v6 = vpop.permute.xlu0 %350 }
  0xc2   : > { %10381 = vst [vmem:[#allocation48_spill] sm:$0xff] %v4198_v62  ;;  %v4270_v62 = vmul.f32 %v225_v43, %v225_v43  ;;  %v234_v43 = vld [vmem:[%s3957_s28 + $0x260] sm:$0xff] }
  0xc3   : > { %10382 = vst [vmem:[#allocation49_spill] sm:$0xff] %v4201_v6 }
  0xc4   : > { %10403 = vst [vmem:[#allocation70_spill] sm:$0xff] %v4270_v62 }
  0xc6   : > { %442 = vrot.lane.b32.xlu1 %v4203_v7, %s3836_s16  ;;  %444 = vrot.lane.b32.xlu2 %v4205_v14, %s3836_s16 }
  0xc7   : > { %440 = vrot.lane.b32.xlu0 %v4207_v18, %s3836_s16 }
  0xc8   : > { %v4217_v31 = vpop.permute.xlu2 %378  ;;  %v4219_v36 = vpop.permute.xlu1 %356 }
  0xc9   : > { %10386 = vst [vmem:[#allocation53_spill] sm:$0xff] %v4217_v31  ;;  %v4222_v44 = vpop.permute.xlu0 %352  ;;  %v222_v31 = vld [vmem:[%s3957_s28 + $0x200] sm:$0xff] }
  0xca   : > { %10387 = vst [vmem:[#allocation54_spill] sm:$0xff] %v4219_v36  ;;  %v4247_v36 = vmul.f32 %v222_v31, %v222_v31 }
  0xcb   : > { %10388 = vst [vmem:[#allocation55_spill] sm:$0xff] %v4222_v44 }
  0xcc   : > { %10396 = vst [vmem:[#allocation63_spill] sm:$0xff] %v4247_v36 }
  0xce   : > { %448 = vrot.lane.b32.xlu1 %v4224_v49, %s3836_s16  ;;  %450 = vrot.lane.b32.xlu2 %v4226_v56, %s3836_s16 }
  0xcf   : > { %446 = vrot.lane.b32.xlu0 %v4228_v60, %s3836_s16 }
  0xd0   : > { %v4238_v20 = vpop.permute.xlu2 %384  ;;  %v4240_v30 = vpop.permute.xlu1 %364 }
  0xd1   : > { %10392 = vst [vmem:[#allocation59_spill] sm:$0xff] %v4238_v20  ;;  %v4243_v61 = vpop.permute.xlu0 %362  ;;  %v228_v20 = vld [vmem:[%s3957_s28 + $0x230] sm:$0xff] }
  0xd2   : > { %10393 = vst [vmem:[#allocation60_spill] sm:$0xff] %v4240_v30  ;;  %v4266_v19 = vmul.f32 %v228_v20, %v228_v20 }
  0xd3   : > { %10394 = vst [vmem:[#allocation61_spill] sm:$0xff] %v4243_v61  ;;  %v231_v61 = vld [vmem:[%s3957_s28 + $0x248] sm:$0xff] }
  0xd4   : > { %10401 = vst [vmem:[#allocation68_spill] sm:$0xff] %v4266_v19  ;;  %v4268_v6 = vmul.f32 %v231_v61, %v231_v61 }
  0xd6   : > { %454 = vrot.lane.b32.xlu1 %v4245_v48, %s3836_s16  ;;  %456 = vrot.lane.b32.xlu2 %v4247_v36, %s3836_s16  ;;  %10402 = vst [vmem:[#allocation69_spill] sm:$0xff] %v4268_v6 }
  0xd7   : > { %452 = vrot.lane.b32.xlu0 %v4249_v32, %s3836_s16  ;;  %v4291_v32 = vmul.f32 %v234_v43, %v234_v43  ;;  %v243_v43 = vld [vmem:[%s3957_s28 + $0x2a8] sm:$0xff] }
  0xd8   : > { %v4259_v2 = vpop.permute.xlu2 %390  ;;  %v4261_v31 = vpop.permute.xlu1 %370 }
  0xd9   : > { %10398 = vst [vmem:[#allocation65_spill] sm:$0xff] %v4259_v2  ;;  %v4264_v30 = vpop.permute.xlu0 %368  ;;  %v237_v2 = vld [vmem:[%s3957_s28 + $0x278] sm:$0xff] }
  0xda   : > { %10399 = vst [vmem:[#allocation66_spill] sm:$0xff] %v4261_v31  ;;  %v4287_v44 = vmul.f32 %v237_v2, %v237_v2 }
  0xdb   : > { %10400 = vst [vmem:[#allocation67_spill] sm:$0xff] %v4264_v30  ;;  %v240_v30 = vld [vmem:[%s3957_s28 + $0x290] sm:$0xff] }
  0xdc   : > { %10407 = vst [vmem:[#allocation74_spill] sm:$0xff] %v4287_v44 }
  0xdd   : > { %10409 = vst [vmem:[#allocation76_spill] sm:$0xff] %v4291_v32 }
  0xde   : > { %460 = vrot.lane.b32.xlu1 %v4266_v19, %s3836_s16  ;;  %462 = vrot.lane.b32.xlu2 %v4268_v6, %s3836_s16  ;;  %v4289_v19 = vmul.f32 %v240_v30, %v240_v30  ;;  %v4312_v6 = vmul.f32 %v243_v43, %v243_v43  ;;  %v252_v43 = vld [vmem:[%s3957_s28 + $0x2f0] sm:$0xff] }
  0xdf   : > { %458 = vrot.lane.b32.xlu0 %v4270_v62, %s3836_s16 }
  0xe0   : > { %v4280_v20 = vpop.permute.xlu2 %396  ;;  %v4282_v61 = vpop.permute.xlu1 %376  ;;  %10408 = vst [vmem:[#allocation75_spill] sm:$0xff] %v4289_v19 }
  0xe1   : > { %10404 = vst [vmem:[#allocation71_spill] sm:$0xff] %v4280_v20  ;;  %v4285_v31 = vpop.permute.xlu0 %374  ;;  %v246_v20 = vld [vmem:[%s3957_s28 + $0x2c0] sm:$0xff] }
  0xe2   : > { %10405 = vst [vmem:[#allocation72_spill] sm:$0xff] %v4282_v61  ;;  %v4308_v62 = vmul.f32 %v246_v20, %v246_v20 }
  0xe3   : > { %10406 = vst [vmem:[#allocation73_spill] sm:$0xff] %v4285_v31  ;;  %v249_v31 = vld [vmem:[%s3957_s28 + $0x2d8] sm:$0xff] }
  0xe4   : > { %10413 = vst [vmem:[#allocation80_spill] sm:$0xff] %v4308_v62 }
  0xe5   : > { %10415 = vst [vmem:[#allocation82_spill] sm:$0xff] %v4312_v6 }
  0xe6   : > { %466 = vrot.lane.b32.xlu1 %v4287_v44, %s3836_s16  ;;  %468 = vrot.lane.b32.xlu2 %v4289_v19, %s3836_s16  ;;  %v4310_v44 = vmul.f32 %v249_v31, %v249_v31  ;;  %v4333_v19 = vmul.f32 %v252_v43, %v252_v43  ;;  %v166_v43 = vld [vmem:[%s3957_s28 + $0x40] sm:$0xff] }
  0xe7   : > { %464 = vrot.lane.b32.xlu0 %v4291_v32, %s3836_s16 }
  0xe8   : > { %v4301_v2 = vpop.permute.xlu2 %402  ;;  %v4303_v30 = vpop.permute.xlu1 %382  ;;  %10414 = vst [vmem:[#allocation81_spill] sm:$0xff] %v4310_v44 }
  0xe9   : > { %10410 = vst [vmem:[#allocation77_spill] sm:$0xff] %v4301_v2  ;;  %v4306_v61 = vpop.permute.xlu0 %380  ;;  %v160_v2 = vld [vmem:[%s3957_s28 + $0x10] sm:$0xff] }
  0xea   : > { %10411 = vst [vmem:[#allocation78_spill] sm:$0xff] %v4303_v30  ;;  %v4329_v32 = vmul.f32 %v160_v2, %v160_v2 }
  0xeb   : > { %10412 = vst [vmem:[#allocation79_spill] sm:$0xff] %v4306_v61  ;;  %v163_v61 = vld [vmem:[%s3957_s28 + $0x28] sm:$0xff] }
  0xec   : > { %10419 = vst [vmem:[#allocation86_spill] sm:$0xff] %v4329_v32 }
  0xed   : > { %10421 = vst [vmem:[#allocation88_spill] sm:$0xff] %v4333_v19 }
  0xee   : > { %472 = vrot.lane.b32.xlu1 %v4308_v62, %s3836_s16  ;;  %474 = vrot.lane.b32.xlu2 %v4310_v44, %s3836_s16  ;;  %v4331_v62 = vmul.f32 %v163_v61, %v163_v61  ;;  %v4354_v44 = vmul.f32 %v166_v43, %v166_v43  ;;  %v175_v43 = vld [vmem:[%s3957_s28 + $0x88] sm:$0xff] }
  0xef   : > { %470 = vrot.lane.b32.xlu0 %v4312_v6, %s3836_s16 }
  0xf0   : > { %v4322_v20 = vpop.permute.xlu2 %408  ;;  %v4324_v31 = vpop.permute.xlu1 %388  ;;  %10420 = vst [vmem:[#allocation87_spill] sm:$0xff] %v4331_v62 }
  0xf1   : > { %10416 = vst [vmem:[#allocation83_spill] sm:$0xff] %v4322_v20  ;;  %v4327_v30 = vpop.permute.xlu0 %386  ;;  %v169_v20 = vld [vmem:[%s3957_s28 + $0x58] sm:$0xff] }
  0xf2   : > { %10417 = vst [vmem:[#allocation84_spill] sm:$0xff] %v4324_v31  ;;  %v4350_v6 = vmul.f32 %v169_v20, %v169_v20 }
  0xf3   : > { %10418 = vst [vmem:[#allocation85_spill] sm:$0xff] %v4327_v30  ;;  %v172_v30 = vld [vmem:[%s3957_s28 + $0x70] sm:$0xff] }
  0xf4   : > { %10425 = vst [vmem:[#allocation92_spill] sm:$0xff] %v4350_v6 }
  0xf5   : > { %10427 = vst [vmem:[#allocation94_spill] sm:$0xff] %v4354_v44 }
  0xf6   : > { %478 = vrot.lane.b32.xlu1 %v4329_v32, %s3836_s16  ;;  %480 = vrot.lane.b32.xlu2 %v4331_v62, %s3836_s16  ;;  %v4352_v32 = vmul.f32 %v172_v30, %v172_v30  ;;  %v4375_v62 = vmul.f32 %v175_v43, %v175_v43  ;;  %v184_v43 = vld [vmem:[%s3957_s28 + $0xd0] sm:$0xff] }
  0xf7   : > { %476 = vrot.lane.b32.xlu0 %v4333_v19, %s3836_s16 }
  0xf8   : > { %v4343_v2 = vpop.permute.xlu1 %394  ;;  %v4345_v61 = vpop.permute.xlu2 %414  ;;  %10426 = vst [vmem:[#allocation93_spill] sm:$0xff] %v4352_v32 }
  0xf9   : > { %10422 = vst [vmem:[#allocation89_spill] sm:$0xff] %v4343_v2  ;;  %v4348_v31 = vpop.permute.xlu0 %392 }
  0xfa   : > { %10423 = vst [vmem:[#allocation90_spill] sm:$0xff] %v4345_v61  ;;  %v178_v61 = vld [vmem:[%s3957_s28 + $0xa0] sm:$0xff] }
  0xfb   : > { %10424 = vst [vmem:[#allocation91_spill] sm:$0xff] %v4348_v31  ;;  %v181_v31 = vld [vmem:[%s3957_s28 + $0xb8] sm:$0xff]  ;;  %v4371_v19 = vmul.f32 %v178_v61, %v178_v61 }
  0xfc   : > { %10433 = vst [vmem:[#allocation100_spill] sm:$0xff] %v4375_v62 }
  0xfd   : > { %10431 = vst [vmem:[#allocation98_spill] sm:$0xff] %v4371_v19 }
  0xfe   : > { %484 = vrot.lane.b32.xlu1 %v4350_v6, %s3836_s16  ;;  %486 = vrot.lane.b32.xlu2 %v4352_v32, %s3836_s16  ;;  %v4373_v6 = vmul.f32 %v181_v31, %v181_v31  ;;  %v4396_v32 = vmul.f32 %v184_v43, %v184_v43  ;;  %v193_v43 = vld [vmem:[%s3957_s28 + $0x118] sm:$0xff] }
  0xff   : > { %482 = vrot.lane.b32.xlu0 %v4354_v44, %s3836_s16 }
 0x100   : > { %v4364_v20 = vpop.permute.xlu1 %400  ;;  %v4366_v30 = vpop.permute.xlu2 %420  ;;  %10432 = vst [vmem:[#allocation99_spill] sm:$0xff] %v4373_v6 }
 0x101   : > { %10428 = vst [vmem:[#allocation95_spill] sm:$0xff] %v4364_v20  ;;  %v4369_v2 = vpop.permute.xlu0 %398 }
 0x102   : > { %10429 = vst [vmem:[#allocation96_spill] sm:$0xff] %v4366_v30  ;;  %v187_v30 = vld [vmem:[%s3957_s28 + $0xe8] sm:$0xff] }
 0x103   : > { %10430 = vst [vmem:[#allocation97_spill] sm:$0xff] %v4369_v2  ;;  %v190_v2 = vld [vmem:[%s3957_s28 + $0x100] sm:$0xff]  ;;  %v4392_v44 = vmul.f32 %v187_v30, %v187_v30 }
 0x104   : > { %10439 = vst [vmem:[#allocation106_spill] sm:$0xff] %v4396_v32 }
 0x105   : > { %10437 = vst [vmem:[#allocation104_spill] sm:$0xff] %v4392_v44 }
 0x106   : > { %490 = vrot.lane.b32.xlu1 %v4371_v19, %s3836_s16  ;;  %492 = vrot.lane.b32.xlu2 %v4373_v6, %s3836_s16  ;;  %v4394_v19 = vmul.f32 %v190_v2, %v190_v2  ;;  %v4417_v6 = vmul.f32 %v193_v43, %v193_v43  ;;  %v202_v43 = vld [vmem:[%s3957_s28 + $0x160] sm:$0xff] }
 0x107   : > { %488 = vrot.lane.b32.xlu0 %v4375_v62, %s3836_s16 }
 0x108   : > { %v4385_v61 = vpop.permute.xlu1 %406  ;;  %v4387_v31 = vpop.permute.xlu2 %426  ;;  %10438 = vst [vmem:[#allocation105_spill] sm:$0xff] %v4394_v19 }
 0x109   : > { %10434 = vst [vmem:[#allocation101_spill] sm:$0xff] %v4385_v61  ;;  %v4390_v20 = vpop.permute.xlu0 %404 }
 0x10a   : > { %10435 = vst [vmem:[#allocation102_spill] sm:$0xff] %v4387_v31  ;;  %v196_v31 = vld [vmem:[%s3957_s28 + $0x130] sm:$0xff] }
 0x10b   : > { %10436 = vst [vmem:[#allocation103_spill] sm:$0xff] %v4390_v20  ;;  %v199_v20 = vld [vmem:[%s3957_s28 + $0x148] sm:$0xff]  ;;  %v4413_v62 = vmul.f32 %v196_v31, %v196_v31 }
 0x10c   : > { %10445 = vst [vmem:[#allocation112_spill] sm:$0xff] %v4417_v6 }
 0x10d   : > { %10443 = vst [vmem:[#allocation110_spill] sm:$0xff] %v4413_v62 }
 0x10e   : > { %496 = vrot.lane.b32.xlu1 %v4392_v44, %s3836_s16  ;;  %498 = vrot.lane.b32.xlu2 %v4394_v19, %s3836_s16  ;;  %v4415_v44 = vmul.f32 %v199_v20, %v199_v20  ;;  %v4438_v19 = vmul.f32 %v202_v43, %v202_v43  ;;  %v211_v43 = vld [vmem:[%s3957_s28 + $0x1a8] sm:$0xff] }
 0x10f   : > { %494 = vrot.lane.b32.xlu0 %v4396_v32, %s3836_s16 }
 0x110   : > { %v4406_v30 = vpop.permute.xlu1 %412  ;;  %v4408_v2 = vpop.permute.xlu2 %432  ;;  %10444 = vst [vmem:[#allocation111_spill] sm:$0xff] %v4415_v44 }
 0x111   : > { %10440 = vst [vmem:[#allocation107_spill] sm:$0xff] %v4406_v30  ;;  %v4411_v61 = vpop.permute.xlu0 %410 }
 0x112   : > { %10441 = vst [vmem:[#allocation108_spill] sm:$0xff] %v4408_v2  ;;  %v205_v2 = vld [vmem:[%s3957_s28 + $0x178] sm:$0xff] }
 0x113   : > { %10442 = vst [vmem:[#allocation109_spill] sm:$0xff] %v4411_v61  ;;  %v208_v61 = vld [vmem:[%s3957_s28 + $0x190] sm:$0xff]  ;;  %v4434_v32 = vmul.f32 %v205_v2, %v205_v2 }
 0x114   : > { %10451 = vst [vmem:[#allocation118_spill] sm:$0xff] %v4438_v19 }
 0x115   : > { %10449 = vst [vmem:[#allocation116_spill] sm:$0xff] %v4434_v32 }
 0x116   : > { %502 = vrot.lane.b32.xlu1 %v4413_v62, %s3836_s16  ;;  %504 = vrot.lane.b32.xlu2 %v4415_v44, %s3836_s16  ;;  %v4436_v62 = vmul.f32 %v208_v61, %v208_v61  ;;  %v4459_v44 = vmul.f32 %v211_v43, %v211_v43  ;;  %v220_v43 = vld [vmem:[%s3957_s28 + $0x1f0] sm:$0xff] }
 0x117   : > { %500 = vrot.lane.b32.xlu0 %v4417_v6, %s3836_s16 }
 0x118   : > { %v4427_v31 = vpop.permute.xlu1 %418  ;;  %v4429_v20 = vpop.permute.xlu2 %438  ;;  %10450 = vst [vmem:[#allocation117_spill] sm:$0xff] %v4436_v62 }
 0x119   : > { %10446 = vst [vmem:[#allocation113_spill] sm:$0xff] %v4427_v31  ;;  %v4432_v30 = vpop.permute.xlu0 %416 }
 0x11a   : > { %10447 = vst [vmem:[#allocation114_spill] sm:$0xff] %v4429_v20  ;;  %v214_v20 = vld [vmem:[%s3957_s28 + $0x1c0] sm:$0xff] }
 0x11b   : > { %10448 = vst [vmem:[#allocation115_spill] sm:$0xff] %v4432_v30  ;;  %v217_v30 = vld [vmem:[%s3957_s28 + $0x1d8] sm:$0xff]  ;;  %v4455_v6 = vmul.f32 %v214_v20, %v214_v20 }
 0x11c   : > { %10457 = vst [vmem:[#allocation124_spill] sm:$0xff] %v4459_v44 }
 0x11d   : > { %10455 = vst [vmem:[#allocation122_spill] sm:$0xff] %v4455_v6 }
 0x11e   : > { %508 = vrot.lane.b32.xlu1 %v4434_v32, %s3836_s16  ;;  %510 = vrot.lane.b32.xlu2 %v4436_v62, %s3836_s16  ;;  %v4457_v32 = vmul.f32 %v217_v30, %v217_v30  ;;  %v4480_v62 = vmul.f32 %v220_v43, %v220_v43  ;;  %v229_v43 = vld [vmem:[%s3957_s28 + $0x238] sm:$0xff] }
 0x11f   : > { %506 = vrot.lane.b32.xlu0 %v4438_v19, %s3836_s16 }
 0x120   : > { %v4448_v2 = vpop.permute.xlu1 %424  ;;  %v4450_v61 = vpop.permute.xlu2 %444  ;;  %10456 = vst [vmem:[#allocation123_spill] sm:$0xff] %v4457_v32 }
 0x121   : > { %10452 = vst [vmem:[#allocation119_spill] sm:$0xff] %v4448_v2  ;;  %v4453_v31 = vpop.permute.xlu0 %422 }
 0x122   : > { %10453 = vst [vmem:[#allocation120_spill] sm:$0xff] %v4450_v61  ;;  %v223_v61 = vld [vmem:[%s3957_s28 + $0x208] sm:$0xff] }
 0x123   : > { %10454 = vst [vmem:[#allocation121_spill] sm:$0xff] %v4453_v31  ;;  %v226_v31 = vld [vmem:[%s3957_s28 + $0x220] sm:$0xff]  ;;  %v4476_v19 = vmul.f32 %v223_v61, %v223_v61 }
 0x124   : > { %10463 = vst [vmem:[#allocation130_spill] sm:$0xff] %v4480_v62 }
 0x125   : > { %10461 = vst [vmem:[#allocation128_spill] sm:$0xff] %v4476_v19 }
 0x126   : > { %514 = vrot.lane.b32.xlu1 %v4455_v6, %s3836_s16  ;;  %516 = vrot.lane.b32.xlu2 %v4457_v32, %s3836_s16  ;;  %v4478_v6 = vmul.f32 %v226_v31, %v226_v31  ;;  %v4501_v32 = vmul.f32 %v229_v43, %v229_v43  ;;  %v238_v43 = vld [vmem:[%s3957_s28 + $0x280] sm:$0xff] }
 0x127   : > { %512 = vrot.lane.b32.xlu0 %v4459_v44, %s3836_s16 }
 0x128   : > { %v4469_v20 = vpop.permute.xlu1 %430  ;;  %v4471_v30 = vpop.permute.xlu2 %450  ;;  %10462 = vst [vmem:[#allocation129_spill] sm:$0xff] %v4478_v6 }
 0x129   : > { %10458 = vst [vmem:[#allocation125_spill] sm:$0xff] %v4469_v20  ;;  %v4474_v2 = vpop.permute.xlu0 %428 }
 0x12a   : > { %10459 = vst [vmem:[#allocation126_spill] sm:$0xff] %v4471_v30  ;;  %v232_v30 = vld [vmem:[%s3957_s28 + $0x250] sm:$0xff] }
 0x12b   : > { %10460 = vst [vmem:[#allocation127_spill] sm:$0xff] %v4474_v2  ;;  %v235_v2 = vld [vmem:[%s3957_s28 + $0x268] sm:$0xff]  ;;  %v4497_v44 = vmul.f32 %v232_v30, %v232_v30 }
 0x12c   : > { %10469 = vst [vmem:[#allocation136_spill] sm:$0xff] %v4501_v32 }
 0x12d   : > { %10467 = vst [vmem:[#allocation134_spill] sm:$0xff] %v4497_v44 }
 0x12e   : > { %520 = vrot.lane.b32.xlu1 %v4476_v19, %s3836_s16  ;;  %522 = vrot.lane.b32.xlu2 %v4478_v6, %s3836_s16  ;;  %v4499_v19 = vmul.f32 %v235_v2, %v235_v2  ;;  %v4522_v6 = vmul.f32 %v238_v43, %v238_v43 }
 0x12f   : > { %518 = vrot.lane.b32.xlu0 %v4480_v62, %s3836_s16 }
 0x130   : > { %v4490_v61 = vpop.permute.xlu1 %436  ;;  %v4492_v31 = vpop.permute.xlu2 %456  ;;  %10468 = vst [vmem:[#allocation135_spill] sm:$0xff] %v4499_v19 }
 0x131   : > { %10464 = vst [vmem:[#allocation131_spill] sm:$0xff] %v4490_v61  ;;  %v4495_v20 = vpop.permute.xlu0 %434 }
 0x132   : > { %10465 = vst [vmem:[#allocation132_spill] sm:$0xff] %v4492_v31  ;;  %v241_v31 = vld [vmem:[%s3957_s28 + $0x298] sm:$0xff] }
 0x133   : > { %10466 = vst [vmem:[#allocation133_spill] sm:$0xff] %v4495_v20  ;;  %v244_v20 = vld [vmem:[%s3957_s28 + $0x2b0] sm:$0xff]  ;;  %v4518_v62 = vmul.f32 %v241_v31, %v241_v31  ;;  %v247_v31 = vld [vmem:[%s3957_s28 + $0x2c8] sm:$0xff] }
 0x134   : > { %10475 = vst [vmem:[#allocation142_spill] sm:$0xff] %v4522_v6 }
 0x135   : > { %10473 = vst [vmem:[#allocation140_spill] sm:$0xff] %v4518_v62 }
 0x136   : > { %526 = vrot.lane.b32.xlu1 %v4497_v44, %s3836_s16  ;;  %528 = vrot.lane.b32.xlu2 %v4499_v19, %s3836_s16  ;;  %v4520_v44 = vmul.f32 %v244_v20, %v244_v20 }
 0x137   : > { %524 = vrot.lane.b32.xlu0 %v4501_v32, %s3836_s16 }
 0x138   : > { %v4511_v30 = vpop.permute.xlu1 %442  ;;  %v4513_v2 = vpop.permute.xlu2 %462  ;;  %10474 = vst [vmem:[#allocation141_spill] sm:$0xff] %v4520_v44 }
 0x139   : > { %10470 = vst [vmem:[#allocation137_spill] sm:$0xff] %v4511_v30  ;;  %v4516_v61 = vpop.permute.xlu0 %440  ;;  %v250_v30 = vld [vmem:[%s3957_s28 + $0x2e0] sm:$0xff] }
 0x13a   : > { %10471 = vst [vmem:[#allocation138_spill] sm:$0xff] %v4513_v2  ;;  %v253_v2 = vld [vmem:[%s3957_s28 + $0x2f8] sm:$0xff]  ;;  %v4539_v43 = vmul.f32 %v250_v30, %v250_v30 }
 0x13b   : > { %10472 = vst [vmem:[#allocation139_spill] sm:$0xff] %v4516_v61  ;;  %v4541_v19 = vmul.f32 %v253_v2, %v253_v2 }
 0x13c   : > { %10479 = vst [vmem:[#allocation146_spill] sm:$0xff] %v4539_v43 }
 0x13d   : > { %10480 = vst [vmem:[#allocation147_spill] sm:$0xff] %v4541_v19 }
 0x13e   : > { %532 = vrot.lane.b32.xlu1 %v4518_v62, %s3836_s16  ;;  %534 = vrot.lane.b32.xlu2 %v4520_v44, %s3836_s16  ;;  %v4543_v62 = vmul.f32 %v247_v31, %v247_v31 }
 0x13f   : > { %530 = vrot.lane.b32.xlu0 %v4522_v6, %s3836_s16 }
 0x140   : > { %v4532_v32 = vpop.permute.xlu1 %448  ;;  %v4534_v61 = vpop.permute.xlu2 %468  ;;  %10481 = vst [vmem:[#allocation148_spill] sm:$0xff] %v4543_v62 }
 0x141   : > { %10476 = vst [vmem:[#allocation143_spill] sm:$0xff] %v4532_v32  ;;  %v4537_v20 = vpop.permute.xlu0 %446 }
 0x142   : > { %10477 = vst [vmem:[#allocation144_spill] sm:$0xff] %v4534_v61 }
 0x143   : > { %10478 = vst [vmem:[#allocation145_spill] sm:$0xff] %v4537_v20 }
 0x146   : > { %538 = vrot.lane.b32.xlu1 %v4539_v43, %s3836_s16  ;;  %540 = vrot.lane.b32.xlu2 %v4541_v19, %s3836_s16 }
 0x147   : > { %536 = vrot.lane.b32.xlu0 %v4543_v62, %s3836_s16 }
 0x148   : > { %v4551_v32 = vpop.permute.xlu1 %454  ;;  %v4553_v61 = vpop.permute.xlu2 %474 }
 0x149   : > { %10482 = vst [vmem:[#allocation149_spill] sm:$0xff] %v4551_v32  ;;  %v4555_v20 = vpop.permute.xlu0 %452 }
 0x14a   : > { %10483 = vst [vmem:[#allocation150_spill] sm:$0xff] %v4553_v61 }
 0x14b   : > { %10484 = vst [vmem:[#allocation151_spill] sm:$0xff] %v4555_v20 }
 0x14e   : > { %643 = vrot.lane.b32.xlu1 %v3985_v11, %s3837_s26  ;;  %645 = vrot.lane.b32.xlu2 %v3968_v4, %s3837_s26 }
 0x14f   : > { %641 = vrot.lane.b32.xlu0 %v3970_v5, %s3837_s26 }
 0x150   : > { %v4563_v30 = vpop.permute.xlu1 %460  ;;  %v4565_v2 = vpop.permute.xlu2 %480 }
 0x151   : > { %10485 = vst [vmem:[#allocation152_spill] sm:$0xff] %v4563_v30  ;;  %v4567_v31 = vpop.permute.xlu0 %458 }
 0x152   : > { %10486 = vst [vmem:[#allocation153_spill] sm:$0xff] %v4565_v2 }
 0x153   : > { %10487 = vst [vmem:[#allocation154_spill] sm:$0xff] %v4567_v31 }
 0x156   : > { %649 = vrot.lane.b32.xlu1 %v3966_v3, %s3837_s26  ;;  %651 = vrot.lane.b32.xlu2 %v3981_v9, %s3837_s26 }
 0x157   : > { %647 = vrot.lane.b32.xlu0 %v3983_v10, %s3837_s26 }
 0x158   : > { %v4575_v61 = vpop.permute.xlu1 %466  ;;  %v4577_v20 = vpop.permute.xlu2 %486 }
 0x159   : > { %10488 = vst [vmem:[#allocation155_spill] sm:$0xff] %v4575_v61  ;;  %v4579_v32 = vpop.permute.xlu0 %464 }
 0x15a   : > { %10489 = vst [vmem:[#allocation156_spill] sm:$0xff] %v4577_v20 }
 0x15b   : > { %10490 = vst [vmem:[#allocation157_spill] sm:$0xff] %v4579_v32 }
 0x15e   : > { %655 = vrot.lane.b32.xlu1 %v3998_v16, %s3837_s26  ;;  %657 = vrot.lane.b32.xlu2 %v3996_v15, %s3837_s26 }
 0x15f   : > { %653 = vrot.lane.b32.xlu0 %v4000_v17, %s3837_s26 }
 0x160   : > { %v4587_v31 = vpop.permute.xlu1 %472  ;;  %v4589_v30 = vpop.permute.xlu2 %492 }
 0x161   : > { %10491 = vst [vmem:[#allocation158_spill] sm:$0xff] %v4587_v31  ;;  %v4591_v10 = vpop.permute.xlu0 %470 }
 0x162   : > { %10492 = vst [vmem:[#allocation159_spill] sm:$0xff] %v4589_v30 }
 0x163   : > { %10493 = vst [vmem:[#allocation160_spill] sm:$0xff] %v4591_v10 }
 0x166   : > { %661 = vrot.lane.b32.xlu1 %v4013_v22, %s3837_s26  ;;  %663 = vrot.lane.b32.xlu2 %v4011_v21, %s3837_s26 }
 0x167   : > { %659 = vrot.lane.b32.xlu0 %v4015_v23, %s3837_s26 }
 0x168   : > { %v4599_v32 = vpop.permute.xlu1 %478  ;;  %v4601_v61 = vpop.permute.xlu2 %498 }
 0x169   : > { %10494 = vst [vmem:[#allocation161_spill] sm:$0xff] %v4599_v32  ;;  %v4603_v17 = vpop.permute.xlu0 %476 }
 0x16a   : > { %10495 = vst [vmem:[#allocation162_spill] sm:$0xff] %v4601_v61 }
 0x16b   : > { %10496 = vst [vmem:[#allocation163_spill] sm:$0xff] %v4603_v17 }
 0x16e   : > { %667 = vrot.lane.b32.xlu1 %v4028_v28, %s3837_s26  ;;  %669 = vrot.lane.b32.xlu2 %v4026_v27, %s3837_s26 }
 0x16f   : > { %665 = vrot.lane.b32.xlu0 %v4030_v29, %s3837_s26 }
 0x170   : > { %v4611_v10 = vpop.permute.xlu1 %484  ;;  %v4613_v31 = vpop.permute.xlu2 %504 }
 0x171   : > { %10497 = vst [vmem:[#allocation164_spill] sm:$0xff] %v4611_v10  ;;  %v4615_v23 = vpop.permute.xlu0 %482 }
 0x172   : > { %10498 = vst [vmem:[#allocation165_spill] sm:$0xff] %v4613_v31 }
 0x173   : > { %10499 = vst [vmem:[#allocation166_spill] sm:$0xff] %v4615_v23 }
 0x176   : > { %673 = vrot.lane.b32.xlu1 %v4043_v34, %s3837_s26  ;;  %675 = vrot.lane.b32.xlu2 %v4041_v33, %s3837_s26 }
 0x177   : > { %671 = vrot.lane.b32.xlu0 %v4045_v35, %s3837_s26 }
 0x178   : > { %v4623_v17 = vpop.permute.xlu1 %490  ;;  %v4625_v27 = vpop.permute.xlu2 %510 }
 0x179   : > { %10500 = vst [vmem:[#allocation167_spill] sm:$0xff] %v4623_v17  ;;  %v4627_v29 = vpop.permute.xlu0 %488 }
 0x17a   : > { %10501 = vst [vmem:[#allocation168_spill] sm:$0xff] %v4625_v27 }
 0x17b   : > { %10502 = vst [vmem:[#allocation169_spill] sm:$0xff] %v4627_v29 }
 0x17e   : > { %679 = vrot.lane.b32.xlu1 %v4058_v40, %s3837_s26  ;;  %681 = vrot.lane.b32.xlu2 %v4056_v39, %s3837_s26 }
 0x17f   : > { %677 = vrot.lane.b32.xlu0 %v4060_v41, %s3837_s26 }
 0x180   : > { %v4635_v34 = vpop.permute.xlu1 %496  ;;  %v4637_v33 = vpop.permute.xlu2 %516 }
 0x181   : > { %10503 = vst [vmem:[#allocation170_spill] sm:$0xff] %v4635_v34  ;;  %v4639_v35 = vpop.permute.xlu0 %494 }
 0x182   : > { %10504 = vst [vmem:[#allocation171_spill] sm:$0xff] %v4637_v33 }
 0x183   : > { %10505 = vst [vmem:[#allocation172_spill] sm:$0xff] %v4639_v35 }
 0x186   : > { %685 = vrot.lane.b32.xlu1 %v4073_v46, %s3837_s26  ;;  %687 = vrot.lane.b32.xlu2 %v4071_v45, %s3837_s26 }
 0x187   : > { %683 = vrot.lane.b32.xlu0 %v4075_v47, %s3837_s26 }
 0x188   : > { %v4647_v40 = vpop.permute.xlu1 %502  ;;  %v4649_v39 = vpop.permute.xlu2 %522 }
 0x189   : > { %10506 = vst [vmem:[#allocation173_spill] sm:$0xff] %v4647_v40  ;;  %v4651_v41 = vpop.permute.xlu0 %500 }
 0x18a   : > { %10507 = vst [vmem:[#allocation174_spill] sm:$0xff] %v4649_v39 }
 0x18b   : > { %10508 = vst [vmem:[#allocation175_spill] sm:$0xff] %v4651_v41 }
 0x18e   : > { %691 = vrot.lane.b32.xlu1 %v4088_v52, %s3837_s26  ;;  %693 = vrot.lane.b32.xlu2 %v4086_v51, %s3837_s26 }
 0x18f   : > { %689 = vrot.lane.b32.xlu0 %v4090_v53, %s3837_s26 }
 0x190   : > { %v4659_v46 = vpop.permute.xlu1 %508  ;;  %v4661_v45 = vpop.permute.xlu2 %528 }
 0x191   : > { %10509 = vst [vmem:[#allocation176_spill] sm:$0xff] %v4659_v46  ;;  %v4663_v47 = vpop.permute.xlu0 %506  ;;  %v542_v46 = vlaneseq }
 0x192   : > { %10510 = vst [vmem:[#allocation177_spill] sm:$0xff] %v4661_v45  ;;  %v10552_v45 = vld [vmem:[#allocation80_spill] sm:$0xff] }
 0x193   : > { %10511 = vst [vmem:[#allocation178_spill] sm:$0xff] %v4663_v47 }
 0x196   : > { %697 = vrot.lane.b32.xlu1 %v4103_v58, %s3837_s26  ;;  %699 = vrot.lane.b32.xlu2 %v4101_v57, %s3837_s26 }
 0x197   : > { %695 = vrot.lane.b32.xlu0 %v4105_v59, %s3837_s26 }
 0x198   : > { %v4671_v52 = vpop.permute.xlu1 %514  ;;  %v4673_v51 = vpop.permute.xlu2 %534 }
 0x199   : > { %10512 = vst [vmem:[#allocation179_spill] sm:$0xff] %v4671_v52  ;;  %v4675_v53 = vpop.permute.xlu0 %512 }
 0x19a   : > { %10513 = vst [vmem:[#allocation180_spill] sm:$0xff] %v4673_v51  ;;  %v10546_v51 = vld [vmem:[#allocation74_spill] sm:$0xff] }
 0x19b   : > { %10514 = vst [vmem:[#allocation181_spill] sm:$0xff] %v4675_v53  ;;  %v10591_v53 = vld [vmem:[#allocation129_spill] sm:$0xff] }
 0x19e   : > { %703 = vrot.lane.b32.xlu1 %v4116_v63, %s3837_s26  ;;  %705 = vrot.lane.b32.xlu2 %v4118_v0, %s3837_s26 }
 0x19f   : > { %701 = vrot.lane.b32.xlu0 %v4120_v1, %s3837_s26 }
 0x1a0   : > { %v4683_v58 = vpop.permute.xlu1 %520  ;;  %v4685_v57 = vpop.permute.xlu2 %540 }
 0x1a1   : > { %10515 = vst [vmem:[#allocation182_spill] sm:$0xff] %v4683_v58  ;;  %v4687_v59 = vpop.permute.xlu0 %518 }
 0x1a2   : > { %10516 = vst [vmem:[#allocation183_spill] sm:$0xff] %v4685_v57  ;;  %v10540_v57 = vld [vmem:[#allocation68_spill] sm:$0xff] }
 0x1a3   : > { %10517 = vst [vmem:[#allocation184_spill] sm:$0xff] %v4687_v59 }
 0x1a6   : > { %709 = vrot.lane.b32.xlu1 %v4131_v8, %s3837_s26  ;;  %711 = vrot.lane.b32.xlu2 %v4133_v12, %s3837_s26 }
 0x1a7   : > { %707 = vrot.lane.b32.xlu0 %v4135_v13, %s3837_s26 }
 0x1a8   : > { %v4695_v63 = vpop.permute.xlu1 %526  ;;  %v4697_v0 = vpop.permute.xlu2 %645 }
 0x1a9   : > { %10518 = vst [vmem:[#allocation185_spill] sm:$0xff] %v4695_v63  ;;  %v4699_v1 = vpop.permute.xlu0 %524  ;;  %v10547_v63 = vld [vmem:[#allocation75_spill] sm:$0xff] }
 0x1aa   : > { %10519 = vst [vmem:[#allocation186_spill] sm:$0xff] %v4697_v0 }
 0x1ab   : > { %10520 = vst [vmem:[#allocation187_spill] sm:$0xff] %v4699_v1  ;;  %v10558_v1 = vld [vmem:[#allocation86_spill] sm:$0xff] }
 0x1ae   : > { %715 = vrot.lane.b32.xlu1 %v4148_v24, %s3837_s26  ;;  %717 = vrot.lane.b32.xlu2 %v4150_v25, %s3837_s26 }
 0x1af   : > { %713 = vrot.lane.b32.xlu0 %v4152_v26, %s3837_s26 }
 0x1b0   : > { %v4707_v8 = vpop.permute.xlu1 %532  ;;  %v4709_v12 = vpop.permute.xlu2 %651 }
 0x1b1   : > { %10521 = vst [vmem:[#allocation188_spill] sm:$0xff] %v4707_v8  ;;  %v4711_v13 = vpop.permute.xlu0 %530  ;;  %v10541_v8 = vld [vmem:[#allocation69_spill] sm:$0xff] }
 0x1b2   : > { %10522 = vst [vmem:[#allocation189_spill] sm:$0xff] %v4709_v12 }
 0x1b3   : > { %10523 = vst [vmem:[#allocation190_spill] sm:$0xff] %v4711_v13 }
 0x1b6   : > { %721 = vrot.lane.b32.xlu1 %v4165_v37, %s3837_s26  ;;  %723 = vrot.lane.b32.xlu2 %v4167_v38, %s3837_s26 }
 0x1b7   : > { %719 = vrot.lane.b32.xlu0 %v4169_v42, %s3837_s26 }
 0x1b8   : > { %v4719_v24 = vpop.permute.xlu1 %538  ;;  %v4721_v25 = vpop.permute.xlu2 %657 }
 0x1b9   : > { %10524 = vst [vmem:[#allocation191_spill] sm:$0xff] %v4719_v24  ;;  %v4723_v26 = vpop.permute.xlu0 %536 }
 0x1ba   : > { %10525 = vst [vmem:[#allocation192_spill] sm:$0xff] %v4721_v25 }
 0x1bb   : > { %10526 = vst [vmem:[#allocation193_spill] sm:$0xff] %v4723_v26 }
 0x1be   : > { %727 = vrot.lane.b32.xlu1 %v4182_v50, %s3837_s26  ;;  %729 = vrot.lane.b32.xlu2 %v4184_v54, %s3837_s26 }
 0x1bf   : > { %725 = vrot.lane.b32.xlu0 %v4186_v55, %s3837_s26 }
 0x1c0   : > { %v4731_v37 = vpop.permute.xlu1 %643  ;;  %v4733_v38 = vpop.permute.xlu2 %663 }
 0x1c1   : > { %10527 = vst [vmem:[#allocation194_spill] sm:$0xff] %v4731_v37  ;;  %v4735_v42 = vpop.permute.xlu0 %641 }
 0x1c2   : > { %10528 = vst [vmem:[#allocation195_spill] sm:$0xff] %v4733_v38 }
 0x1c3   : > { %10529 = vst [vmem:[#allocation196_spill] sm:$0xff] %v4735_v42 }
 0x1c6   : > { %733 = vrot.lane.b32.xlu1 %v4203_v7, %s3837_s26  ;;  %735 = vrot.lane.b32.xlu2 %v4205_v14, %s3837_s26 }
 0x1c7   : > { %731 = vrot.lane.b32.xlu0 %v4207_v18, %s3837_s26 }
 0x1c8   : > { %v4743_v50 = vpop.permute.xlu1 %649  ;;  %v4745_v54 = vpop.permute.xlu2 %669 }
 0x1c9   : > { %10530 = vst [vmem:[#allocation197_spill] sm:$0xff] %v4743_v50  ;;  %v4747_v55 = vpop.permute.xlu0 %647 }
 0x1ca   : > { %10531 = vst [vmem:[#allocation198_spill] sm:$0xff] %v4745_v54  ;;  %v10601_v54 = vld [vmem:[#allocation140_spill] sm:$0xff] }
 0x1cb   : > { %10532 = vst [vmem:[#allocation199_spill] sm:$0xff] %v4747_v55 }
 0x1ce   : > { %739 = vrot.lane.b32.xlu1 %v4224_v49, %s3837_s26  ;;  %741 = vrot.lane.b32.xlu2 %v4226_v56, %s3837_s26  ;;  %v10536_v49 = vld [vmem:[#allocation64_spill] sm:$0xff] }
 0x1cf   : > { %737 = vrot.lane.b32.xlu0 %v4228_v60, %s3837_s26 }
 0x1d0   : > { %v4755_v7 = vpop.permute.xlu1 %655  ;;  %v4757_v14 = vpop.permute.xlu2 %675 }
 0x1d1   : > { %10533 = vst [vmem:[#allocation200_spill] sm:$0xff] %v4755_v7  ;;  %v4759_v18 = vpop.permute.xlu0 %653 }
 0x1d2   : > { %10534 = vst [vmem:[#allocation201_spill] sm:$0xff] %v4757_v14 }
 0x1d3   : > { %10535 = vst [vmem:[#allocation202_spill] sm:$0xff] %v4759_v18 }
 0x1d6   : > { %745 = vrot.lane.b32.xlu1 %v4245_v48, %s3837_s26  ;;  %747 = vrot.lane.b32.xlu2 %v4247_v36, %s3837_s26  ;;  %v10542_v48 = vld [vmem:[#allocation70_spill] sm:$0xff] }
 0x1d7   : > { %743 = vrot.lane.b32.xlu0 %v10536_v49, %s3837_s26 }
 0x1d8   : > { %v4767_v24 = vpop.permute.xlu1 %661  ;;  %v4769_v56 = vpop.permute.xlu2 %681 }
 0x1d9   : > { %10537 = vst [vmem:[#allocation203_spill] sm:$0xff] %v4767_v24  ;;  %v4771_v60 = vpop.permute.xlu0 %659 }
 0x1da   : > { %10538 = vst [vmem:[#allocation204_spill] sm:$0xff] %v4769_v56 }
 0x1db   : > { %10539 = vst [vmem:[#allocation205_spill] sm:$0xff] %v4771_v60 }
 0x1de   : > { %751 = vrot.lane.b32.xlu1 %v10540_v57, %s3837_s26  ;;  %753 = vrot.lane.b32.xlu2 %v10541_v8, %s3837_s26  ;;  %v10548_v57 = vld [vmem:[#allocation76_spill] sm:$0xff] }
 0x1df   : > { %749 = vrot.lane.b32.xlu0 %v10542_v48, %s3837_s26 }
 0x1e0   : > { %v4779_v26 = vpop.permute.xlu1 %667  ;;  %v4781_v36 = vpop.permute.xlu2 %687 }
 0x1e1   : > { %10543 = vst [vmem:[#allocation206_spill] sm:$0xff] %v4779_v26  ;;  %v4783_v49 = vpop.permute.xlu0 %665 }
 0x1e2   : > { %10544 = vst [vmem:[#allocation207_spill] sm:$0xff] %v4781_v36  ;;  %v10553_v36 = vld [vmem:[#allocation81_spill] sm:$0xff] }
 0x1e3   : > { %10545 = vst [vmem:[#allocation208_spill] sm:$0xff] %v4783_v49  ;;  %v4905_v49 = vand.u32 127, %v542_v46 }
 0x1e5   : > { %vm544_vm0 = vcmp.lt.s32.totalorder %v4905_v49, 1  ;;  %vm833_vm1 = vcmp.lt.s32.totalorder %v4905_v49, 127 }
 0x1e6   : > { %757 = vrot.lane.b32.xlu1 %v10546_v51, %s3837_s26  ;;  %759 = vrot.lane.b32.xlu2 %v10547_v63, %s3837_s26  ;;  %v10554_v51 = vld [vmem:[#allocation82_spill] sm:$0xff] }
 0x1e7   : > { %755 = vrot.lane.b32.xlu0 %v10548_v57, %s3837_s26 }
 0x1e8   : > { %v4791_v13 = vpop.permute.xlu1 %673  ;;  %v4793_v8 = vpop.permute.xlu2 %693 }
 0x1e9   : > { %10549 = vst [vmem:[#allocation209_spill] sm:$0xff] %v4791_v13  ;;  %v4795_v48 = vpop.permute.xlu0 %671  ;;  %v10587_v13 = vld [vmem:[#allocation123_spill] sm:$0xff] }
 0x1ea   : > { %10550 = vst [vmem:[#allocation210_spill] sm:$0xff] %v4793_v8  ;;  %v10559_v8 = vld [vmem:[#allocation87_spill] sm:$0xff] }
 0x1eb   : > { %10551 = vst [vmem:[#allocation211_spill] sm:$0xff] %v4795_v48  ;;  %v10586_v48 = vld [vmem:[#allocation122_spill] sm:$0xff] }
 0x1ee   : > { %763 = vrot.lane.b32.xlu1 %v10552_v45, %s3837_s26  ;;  %765 = vrot.lane.b32.xlu2 %v10553_v36, %s3837_s26  ;;  %v10560_v45 = vld [vmem:[#allocation88_spill] sm:$0xff] }
 0x1ef   : > { %761 = vrot.lane.b32.xlu0 %v10554_v51, %s3837_s26 }
 0x1f0   : > { %v4803_v58 = vpop.permute.xlu1 %679  ;;  %v4805_v63 = vpop.permute.xlu2 %699 }
 0x1f1   : > { %10555 = vst [vmem:[#allocation212_spill] sm:$0xff] %v4803_v58  ;;  %v4807_v57 = vpop.permute.xlu0 %677  ;;  %v10563_v58 = vld [vmem:[#allocation92_spill] sm:$0xff] }
 0x1f2   : > { %10556 = vst [vmem:[#allocation213_spill] sm:$0xff] %v4805_v63  ;;  %v10564_v63 = vld [vmem:[#allocation93_spill] sm:$0xff] }
 0x1f3   : > { %10557 = vst [vmem:[#allocation214_spill] sm:$0xff] %v4807_v57 }
 0x1f6   : > { %769 = vrot.lane.b32.xlu1 %v10558_v1, %s3837_s26  ;;  %771 = vrot.lane.b32.xlu2 %v10559_v8, %s3837_s26  ;;  %v10565_v1 = vld [vmem:[#allocation94_spill] sm:$0xff] }
 0x1f7   : > { %767 = vrot.lane.b32.xlu0 %v10560_v45, %s3837_s26 }
 0x1f8   : > { %v4815_v39 = vpop.permute.xlu1 %685  ;;  %v4817_v36 = vpop.permute.xlu2 %705 }
 0x1f9   : > { %10561 = vst [vmem:[#allocation215_spill] sm:$0xff] %v4815_v39  ;;  %v4819_v51 = vpop.permute.xlu0 %683  ;;  %v10568_v39 = vld [vmem:[#allocation98_spill] sm:$0xff] }
 0x1fa   : > { %10562 = vst [vmem:[#allocation216_spill] sm:$0xff] %v4819_v51  ;;  %v10569_v51 = vld [vmem:[#allocation99_spill] sm:$0xff] }
 0x1fe   : > { %775 = vrot.lane.b32.xlu1 %v10563_v58, %s3837_s26  ;;  %777 = vrot.lane.b32.xlu2 %v10564_v63, %s3837_s26  ;;  %v10570_v58 = vld [vmem:[#allocation100_spill] sm:$0xff] }
 0x1ff   : > { %773 = vrot.lane.b32.xlu0 %v10565_v1, %s3837_s26 }
 0x200   : > { %v4827_v57 = vpop.permute.xlu1 %691  ;;  %v4829_v8 = vpop.permute.xlu2 %711 }
 0x201   : > { %10566 = vst [vmem:[#allocation217_spill] sm:$0xff] %v4827_v57  ;;  %v4831_v45 = vpop.permute.xlu0 %689  ;;  %v10573_v57 = vld [vmem:[#allocation104_spill] sm:$0xff] }
 0x202   : > { %10567 = vst [vmem:[#allocation218_spill] sm:$0xff] %v4831_v45  ;;  %v10574_v45 = vld [vmem:[#allocation105_spill] sm:$0xff] }
 0x206   : > { %781 = vrot.lane.b32.xlu1 %v10568_v39, %s3837_s26  ;;  %783 = vrot.lane.b32.xlu2 %v10569_v51, %s3837_s26  ;;  %v10575_v39 = vld [vmem:[#allocation106_spill] sm:$0xff] }
 0x207   : > { %779 = vrot.lane.b32.xlu0 %v10570_v58, %s3837_s26 }
 0x208   : > { %v4839_v56 = vpop.permute.xlu1 %697  ;;  %v4841_v63 = vpop.permute.xlu2 %717 }
 0x209   : > { %10571 = vst [vmem:[#allocation219_spill] sm:$0xff] %v4839_v56  ;;  %v4843_v1 = vpop.permute.xlu0 %695  ;;  %v10578_v56 = vld [vmem:[#allocation110_spill] sm:$0xff] }
 0x20a   : > { %10572 = vst [vmem:[#allocation220_spill] sm:$0xff] %v4843_v1  ;;  %v10579_v1 = vld [vmem:[#allocation111_spill] sm:$0xff] }
 0x20e   : > { %787 = vrot.lane.b32.xlu1 %v10573_v57, %s3837_s26  ;;  %789 = vrot.lane.b32.xlu2 %v10574_v45, %s3837_s26  ;;  %v10580_v57 = vld [vmem:[#allocation112_spill] sm:$0xff] }
 0x20f   : > { %785 = vrot.lane.b32.xlu0 %v10575_v39, %s3837_s26 }
 0x210   : > { %v4851_v52 = vpop.permute.xlu1 %703  ;;  %v4853_v51 = vpop.permute.xlu2 %723 }
 0x211   : > { %10576 = vst [vmem:[#allocation221_spill] sm:$0xff] %v4851_v52  ;;  %v4855_v58 = vpop.permute.xlu0 %701  ;;  %v10582_v52 = vld [vmem:[#allocation116_spill] sm:$0xff] }
 0x212   : > { %10577 = vst [vmem:[#allocation222_spill] sm:$0xff] %v4855_v58  ;;  %v10583_v58 = vld [vmem:[#allocation117_spill] sm:$0xff] }
 0x216   : > { %793 = vrot.lane.b32.xlu1 %v10578_v56, %s3837_s26  ;;  %795 = vrot.lane.b32.xlu2 %v10579_v1, %s3837_s26  ;;  %v10584_v56 = vld [vmem:[#allocation118_spill] sm:$0xff] }
 0x217   : > { %791 = vrot.lane.b32.xlu0 %v10580_v57, %s3837_s26 }
 0x218   : > { %v4863_v59 = vpop.permute.xlu1 %709  ;;  %v4865_v45 = vpop.permute.xlu2 %729 }
 0x219   : > { %10581 = vst [vmem:[#allocation223_spill] sm:$0xff] %v4865_v45  ;;  %v4867_v39 = vpop.permute.xlu0 %707  ;;  %v10595_v45 = vld [vmem:[#allocation134_spill] sm:$0xff] }
 0x21e   : > { %799 = vrot.lane.b32.xlu1 %v10582_v52, %s3837_s26  ;;  %801 = vrot.lane.b32.xlu2 %v10583_v58, %s3837_s26  ;;  %v10588_v52 = vld [vmem:[#allocation124_spill] sm:$0xff] }
 0x21f   : > { %797 = vrot.lane.b32.xlu0 %v10584_v56, %s3837_s26 }
 0x220   : > { %v4875_v33 = vpop.permute.xlu1 %715  ;;  %v4877_v1 = vpop.permute.xlu2 %735 }
 0x221   : > { %10585 = vst [vmem:[#allocation224_spill] sm:$0xff] %v4877_v1  ;;  %v4879_v57 = vpop.permute.xlu0 %713  ;;  %v10590_v1 = vld [vmem:[#allocation128_spill] sm:$0xff] }
 0x226   : > { %805 = vrot.lane.b32.xlu1 %v10586_v48, %s3837_s26  ;;  %807 = vrot.lane.b32.xlu2 %v10587_v13, %s3837_s26  ;;  %v10592_v48 = vld [vmem:[#allocation130_spill] sm:$0xff] }
 0x227   : > { %803 = vrot.lane.b32.xlu0 %v10588_v52, %s3837_s26 }
 0x228   : > { %v4887_v14 = vpop.permute.xlu1 %721  ;;  %v4889_v58 = vpop.permute.xlu2 %741 }
 0x229   : > { %10589 = vst [vmem:[#allocation225_spill] sm:$0xff] %v4889_v58  ;;  %v4891_v56 = vpop.permute.xlu0 %719  ;;  %v1124_v58 = vcvt.s32.f32 %v4905_v49 }
 0x22e   : > { %811 = vrot.lane.b32.xlu1 %v10590_v1, %s3837_s26  ;;  %813 = vrot.lane.b32.xlu2 %v10591_v53, %s3837_s26  ;;  %v10596_v1 = vld [vmem:[#allocation135_spill] sm:$0xff]  ;;  %v10597_v53 = vld [vmem:[#allocation136_spill] sm:$0xff] }
 0x22f   : > { %809 = vrot.lane.b32.xlu0 %v10592_v48, %s3837_s26 }
 0x230   : > { %v4899_v13 = vpop.permute.xlu1 %727  ;;  %v4901_v27 = vpop.permute.xlu2 %747 }
 0x231   : > { %10593 = vst [vmem:[#allocation226_spill] sm:$0xff] %v4901_v27  ;;  %v4903_v52 = vpop.permute.xlu0 %725  ;;  %v1127_v27 = vmul.f32 0.33333334, %v1124_v58 }
 0x232   : > { %10594 = vst [vmem:[#allocation227_spill] sm:$0xff] %v4903_v52 }
 0x233   : > { %v1130_v46 = vfloor.f32 %v1127_v27 }
 0x236   : > { %817 = vrot.lane.b32.xlu1 %v10595_v45, %s3837_s26  ;;  %819 = vrot.lane.b32.xlu2 %v10596_v1, %s3837_s26  ;;  %v1133_v1 = vmul.f32 3.0, %v1130_v46 }
 0x237   : > { %815 = vrot.lane.b32.xlu0 %v10597_v53, %s3837_s26 }
 0x238   : > { %v4914_v48 = vpop.permute.xlu1 %733  ;;  %v4916_v28 = vpop.permute.xlu2 %753 }
 0x239   : > { %10598 = vst [vmem:[#allocation228_spill] sm:$0xff] %v4914_v48  ;;  %v4918_v26 = vpop.permute.xlu0 %731 }
 0x23a   : > { %10599 = vst [vmem:[#allocation229_spill] sm:$0xff] %v4916_v28  ;;  %v10605_v28 = vld [vmem:[#allocation55_spill] sm:$0xff] }
 0x23b   : > { %10600 = vst [vmem:[#allocation230_spill] sm:$0xff] %v4918_v26  ;;  %v610_v27 = vsel %vm544_vm0, %v4565_v2, %v10605_v28  ;;  %v867_v2 = vsel %vm833_vm1, %v4731_v37, %v4867_v39 }
 0x23e   : > { %823 = vrot.lane.b32.xlu1 %v10601_v54, %s3837_s26  ;;  %825 = vrot.lane.b32.xlu2 %v4520_v44, %s3837_s26  ;;  %v10606_v54 = vld [vmem:[#allocation48_spill] sm:$0xff] }
 0x23f   : > { %821 = vrot.lane.b32.xlu0 %v4522_v6, %s3837_s26  ;;  %v611_v44 = vsel %vm544_vm0, %v4615_v23, %v10606_v54  ;;  %v1136_v6 = vsub.f32 %v1124_v58, %v1133_v1  ;;  %v933_v58 = vadd.f32 %v610_v27, %v3985_v11 }
 0x240   : > { %v4926_v45 = vpop.permute.xlu1 %739  ;;  %v4928_v53 = vpop.permute.xlu2 %759  ;;  %v936_v1 = vadd.f32 %v611_v44, %v3968_v4 }
 0x241   : > { %10602 = vst [vmem:[#allocation231_spill] sm:$0xff] %v4926_v45  ;;  %v4930_v48 = vpop.permute.xlu0 %737  ;;  %v10607_v45 = vld [vmem:[#allocation49_spill] sm:$0xff]  ;;  %vm1139_vm2 = vcmp.gt.f32.partialorder %v1136_v6, 0.5  ;;  %vm1142_vm3 = vcmp.lt.f32.partialorder %v1136_v6, 1.5  ;;  %v1029_v11 = vadd.f32 %v933_v58, %v867_v2  ;;  %v10614_v6 = vld [vmem:[#allocation54_spill] sm:$0xff]  ;;  %v871_v2 = vsel %vm833_vm1, %v4709_v12, %v4875_v33 }
 0x242   : > { %10603 = vst [vmem:[#allocation232_spill] sm:$0xff] %v4928_v53  ;;  %v609_v46 = vsel %vm544_vm0, %v4599_v32, %v10607_v45  ;;  %v868_v53 = vsel %vm833_vm1, %v4697_v0, %v4863_v59  ;;  %v866_v0 = vsel %vm833_vm1, %v4735_v42, %v4817_v36  ;;  %vm4973_vm4 = vmand %vm1139_vm2, %vm1142_vm3  ;;  %v10612_v42 = vld [vmem:[#allocation35_spill] sm:$0xff]  ;;  %v870_v58 = vsel %vm833_vm1, %v4743_v50, %v4879_v57 }
 0x243   : > { %10604 = vst [vmem:[#allocation233_spill] sm:$0xff] %v4930_v48  ;;  %v930_v23 = vadd.f32 %v609_v46, %v3970_v5  ;;  %v613_v5 = vsel %vm544_vm0, %v4577_v20, %v10612_v42  ;;  %v10613_v46 = vld [vmem:[#allocation39_spill] sm:$0xff]  ;;  %v869_v12 = vsel %vm833_vm1, %v4747_v55, %v4829_v8 }
 0x245   : > { %v1026_v4 = vadd.f32 %v930_v23, %v866_v0  ;;  %v4995_v0 = vsel %vm4973_vm4, %v1029_v11, 0.0 }
 0x246   : > { %829 = vrot.lane.b32.xlu1 %v4539_v43, %s3837_s26  ;;  %831 = vrot.lane.b32.xlu2 %v4541_v19, %s3837_s26  ;;  %v1032_v19 = vadd.f32 %v936_v1, %v868_v53  ;;  %v612_v53 = vsel %vm544_vm0, %v4611_v10, %v10614_v6  ;;  %10616 = vst [vmem:[#allocation35_spill] sm:$0xff] %v4995_v0 }
 0x247   : > { %827 = vrot.lane.b32.xlu0 %v4543_v62, %s3837_s26  ;;  %v614_v62 = vsel %vm544_vm0, %v4627_v29, %v10613_v46  ;;  %v942_v1 = vadd.f32 %v613_v5, %v3966_v3  ;;  %v10622_v5 = vld [vmem:[#allocation43_spill] sm:$0xff] }
 0x248   : > { %v4967_v37 = vpop.permute.xlu1 %745  ;;  %v4969_v43 = vpop.permute.xlu2 %765  ;;  %v4991_v23 = vsel %vm4973_vm4, %v1032_v19, 0.0  ;;  %v5009_v19 = vsel %vm4973_vm4, %v1026_v4, 0.0  ;;  %v945_v11 = vadd.f32 %v614_v62, %v3981_v9  ;;  %v10621_v9 = vld [vmem:[#allocation60_spill] sm:$0xff] }
 0x249   : > { %10608 = vst [vmem:[#allocation55_spill] sm:$0xff] %v4967_v37  ;;  %v4971_v27 = vpop.permute.xlu0 %743  ;;  %v616_v62 = vsel %vm544_vm0, %v4589_v30, %v10621_v9 }
 0x24a   : > { %10609 = vst [vmem:[#allocation48_spill] sm:$0xff] %v4971_v27  ;;  %v1041_v10 = vadd.f32 %v945_v11, %v871_v2  ;;  %v872_v11 = vsel %vm833_vm1, %v4759_v18, %v4841_v63 }
 0x24b   : > { %10615 = vst [vmem:[#allocation49_spill] sm:$0xff] %v4991_v23 }
 0x24c   : > { %10617 = vst [vmem:[#allocation39_spill] sm:$0xff] %v5009_v19  ;;  %v5042_v2 = vsel %vm4973_vm4, %v1041_v10, 0.0 }
 0x24d   : > { %10624 = vst [vmem:[#allocation60_spill] sm:$0xff] %v5042_v2 }
 0x24e   : > { %1248 = vrot.lane.b32.xlu2 %v4991_v23, %s3836_s16  ;;  %1246 = vrot.lane.b32.xlu1 %v4995_v0, %s3836_s16  ;;  %v10618_v23 = vld [vmem:[#allocation8_spill] sm:$0xff]  ;;  %v1038_v0 = vadd.f32 %v942_v1, %v870_v58  ;;  %v873_v58 = vsel %vm833_vm1, %v4755_v7, %v4891_v56 }
 0x24f   : > { %1244 = vrot.lane.b32.xlu0 %v5009_v19, %s3836_s16  ;;  %v939_v29 = vadd.f32 %v612_v53, %v10618_v23  ;;  %v617_v19 = vsel %vm544_vm0, %v4639_v35, %v10622_v5  ;;  %v10623_v53 = vld [vmem:[#allocation61_spill] sm:$0xff] }
 0x250   : > { %v5022_v50 = vpop.permute.xlu1 %751  ;;  %v5024_v4 = vpop.permute.xlu2 %771  ;;  %v615_v23 = vsel %vm544_vm0, %v4623_v17, %v10623_v53  ;;  %v954_v1 = vadd.f32 %v617_v19, %v3996_v15  ;;  %v10630_v15 = vld [vmem:[#allocation66_spill] sm:$0xff] }
 0x251   : > { %10619 = vst [vmem:[#allocation54_spill] sm:$0xff] %v5022_v50  ;;  %v5026_v20 = vpop.permute.xlu0 %749  ;;  %v1035_v3 = vadd.f32 %v939_v29, %v869_v12  ;;  %v5046_v29 = vsel %vm4973_vm4, %v1038_v0, 0.0  ;;  %v874_v12 = vsel %vm833_vm1, %v4721_v25, %v4887_v14  ;;  %v951_v0 = vadd.f32 %v616_v62, %v3998_v16  ;;  %v10631_v62 = vld [vmem:[#allocation47_spill] sm:$0xff] }
 0x252   : > { %10620 = vst [vmem:[#allocation8_spill] sm:$0xff] %v5026_v20  ;;  %v1050_v7 = vadd.f32 %v954_v1, %v874_v12  ;;  %v619_v19 = vsel %vm544_vm0, %v4601_v61, %v10630_v15  ;;  %v10651_v61 = vld [vmem:[#allocation208_spill] sm:$0xff] }
 0x253   : > { %10625 = vst [vmem:[#allocation43_spill] sm:$0xff] %v5046_v29  ;;  %v5060_v10 = vsel %vm4973_vm4, %v1035_v3, 0.0 }
 0x254   : > { %10626 = vst [vmem:[#allocation61_spill] sm:$0xff] %v5060_v10  ;;  %v5093_v12 = vsel %vm4973_vm4, %v1050_v7, 0.0 }
 0x255   : > { %10633 = vst [vmem:[#allocation66_spill] sm:$0xff] %v5093_v12 }
 0x256   : > { %1254 = vrot.lane.b32.xlu2 %v5042_v2, %s3836_s16  ;;  %1252 = vrot.lane.b32.xlu1 %v5046_v29, %s3836_s16  ;;  %v10627_v2 = vld [vmem:[#allocation9_spill] sm:$0xff]  ;;  %v1047_v29 = vadd.f32 %v951_v0, %v873_v58  ;;  %v877_v58 = vsel %vm833_vm1, %v4733_v38, %v4899_v13  ;;  %v876_v0 = vsel %vm833_vm1, %v4767_v24, %v4903_v52 }
 0x257   : > { %1250 = vrot.lane.b32.xlu0 %v5060_v10, %s3836_s16  ;;  %v948_v25 = vadd.f32 %v615_v23, %v10627_v2  ;;  %v620_v10 = vsel %vm544_vm0, %v4651_v41, %v10631_v62  ;;  %v10632_v23 = vld [vmem:[#allocation67_spill] sm:$0xff]  ;;  %v10728_v52 = vld [vmem:[#allocation193_spill] sm:$0xff] }
 0x258   : > { %v5073_v35 = vpop.permute.xlu1 %757  ;;  %v5075_v3 = vpop.permute.xlu2 %777  ;;  %v618_v2 = vsel %vm544_vm0, %v4635_v34, %v10632_v23  ;;  %v963_v1 = vadd.f32 %v620_v10, %v4011_v21  ;;  %v10639_v21 = vld [vmem:[#allocation72_spill] sm:$0xff] }
 0x259   : > { %10628 = vst [vmem:[#allocation9_spill] sm:$0xff] %v5073_v35  ;;  %v5077_v17 = vpop.permute.xlu0 %755  ;;  %v1044_v16 = vadd.f32 %v948_v25, %v872_v11  ;;  %v5097_v25 = vsel %vm4973_vm4, %v1047_v29, 0.0  ;;  %v960_v29 = vadd.f32 %v619_v19, %v4013_v22  ;;  %v875_v11 = vsel %vm833_vm1, %v4771_v60, %v4853_v51  ;;  %v10640_v19 = vld [vmem:[#allocation53_spill] sm:$0xff] }
 0x25a   : > { %10629 = vst [vmem:[#allocation234_spill] sm:$0xff] %v5077_v17  ;;  %v1059_v24 = vadd.f32 %v963_v1, %v877_v58  ;;  %v622_v10 = vsel %vm544_vm0, %v4613_v31, %v10639_v21  ;;  %v10649_v31 = vld [vmem:[#allocation11_spill] sm:$0xff] }
 0x25b   : > { %10634 = vst [vmem:[#allocation47_spill] sm:$0xff] %v5097_v25  ;;  %v5111_v7 = vsel %vm4973_vm4, %v1044_v16, 0.0 }
 0x25c   : > { %10635 = vst [vmem:[#allocation67_spill] sm:$0xff] %v5111_v7  ;;  %v5144_v58 = vsel %vm4973_vm4, %v1059_v24, 0.0 }
 0x25e   : > { %1260 = vrot.lane.b32.xlu2 %v5093_v12, %s3836_s16  ;;  %1258 = vrot.lane.b32.xlu1 %v5097_v25, %s3836_s16  ;;  %v10636_v12 = vld [vmem:[#allocation10_spill] sm:$0xff]  ;;  %v1056_v25 = vadd.f32 %v960_v29, %v876_v0  ;;  %v10644_v0 = vld [vmem:[#allocation228_spill] sm:$0xff] }
 0x25f   : > { %1256 = vrot.lane.b32.xlu0 %v5111_v7, %s3836_s16  ;;  %v957_v38 = vadd.f32 %v618_v2, %v10636_v12  ;;  %v623_v7 = vsel %vm544_vm0, %v4663_v47, %v10640_v19  ;;  %v10641_v2 = vld [vmem:[#allocation73_spill] sm:$0xff]  ;;  %v10645_v29 = vld [vmem:[#allocation198_spill] sm:$0xff] }
 0x260   : > { %v5124_v41 = vpop.permute.xlu1 %763  ;;  %v5126_v16 = vpop.permute.xlu2 %783  ;;  %v621_v12 = vsel %vm544_vm0, %v4647_v40, %v10641_v2  ;;  %10642 = vst [vmem:[#allocation73_spill] sm:$0xff] %v5144_v58  ;;  %v880_v1 = vsel %vm833_vm1, %v10645_v29, %v10644_v0  ;;  %v972_v60 = vadd.f32 %v623_v7, %v10649_v31  ;;  %v10650_v29 = vld [vmem:[#allocation223_spill] sm:$0xff]  ;;  %v10655_v31 = vld [vmem:[#allocation78_spill] sm:$0xff]  ;;  %v10656_v7 = vld [vmem:[#allocation168_spill] sm:$0xff] }
 0x261   : > { %10637 = vst [vmem:[#allocation10_spill] sm:$0xff] %v5124_v41  ;;  %v5128_v34 = vpop.permute.xlu0 %761  ;;  %v1053_v22 = vadd.f32 %v957_v38, %v875_v11  ;;  %v5148_v38 = vsel %vm4973_vm4, %v1056_v25, 0.0  ;;  %v10646_v11 = vld [vmem:[#allocation206_spill] sm:$0xff]  ;;  %v10648_v25 = vld [vmem:[#allocation12_spill] sm:$0xff]  ;;  %v878_v18 = vsel %vm833_vm1, %v10651_v61, %v10650_v29  ;;  %v10657_v61 = vld [vmem:[#allocation59_spill] sm:$0xff] }
 0x262   : > { %10638 = vst [vmem:[#allocation235_spill] sm:$0xff] %v5128_v34  ;;  %v879_v47 = vsel %vm833_vm1, %v10646_v11, %v4918_v26  ;;  %v969_v40 = vadd.f32 %v622_v10, %v10648_v25  ;;  %v1068_v55 = vadd.f32 %v972_v60, %v880_v1  ;;  %v625_v25 = vsel %vm544_vm0, %v10656_v7, %v10655_v31  ;;  %v10658_v26 = vld [vmem:[#allocation181_spill] sm:$0xff]  ;;  %v10668_v7 = vld [vmem:[#allocation14_spill] sm:$0xff] }
 0x263   : > { %10643 = vst [vmem:[#allocation236_spill] sm:$0xff] %v5148_v38  ;;  %v5162_v24 = vsel %vm4973_vm4, %v1053_v22, 0.0  ;;  %v10664_v60 = vld [vmem:[#allocation201_spill] sm:$0xff] }
 0x264   : > { %10647 = vst [vmem:[#allocation237_spill] sm:$0xff] %v5162_v24 }
 0x266   : > { %1266 = vrot.lane.b32.xlu2 %v5144_v58, %s3836_s16  ;;  %1264 = vrot.lane.b32.xlu1 %v5148_v38, %s3836_s16  ;;  %v10652_v58 = vld [vmem:[#allocation13_spill] sm:$0xff]  ;;  %v1065_v38 = vadd.f32 %v969_v40, %v879_v47  ;;  %v5195_v40 = vsel %vm4973_vm4, %v1068_v55, 0.0 }
 0x267   : > { %1262 = vrot.lane.b32.xlu0 %v5162_v24, %s3836_s16  ;;  %v966_v11 = vadd.f32 %v621_v12, %v10652_v58  ;;  %v626_v24 = vsel %vm544_vm0, %v10658_v26, %v10657_v61  ;;  %v10659_v12 = vld [vmem:[#allocation79_spill] sm:$0xff]  ;;  %v10660_v58 = vld [vmem:[#allocation176_spill] sm:$0xff]  ;;  %10661 = vst [vmem:[#allocation223_spill] sm:$0xff] %v5195_v40 }
 0x268   : > { %v5175_v30 = vpop.permute.xlu1 %769  ;;  %v5177_v22 = vpop.permute.xlu2 %789  ;;  %v624_v0 = vsel %vm544_vm0, %v10660_v58, %v10659_v12  ;;  %v5199_v47 = vsel %vm4973_vm4, %v1065_v38, 0.0  ;;  %v10667_v38 = vld [vmem:[#allocation15_spill] sm:$0xff]  ;;  %v981_v31 = vadd.f32 %v626_v24, %v10668_v7  ;;  %v10673_v24 = vld [vmem:[#allocation84_spill] sm:$0xff]  ;;  %v10712_v12 = vld [vmem:[#allocation185_spill] sm:$0xff] }
 0x269   : > { %10653 = vst [vmem:[#allocation12_spill] sm:$0xff] %v5175_v30  ;;  %v5179_v32 = vpop.permute.xlu0 %767  ;;  %v1062_v10 = vadd.f32 %v966_v11, %v878_v18  ;;  %v10663_v18 = vld [vmem:[#allocation231_spill] sm:$0xff]  ;;  %v10665_v11 = vld [vmem:[#allocation209_spill] sm:$0xff]  ;;  %v978_v58 = vadd.f32 %v625_v25, %v10667_v38 }
 0x26a   : > { %10654 = vst [vmem:[#allocation11_spill] sm:$0xff] %v5179_v32  ;;  %v883_v1 = vsel %vm833_vm1, %v10664_v60, %v10663_v18  ;;  %v882_v26 = vsel %vm833_vm1, %v10665_v11, %v4930_v48  ;;  %v10669_v60 = vld [vmem:[#allocation224_spill] sm:$0xff]  ;;  %v10670_v18 = vld [vmem:[#allocation211_spill] sm:$0xff] }
 0x26b   : > { %10662 = vst [vmem:[#allocation13_spill] sm:$0xff] %v5199_v47  ;;  %v5213_v55 = vsel %vm4973_vm4, %v1062_v10, 0.0  ;;  %v881_v61 = vsel %vm833_vm1, %v10670_v18, %v10669_v60  ;;  %v1077_v21 = vadd.f32 %v981_v31, %v883_v1  ;;  %v10674_v7 = vld [vmem:[#allocation171_spill] sm:$0xff]  ;;  %v10675_v18 = vld [vmem:[#allocation65_spill] sm:$0xff]  ;;  %v10676_v60 = vld [vmem:[#allocation184_spill] sm:$0xff] }
 0x26c   : > { %10666 = vst [vmem:[#allocation238_spill] sm:$0xff] %v5213_v55  ;;  %v628_v38 = vsel %vm544_vm0, %v10674_v7, %v10673_v24  ;;  %v10681_v31 = vld [vmem:[#allocation204_spill] sm:$0xff] }
 0x26d   : > { %v10682_v1 = vld [vmem:[#allocation212_spill] sm:$0xff] }
 0x26e   : > { %1272 = vrot.lane.b32.xlu2 %v5195_v40, %s3836_s16  ;;  %1270 = vrot.lane.b32.xlu1 %v5199_v47, %s3836_s16  ;;  %v10671_v40 = vld [vmem:[#allocation16_spill] sm:$0xff]  ;;  %v1074_v47 = vadd.f32 %v978_v58, %v882_v26  ;;  %v5246_v26 = vsel %vm4973_vm4, %v1077_v21, 0.0  ;;  %v886_v58 = vsel %vm833_vm1, %v10681_v31, %v4967_v37  ;;  %v10686_v31 = vld [vmem:[#allocation225_spill] sm:$0xff]  ;;  %v10687_v37 = vld [vmem:[#allocation214_spill] sm:$0xff] }
 0x26f   : > { %1268 = vrot.lane.b32.xlu0 %v5213_v55, %s3836_s16  ;;  %v975_v11 = vadd.f32 %v624_v0, %v10671_v40  ;;  %v629_v55 = vsel %vm544_vm0, %v10676_v60, %v10675_v18  ;;  %v10677_v0 = vld [vmem:[#allocation85_spill] sm:$0xff]  ;;  %v10678_v40 = vld [vmem:[#allocation179_spill] sm:$0xff]  ;;  %10679 = vst [vmem:[#allocation14_spill] sm:$0xff] %v5246_v26  ;;  %v884_v24 = vsel %vm833_vm1, %v10687_v37, %v10686_v31 }
 0x270   : > { %v5226_v48 = vpop.permute.xlu1 %775  ;;  %v5228_v10 = vpop.permute.xlu2 %795  ;;  %v10692_v37 = vld [vmem:[#allocation71_spill] sm:$0xff] }
 0x271   : > { %10672 = vst [vmem:[#allocation15_spill] sm:$0xff] %v5228_v10  ;;  %v5230_v19 = vpop.permute.xlu0 %773  ;;  %v1071_v25 = vadd.f32 %v975_v11, %v881_v61  ;;  %v627_v10 = vsel %vm544_vm0, %v10678_v40, %v10677_v0  ;;  %v5250_v61 = vsel %vm4973_vm4, %v1074_v47, 0.0  ;;  %v885_v11 = vsel %vm833_vm1, %v10682_v1, %v4971_v27  ;;  %v10684_v47 = vld [vmem:[#allocation18_spill] sm:$0xff]  ;;  %v10685_v40 = vld [vmem:[#allocation17_spill] sm:$0xff]  ;;  %v10693_v31 = vld [vmem:[#allocation187_spill] sm:$0xff] }
 0x272   : > { %10680 = vst [vmem:[#allocation16_spill] sm:$0xff] %v5250_v61  ;;  %v987_v60 = vadd.f32 %v628_v38, %v10684_v47  ;;  %v990_v7 = vadd.f32 %v629_v55, %v10685_v40  ;;  %v10690_v55 = vld [vmem:[#allocation89_spill] sm:$0xff]  ;;  %v10691_v40 = vld [vmem:[#allocation174_spill] sm:$0xff] }
 0x273   : > { %v5264_v21 = vsel %vm4973_vm4, %v1071_v25, 0.0  ;;  %v631_v47 = vsel %vm544_vm0, %v10691_v40, %v10690_v55 }
 0x274   : > { %10683 = vst [vmem:[#allocation239_spill] sm:$0xff] %v5264_v21  ;;  %v1086_v18 = vadd.f32 %v990_v7, %v886_v58  ;;  %v10698_v7 = vld [vmem:[#allocation207_spill] sm:$0xff] }
 0x275   : > { %v889_v58 = vsel %vm833_vm1, %v10698_v7, %v5022_v50  ;;  %v10703_v7 = vld [vmem:[#allocation226_spill] sm:$0xff]  ;;  %v10704_v50 = vld [vmem:[#allocation216_spill] sm:$0xff] }
 0x276   : > { %1278 = vrot.lane.b32.xlu2 %v5246_v26, %s3836_s16  ;;  %1276 = vrot.lane.b32.xlu1 %v5250_v61, %s3836_s16  ;;  %v10688_v26 = vld [vmem:[#allocation19_spill] sm:$0xff]  ;;  %v1083_v61 = vadd.f32 %v987_v60, %v885_v11  ;;  %v5297_v60 = vsel %vm4973_vm4, %v1086_v18, 0.0  ;;  %v887_v55 = vsel %vm833_vm1, %v10704_v50, %v10703_v7  ;;  %v10709_v7 = vld [vmem:[#allocation77_spill] sm:$0xff] }
 0x277   : > { %1274 = vrot.lane.b32.xlu0 %v5264_v21, %s3836_s16  ;;  %v984_v1 = vadd.f32 %v627_v10, %v10688_v26  ;;  %v632_v21 = vsel %vm544_vm0, %v10693_v31, %v10692_v37  ;;  %v10694_v10 = vld [vmem:[#allocation91_spill] sm:$0xff]  ;;  %v10695_v26 = vld [vmem:[#allocation182_spill] sm:$0xff]  ;;  %10696 = vst [vmem:[#allocation17_spill] sm:$0xff] %v5297_v60 }
 0x278   : > { %v5277_v27 = vpop.permute.xlu1 %781  ;;  %v5279_v25 = vpop.permute.xlu2 %801 }
 0x279   : > { %10689 = vst [vmem:[#allocation18_spill] sm:$0xff] %v5279_v25  ;;  %v5281_v0 = vpop.permute.xlu0 %779  ;;  %v1080_v38 = vadd.f32 %v984_v1, %v884_v24  ;;  %v630_v25 = vsel %vm544_vm0, %v10695_v26, %v10694_v10  ;;  %v5301_v24 = vsel %vm4973_vm4, %v1083_v61, 0.0  ;;  %v10699_v1 = vld [vmem:[#allocation215_spill] sm:$0xff]  ;;  %v10701_v61 = vld [vmem:[#allocation21_spill] sm:$0xff]  ;;  %v10702_v26 = vld [vmem:[#allocation20_spill] sm:$0xff] }
 0x27a   : > { %10697 = vst [vmem:[#allocation19_spill] sm:$0xff] %v5301_v24  ;;  %v888_v11 = vsel %vm833_vm1, %v10699_v1, %v5026_v20  ;;  %v996_v31 = vadd.f32 %v631_v47, %v10701_v61  ;;  %v999_v40 = vadd.f32 %v632_v21, %v10702_v26  ;;  %v1122_v21 = vadd.s32 128, %v4905_v49  ;;  %v10707_v26 = vld [vmem:[#allocation95_spill] sm:$0xff]  ;;  %v10708_v61 = vld [vmem:[#allocation177_spill] sm:$0xff] }
 0x27b   : > { %v5315_v18 = vsel %vm4973_vm4, %v1080_v38, 0.0  ;;  %v634_v50 = vsel %vm544_vm0, %v10708_v61, %v10707_v26 }
 0x27c   : > { %10700 = vst [vmem:[#allocation240_spill] sm:$0xff] %v5315_v18  ;;  %v1095_v37 = vadd.f32 %v999_v40, %v889_v58  ;;  %v1125_v58 = vcvt.s32.f32 %v1122_v21 }
 0x27e   : > { %1284 = vrot.lane.b32.xlu2 %v5297_v60, %s3836_s16  ;;  %1282 = vrot.lane.b32.xlu1 %v5301_v24, %s3836_s16  ;;  %v10705_v60 = vld [vmem:[#allocation22_spill] sm:$0xff]  ;;  %v1092_v24 = vadd.f32 %v996_v31, %v888_v11  ;;  %v5349_v40 = vsel %vm4973_vm4, %v1095_v37, 0.0 }
 0x27f   : > { %1280 = vrot.lane.b32.xlu0 %v5315_v18, %s3836_s16  ;;  %v993_v1 = vadd.f32 %v630_v25, %v10705_v60  ;;  %v10710_v18 = vld [vmem:[#allocation190_spill] sm:$0xff]  ;;  %v10711_v60 = vld [vmem:[#allocation97_spill] sm:$0xff]  ;;  %10713 = vst [vmem:[#allocation20_spill] sm:$0xff] %v5349_v40 }
 0x280   : > { %v5328_v20 = vpop.permute.xlu1 %787  ;;  %v5330_v38 = vpop.permute.xlu2 %807  ;;  %v635_v25 = vsel %vm544_vm0, %v10710_v18, %v10709_v7  ;;  %v633_v31 = vsel %vm544_vm0, %v10712_v12, %v10711_v60  ;;  %v10716_v18 = vld [vmem:[#allocation217_spill] sm:$0xff]  ;;  %v10719_v12 = vld [vmem:[#allocation23_spill] sm:$0xff] }
 0x281   : > { %10706 = vst [vmem:[#allocation21_spill] sm:$0xff] %v5330_v38  ;;  %v5332_v10 = vpop.permute.xlu0 %785  ;;  %v1089_v47 = vadd.f32 %v993_v1, %v887_v55  ;;  %v5353_v55 = vsel %vm4973_vm4, %v1092_v24, 0.0  ;;  %v10715_v1 = vld [vmem:[#allocation210_spill] sm:$0xff]  ;;  %v891_v61 = vsel %vm833_vm1, %v10716_v18, %v5077_v17  ;;  %v10718_v24 = vld [vmem:[#allocation24_spill] sm:$0xff]  ;;  %v1008_v26 = vadd.f32 %v635_v25, %v10719_v12  ;;  %v10725_v25 = vld [vmem:[#allocation101_spill] sm:$0xff] }
 0x282   : > { %10714 = vst [vmem:[#allocation22_spill] sm:$0xff] %v5353_v55  ;;  %v892_v11 = vsel %vm833_vm1, %v10715_v1, %v5073_v35  ;;  %v1005_v21 = vadd.f32 %v634_v50, %v10718_v24  ;;  %v10720_v1 = vld [vmem:[#allocation229_spill] sm:$0xff]  ;;  %v10721_v35 = vld [vmem:[#allocation218_spill] sm:$0xff]  ;;  %v1128_v50 = vmul.f32 0.33333334, %v1125_v58  ;;  %v10726_v24 = vld [vmem:[#allocation180_spill] sm:$0xff] }
 0x283   : > { %v5367_v37 = vsel %vm4973_vm4, %v1089_v47, 0.0  ;;  %v890_v7 = vsel %vm833_vm1, %v10721_v35, %v10720_v1  ;;  %v1104_v60 = vadd.f32 %v1008_v26, %v892_v11  ;;  %v637_v35 = vsel %vm544_vm0, %v10726_v24, %v10725_v25  ;;  %v10727_v1 = vld [vmem:[#allocation83_spill] sm:$0xff]  ;;  %v10733_v11 = vld [vmem:[#allocation213_spill] sm:$0xff] }
 0x284   : > { %10717 = vst [vmem:[#allocation241_spill] sm:$0xff] %v5367_v37 }
 0x286   : > { %1290 = vrot.lane.b32.xlu2 %v5349_v40, %s3836_s16  ;;  %1288 = vrot.lane.b32.xlu1 %v5353_v55, %s3836_s16  ;;  %v10722_v40 = vld [vmem:[#allocation25_spill] sm:$0xff]  ;;  %v1101_v55 = vadd.f32 %v1005_v21, %v891_v61  ;;  %v5400_v61 = vsel %vm4973_vm4, %v1104_v60, 0.0  ;;  %v895_v21 = vsel %vm833_vm1, %v10733_v11, %v5124_v41  ;;  %v10738_v11 = vld [vmem:[#allocation232_spill] sm:$0xff] }
 0x287   : > { %1286 = vrot.lane.b32.xlu0 %v5367_v37, %s3836_s16  ;;  %v1002_v18 = vadd.f32 %v633_v31, %v10722_v40  ;;  %v638_v31 = vsel %vm544_vm0, %v10728_v52, %v10727_v1  ;;  %v10729_v40 = vld [vmem:[#allocation103_spill] sm:$0xff]  ;;  %v10730_v37 = vld [vmem:[#allocation188_spill] sm:$0xff]  ;;  %10731 = vst [vmem:[#allocation25_spill] sm:$0xff] %v5400_v61 }
 0x288   : > { %v5380_v17 = vpop.permute.xlu1 %793  ;;  %v5382_v47 = vpop.permute.xlu2 %813  ;;  %v636_v26 = vsel %vm544_vm0, %v10730_v37, %v10729_v40  ;;  %v10734_v52 = vld [vmem:[#allocation219_spill] sm:$0xff]  ;;  %v10737_v37 = vld [vmem:[#allocation26_spill] sm:$0xff]  ;;  %v10739_v41 = vld [vmem:[#allocation220_spill] sm:$0xff] }
 0x289   : > { %10723 = vst [vmem:[#allocation24_spill] sm:$0xff] %v5382_v47  ;;  %v5384_v38 = vpop.permute.xlu0 %791  ;;  %v1098_v12 = vadd.f32 %v1002_v18, %v890_v7  ;;  %v5404_v7 = vsel %vm4973_vm4, %v1101_v55, 0.0  ;;  %v1131_v18 = vfloor.f32 %v1128_v50  ;;  %v894_v24 = vsel %vm833_vm1, %v10734_v52, %v5128_v34  ;;  %v10736_v55 = vld [vmem:[#allocation27_spill] sm:$0xff] }
 0x28a   : > { %10724 = vst [vmem:[#allocation23_spill] sm:$0xff] %v5384_v38  ;;  %v1014_v50 = vadd.f32 %v637_v35, %v10736_v55  ;;  %v1017_v25 = vadd.f32 %v638_v31, %v10737_v37  ;;  %v893_v1 = vsel %vm833_vm1, %v10739_v41, %v10738_v11  ;;  %v10743_v31 = vld [vmem:[#allocation90_spill] sm:$0xff]  ;;  %v10744_v41 = vld [vmem:[#allocation107_spill] sm:$0xff] }
 0x28b   : > { %10732 = vst [vmem:[#allocation242_spill] sm:$0xff] %v5404_v7  ;;  %v5418_v60 = vsel %vm4973_vm4, %v1098_v12, 0.0  ;;  %v1134_v35 = vmul.f32 3.0, %v1131_v18  ;;  %v577_v55 = vsel %vm544_vm0, %v10607_v45, %v10743_v31  ;;  %v10745_v11 = vld [vmem:[#allocation183_spill] sm:$0xff]  ;;  %v834_v45 = vsel %vm833_vm1, %v4817_v36, %v5175_v30  ;;  %v10750_v18 = vld [vmem:[#allocation221_spill] sm:$0xff]  ;;  %v10754_v36 = vld [vmem:[#allocation222_spill] sm:$0xff] }
 0x28c   : > { %10735 = vst [vmem:[#allocation243_spill] sm:$0xff] %v5418_v60  ;;  %v1113_v40 = vadd.f32 %v1017_v25, %v895_v21  ;;  %v897_v21 = vsel %vm833_vm1, %v10750_v18, %v5179_v32 }
 0x28e   : > { %1296 = vrot.lane.b32.xlu2 %v5400_v61, %s3836_s16  ;;  %1294 = vrot.lane.b32.xlu1 %v5404_v7, %s3836_s16  ;;  %v10740_v61 = vld [vmem:[#allocation28_spill] sm:$0xff]  ;;  %v1110_v7 = vadd.f32 %v1014_v50, %v894_v24  ;;  %v5451_v24 = vsel %vm4973_vm4, %v1113_v40, 0.0  ;;  %v10753_v50 = vld [vmem:[#allocation29_spill] sm:$0xff] }
 0x28f   : > { %1292 = vrot.lane.b32.xlu0 %v5418_v60, %s3836_s16  ;;  %v1011_v52 = vadd.f32 %v636_v26, %v10740_v61  ;;  %v640_v26 = vsel %vm544_vm0, %v10745_v11, %v10744_v41  ;;  %v10746_v61 = vld [vmem:[#allocation109_spill] sm:$0xff]  ;;  %v10747_v60 = vld [vmem:[#allocation191_spill] sm:$0xff]  ;;  %10748 = vst [vmem:[#allocation28_spill] sm:$0xff] %v5451_v24 }
 0x290   : > { %v5431_v34 = vpop.permute.xlu1 %799  ;;  %v5433_v12 = vpop.permute.xlu2 %819  ;;  %v639_v25 = vsel %vm544_vm0, %v10747_v60, %v10746_v61  ;;  %v896_v60 = vsel %vm833_vm1, %v10754_v36, %v4969_v43  ;;  %v10822_v36 = vld [vmem:[#allocation230_spill] sm:$0xff] }
 0x291   : > { %10741 = vst [vmem:[#allocation27_spill] sm:$0xff] %v5431_v34  ;;  %v5435_v47 = vpop.permute.xlu0 %797  ;;  %v1107_v37 = vadd.f32 %v1011_v52, %v893_v1  ;;  %v5455_v52 = vsel %vm4973_vm4, %v1110_v7, 0.0  ;;  %v1137_v1 = vsub.f32 %v1125_v58, %v1134_v35  ;;  %v10752_v58 = vld [vmem:[#allocation30_spill] sm:$0xff]  ;;  %v1023_v35 = vadd.f32 %v640_v26, %v10753_v50  ;;  %v10758_v26 = vld [vmem:[#allocation96_spill] sm:$0xff]  ;;  %v10759_v50 = vld [vmem:[#allocation113_spill] sm:$0xff] }
 0x292   : > { %10742 = vst [vmem:[#allocation26_spill] sm:$0xff] %v5435_v47  ;;  %v931_v7 = vadd.f32 %v577_v55, %v10752_v58  ;;  %v580_v58 = vsel %vm544_vm0, %v10614_v6, %v10758_v26 }
 0x293   : > { %10749 = vst [vmem:[#allocation90_spill] sm:$0xff] %v5455_v52  ;;  %v5469_v40 = vsel %vm4973_vm4, %v1107_v37, 0.0  ;;  %vm1140_vm5 = vcmp.gt.f32.partialorder %v1137_v1, 0.5  ;;  %vm1143_vm6 = vcmp.lt.f32.partialorder %v1137_v1, 1.5 }
 0x294   : > { %10751 = vst [vmem:[#allocation107_spill] sm:$0xff] %v5469_v40  ;;  %v1027_v32 = vadd.f32 %v931_v7, %v834_v45  ;;  %vm5496_vm7 = vmand %vm1140_vm5, %vm1143_vm6  ;;  %v10762_v45 = vld [vmem:[#allocation115_spill] sm:$0xff] }
 0x295   : > { %v578_v1 = vsel %vm544_vm0, %v10605_v28, %v10762_v45 }
 0x296   : > { %1302 = vrot.lane.b32.xlu2 %v5451_v24, %s3836_s16  ;;  %1300 = vrot.lane.b32.xlu1 %v5455_v52, %s3836_s16  ;;  %v10755_v24 = vld [vmem:[#allocation31_spill] sm:$0xff]  ;;  %v1119_v52 = vadd.f32 %v1023_v35, %v897_v21  ;;  %v10767_v21 = vld [vmem:[#allocation32_spill] sm:$0xff] }
 0x297   : > { %1298 = vrot.lane.b32.xlu0 %v5469_v40, %s3836_s16  ;;  %v1020_v18 = vadd.f32 %v639_v25, %v10755_v24  ;;  %v579_v25 = vsel %vm544_vm0, %v10606_v54, %v10759_v50  ;;  %v837_v54 = vsel %vm833_vm1, %v4829_v8, %v5226_v48  ;;  %v835_v8 = vsel %vm833_vm1, %v4867_v39, %v5024_v4  ;;  %v10772_v39 = vld [vmem:[#allocation119_spill] sm:$0xff] }
 0x298   : > { %v5482_v11 = vpop.permute.xlu1 %805  ;;  %v5484_v37 = vpop.permute.xlu2 %825  ;;  %v5510_v6 = vsel %vm4973_vm4, %v1119_v52, 0.0  ;;  %v937_v7 = vadd.f32 %v579_v25, %v10767_v21  ;;  %v10771_v25 = vld [vmem:[#allocation102_spill] sm:$0xff]  ;;  %v582_v21 = vsel %vm544_vm0, %v10613_v46, %v10772_v39  ;;  %v839_v46 = vsel %vm833_vm1, %v4875_v33, %v5281_v0 }
 0x299   : > { %10756 = vst [vmem:[#allocation109_spill] sm:$0xff] %v5482_v11  ;;  %v5486_v30 = vpop.permute.xlu0 %803  ;;  %v1116_v55 = vadd.f32 %v1020_v18, %v896_v60  ;;  %v5506_v60 = vsel %vm5496_vm7, %v1027_v32, 0.0  ;;  %v836_v18 = vsel %vm833_vm1, %v4863_v59, %v5230_v19  ;;  %v10766_v32 = vld [vmem:[#allocation33_spill] sm:$0xff]  ;;  %v10768_v59 = vld [vmem:[#allocation34_spill] sm:$0xff] }
 0x29a   : > { %10757 = vst [vmem:[#allocation30_spill] sm:$0xff] %v5486_v30  ;;  %v940_v52 = vadd.f32 %v580_v58, %v10766_v32  ;;  %v934_v35 = vadd.f32 %v578_v1, %v10768_v59  ;;  %v583_v32 = vsel %vm544_vm0, %v10623_v53, %v10771_v25  ;;  %v10773_v1 = vld [vmem:[#allocation121_spill] sm:$0xff]  ;;  %v840_v53 = vsel %vm833_vm1, %v4841_v63, %v5277_v27  ;;  %v10779_v33 = vld [vmem:[#allocation38_spill] sm:$0xff] }
 0x29b   : > { %10763 = vst [vmem:[#allocation29_spill] sm:$0xff] %v5506_v60  ;;  %v5524_v28 = vsel %vm4973_vm4, %v1116_v55, 0.0  ;;  %v581_v59 = vsel %vm544_vm0, %v10612_v42, %v10773_v1  ;;  %v838_v63 = vsel %vm833_vm1, %v4879_v57, %v5075_v3  ;;  %v10784_v57 = vld [vmem:[#allocation125_spill] sm:$0xff] }
 0x29c   : > { %10764 = vst [vmem:[#allocation31_spill] sm:$0xff] %v5510_v6  ;;  %v1030_v58 = vadd.f32 %v934_v35, %v835_v8  ;;  %v943_v8 = vadd.f32 %v581_v59, %v10779_v33  ;;  %v10785_v59 = vld [vmem:[#allocation127_spill] sm:$0xff] }
 0x29d   : > { %10765 = vst [vmem:[#allocation96_spill] sm:$0xff] %v5524_v28  ;;  %v584_v33 = vsel %vm544_vm0, %v10621_v9, %v10785_v59 }
 0x29e   : > { %1308 = vrot.lane.b32.xlu2 %v5506_v60, %s3836_s16  ;;  %1306 = vrot.lane.b32.xlu1 %v5510_v6, %s3836_s16  ;;  %v1036_v60 = vadd.f32 %v940_v52, %v837_v54  ;;  %v1033_v6 = vadd.f32 %v937_v7, %v836_v18  ;;  %v5575_v42 = vsel %vm5496_vm7, %v1030_v58, 0.0  ;;  %v10778_v52 = vld [vmem:[#allocation36_spill] sm:$0xff] }
 0x29f   : > { %1304 = vrot.lane.b32.xlu0 %v5524_v28, %s3836_s16  ;;  %10776 = vst [vmem:[#allocation34_spill] sm:$0xff] %v5575_v42  ;;  %v946_v7 = vadd.f32 %v582_v21, %v10778_v52  ;;  %v10783_v21 = vld [vmem:[#allocation108_spill] sm:$0xff]  ;;  %v585_v52 = vsel %vm544_vm0, %v10622_v5, %v10784_v57  ;;  %v842_v5 = vsel %vm833_vm1, %v4887_v14, %v5332_v10  ;;  %v10791_v14 = vld [vmem:[#allocation42_spill] sm:$0xff] }
 0x2a0   : > { %v5537_v44 = vpop.permute.xlu1 %811  ;;  %v5539_v55 = vpop.permute.xlu2 %831  ;;  %v5557_v54 = vsel %vm5496_vm7, %v1036_v60, 0.0  ;;  %v5561_v18 = vsel %vm5496_vm7, %v1033_v6, 0.0  ;;  %v10777_v60 = vld [vmem:[#allocation37_spill] sm:$0xff] }
 0x2a1   : > { %10769 = vst [vmem:[#allocation113_spill] sm:$0xff] %v5537_v44  ;;  %v5541_v40 = vpop.permute.xlu0 %809  ;;  %v949_v6 = vadd.f32 %v583_v32, %v10777_v60  ;;  %v1039_v32 = vadd.f32 %v943_v8, %v838_v63  ;;  %v586_v60 = vsel %vm544_vm0, %v10632_v23, %v10783_v21  ;;  %v843_v23 = vsel %vm833_vm1, %v4853_v51, %v5328_v20 }
 0x2a2   : > { %10770 = vst [vmem:[#allocation115_spill] sm:$0xff] %v5541_v40  ;;  %v841_v51 = vsel %vm833_vm1, %v4891_v56, %v5126_v16  ;;  %v952_v63 = vadd.f32 %v584_v33, %v10791_v14  ;;  %v10796_v56 = vld [vmem:[#allocation131_spill] sm:$0xff]  ;;  %v10797_v33 = vld [vmem:[#allocation133_spill] sm:$0xff] }
 0x2a3   : > { %10774 = vst [vmem:[#allocation33_spill] sm:$0xff] %v5557_v54  ;;  %v5626_v9 = vsel %vm5496_vm7, %v1039_v32, 0.0  ;;  %v587_v14 = vsel %vm544_vm0, %v10630_v15, %v10797_v33 }
 0x2a4   : > { %10775 = vst [vmem:[#allocation32_spill] sm:$0xff] %v5561_v18 }
 0x2a5   : > { %10788 = vst [vmem:[#allocation38_spill] sm:$0xff] %v5626_v9 }
 0x2a6   : > { %1314 = vrot.lane.b32.xlu2 %v5557_v54, %s3836_s16  ;;  %1312 = vrot.lane.b32.xlu1 %v5561_v18, %s3836_s16  ;;  %v1045_v54 = vadd.f32 %v949_v6, %v840_v53  ;;  %v1042_v18 = vadd.f32 %v946_v7, %v839_v46  ;;  %v10790_v6 = vld [vmem:[#allocation40_spill] sm:$0xff] }
 0x2a7   : > { %1310 = vrot.lane.b32.xlu0 %v5575_v42, %s3836_s16  ;;  %v955_v7 = vadd.f32 %v585_v52, %v10790_v6  ;;  %v10795_v52 = vld [vmem:[#allocation114_spill] sm:$0xff]  ;;  %v588_v6 = vsel %vm544_vm0, %v10631_v62, %v10796_v56  ;;  %v845_v62 = vsel %vm833_vm1, %v4899_v13, %v5384_v38  ;;  %v10811_v42 = vld [vmem:[#allocation53_spill] sm:$0xff]  ;;  %v10830_v38 = vld [vmem:[#allocation59_spill] sm:$0xff] }
 0x2a8   : > { %v5588_v35 = vpop.permute.xlu1 %817  ;;  %v5590_v58 = vpop.permute.xlu2 %1248  ;;  %v5608_v53 = vsel %vm5496_vm7, %v1045_v54, 0.0  ;;  %v5612_v46 = vsel %vm5496_vm7, %v1042_v18, 0.0  ;;  %v10789_v54 = vld [vmem:[#allocation41_spill] sm:$0xff]  ;;  %v10804_v13 = vld [vmem:[#allocation46_spill] sm:$0xff] }
 0x2a9   : > { %10780 = vst [vmem:[#allocation102_spill] sm:$0xff] %v5588_v35  ;;  %v5592_v28 = vpop.permute.xlu0 %815  ;;  %v958_v18 = vadd.f32 %v586_v60, %v10789_v54  ;;  %v1048_v60 = vadd.f32 %v952_v63, %v841_v51  ;;  %v589_v54 = vsel %vm544_vm0, %v10641_v2, %v10795_v52  ;;  %v846_v2 = vsel %vm833_vm1, %v10650_v29, %v5380_v17  ;;  %v10803_v29 = vld [vmem:[#allocation227_spill] sm:$0xff] }
 0x2aa   : > { %10781 = vst [vmem:[#allocation119_spill] sm:$0xff] %v5590_v58  ;;  %v844_v51 = vsel %vm833_vm1, %v10803_v29, %v5177_v22  ;;  %v961_v63 = vadd.f32 %v587_v14, %v10804_v13  ;;  %v10810_v29 = vld [vmem:[#allocation137_spill] sm:$0xff]  ;;  %v10812_v14 = vld [vmem:[#allocation139_spill] sm:$0xff]  ;;  %v10813_v13 = vld [vmem:[#allocation72_spill] sm:$0xff] }
 0x2ab   : > { %10782 = vst [vmem:[#allocation121_spill] sm:$0xff] %v5592_v28  ;;  %v1054_v58 = vadd.f32 %v958_v18, %v843_v23  ;;  %v5677_v15 = vsel %vm5496_vm7, %v1048_v60, 0.0  ;;  %v10802_v18 = vld [vmem:[#allocation44_spill] sm:$0xff] }
 0x2ac   : > { %10786 = vst [vmem:[#allocation37_spill] sm:$0xff] %v5608_v53 }
 0x2ad   : > { %10787 = vst [vmem:[#allocation36_spill] sm:$0xff] %v5612_v46  ;;  %v5659_v23 = vsel %vm5496_vm7, %v1054_v58, 0.0  ;;  %v10801_v58 = vld [vmem:[#allocation45_spill] sm:$0xff] }
 0x2ae   : > { %1320 = vrot.lane.b32.xlu2 %v5608_v53, %s3836_s16  ;;  %1318 = vrot.lane.b32.xlu1 %v5612_v46, %s3836_s16  ;;  %v1051_v46 = vadd.f32 %v955_v7, %v842_v5  ;;  %10798 = vst [vmem:[#allocation41_spill] sm:$0xff] %v5659_v23  ;;  %v964_v7 = vadd.f32 %v588_v6, %v10802_v18  ;;  %v10808_v6 = vld [vmem:[#allocation120_spill] sm:$0xff] }
 0x2af   : > { %1316 = vrot.lane.b32.xlu0 %v5626_v9, %s3836_s16  ;;  %10800 = vst [vmem:[#allocation42_spill] sm:$0xff] %v5677_v15 }
 0x2b0   : > { %v5639_v8 = vpop.permute.xlu1 %823  ;;  %v5641_v32 = vpop.permute.xlu2 %1254  ;;  %v5663_v5 = vsel %vm5496_vm7, %v1051_v46, 0.0  ;;  %v967_v46 = vadd.f32 %v589_v54, %v10801_v58  ;;  %v1057_v54 = vadd.f32 %v961_v63, %v844_v51  ;;  %v10809_v58 = vld [vmem:[#allocation79_spill] sm:$0xff] }
 0x2b1   : > { %10792 = vst [vmem:[#allocation108_spill] sm:$0xff] %v5639_v8  ;;  %v5643_v53 = vpop.permute.xlu0 %821  ;;  %v592_v18 = vsel %vm544_vm0, %v10809_v58, %v10808_v6  ;;  %v10820_v58 = vld [vmem:[#allocation50_spill] sm:$0xff] }
 0x2b2   : > { %10793 = vst [vmem:[#allocation125_spill] sm:$0xff] %v5641_v32 }
 0x2b3   : > { %10794 = vst [vmem:[#allocation127_spill] sm:$0xff] %v5643_v53 }
 0x2b4   : > { %10799 = vst [vmem:[#allocation40_spill] sm:$0xff] %v5663_v5 }
 0x2b6   : > { %1326 = vrot.lane.b32.xlu2 %v5659_v23, %s3836_s16  ;;  %1324 = vrot.lane.b32.xlu1 %v5663_v5, %s3836_s16  ;;  %v1063_v23 = vadd.f32 %v967_v46, %v846_v2  ;;  %v1060_v5 = vadd.f32 %v964_v7, %v845_v62  ;;  %v10816_v46 = vld [vmem:[#allocation224_spill] sm:$0xff] }
 0x2b7   : > { %1322 = vrot.lane.b32.xlu0 %v5677_v15, %s3836_s16  ;;  %v591_v15 = vsel %vm544_vm0, %v10811_v42, %v10810_v29  ;;  %v849_v7 = vsel %vm833_vm1, %v10816_v46, %v5431_v34  ;;  %v10817_v42 = vld [vmem:[#allocation228_spill] sm:$0xff]  ;;  %v10821_v46 = vld [vmem:[#allocation15_spill] sm:$0xff] }
 0x2b8   : > { %v5690_v32 = vpop.permute.xlu1 %829  ;;  %v5692_v60 = vpop.permute.xlu2 %1260  ;;  %v5710_v2 = vsel %vm5496_vm7, %v1063_v23, 0.0  ;;  %v5714_v62 = vsel %vm5496_vm7, %v1060_v5, 0.0  ;;  %v848_v51 = vsel %vm833_vm1, %v10817_v42, %v5435_v47  ;;  %v5728_v23 = vsel %vm5496_vm7, %v1057_v54, 0.0  ;;  %v10819_v5 = vld [vmem:[#allocation51_spill] sm:$0xff]  ;;  %v10823_v42 = vld [vmem:[#allocation52_spill] sm:$0xff] }
 0x2b9   : > { %10805 = vst [vmem:[#allocation114_spill] sm:$0xff] %v5690_v32  ;;  %v5694_v9 = vpop.permute.xlu0 %827  ;;  %v976_v63 = vadd.f32 %v592_v18, %v10819_v5  ;;  %v847_v34 = vsel %vm833_vm1, %v10822_v36, %v10821_v46  ;;  %v10828_v5 = vld [vmem:[#allocation85_spill] sm:$0xff]  ;;  %v10829_v36 = vld [vmem:[#allocation143_spill] sm:$0xff] }
 0x2ba   : > { %10806 = vst [vmem:[#allocation131_spill] sm:$0xff] %v5692_v60  ;;  %v590_v60 = vsel %vm544_vm0, %v10813_v13, %v10812_v14  ;;  %v973_v13 = vadd.f32 %v591_v15, %v10820_v58  ;;  %v10827_v15 = vld [vmem:[#allocation126_spill] sm:$0xff] }
 0x2bb   : > { %10807 = vst [vmem:[#allocation133_spill] sm:$0xff] %v5694_v9  ;;  %v1072_v29 = vadd.f32 %v976_v63, %v849_v7  ;;  %v595_v58 = vsel %vm544_vm0, %v10828_v5, %v10827_v15  ;;  %v10839_v5 = vld [vmem:[#allocation56_spill] sm:$0xff]  ;;  %v10849_v15 = vld [vmem:[#allocation65_spill] sm:$0xff] }
 0x2bc   : > { %10814 = vst [vmem:[#allocation45_spill] sm:$0xff] %v5710_v2 }
 0x2bd   : > { %10815 = vst [vmem:[#allocation44_spill] sm:$0xff] %v5714_v62  ;;  %v5761_v7 = vsel %vm5496_vm7, %v1072_v29, 0.0 }
 0x2be   : > { %1332 = vrot.lane.b32.xlu2 %v5710_v2, %s3836_s16  ;;  %10818 = vst [vmem:[#allocation227_spill] sm:$0xff] %v5728_v23  ;;  %1330 = vrot.lane.b32.xlu1 %v5714_v62, %s3836_s16  ;;  %v970_v2 = vadd.f32 %v590_v60, %v10823_v42  ;;  %v1069_v62 = vadd.f32 %v973_v13, %v848_v51  ;;  %v10831_v60 = vld [vmem:[#allocation145_spill] sm:$0xff]  ;;  %v10832_v42 = vld [vmem:[#allocation78_spill] sm:$0xff] }
 0x2bf   : > { %1328 = vrot.lane.b32.xlu0 %v5728_v23, %s3836_s16  ;;  %v594_v23 = vsel %vm544_vm0, %v10830_v38, %v10829_v36  ;;  %10833 = vst [vmem:[#allocation139_spill] sm:$0xff] %v5761_v7  ;;  %v10836_v38 = vld [vmem:[#allocation231_spill] sm:$0xff] }
 0x2c0   : > { %v5741_v47 = vpop.permute.xlu2 %1266  ;;  %v5743_v54 = vpop.permute.xlu1 %1246  ;;  %v1066_v18 = vadd.f32 %v970_v2, %v847_v34  ;;  %v5765_v34 = vsel %vm5496_vm7, %v1069_v62, 0.0  ;;  %v10835_v2 = vld [vmem:[#allocation225_spill] sm:$0xff]  ;;  %v851_v63 = vsel %vm833_vm1, %v10836_v38, %v5486_v30  ;;  %v10842_v38 = vld [vmem:[#allocation58_spill] sm:$0xff] }
 0x2c1   : > { %10824 = vst [vmem:[#allocation46_spill] sm:$0xff] %v5741_v47  ;;  %v5745_v6 = vpop.permute.xlu0 %1244  ;;  %v593_v47 = vsel %vm544_vm0, %v10832_v42, %v10831_v60  ;;  %v852_v51 = vsel %vm833_vm1, %v10835_v2, %v5482_v11  ;;  %v10838_v62 = vld [vmem:[#allocation57_spill] sm:$0xff]  ;;  %v982_v42 = vadd.f32 %v594_v23, %v10839_v5  ;;  %v10840_v2 = vld [vmem:[#allocation18_spill] sm:$0xff]  ;;  %v10846_v23 = vld [vmem:[#allocation132_spill] sm:$0xff] }
 0x2c2   : > { %10825 = vst [vmem:[#allocation79_spill] sm:$0xff] %v5743_v54  ;;  %v5779_v29 = vsel %vm5496_vm7, %v1066_v18, 0.0  ;;  %v985_v13 = vadd.f32 %v595_v58, %v10838_v62  ;;  %v10841_v54 = vld [vmem:[#allocation233_spill] sm:$0xff]  ;;  %v10847_v62 = vld [vmem:[#allocation91_spill] sm:$0xff] }
 0x2c3   : > { %10826 = vst [vmem:[#allocation53_spill] sm:$0xff] %v5745_v6  ;;  %v850_v6 = vsel %vm833_vm1, %v10841_v54, %v10840_v2  ;;  %v598_v5 = vsel %vm544_vm0, %v10847_v62, %v10846_v23  ;;  %v10848_v54 = vld [vmem:[#allocation149_spill] sm:$0xff]  ;;  %v10858_v62 = vld [vmem:[#allocation62_spill] sm:$0xff]  ;;  %v10868_v23 = vld [vmem:[#allocation71_spill] sm:$0xff] }
 0x2c4   : > { %10834 = vst [vmem:[#allocation72_spill] sm:$0xff] %v5765_v34  ;;  %v1081_v11 = vadd.f32 %v985_v13, %v852_v51 }
 0x2c5   : > { %10837 = vst [vmem:[#allocation224_spill] sm:$0xff] %v5779_v29 }
 0x2c6   : > { %1338 = vrot.lane.b32.xlu2 %v5761_v7, %s3836_s16  ;;  %1336 = vrot.lane.b32.xlu1 %v5765_v34, %s3836_s16  ;;  %v979_v7 = vadd.f32 %v593_v47, %v10842_v38  ;;  %v1078_v34 = vadd.f32 %v982_v42, %v851_v63  ;;  %v10850_v47 = vld [vmem:[#allocation151_spill] sm:$0xff]  ;;  %v10851_v38 = vld [vmem:[#allocation84_spill] sm:$0xff]  ;;  %v5812_v51 = vsel %vm5496_vm7, %v1081_v11, 0.0 }
 0x2c7   : > { %1334 = vrot.lane.b32.xlu0 %v5779_v29, %s3836_s16  ;;  %v597_v29 = vsel %vm544_vm0, %v10849_v15, %v10848_v54  ;;  %10852 = vst [vmem:[#allocation15_spill] sm:$0xff] %v5812_v51  ;;  %v10855_v15 = vld [vmem:[#allocation55_spill] sm:$0xff] }
 0x2c8   : > { %v5792_v30 = vpop.permute.xlu2 %1272  ;;  %v5794_v18 = vpop.permute.xlu1 %1252  ;;  %v1075_v58 = vadd.f32 %v979_v7, %v850_v6  ;;  %v5816_v6 = vsel %vm5496_vm7, %v1078_v34, 0.0  ;;  %v10854_v7 = vld [vmem:[#allocation226_spill] sm:$0xff]  ;;  %v854_v13 = vsel %vm833_vm1, %v10855_v15, %v5541_v40  ;;  %v10857_v34 = vld [vmem:[#allocation63_spill] sm:$0xff]  ;;  %v10861_v15 = vld [vmem:[#allocation64_spill] sm:$0xff] }
 0x2c9   : > { %10843 = vst [vmem:[#allocation228_spill] sm:$0xff] %v5792_v30  ;;  %v5796_v36 = vpop.permute.xlu0 %1250  ;;  %v596_v30 = vsel %vm544_vm0, %v10851_v38, %v10850_v47  ;;  %v855_v63 = vsel %vm833_vm1, %v10854_v7, %v5537_v44  ;;  %v994_v42 = vadd.f32 %v598_v5, %v10857_v34  ;;  %v991_v38 = vadd.f32 %v597_v29, %v10858_v62  ;;  %v10859_v7 = vld [vmem:[#allocation21_spill] sm:$0xff]  ;;  %v10865_v29 = vld [vmem:[#allocation138_spill] sm:$0xff] }
 0x2ca   : > { %10844 = vst [vmem:[#allocation51_spill] sm:$0xff] %v5794_v18  ;;  %v5830_v11 = vsel %vm5496_vm7, %v1075_v58, 0.0  ;;  %v10860_v18 = vld [vmem:[#allocation48_spill] sm:$0xff]  ;;  %v10866_v34 = vld [vmem:[#allocation97_spill] sm:$0xff] }
 0x2cb   : > { %10845 = vst [vmem:[#allocation50_spill] sm:$0xff] %v5796_v36  ;;  %v853_v36 = vsel %vm833_vm1, %v10860_v18, %v10859_v7  ;;  %v1090_v44 = vadd.f32 %v994_v42, %v855_v63  ;;  %v601_v62 = vsel %vm544_vm0, %v10866_v34, %v10865_v29  ;;  %v10867_v18 = vld [vmem:[#allocation152_spill] sm:$0xff]  ;;  %v10885_v29 = vld [vmem:[#allocation103_spill] sm:$0xff] }
 0x2cc   : > { %10853 = vst [vmem:[#allocation230_spill] sm:$0xff] %v5816_v6  ;;  %v10877_v34 = vld [vmem:[#allocation68_spill] sm:$0xff] }
 0x2cd   : > { %10856 = vst [vmem:[#allocation52_spill] sm:$0xff] %v5830_v11  ;;  %v5863_v63 = vsel %vm5496_vm7, %v1090_v44, 0.0 }
 0x2ce   : > { %1344 = vrot.lane.b32.xlu2 %v5812_v51, %s3836_s16  ;;  %1342 = vrot.lane.b32.xlu1 %v5816_v6, %s3836_s16  ;;  %v988_v51 = vadd.f32 %v596_v30, %v10861_v15  ;;  %v1087_v6 = vadd.f32 %v991_v38, %v854_v13  ;;  %v10869_v30 = vld [vmem:[#allocation154_spill] sm:$0xff]  ;;  %v10870_v15 = vld [vmem:[#allocation89_spill] sm:$0xff]  ;;  %10871 = vst [vmem:[#allocation78_spill] sm:$0xff] %v5863_v63 }
 0x2cf   : > { %1340 = vrot.lane.b32.xlu0 %v5830_v11, %s3836_s16  ;;  %v600_v11 = vsel %vm544_vm0, %v10868_v23, %v10867_v18  ;;  %v10874_v23 = vld [vmem:[#allocation54_spill] sm:$0xff]  ;;  %v10884_v18 = vld [vmem:[#allocation144_spill] sm:$0xff] }
 0x2d0   : > { %v5843_v40 = vpop.permute.xlu2 %1278  ;;  %v5845_v58 = vpop.permute.xlu1 %1258  ;;  %v1084_v5 = vadd.f32 %v988_v51, %v853_v36  ;;  %v5867_v36 = vsel %vm5496_vm7, %v1087_v6, 0.0  ;;  %v10873_v51 = vld [vmem:[#allocation229_spill] sm:$0xff]  ;;  %v857_v42 = vsel %vm833_vm1, %v10874_v23, %v5592_v28  ;;  %v1123_v23 = vadd.s32 256, %v4905_v49 }
 0x2d1   : > { %10862 = vst [vmem:[#allocation85_spill] sm:$0xff] %v5843_v40  ;;  %v5847_v54 = vpop.permute.xlu0 %1256  ;;  %v599_v40 = vsel %vm544_vm0, %v10870_v15, %v10869_v30  ;;  %v858_v13 = vsel %vm833_vm1, %v10873_v51, %v5588_v35  ;;  %v10876_v6 = vld [vmem:[#allocation69_spill] sm:$0xff]  ;;  %v1000_v15 = vadd.f32 %v600_v11, %v10877_v34  ;;  %v10878_v51 = vld [vmem:[#allocation24_spill] sm:$0xff] }
 0x2d2   : > { %10863 = vst [vmem:[#allocation59_spill] sm:$0xff] %v5845_v58  ;;  %v5881_v44 = vsel %vm5496_vm7, %v1084_v5, 0.0  ;;  %v1003_v38 = vadd.f32 %v601_v62, %v10876_v6  ;;  %v10879_v58 = vld [vmem:[#allocation8_spill] sm:$0xff]  ;;  %v1126_v34 = vcvt.s32.f32 %v1123_v23 }
 0x2d3   : > { %10864 = vst [vmem:[#allocation145_spill] sm:$0xff] %v5847_v54  ;;  %v856_v54 = vsel %vm833_vm1, %v10879_v58, %v10878_v51  ;;  %v1096_v62 = vadd.f32 %v1000_v15, %v857_v42  ;;  %v604_v58 = vsel %vm544_vm0, %v10885_v29, %v10884_v18  ;;  %v10887_v51 = vld [vmem:[#allocation77_spill] sm:$0xff]  ;;  %v10892_v29 = vld [vmem:[#allocation232_spill] sm:$0xff] }
 0x2d4   : > { %10872 = vst [vmem:[#allocation225_spill] sm:$0xff] %v5867_v36  ;;  %v10893_v15 = vld [vmem:[#allocation9_spill] sm:$0xff] }
 0x2d5   : > { %10875 = vst [vmem:[#allocation231_spill] sm:$0xff] %v5881_v44 }
 0x2d6   : > { %1350 = vrot.lane.b32.xlu2 %v5863_v63, %s3836_s16  ;;  %1348 = vrot.lane.b32.xlu1 %v5867_v36, %s3836_s16  ;;  %v10880_v63 = vld [vmem:[#allocation70_spill] sm:$0xff]  ;;  %v1099_v36 = vadd.f32 %v1003_v38, %v858_v13  ;;  %v861_v38 = vsel %vm833_vm1, %v10892_v29, %v5639_v8 }
 0x2d7   : > { %1346 = vrot.lane.b32.xlu0 %v5881_v44, %s3836_s16  ;;  %v997_v5 = vadd.f32 %v599_v40, %v10880_v63  ;;  %v10886_v44 = vld [vmem:[#allocation155_spill] sm:$0xff]  ;;  %v10888_v63 = vld [vmem:[#allocation157_spill] sm:$0xff]  ;;  %v10897_v29 = vld [vmem:[#allocation234_spill] sm:$0xff] }
 0x2d8   : > { %v5895_v28 = vpop.permute.xlu2 %1284  ;;  %v5897_v35 = vpop.permute.xlu1 %1264  ;;  %v603_v40 = vsel %vm544_vm0, %v10887_v51, %v10886_v44  ;;  %v5915_v42 = vsel %vm5496_vm7, %v1099_v36, 0.0  ;;  %v860_v51 = vsel %vm833_vm1, %v10893_v15, %v5643_v53  ;;  %v10895_v36 = vld [vmem:[#allocation75_spill] sm:$0xff]  ;;  %v1129_v15 = vmul.f32 0.33333334, %v1126_v34  ;;  %v10903_v44 = vld [vmem:[#allocation158_spill] sm:$0xff] }
 0x2d9   : > { %10881 = vst [vmem:[#allocation57_spill] sm:$0xff] %v5895_v28  ;;  %v5899_v6 = vpop.permute.xlu0 %1262  ;;  %v1093_v11 = vadd.f32 %v997_v5, %v856_v54  ;;  %v10889_v28 = vld [vmem:[#allocation95_spill] sm:$0xff]  ;;  %v5919_v54 = vsel %vm5496_vm7, %v1096_v62, 0.0  ;;  %v1012_v23 = vadd.f32 %v604_v58, %v10895_v36  ;;  %v10896_v5 = vld [vmem:[#allocation74_spill] sm:$0xff] }
 0x2da   : > { %10882 = vst [vmem:[#allocation56_spill] sm:$0xff] %v5897_v35  ;;  %v602_v13 = vsel %vm544_vm0, %v10889_v28, %v10888_v63  ;;  %v1009_v62 = vadd.f32 %v603_v40, %v10896_v5  ;;  %v859_v35 = vsel %vm833_vm1, %v10897_v29, %v5433_v12  ;;  %v1132_v36 = vfloor.f32 %v1129_v15  ;;  %v10902_v5 = vld [vmem:[#allocation150_spill] sm:$0xff] }
 0x2db   : > { %10883 = vst [vmem:[#allocation18_spill] sm:$0xff] %v5899_v6  ;;  %v5933_v28 = vsel %vm5496_vm7, %v1093_v11, 0.0  ;;  %v10898_v6 = vld [vmem:[#allocation76_spill] sm:$0xff]  ;;  %v607_v29 = vsel %vm544_vm0, %v10746_v61, %v10902_v5  ;;  %v864_v61 = vsel %vm833_vm1, %v4969_v43, %v5690_v32  ;;  %v10913_v43 = vld [vmem:[#allocation235_spill] sm:$0xff]  ;;  %v10917_v32 = vld [vmem:[#allocation161_spill] sm:$0xff] }
 0x2dc   : > { %10890 = vst [vmem:[#allocation233_spill] sm:$0xff] %v5915_v42  ;;  %v1105_v8 = vadd.f32 %v1009_v62, %v860_v51  ;;  %v10912_v62 = vld [vmem:[#allocation80_spill] sm:$0xff] }
 0x2dd   : > { %10891 = vst [vmem:[#allocation58_spill] sm:$0xff] %v5919_v54 }
 0x2de   : > { %1356 = vrot.lane.b32.xlu2 %v5915_v42, %s3836_s16  ;;  %10894 = vst [vmem:[#allocation91_spill] sm:$0xff] %v5933_v28  ;;  %1354 = vrot.lane.b32.xlu1 %v5919_v54, %s3836_s16  ;;  %v1006_v42 = vadd.f32 %v602_v13, %v10898_v6  ;;  %v1108_v54 = vadd.f32 %v1012_v23, %v861_v38  ;;  %v10905_v13 = vld [vmem:[#allocation160_spill] sm:$0xff] }
 0x2df   : > { %1352 = vrot.lane.b32.xlu0 %v5933_v28, %s3836_s16  ;;  %v10904_v28 = vld [vmem:[#allocation83_spill] sm:$0xff] }
 0x2e0   : > { %v5946_v11 = vpop.permute.xlu2 %1290  ;;  %v5948_v53 = vpop.permute.xlu1 %1270  ;;  %v1102_v40 = vadd.f32 %v1006_v42, %v859_v35  ;;  %v606_v6 = vsel %vm544_vm0, %v10904_v28, %v10903_v44  ;;  %v5966_v51 = vsel %vm5496_vm7, %v1108_v54, 0.0  ;;  %v5970_v35 = vsel %vm5496_vm7, %v1105_v8, 0.0  ;;  %v10909_v42 = vld [vmem:[#allocation10_spill] sm:$0xff]  ;;  %v10911_v8 = vld [vmem:[#allocation81_spill] sm:$0xff] }
 0x2e1   : > { %10899 = vst [vmem:[#allocation65_spill] sm:$0xff] %v5946_v11  ;;  %v5950_v58 = vpop.permute.xlu0 %1268  ;;  %v10906_v11 = vld [vmem:[#allocation101_spill] sm:$0xff]  ;;  %v863_v28 = vsel %vm833_vm1, %v10909_v42, %v5694_v9  ;;  %v1021_v23 = vadd.f32 %v607_v29, %v10911_v8  ;;  %v1018_v15 = vadd.f32 %v606_v6, %v10912_v62  ;;  %v1135_v42 = vmul.f32 3.0, %v1132_v36  ;;  %v10918_v36 = vld [vmem:[#allocation163_spill] sm:$0xff] }
 0x2e2   : > { %10900 = vst [vmem:[#allocation151_spill] sm:$0xff] %v5948_v53  ;;  %v605_v38 = vsel %vm544_vm0, %v10906_v11, %v10905_v13  ;;  %v5984_v54 = vsel %vm5496_vm7, %v1102_v40, 0.0  ;;  %v862_v11 = vsel %vm833_vm1, %v10913_v43, %v5484_v37  ;;  %v10914_v53 = vld [vmem:[#allocation82_spill] sm:$0xff]  ;;  %v10916_v8 = vld [vmem:[#allocation153_spill] sm:$0xff] }
 0x2e3   : > { %10901 = vst [vmem:[#allocation84_spill] sm:$0xff] %v5950_v58  ;;  %v1015_v58 = vadd.f32 %v605_v38, %v10914_v53  ;;  %v1114_v9 = vadd.f32 %v1018_v15, %v863_v28  ;;  %v546_v62 = vsel %vm544_vm0, %v10762_v45, %v10916_v8  ;;  %v1138_v43 = vsub.f32 %v1126_v34, %v1135_v42  ;;  %v10919_v45 = vld [vmem:[#allocation87_spill] sm:$0xff]  ;;  %v10920_v28 = vld [vmem:[#allocation194_spill] sm:$0xff]  ;;  %v10925_v42 = vld [vmem:[#allocation88_spill] sm:$0xff] }
 0x2e4   : > { %10907 = vst [vmem:[#allocation226_spill] sm:$0xff] %v5966_v51  ;;  %v545_v53 = vsel %vm544_vm0, %v10743_v31, %v10917_v32  ;;  %v608_v38 = vsel %vm544_vm0, %v10744_v41, %v10918_v36  ;;  %v935_v34 = vadd.f32 %v546_v62, %v10919_v45  ;;  %v899_v31 = vsel %vm833_vm1, %v5024_v4, %v10920_v28  ;;  %v10921_v32 = vld [vmem:[#allocation196_spill] sm:$0xff] }
 0x2e5   : > { %10908 = vst [vmem:[#allocation55_spill] sm:$0xff] %v5970_v35  ;;  %v1111_v6 = vadd.f32 %v1015_v58, %v862_v11  ;;  %v6021_v58 = vsel %vm5496_vm7, %v1114_v9, 0.0  ;;  %v10923_v9 = vld [vmem:[#allocation86_spill] sm:$0xff]  ;;  %v10924_v11 = vld [vmem:[#allocation11_spill] sm:$0xff]  ;;  %vm1141_vm8 = vcmp.gt.f32.partialorder %v1138_v43, 0.5  ;;  %vm1144_vm9 = vcmp.lt.f32.partialorder %v1138_v43, 1.5 }
 0x2e6   : > { %1362 = vrot.lane.b32.xlu2 %v5966_v51, %s3836_s16  ;;  %10910 = vst [vmem:[#allocation63_spill] sm:$0xff] %v5984_v54  ;;  %1360 = vrot.lane.b32.xlu1 %v5970_v35, %s3836_s16  ;;  %v1117_v35 = vadd.f32 %v1021_v23, %v864_v61  ;;  %v10922_v23 = vld [vmem:[#allocation12_spill] sm:$0xff]  ;;  %v932_v15 = vadd.f32 %v545_v53, %v10923_v9  ;;  %vm6054_vm10 = vmand %vm1141_vm8, %vm1144_vm9 }
 0x2e7   : > { %1358 = vrot.lane.b32.xlu0 %v5984_v54, %s3836_s16  ;;  %v898_v41 = vsel %vm833_vm1, %v10922_v23, %v10921_v32  ;;  %v865_v4 = vsel %vm833_vm1, %v10924_v11, %v5539_v55  ;;  %v1024_v8 = vadd.f32 %v608_v38, %v10925_v42  ;;  %v1031_v45 = vadd.f32 %v935_v34, %v899_v31  ;;  %v10930_v9 = vld [vmem:[#allocation156_spill] sm:$0xff]  ;;  %v10932_v42 = vld [vmem:[#allocation166_spill] sm:$0xff]  ;;  %v11091_v23 = vld [vmem:[#allocation39_spill] sm:$0xff] }
 0x2e8   : > { %v5997_v40 = vpop.permute.xlu2 %1296  ;;  %v5999_v51 = vpop.permute.xlu1 %1276  ;;  %v6017_v61 = vsel %vm5496_vm7, %v1117_v35, 0.0  ;;  %v6036_v35 = vsel %vm5496_vm7, %v1111_v6, 0.0  ;;  %v1028_v28 = vadd.f32 %v932_v15, %v898_v41  ;;  %v549_v43 = vsel %vm544_vm0, %v10773_v1, %v10930_v9  ;;  %v10931_v11 = vld [vmem:[#allocation164_spill] sm:$0xff]  ;;  %v10935_v15 = vld [vmem:[#allocation197_spill] sm:$0xff] }
 0x2e9   : > { %10915 = vst [vmem:[#allocation62_spill] sm:$0xff] %v5997_v40  ;;  %v6001_v29 = vpop.permute.xlu0 %1274  ;;  %v1120_v53 = vadd.f32 %v1024_v8, %v865_v4  ;;  %v548_v38 = vsel %vm544_vm0, %v10758_v26, %v10931_v11  ;;  %v547_v34 = vsel %vm544_vm0, %v10759_v50, %v10932_v42  ;;  %v6072_v31 = vsel %vm6054_vm10, %v1031_v45, 0.0  ;;  %v10936_v4 = vld [vmem:[#allocation199_spill] sm:$0xff]  ;;  %v10938_v8 = vld [vmem:[#allocation93_spill] sm:$0xff] }
 0x2ea   : > { %10933 = vst [vmem:[#allocation64_spill] sm:$0xff] %v6072_v31  ;;  %v6076_v41 = vsel %vm6054_vm10, %v1028_v28, 0.0  ;;  %v902_v1 = vsel %vm833_vm1, %v5075_v3, %v10935_v15  ;;  %v901_v26 = vsel %vm833_vm1, %v5226_v48, %v10936_v4  ;;  %v944_v45 = vadd.f32 %v549_v43, %v10938_v8  ;;  %v10939_v28 = vld [vmem:[#allocation92_spill] sm:$0xff]  ;;  %v10940_v3 = vld [vmem:[#allocation186_spill] sm:$0xff] }
 0x2eb   : > { %10934 = vst [vmem:[#allocation97_spill] sm:$0xff] %v6076_v41  ;;  %v6090_v50 = vsel %vm5496_vm7, %v1120_v53, 0.0  ;;  %v941_v9 = vadd.f32 %v548_v38, %v10939_v28  ;;  %v900_v11 = vsel %vm833_vm1, %v5230_v19, %v10940_v3  ;;  %v10941_v48 = vld [vmem:[#allocation94_spill] sm:$0xff]  ;;  %v10944_v38 = vld [vmem:[#allocation159_spill] sm:$0xff] }
 0x2ec   : > { %10937 = vst [vmem:[#allocation71_spill] sm:$0xff] %v6090_v50  ;;  %v938_v42 = vadd.f32 %v547_v34, %v10941_v48  ;;  %v1040_v15 = vadd.f32 %v944_v45, %v902_v1  ;;  %v552_v8 = vsel %vm544_vm0, %v10785_v59, %v10944_v38  ;;  %v10945_v19 = vld [vmem:[#allocation167_spill] sm:$0xff]  ;;  %v10946_v34 = vld [vmem:[#allocation169_spill] sm:$0xff]  ;;  %v10949_v45 = vld [vmem:[#allocation200_spill] sm:$0xff] }
 0x2ed   : > { %v1037_v4 = vadd.f32 %v941_v9, %v901_v26  ;;  %v551_v28 = vsel %vm544_vm0, %v10771_v25, %v10945_v19  ;;  %v550_v3 = vsel %vm544_vm0, %v10772_v39, %v10946_v34  ;;  %v905_v59 = vsel %vm833_vm1, %v5126_v16, %v10949_v45  ;;  %v10950_v9 = vld [vmem:[#allocation202_spill] sm:$0xff]  ;;  %v10954_v16 = vld [vmem:[#allocation189_spill] sm:$0xff] }
 0x2ee   : > { %1368 = vrot.lane.b32.xlu2 %v6017_v61, %s3836_s16  ;;  %1366 = vrot.lane.b32.xlu1 %v6021_v58, %s3836_s16  ;;  %v1034_v43 = vadd.f32 %v938_v42, %v900_v11  ;;  %v6123_v1 = vsel %vm6054_vm10, %v1040_v15, 0.0  ;;  %v904_v25 = vsel %vm833_vm1, %v5277_v27, %v10950_v9  ;;  %v10952_v11 = vld [vmem:[#allocation99_spill] sm:$0xff]  ;;  %v10953_v42 = vld [vmem:[#allocation98_spill] sm:$0xff]  ;;  %v10955_v27 = vld [vmem:[#allocation100_spill] sm:$0xff] }
 0x2ef   : > { %1364 = vrot.lane.b32.xlu0 %v6036_v35, %s3836_s16  ;;  %10947 = vst [vmem:[#allocation229_spill] sm:$0xff] %v6123_v1  ;;  %v6127_v26 = vsel %vm6054_vm10, %v1037_v4, 0.0  ;;  %v953_v48 = vadd.f32 %v552_v8, %v10952_v11  ;;  %v950_v15 = vadd.f32 %v551_v28, %v10953_v42  ;;  %v903_v4 = vsel %vm833_vm1, %v5281_v0, %v10954_v16  ;;  %v10958_v28 = vld [vmem:[#allocation162_spill] sm:$0xff] }
 0x2f0   : > { %v6048_v62 = vpop.permute.xlu2 %1302  ;;  %v6050_v6 = vpop.permute.xlu1 %1282  ;;  %10948 = vst [vmem:[#allocation54_spill] sm:$0xff] %v6127_v26  ;;  %v6141_v39 = vsel %vm6054_vm10, %v1034_v43, 0.0  ;;  %v947_v38 = vadd.f32 %v550_v3, %v10955_v27  ;;  %v555_v11 = vsel %vm544_vm0, %v10797_v33, %v10958_v28  ;;  %v10959_v0 = vld [vmem:[#allocation170_spill] sm:$0xff]  ;;  %v10960_v3 = vld [vmem:[#allocation172_spill] sm:$0xff] }
 0x2f1   : > { %10926 = vst [vmem:[#allocation21_spill] sm:$0xff] %v6048_v62  ;;  %v6052_v32 = vpop.permute.xlu0 %1280  ;;  %v1049_v34 = vadd.f32 %v953_v48, %v905_v59  ;;  %v1046_v45 = vadd.f32 %v950_v15, %v904_v25  ;;  %v554_v42 = vsel %vm544_vm0, %v10783_v21, %v10959_v0  ;;  %v553_v16 = vsel %vm544_vm0, %v10784_v57, %v10960_v3  ;;  %v10963_v48 = vld [vmem:[#allocation203_spill] sm:$0xff]  ;;  %v10964_v15 = vld [vmem:[#allocation205_spill] sm:$0xff] }
 0x2f2   : > { %10927 = vst [vmem:[#allocation48_spill] sm:$0xff] %v6050_v6  ;;  %v1043_v8 = vadd.f32 %v947_v38, %v903_v4  ;;  %v908_v33 = vsel %vm833_vm1, %v5177_v22, %v10963_v48  ;;  %v907_v21 = vsel %vm833_vm1, %v5328_v20, %v10964_v15  ;;  %v10966_v4 = vld [vmem:[#allocation105_spill] sm:$0xff]  ;;  %v10967_v38 = vld [vmem:[#allocation104_spill] sm:$0xff]  ;;  %v10969_v20 = vld [vmem:[#allocation106_spill] sm:$0xff] }
 0x2f3   : > { %10951 = vst [vmem:[#allocation69_spill] sm:$0xff] %v6141_v39  ;;  %v6174_v59 = vsel %vm6054_vm10, %v1049_v34, 0.0  ;;  %v6178_v25 = vsel %vm6054_vm10, %v1046_v45, 0.0  ;;  %v962_v27 = vadd.f32 %v555_v11, %v10966_v4  ;;  %v959_v34 = vadd.f32 %v554_v42, %v10967_v38  ;;  %v10968_v22 = vld [vmem:[#allocation192_spill] sm:$0xff]  ;;  %v10972_v42 = vld [vmem:[#allocation165_spill] sm:$0xff] }
 0x2f4   : > { %10961 = vst [vmem:[#allocation70_spill] sm:$0xff] %v6174_v59  ;;  %v6192_v57 = vsel %vm6054_vm10, %v1043_v8, 0.0  ;;  %v906_v45 = vsel %vm833_vm1, %v5332_v10, %v10968_v22  ;;  %v956_v28 = vadd.f32 %v553_v16, %v10969_v20  ;;  %v558_v4 = vsel %vm544_vm0, %v10812_v14, %v10972_v42  ;;  %v10973_v10 = vld [vmem:[#allocation173_spill] sm:$0xff]  ;;  %v10974_v16 = vld [vmem:[#allocation175_spill] sm:$0xff] }
 0x2f5   : > { %10962 = vst [vmem:[#allocation144_spill] sm:$0xff] %v6178_v25  ;;  %v1058_v3 = vadd.f32 %v962_v27, %v908_v33  ;;  %v1055_v48 = vadd.f32 %v959_v34, %v907_v21  ;;  %v557_v38 = vsel %vm544_vm0, %v10795_v52, %v10973_v10  ;;  %v556_v22 = vsel %vm544_vm0, %v10796_v56, %v10974_v16  ;;  %v10977_v27 = vld [vmem:[#allocation206_spill] sm:$0xff]  ;;  %v10978_v34 = vld [vmem:[#allocation208_spill] sm:$0xff] }
 0x2f6   : > { %1374 = vrot.lane.b32.xlu2 %v6072_v31, %s3836_s16  ;;  %1372 = vrot.lane.b32.xlu1 %v6076_v41, %s3836_s16  ;;  %10965 = vst [vmem:[#allocation103_spill] sm:$0xff] %v6192_v57  ;;  %v1052_v11 = vadd.f32 %v956_v28, %v906_v45  ;;  %v911_v14 = vsel %vm833_vm1, %v10821_v46, %v10977_v27  ;;  %v10980_v45 = vld [vmem:[#allocation111_spill] sm:$0xff]  ;;  %v10981_v28 = vld [vmem:[#allocation110_spill] sm:$0xff] }
 0x2f7   : > { %1370 = vrot.lane.b32.xlu0 %v6090_v50, %s3836_s16  ;;  %v6225_v33 = vsel %vm6054_vm10, %v1058_v3, 0.0  ;;  %v6229_v21 = vsel %vm6054_vm10, %v1055_v48, 0.0  ;;  %v910_v52 = vsel %vm833_vm1, %v5380_v17, %v10978_v34  ;;  %v971_v20 = vadd.f32 %v558_v4, %v10980_v45  ;;  %v10982_v46 = vld [vmem:[#allocation195_spill] sm:$0xff]  ;;  %v10984_v17 = vld [vmem:[#allocation112_spill] sm:$0xff] }
 0x2f8   : > { %v6103_v24 = vpop.permute.xlu2 %1308  ;;  %v6105_v53 = vpop.permute.xlu1 %1288  ;;  %10975 = vst [vmem:[#allocation95_spill] sm:$0xff] %v6225_v33  ;;  %v6243_v56 = vsel %vm6054_vm10, %v1052_v11, 0.0  ;;  %v968_v3 = vadd.f32 %v557_v38, %v10981_v28  ;;  %v10983_v48 = vld [vmem:[#allocation23_spill] sm:$0xff]  ;;  %v965_v10 = vadd.f32 %v556_v22, %v10984_v17  ;;  %v10987_v38 = vld [vmem:[#allocation168_spill] sm:$0xff]  ;;  %v10990_v22 = vld [vmem:[#allocation178_spill] sm:$0xff] }
 0x2f9   : > { %10942 = vst [vmem:[#allocation154_spill] sm:$0xff] %v6103_v24  ;;  %v6107_v62 = vpop.permute.xlu0 %1286  ;;  %v909_v42 = vsel %vm833_vm1, %v10983_v48, %v10982_v46  ;;  %v1067_v27 = vadd.f32 %v971_v20, %v911_v14  ;;  %v561_v45 = vsel %vm544_vm0, %v10831_v60, %v10987_v38  ;;  %v10988_v28 = vld [vmem:[#allocation176_spill] sm:$0xff]  ;;  %v10991_v17 = vld [vmem:[#allocation137_spill] sm:$0xff] }
 0x2fa   : > { %10943 = vst [vmem:[#allocation89_spill] sm:$0xff] %v6105_v53  ;;  %v1064_v34 = vadd.f32 %v968_v3, %v910_v52  ;;  %v1061_v4 = vadd.f32 %v965_v10, %v909_v42  ;;  %v10989_v46 = vld [vmem:[#allocation120_spill] sm:$0xff]  ;;  %v10994_v20 = vld [vmem:[#allocation209_spill] sm:$0xff]  ;;  %v10995_v3 = vld [vmem:[#allocation211_spill] sm:$0xff] }
 0x2fb   : > { %10976 = vst [vmem:[#allocation232_spill] sm:$0xff] %v6229_v21  ;;  %v560_v48 = vsel %vm544_vm0, %v10989_v46, %v10988_v28  ;;  %v6276_v14 = vsel %vm6054_vm10, %v1067_v27, 0.0  ;;  %v914_v60 = vsel %vm833_vm1, %v10840_v2, %v10994_v20  ;;  %v10996_v42 = vld [vmem:[#allocation27_spill] sm:$0xff]  ;;  %v10999_v28 = vld [vmem:[#allocation116_spill] sm:$0xff]  ;;  %v11000_v2 = vld [vmem:[#allocation198_spill] sm:$0xff] }
 0x2fc   : > { %10979 = vst [vmem:[#allocation9_spill] sm:$0xff] %v6243_v56  ;;  %v6280_v52 = vsel %vm6054_vm10, %v1064_v34, 0.0  ;;  %v913_v10 = vsel %vm833_vm1, %v10996_v42, %v10995_v3  ;;  %v6294_v27 = vsel %vm6054_vm10, %v1061_v4, 0.0  ;;  %v10998_v34 = vld [vmem:[#allocation117_spill] sm:$0xff]  ;;  %v977_v46 = vadd.f32 %v560_v48, %v10999_v28  ;;  %v11002_v20 = vld [vmem:[#allocation118_spill] sm:$0xff]  ;;  %v11004_v48 = vld [vmem:[#allocation171_spill] sm:$0xff] }
 0x2fd   : > { %10992 = vst [vmem:[#allocation234_spill] sm:$0xff] %v6276_v14  ;;  %v980_v38 = vadd.f32 %v561_v45, %v10998_v34  ;;  %v564_v34 = vsel %vm544_vm0, %v10850_v47, %v11004_v48  ;;  %v11005_v28 = vld [vmem:[#allocation179_spill] sm:$0xff] }
 0x2fe   : > { %1380 = vrot.lane.b32.xlu2 %v6123_v1, %s3836_s16  ;;  %1378 = vrot.lane.b32.xlu1 %v6127_v26, %s3836_s16  ;;  %10993 = vst [vmem:[#allocation76_spill] sm:$0xff] %v6280_v52 }
 0x2ff   : > { %1376 = vrot.lane.b32.xlu0 %v6141_v39, %s3836_s16  ;;  %10997 = vst [vmem:[#allocation150_spill] sm:$0xff] %v6294_v27 }
 0x300   : > { %v6154_v19 = vpop.permute.xlu2 %1314  ;;  %v6156_v43 = vpop.permute.xlu1 %1294 }
 0x301   : > { %10956 = vst [vmem:[#allocation68_spill] sm:$0xff] %v6154_v19  ;;  %v6158_v9 = vpop.permute.xlu0 %1292 }
 0x302   : > { %10957 = vst [vmem:[#allocation8_spill] sm:$0xff] %v6156_v43 }
 0x306   : > { %1386 = vrot.lane.b32.xlu2 %v6174_v59, %s3836_s16  ;;  %1384 = vrot.lane.b32.xlu1 %v6178_v25, %s3836_s16 }
 0x307   : > { %1382 = vrot.lane.b32.xlu0 %v6192_v57, %s3836_s16  ;;  %v1076_v57 = vadd.f32 %v980_v38, %v914_v60  ;;  %v11011_v38 = vld [vmem:[#allocation212_spill] sm:$0xff] }
 0x308   : > { %v6205_v0 = vpop.permute.xlu2 %1320  ;;  %v6207_v8 = vpop.permute.xlu1 %1300  ;;  %v917_v47 = vsel %vm833_vm1, %v10859_v7, %v11011_v38  ;;  %v11017_v7 = vld [vmem:[#allocation201_spill] sm:$0xff]  ;;  %v11019_v38 = vld [vmem:[#allocation124_spill] sm:$0xff] }
 0x309   : > { %10970 = vst [vmem:[#allocation77_spill] sm:$0xff] %v6205_v0  ;;  %v6209_v15 = vpop.permute.xlu0 %1298  ;;  %v6327_v60 = vsel %vm6054_vm10, %v1076_v57, 0.0 }
 0x30a   : > { %10971 = vst [vmem:[#allocation157_spill] sm:$0xff] %v6207_v8  ;;  %v11113_v8 = vld [vmem:[#allocation223_spill] sm:$0xff] }
 0x30b   : > { %11009 = vst [vmem:[#allocation83_spill] sm:$0xff] %v6327_v60 }
 0x30e   : > { %1392 = vrot.lane.b32.xlu2 %v6225_v33, %s3836_s16  ;;  %1390 = vrot.lane.b32.xlu1 %v6229_v21, %s3836_s16 }
 0x30f   : > { %1388 = vrot.lane.b32.xlu0 %v6243_v56, %s3836_s16  ;;  %v559_v56 = vsel %vm544_vm0, %v10991_v17, %v10990_v22  ;;  %v11001_v22 = vld [vmem:[#allocation26_spill] sm:$0xff] }
 0x310   : > { %v6256_v16 = vpop.permute.xlu2 %1326  ;;  %v6258_v11 = vpop.permute.xlu1 %1306  ;;  %v912_v17 = vsel %vm833_vm1, %v11001_v22, %v11000_v2  ;;  %v974_v3 = vadd.f32 %v559_v56, %v11002_v20  ;;  %v11006_v2 = vld [vmem:[#allocation126_spill] sm:$0xff]  ;;  %v11007_v56 = vld [vmem:[#allocation181_spill] sm:$0xff]  ;;  %v11008_v20 = vld [vmem:[#allocation143_spill] sm:$0xff] }
 0x311   : > { %10985 = vst [vmem:[#allocation75_spill] sm:$0xff] %v6256_v16  ;;  %v6260_v21 = vpop.permute.xlu0 %1304  ;;  %v563_v22 = vsel %vm544_vm0, %v11006_v2, %v11005_v28  ;;  %v11016_v28 = vld [vmem:[#allocation122_spill] sm:$0xff] }
 0x312   : > { %10986 = vst [vmem:[#allocation74_spill] sm:$0xff] %v6258_v11  ;;  %v1070_v45 = vadd.f32 %v974_v3, %v912_v17  ;;  %v11013_v17 = vld [vmem:[#allocation109_spill] sm:$0xff]  ;;  %v986_v2 = vadd.f32 %v563_v22, %v11016_v28  ;;  %v11020_v22 = vld [vmem:[#allocation174_spill] sm:$0xff]  ;;  %v11108_v11 = vld [vmem:[#allocation236_spill] sm:$0xff] }
 0x313   : > { %v11021_v28 = vld [vmem:[#allocation182_spill] sm:$0xff] }
 0x314   : > { %v6345_v57 = vsel %vm6054_vm10, %v1070_v45, 0.0 }
 0x315   : > { %11014 = vst [vmem:[#allocation101_spill] sm:$0xff] %v6345_v57 }
 0x316   : > { %1398 = vrot.lane.b32.xlu2 %v6276_v14, %s3836_s16  ;;  %1396 = vrot.lane.b32.xlu1 %v6280_v52, %s3836_s16  ;;  %v1073_v52 = vadd.f32 %v977_v46, %v913_v10  ;;  %v11012_v46 = vld [vmem:[#allocation214_spill] sm:$0xff] }
 0x317   : > { %1394 = vrot.lane.b32.xlu0 %v6294_v27, %s3836_s16  ;;  %v562_v27 = vsel %vm544_vm0, %v11008_v20, %v11007_v56  ;;  %v916_v3 = vsel %vm833_vm1, %v11013_v17, %v11012_v46  ;;  %v11018_v56 = vld [vmem:[#allocation30_spill] sm:$0xff] }
 0x318   : > { %v6307_v42 = vpop.permute.xlu2 %1332  ;;  %v6309_v4 = vpop.permute.xlu1 %1312  ;;  %v6331_v10 = vsel %vm6054_vm10, %v1073_v52, 0.0  ;;  %v11015_v52 = vld [vmem:[#allocation123_spill] sm:$0xff]  ;;  %v915_v20 = vsel %vm833_vm1, %v11018_v56, %v11017_v7  ;;  %v983_v46 = vadd.f32 %v562_v27, %v11019_v38  ;;  %v11022_v7 = vld [vmem:[#allocation132_spill] sm:$0xff]  ;;  %v11024_v38 = vld [vmem:[#allocation149_spill] sm:$0xff] }
 0x319   : > { %11003 = vst [vmem:[#allocation158_spill] sm:$0xff] %v6307_v42  ;;  %v6311_v25 = vpop.permute.xlu0 %1310  ;;  %v989_v48 = vadd.f32 %v564_v34, %v11015_v52  ;;  %v567_v52 = vsel %vm544_vm0, %v10869_v30, %v11020_v22  ;;  %v566_v56 = vsel %vm544_vm0, %v11022_v7, %v11021_v28  ;;  %v11023_v27 = vld [vmem:[#allocation184_spill] sm:$0xff] }
 0x31a   : > { %11010 = vst [vmem:[#allocation160_spill] sm:$0xff] %v6331_v10  ;;  %v1079_v34 = vadd.f32 %v983_v46, %v915_v20  ;;  %v11028_v30 = vld [vmem:[#allocation24_spill] sm:$0xff]  ;;  %v11030_v46 = vld [vmem:[#allocation113_spill] sm:$0xff] }
 0x31b   : > { %v11029_v20 = vld [vmem:[#allocation216_spill] sm:$0xff] }
 0x31c   : > { %v919_v22 = vsel %vm833_vm1, %v11030_v46, %v11029_v20  ;;  %v11033_v7 = vld [vmem:[#allocation128_spill] sm:$0xff]  ;;  %v11036_v20 = vld [vmem:[#allocation130_spill] sm:$0xff] }
 0x31e   : > { %1404 = vrot.lane.b32.xlu2 %v6327_v60, %s3836_s16  ;;  %1402 = vrot.lane.b32.xlu1 %v6331_v10, %s3836_s16  ;;  %v1085_v60 = vadd.f32 %v989_v48, %v917_v47  ;;  %v1082_v10 = vadd.f32 %v986_v2, %v916_v3  ;;  %v11027_v48 = vld [vmem:[#allocation215_spill] sm:$0xff] }
 0x31f   : > { %1400 = vrot.lane.b32.xlu0 %v6345_v57, %s3836_s16  ;;  %v565_v57 = vsel %vm544_vm0, %v11024_v38, %v11023_v27  ;;  %v920_v2 = vsel %vm833_vm1, %v11028_v30, %v11027_v48  ;;  %v995_v27 = vadd.f32 %v566_v56, %v11033_v7  ;;  %v11034_v38 = vld [vmem:[#allocation204_spill] sm:$0xff]  ;;  %v11035_v48 = vld [vmem:[#allocation115_spill] sm:$0xff]  ;;  %v11037_v56 = vld [vmem:[#allocation177_spill] sm:$0xff] }
 0x320   : > { %v6358_v17 = vpop.permute.xlu2 %1338  ;;  %v6360_v45 = vpop.permute.xlu1 %1318  ;;  %v6378_v47 = vsel %vm6054_vm10, %v1085_v60, 0.0  ;;  %v6382_v3 = vsel %vm6054_vm10, %v1082_v10, 0.0  ;;  %v6396_v60 = vsel %vm6054_vm10, %v1079_v34, 0.0  ;;  %v11032_v10 = vld [vmem:[#allocation129_spill] sm:$0xff]  ;;  %v918_v30 = vsel %vm833_vm1, %v11035_v48, %v11034_v38  ;;  %v11039_v38 = vld [vmem:[#allocation138_spill] sm:$0xff] }
 0x321   : > { %v6362_v14 = vpop.permute.xlu0 %1316  ;;  %11025 = vst [vmem:[#allocation10_spill] sm:$0xff] %v6378_v47  ;;  %v998_v28 = vadd.f32 %v567_v52, %v11032_v10  ;;  %v992_v46 = vadd.f32 %v565_v57, %v11036_v20  ;;  %v570_v10 = vsel %vm544_vm0, %v10888_v63, %v11037_v56  ;;  %v11038_v7 = vld [vmem:[#allocation185_spill] sm:$0xff]  ;;  %v11040_v57 = vld [vmem:[#allocation187_spill] sm:$0xff]  ;;  %v11041_v20 = vld [vmem:[#allocation152_spill] sm:$0xff] }
 0x322   : > { %11026 = vst [vmem:[#allocation81_spill] sm:$0xff] %v6382_v3  ;;  %v569_v48 = vsel %vm544_vm0, %v11039_v38, %v11038_v7  ;;  %v11049_v7 = vld [vmem:[#allocation134_spill] sm:$0xff] }
 0x323   : > { %11031 = vst [vmem:[#allocation80_spill] sm:$0xff] %v6396_v60  ;;  %v1094_v39 = vadd.f32 %v998_v28, %v920_v2  ;;  %v1088_v52 = vadd.f32 %v992_v46, %v918_v30  ;;  %v11044_v28 = vld [vmem:[#allocation217_spill] sm:$0xff]  ;;  %v11046_v30 = vld [vmem:[#allocation102_spill] sm:$0xff]  ;;  %v1004_v38 = vadd.f32 %v569_v48, %v11049_v7  ;;  %v11053_v48 = vld [vmem:[#allocation180_spill] sm:$0xff] }
 0x324   : > { %v923_v63 = vsel %vm833_vm1, %v5433_v12, %v11044_v28  ;;  %v11050_v12 = vld [vmem:[#allocation207_spill] sm:$0xff]  ;;  %v11052_v28 = vld [vmem:[#allocation136_spill] sm:$0xff] }
 0x325   : > { %v6429_v2 = vsel %vm6054_vm10, %v1094_v39, 0.0  ;;  %v6447_v39 = vsel %vm6054_vm10, %v1088_v52, 0.0  ;;  %v11054_v7 = vld [vmem:[#allocation188_spill] sm:$0xff] }
 0x326   : > { %1410 = vrot.lane.b32.xlu2 %v6378_v47, %s3836_s16  ;;  %1408 = vrot.lane.b32.xlu1 %v6382_v3, %s3836_s16  ;;  %v1091_v3 = vadd.f32 %v995_v27, %v919_v22  ;;  %11042 = vst [vmem:[#allocation235_spill] sm:$0xff] %v6429_v2  ;;  %v11045_v27 = vld [vmem:[#allocation218_spill] sm:$0xff] }
 0x327   : > { %1406 = vrot.lane.b32.xlu0 %v6396_v60, %s3836_s16  ;;  %v568_v60 = vsel %vm544_vm0, %v11041_v20, %v11040_v57  ;;  %v922_v46 = vsel %vm833_vm1, %v11046_v30, %v11045_v27  ;;  %11047 = vst [vmem:[#allocation153_spill] sm:$0xff] %v6447_v39  ;;  %v11051_v57 = vld [vmem:[#allocation121_spill] sm:$0xff] }
 0x328   : > { %v6409_v47 = vpop.permute.xlu2 %1344  ;;  %v6411_v34 = vpop.permute.xlu1 %1324  ;;  %v6433_v22 = vsel %vm6054_vm10, %v1091_v3, 0.0  ;;  %v11048_v3 = vld [vmem:[#allocation135_spill] sm:$0xff]  ;;  %v921_v20 = vsel %vm833_vm1, %v11051_v57, %v11050_v12  ;;  %v1001_v27 = vadd.f32 %v568_v60, %v11052_v28  ;;  %v572_v12 = vsel %vm544_vm0, %v10884_v18, %v11054_v7  ;;  %v11055_v60 = vld [vmem:[#allocation190_spill] sm:$0xff]  ;;  %v11061_v18 = vld [vmem:[#allocation108_spill] sm:$0xff] }
 0x329   : > { %v6413_v33 = vpop.permute.xlu0 %1322  ;;  %11043 = vst [vmem:[#allocation82_spill] sm:$0xff] %v6433_v22  ;;  %v1007_v56 = vadd.f32 %v570_v10, %v11048_v3  ;;  %v573_v3 = vsel %vm544_vm0, %v10905_v13, %v11053_v48  ;;  %v11056_v57 = vld [vmem:[#allocation155_spill] sm:$0xff]  ;;  %v11064_v48 = vld [vmem:[#allocation140_spill] sm:$0xff] }
 0x32a   : > { %v1097_v10 = vadd.f32 %v1001_v27, %v921_v20  ;;  %v571_v28 = vsel %vm544_vm0, %v11056_v57, %v11055_v60  ;;  %v1013_v7 = vadd.f32 %v572_v12, %v11064_v48  ;;  %v11066_v60 = vld [vmem:[#allocation127_spill] sm:$0xff] }
 0x32b   : > { %v11069_v12 = vld [vmem:[#allocation183_spill] sm:$0xff] }
 0x32c   : > { %v11070_v48 = vld [vmem:[#allocation191_spill] sm:$0xff] }
 0x32e   : > { %1416 = vrot.lane.b32.xlu2 %v6429_v2, %s3836_s16  ;;  %1414 = vrot.lane.b32.xlu1 %v6433_v22, %s3836_s16  ;;  %v1103_v2 = vadd.f32 %v1007_v56, %v923_v63  ;;  %v1100_v22 = vadd.f32 %v1004_v38, %v922_v46  ;;  %v11059_v56 = vld [vmem:[#allocation219_spill] sm:$0xff]  ;;  %v11060_v38 = vld [vmem:[#allocation220_spill] sm:$0xff] }
 0x32f   : > { %1412 = vrot.lane.b32.xlu0 %v6447_v39, %s3836_s16  ;;  %v926_v13 = vsel %vm833_vm1, %v5484_v37, %v11059_v56  ;;  %v925_v20 = vsel %vm833_vm1, %v11061_v18, %v11060_v38  ;;  %v11065_v37 = vld [vmem:[#allocation210_spill] sm:$0xff] }
 0x330   : > { %v6460_v30 = vpop.permute.xlu2 %1350  ;;  %v6462_v52 = vpop.permute.xlu1 %1330  ;;  %v6480_v63 = vsel %vm6054_vm10, %v1103_v2, 0.0  ;;  %v6484_v46 = vsel %vm6054_vm10, %v1100_v22, 0.0  ;;  %v6498_v2 = vsel %vm6054_vm10, %v1097_v10, 0.0  ;;  %v11063_v22 = vld [vmem:[#allocation141_spill] sm:$0xff]  ;;  %v924_v57 = vsel %vm833_vm1, %v11066_v60, %v11065_v37  ;;  %v11067_v56 = vld [vmem:[#allocation142_spill] sm:$0xff] }
 0x331   : > { %v6464_v26 = vpop.permute.xlu0 %1328  ;;  %11057 = vst [vmem:[#allocation161_spill] sm:$0xff] %v6480_v63  ;;  %v1016_v27 = vadd.f32 %v573_v3, %v11063_v22  ;;  %v1010_v38 = vadd.f32 %v571_v28, %v11067_v56  ;;  %v576_v22 = vsel %vm544_vm0, %v10918_v36, %v11069_v12  ;;  %v575_v37 = vsel %vm544_vm0, %v10902_v5, %v11070_v48  ;;  %v11071_v28 = vld [vmem:[#allocation193_spill] sm:$0xff]  ;;  %v11076_v5 = vld [vmem:[#allocation114_spill] sm:$0xff] }
 0x332   : > { %11058 = vst [vmem:[#allocation163_spill] sm:$0xff] %v6484_v46  ;;  %v574_v60 = vsel %vm544_vm0, %v10903_v44, %v11071_v28  ;;  %v11079_v56 = vld [vmem:[#allocation146_spill] sm:$0xff]  ;;  %v11081_v12 = vld [vmem:[#allocation133_spill] sm:$0xff]  ;;  %v11082_v28 = vld [vmem:[#allocation148_spill] sm:$0xff] }
 0x333   : > { %11062 = vst [vmem:[#allocation87_spill] sm:$0xff] %v6498_v2  ;;  %v1112_v39 = vadd.f32 %v1016_v27, %v926_v13  ;;  %v1106_v3 = vadd.f32 %v1010_v38, %v924_v57  ;;  %v11074_v27 = vld [vmem:[#allocation221_spill] sm:$0xff]  ;;  %v1022_v38 = vadd.f32 %v575_v37, %v11079_v56  ;;  %v11090_v56 = vld [vmem:[#allocation35_spill] sm:$0xff] }
 0x334   : > { %v929_v36 = vsel %vm833_vm1, %v5539_v55, %v11074_v27  ;;  %v11080_v55 = vld [vmem:[#allocation213_spill] sm:$0xff]  ;;  %v1019_v27 = vadd.f32 %v574_v60, %v11082_v28  ;;  %v11096_v28 = vld [vmem:[#allocation43_spill] sm:$0xff] }
 0x335   : > { %v6531_v13 = vsel %vm6054_vm10, %v1112_v39, 0.0  ;;  %v6549_v44 = vsel %vm6054_vm10, %v1106_v3, 0.0  ;;  %v11078_v39 = vld [vmem:[#allocation147_spill] sm:$0xff]  ;;  %v927_v48 = vsel %vm833_vm1, %v11081_v12, %v11080_v55 }
 0x336   : > { %1422 = vrot.lane.b32.xlu2 %v6480_v63, %s3836_s16  ;;  %1420 = vrot.lane.b32.xlu1 %v6484_v46, %s3836_s16  ;;  %v1109_v46 = vadd.f32 %v1013_v7, %v925_v20  ;;  %11072 = vst [vmem:[#allocation196_spill] sm:$0xff] %v6531_v13  ;;  %v11075_v7 = vld [vmem:[#allocation222_spill] sm:$0xff] }
 0x337   : > { %1418 = vrot.lane.b32.xlu0 %v6498_v2, %s3836_s16  ;;  %v928_v57 = vsel %vm833_vm1, %v11076_v5, %v11075_v7  ;;  %11077 = vst [vmem:[#allocation86_spill] sm:$0xff] %v6549_v44 }
 0x338   : > { %v6511_v18 = vpop.permute.xlu2 %1356  ;;  %v6513_v10 = vpop.permute.xlu1 %1336  ;;  %v6535_v20 = vsel %vm6054_vm10, %v1109_v46, 0.0  ;;  %v1025_v46 = vadd.f32 %v576_v22, %v11078_v39  ;;  %v1115_v22 = vadd.f32 %v1019_v27, %v927_v48  ;;  %v11095_v48 = vld [vmem:[#allocation60_spill] sm:$0xff]  ;;  %v11097_v27 = vld [vmem:[#allocation61_spill] sm:$0xff] }
 0x339   : > { %11068 = vst [vmem:[#allocation194_spill] sm:$0xff] %v6511_v18  ;;  %v6515_v63 = vpop.permute.xlu0 %1334 }
 0x33a   : > { %11073 = vst [vmem:[#allocation12_spill] sm:$0xff] %v6535_v20  ;;  %v1121_v5 = vadd.f32 %v1025_v46, %v929_v36  ;;  %v6580_v60 = vsel %vm6054_vm10, %v1115_v22, 0.0 }
 0x33b   : > { %11086 = vst [vmem:[#allocation164_spill] sm:$0xff] %v6580_v60 }
 0x33c   : > { %v6570_v37 = vsel %vm6054_vm10, %v1121_v5, 0.0 }
 0x33d   : > { %11084 = vst [vmem:[#allocation88_spill] sm:$0xff] %v6570_v37 }
 0x33e   : > { %1428 = vrot.lane.b32.xlu2 %v6531_v13, %s3836_s16  ;;  %1426 = vrot.lane.b32.xlu1 %v6535_v20, %s3836_s16  ;;  %v1118_v20 = vadd.f32 %v1022_v38, %v928_v57 }
 0x33f   : > { %1424 = vrot.lane.b32.xlu0 %v6549_v44, %s3836_s16  ;;  %v11102_v44 = vld [vmem:[#allocation47_spill] sm:$0xff] }
 0x340   : > { %v6562_v7 = vpop.permute.xlu2 %1362  ;;  %v6564_v3 = vpop.permute.xlu1 %1342  ;;  %v6574_v39 = vsel %vm6054_vm10, %v1118_v20, 0.0  ;;  %v11089_v20 = vld [vmem:[#allocation49_spill] sm:$0xff] }
 0x341   : > { %11083 = vst [vmem:[#allocation11_spill] sm:$0xff] %v6562_v7  ;;  %v6566_v2 = vpop.permute.xlu0 %1340 }
 0x342   : > { %11085 = vst [vmem:[#allocation156_spill] sm:$0xff] %v6574_v39 }
 0x346   : > { %1434 = vrot.lane.b32.xlu2 %v6570_v37, %s3836_s16  ;;  %1432 = vrot.lane.b32.xlu1 %v6574_v39, %s3836_s16  ;;  %v11101_v39 = vld [vmem:[#allocation66_spill] sm:$0xff]  ;;  %v11103_v37 = vld [vmem:[#allocation67_spill] sm:$0xff] }
 0x347   : > { %1430 = vrot.lane.b32.xlu0 %v6580_v60, %s3836_s16 }
 0x348   : > { %v6586_v36 = vpop.permute.xlu2 %1368  ;;  %v6588_v57 = vpop.permute.xlu1 %1348 }
 0x349   : > { %11087 = vst [vmem:[#allocation166_spill] sm:$0xff] %v6586_v36  ;;  %v6590_v46 = vpop.permute.xlu0 %1346 }
 0x34a   : > { %11088 = vst [vmem:[#allocation197_spill] sm:$0xff] %v6590_v46 }
 0x34e   : > { %1632 = vrot.lane.b32.xlu2 %v11089_v20, %s3837_s26  ;;  %1630 = vrot.lane.b32.xlu1 %v11090_v56, %s3837_s26 }
 0x34f   : > { %1628 = vrot.lane.b32.xlu0 %v11091_v23, %s3837_s26 }
 0x350   : > { %v6598_v38 = vpop.permute.xlu2 %1374  ;;  %v6600_v55 = vpop.permute.xlu1 %1354 }
 0x351   : > { %11092 = vst [vmem:[#allocation199_spill] sm:$0xff] %v6598_v38  ;;  %v6602_v12 = vpop.permute.xlu0 %1352 }
 0x352   : > { %11093 = vst [vmem:[#allocation93_spill] sm:$0xff] %v6600_v55 }
 0x353   : > { %11094 = vst [vmem:[#allocation92_spill] sm:$0xff] %v6602_v12 }
 0x356   : > { %1638 = vrot.lane.b32.xlu2 %v11095_v48, %s3837_s26  ;;  %1636 = vrot.lane.b32.xlu1 %v11096_v28, %s3837_s26 }
 0x357   : > { %1634 = vrot.lane.b32.xlu0 %v11097_v27, %s3837_s26  ;;  %v11107_v27 = vld [vmem:[#allocation73_spill] sm:$0xff] }
 0x358   : > { %v6610_v5 = vpop.permute.xlu2 %1380  ;;  %v6612_v22 = vpop.permute.xlu1 %1360 }
 0x359   : > { %11098 = vst [vmem:[#allocation186_spill] sm:$0xff] %v6610_v5  ;;  %v6614_v60 = vpop.permute.xlu0 %1358 }
 0x35a   : > { %11099 = vst [vmem:[#allocation94_spill] sm:$0xff] %v6612_v22 }
 0x35b   : > { %11100 = vst [vmem:[#allocation159_spill] sm:$0xff] %v6614_v60 }
 0x35e   : > { %1644 = vrot.lane.b32.xlu2 %v11101_v39, %s3837_s26  ;;  %1642 = vrot.lane.b32.xlu1 %v11102_v44, %s3837_s26  ;;  %v11109_v39 = vld [vmem:[#allocation237_spill] sm:$0xff] }
 0x35f   : > { %1640 = vrot.lane.b32.xlu0 %v11103_v37, %s3837_s26 }
 0x360   : > { %v6622_v13 = vpop.permute.xlu2 %1386  ;;  %v6624_v48 = vpop.permute.xlu1 %1366 }
 0x361   : > { %11104 = vst [vmem:[#allocation167_spill] sm:$0xff] %v6622_v13  ;;  %v6626_v20 = vpop.permute.xlu0 %1364 }
 0x362   : > { %11105 = vst [vmem:[#allocation169_spill] sm:$0xff] %v6624_v48  ;;  %v11114_v48 = vld [vmem:[#allocation13_spill] sm:$0xff] }
 0x363   : > { %11106 = vst [vmem:[#allocation200_spill] sm:$0xff] %v6626_v20 }
 0x366   : > { %1650 = vrot.lane.b32.xlu2 %v11107_v27, %s3837_s26  ;;  %1648 = vrot.lane.b32.xlu1 %v11108_v11, %s3837_s26  ;;  %v11115_v27 = vld [vmem:[#allocation238_spill] sm:$0xff] }
 0x367   : > { %1646 = vrot.lane.b32.xlu0 %v11109_v39, %s3837_s26 }
 0x368   : > { %v6634_v59 = vpop.permute.xlu2 %1392  ;;  %v6636_v44 = vpop.permute.xlu1 %1372 }
 0x369   : > { %11110 = vst [vmem:[#allocation202_spill] sm:$0xff] %v6634_v59  ;;  %v6638_v37 = vpop.permute.xlu0 %1370 }
 0x36a   : > { %11111 = vst [vmem:[#allocation99_spill] sm:$0xff] %v6636_v44 }
 0x36b   : > { %11112 = vst [vmem:[#allocation98_spill] sm:$0xff] %v6638_v37 }
 0x36e   : > { %1656 = vrot.lane.b32.xlu2 %v11113_v8, %s3837_s26  ;;  %1654 = vrot.lane.b32.xlu1 %v11114_v48, %s3837_s26  ;;  %v11120_v8 = vld [vmem:[#allocation14_spill] sm:$0xff]  ;;  %v11121_v48 = vld [vmem:[#allocation16_spill] sm:$0xff] }
 0x36f   : > { %1652 = vrot.lane.b32.xlu0 %v11115_v27, %s3837_s26  ;;  %v11122_v27 = vld [vmem:[#allocation239_spill] sm:$0xff] }
 0x370   : > { %v6646_v1 = vpop.permute.xlu2 %1398  ;;  %v6648_v11 = vpop.permute.xlu1 %1378 }
 0x371   : > { %11116 = vst [vmem:[#allocation189_spill] sm:$0xff] %v6646_v1  ;;  %v6654_v39 = vsel %vm544_vm0, %v6515_v63, %v6646_v1  ;;  %v6656_v59 = vpop.permute.xlu0 %1376 }
 0x372   : > { %11117 = vst [vmem:[#allocation100_spill] sm:$0xff] %v6648_v11 }
 0x373   : > { %11118 = vst [vmem:[#allocation162_spill] sm:$0xff] %v6654_v39 }
 0x374   : > { %11119 = vst [vmem:[#allocation170_spill] sm:$0xff] %v6656_v59 }
 0x376   : > { %1662 = vrot.lane.b32.xlu2 %v11120_v8, %s3837_s26  ;;  %1660 = vrot.lane.b32.xlu1 %v11121_v48, %s3837_s26  ;;  %v11127_v8 = vld [vmem:[#allocation17_spill] sm:$0xff]  ;;  %v11128_v48 = vld [vmem:[#allocation19_spill] sm:$0xff] }
 0x377   : > { %1658 = vrot.lane.b32.xlu0 %v11122_v27, %s3837_s26  ;;  %v11129_v27 = vld [vmem:[#allocation240_spill] sm:$0xff] }
 0x378   : > { %v6664_v28 = vpop.permute.xlu2 %1404  ;;  %v6666_v11 = vpop.permute.xlu1 %1384 }
 0x379   : > { %11123 = vst [vmem:[#allocation172_spill] sm:$0xff] %v6664_v28  ;;  %v6672_v39 = vsel %vm544_vm0, %v6566_v2, %v6664_v28  ;;  %v6674_v59 = vpop.permute.xlu0 %1382 }
 0x37a   : > { %11124 = vst [vmem:[#allocation203_spill] sm:$0xff] %v6666_v11 }
 0x37b   : > { %11125 = vst [vmem:[#allocation205_spill] sm:$0xff] %v6672_v39 }
 0x37c   : > { %11126 = vst [vmem:[#allocation105_spill] sm:$0xff] %v6674_v59 }
 0x37e   : > { %1668 = vrot.lane.b32.xlu2 %v11127_v8, %s3837_s26  ;;  %1666 = vrot.lane.b32.xlu1 %v11128_v48, %s3837_s26  ;;  %v11134_v8 = vld [vmem:[#allocation20_spill] sm:$0xff]  ;;  %v11135_v48 = vld [vmem:[#allocation22_spill] sm:$0xff] }
 0x37f   : > { %1664 = vrot.lane.b32.xlu0 %v11129_v27, %s3837_s26  ;;  %v11136_v27 = vld [vmem:[#allocation241_spill] sm:$0xff] }
 0x380   : > { %v6682_v1 = vpop.permute.xlu2 %1410  ;;  %v6684_v11 = vpop.permute.xlu1 %1390 }
 0x381   : > { %11130 = vst [vmem:[#allocation104_spill] sm:$0xff] %v6682_v1  ;;  %v6690_v39 = vsel %vm544_vm0, %v6590_v46, %v6682_v1  ;;  %v6692_v59 = vpop.permute.xlu0 %1388 }
 0x382   : > { %11131 = vst [vmem:[#allocation192_spill] sm:$0xff] %v6684_v11 }
 0x383   : > { %11132 = vst [vmem:[#allocation106_spill] sm:$0xff] %v6690_v39 }
 0x384   : > { %11133 = vst [vmem:[#allocation165_spill] sm:$0xff] %v6692_v59 }
 0x386   : > { %1674 = vrot.lane.b32.xlu2 %v11134_v8, %s3837_s26  ;;  %1672 = vrot.lane.b32.xlu1 %v11135_v48, %s3837_s26  ;;  %v11141_v8 = vld [vmem:[#allocation25_spill] sm:$0xff]  ;;  %v11142_v48 = vld [vmem:[#allocation242_spill] sm:$0xff] }
 0x387   : > { %1670 = vrot.lane.b32.xlu0 %v11136_v27, %s3837_s26  ;;  %v11143_v27 = vld [vmem:[#allocation243_spill] sm:$0xff] }
 0x388   : > { %v6700_v28 = vpop.permute.xlu2 %1416  ;;  %v6702_v11 = vpop.permute.xlu1 %1396 }
 0x389   : > { %11137 = vst [vmem:[#allocation173_spill] sm:$0xff] %v6700_v28  ;;  %v6708_v39 = vsel %vm544_vm0, %v6602_v12, %v6700_v28  ;;  %v6710_v59 = vpop.permute.xlu0 %1394 }
 0x38a   : > { %11138 = vst [vmem:[#allocation175_spill] sm:$0xff] %v6702_v11 }
 0x38b   : > { %11139 = vst [vmem:[#allocation206_spill] sm:$0xff] %v6708_v39 }
 0x38c   : > { %11140 = vst [vmem:[#allocation208_spill] sm:$0xff] %v6710_v59 }
 0x38e   : > { %1680 = vrot.lane.b32.xlu2 %v11141_v8, %s3837_s26  ;;  %1678 = vrot.lane.b32.xlu1 %v11142_v48, %s3837_s26  ;;  %v11148_v8 = vld [vmem:[#allocation28_spill] sm:$0xff]  ;;  %v11149_v48 = vld [vmem:[#allocation90_spill] sm:$0xff] }
 0x38f   : > { %1676 = vrot.lane.b32.xlu0 %v11143_v27, %s3837_s26  ;;  %v11150_v27 = vld [vmem:[#allocation107_spill] sm:$0xff] }
 0x390   : > { %v6718_v1 = vpop.permute.xlu2 %1422  ;;  %v6720_v11 = vpop.permute.xlu1 %1402 }
 0x391   : > { %11144 = vst [vmem:[#allocation111_spill] sm:$0xff] %v6718_v1  ;;  %v6726_v39 = vsel %vm544_vm0, %v6614_v60, %v6718_v1  ;;  %v6728_v59 = vpop.permute.xlu0 %1400 }
 0x392   : > { %11145 = vst [vmem:[#allocation110_spill] sm:$0xff] %v6720_v11 }
 0x393   : > { %11146 = vst [vmem:[#allocation195_spill] sm:$0xff] %v6726_v39 }
 0x394   : > { %11147 = vst [vmem:[#allocation23_spill] sm:$0xff] %v6728_v59 }
 0x396   : > { %1686 = vrot.lane.b32.xlu2 %v11148_v8, %s3837_s26  ;;  %1684 = vrot.lane.b32.xlu1 %v11149_v48, %s3837_s26  ;;  %v11155_v8 = vld [vmem:[#allocation29_spill] sm:$0xff]  ;;  %v11156_v48 = vld [vmem:[#allocation31_spill] sm:$0xff] }
 0x397   : > { %1682 = vrot.lane.b32.xlu0 %v11150_v27, %s3837_s26  ;;  %v11157_v27 = vld [vmem:[#allocation96_spill] sm:$0xff] }
 0x398   : > { %v6736_v28 = vpop.permute.xlu2 %1428  ;;  %v6738_v11 = vpop.permute.xlu1 %1408 }
 0x399   : > { %11151 = vst [vmem:[#allocation112_spill] sm:$0xff] %v6736_v28  ;;  %v6744_v39 = vsel %vm544_vm0, %v6626_v20, %v6736_v28  ;;  %v6746_v59 = vpop.permute.xlu0 %1406  ;;  %v11162_v28 = vld [vmem:[#allocation33_spill] sm:$0xff] }
 0x39a   : > { %11152 = vst [vmem:[#allocation168_spill] sm:$0xff] %v6738_v11 }
 0x39b   : > { %11153 = vst [vmem:[#allocation176_spill] sm:$0xff] %v6744_v39 }
 0x39c   : > { %11154 = vst [vmem:[#allocation120_spill] sm:$0xff] %v6746_v59 }
 0x39e   : > { %1692 = vrot.lane.b32.xlu2 %v11155_v8, %s3837_s26  ;;  %1690 = vrot.lane.b32.xlu1 %v11156_v48, %s3837_s26  ;;  %v11163_v48 = vld [vmem:[#allocation32_spill] sm:$0xff] }
 0x39f   : > { %1688 = vrot.lane.b32.xlu0 %v11157_v27, %s3837_s26  ;;  %v11164_v27 = vld [vmem:[#allocation34_spill] sm:$0xff] }
 0x3a0   : > { %v6754_v1 = vpop.permute.xlu2 %1434  ;;  %v6756_v11 = vpop.permute.xlu1 %1414 }
 0x3a1   : > { %11158 = vst [vmem:[#allocation178_spill] sm:$0xff] %v6754_v1  ;;  %v6762_v39 = vsel %vm544_vm0, %v6638_v37, %v6754_v1  ;;  %v6764_v59 = vpop.permute.xlu0 %1412  ;;  %v11168_v1 = vld [vmem:[#allocation37_spill] sm:$0xff] }
 0x3a2   : > { %11159 = vst [vmem:[#allocation137_spill] sm:$0xff] %v6756_v11 }
 0x3a3   : > { %11160 = vst [vmem:[#allocation209_spill] sm:$0xff] %v6762_v39  ;;  %v11170_v39 = vld [vmem:[#allocation38_spill] sm:$0xff] }
 0x3a4   : > { %11161 = vst [vmem:[#allocation211_spill] sm:$0xff] %v6764_v59  ;;  %v11169_v59 = vld [vmem:[#allocation36_spill] sm:$0xff] }
 0x3a6   : > { %1698 = vrot.lane.b32.xlu2 %v11162_v28, %s3837_s26  ;;  %1696 = vrot.lane.b32.xlu1 %v11163_v48, %s3837_s26 }
 0x3a7   : > { %1694 = vrot.lane.b32.xlu0 %v11164_v27, %s3837_s26 }
 0x3a8   : > { %v6772_v20 = vpop.permute.xlu2 %1632  ;;  %v6774_v11 = vpop.permute.xlu1 %1420 }
 0x3a9   : > { %11165 = vst [vmem:[#allocation27_spill] sm:$0xff] %v6772_v20  ;;  %v6776_v13 = vpop.permute.xlu0 %1418  ;;  %v11174_v20 = vld [vmem:[#allocation41_spill] sm:$0xff] }
 0x3aa   : > { %11166 = vst [vmem:[#allocation117_spill] sm:$0xff] %v6774_v11  ;;  %v11176_v11 = vld [vmem:[#allocation42_spill] sm:$0xff] }
 0x3ab   : > { %11167 = vst [vmem:[#allocation116_spill] sm:$0xff] %v6776_v13  ;;  %v11175_v13 = vld [vmem:[#allocation40_spill] sm:$0xff] }
 0x3ae   : > { %1704 = vrot.lane.b32.xlu2 %v11168_v1, %s3837_s26  ;;  %1702 = vrot.lane.b32.xlu1 %v11169_v59, %s3837_s26 }
 0x3af   : > { %1700 = vrot.lane.b32.xlu0 %v11170_v39, %s3837_s26 }
 0x3b0   : > { %v6784_v37 = vpop.permute.xlu2 %1638  ;;  %v6786_v43 = vpop.permute.xlu1 %1426 }
 0x3b1   : > { %11171 = vst [vmem:[#allocation198_spill] sm:$0xff] %v6784_v37  ;;  %v6788_v60 = vpop.permute.xlu0 %1424  ;;  %v11180_v37 = vld [vmem:[#allocation45_spill] sm:$0xff] }
 0x3b2   : > { %11172 = vst [vmem:[#allocation26_spill] sm:$0xff] %v6786_v43  ;;  %v11182_v43 = vld [vmem:[#allocation227_spill] sm:$0xff] }
 0x3b3   : > { %11173 = vst [vmem:[#allocation118_spill] sm:$0xff] %v6788_v60  ;;  %v11181_v60 = vld [vmem:[#allocation44_spill] sm:$0xff] }
 0x3b6   : > { %1710 = vrot.lane.b32.xlu2 %v11174_v20, %s3837_s26  ;;  %1708 = vrot.lane.b32.xlu1 %v11175_v13, %s3837_s26 }
 0x3b7   : > { %1706 = vrot.lane.b32.xlu0 %v11176_v11, %s3837_s26 }
 0x3b8   : > { %v6796_v23 = vpop.permute.xlu2 %1644  ;;  %v6798_v40 = vpop.permute.xlu1 %1432 }
 0x3b9   : > { %11177 = vst [vmem:[#allocation171_spill] sm:$0xff] %v6796_v23  ;;  %v6800_v22 = vpop.permute.xlu0 %1430  ;;  %v11186_v23 = vld [vmem:[#allocation139_spill] sm:$0xff] }
 0x3ba   : > { %11178 = vst [vmem:[#allocation179_spill] sm:$0xff] %v6798_v40  ;;  %v11188_v40 = vld [vmem:[#allocation224_spill] sm:$0xff] }
 0x3bb   : > { %11179 = vst [vmem:[#allocation126_spill] sm:$0xff] %v6800_v22  ;;  %v11187_v22 = vld [vmem:[#allocation72_spill] sm:$0xff] }
 0x3be   : > { %1716 = vrot.lane.b32.xlu2 %v11180_v37, %s3837_s26  ;;  %1714 = vrot.lane.b32.xlu1 %v11181_v60, %s3837_s26 }
 0x3bf   : > { %1712 = vrot.lane.b32.xlu0 %v11182_v43, %s3837_s26 }
 0x3c0   : > { %v6808_v5 = vpop.permute.xlu2 %1650  ;;  %v6810_v50 = vpop.permute.xlu1 %1630 }
 0x3c1   : > { %11183 = vst [vmem:[#allocation181_spill] sm:$0xff] %v6808_v5  ;;  %v6812_v56 = vpop.permute.xlu0 %1628  ;;  %v11192_v5 = vld [vmem:[#allocation15_spill] sm:$0xff] }
 0x3c2   : > { %11184 = vst [vmem:[#allocation143_spill] sm:$0xff] %v6810_v50  ;;  %v11193_v50 = vld [vmem:[#allocation230_spill] sm:$0xff] }
 0x3c3   : > { %11185 = vst [vmem:[#allocation212_spill] sm:$0xff] %v6812_v56  ;;  %v11194_v56 = vld [vmem:[#allocation52_spill] sm:$0xff] }
 0x3c6   : > { %1722 = vrot.lane.b32.xlu2 %v11186_v23, %s3837_s26  ;;  %1720 = vrot.lane.b32.xlu1 %v11187_v22, %s3837_s26 }
 0x3c7   : > { %1718 = vrot.lane.b32.xlu0 %v11188_v40, %s3837_s26 }
 0x3c8   : > { %v6820_v41 = vpop.permute.xlu2 %1656  ;;  %v6822_v31 = vpop.permute.xlu1 %1636 }
 0x3c9   : > { %11189 = vst [vmem:[#allocation214_spill] sm:$0xff] %v6820_v41  ;;  %v6824_v53 = vpop.permute.xlu0 %1634  ;;  %v11198_v41 = vld [vmem:[#allocation78_spill] sm:$0xff] }
 0x3ca   : > { %11190 = vst [vmem:[#allocation109_spill] sm:$0xff] %v6822_v31  ;;  %v11199_v31 = vld [vmem:[#allocation225_spill] sm:$0xff] }
 0x3cb   : > { %11191 = vst [vmem:[#allocation123_spill] sm:$0xff] %v6824_v53  ;;  %v11200_v53 = vld [vmem:[#allocation231_spill] sm:$0xff] }
 0x3ce   : > { %1728 = vrot.lane.b32.xlu2 %v11192_v5, %s3837_s26  ;;  %1726 = vrot.lane.b32.xlu1 %v11193_v50, %s3837_s26 }
 0x3cf   : > { %1724 = vrot.lane.b32.xlu0 %v11194_v56, %s3837_s26 }
 0x3d0   : > { %v6832_v12 = vpop.permute.xlu2 %1662  ;;  %v6834_v55 = vpop.permute.xlu1 %1642 }
 0x3d1   : > { %11195 = vst [vmem:[#allocation122_spill] sm:$0xff] %v6832_v12  ;;  %v6836_v44 = vpop.permute.xlu0 %1640  ;;  %v11204_v12 = vld [vmem:[#allocation233_spill] sm:$0xff] }
 0x3d2   : > { %11196 = vst [vmem:[#allocation201_spill] sm:$0xff] %v6834_v55  ;;  %v11205_v55 = vld [vmem:[#allocation58_spill] sm:$0xff] }
 0x3d3   : > { %11197 = vst [vmem:[#allocation30_spill] sm:$0xff] %v6836_v44  ;;  %v11206_v44 = vld [vmem:[#allocation91_spill] sm:$0xff] }
 0x3d6   : > { %1734 = vrot.lane.b32.xlu2 %v11198_v41, %s3837_s26  ;;  %1732 = vrot.lane.b32.xlu1 %v11199_v31, %s3837_s26 }
 0x3d7   : > { %1730 = vrot.lane.b32.xlu0 %v11200_v53, %s3837_s26 }
 0x3d8   : > { %v6844_v38 = vpop.permute.xlu2 %1668  ;;  %v6846_v50 = vpop.permute.xlu1 %1648 }
 0x3d9   : > { %11201 = vst [vmem:[#allocation124_spill] sm:$0xff] %v6844_v38  ;;  %v6848_v56 = vpop.permute.xlu0 %1646  ;;  %v11210_v38 = vld [vmem:[#allocation226_spill] sm:$0xff] }
 0x3da   : > { %11202 = vst [vmem:[#allocation174_spill] sm:$0xff] %v6846_v50  ;;  %v11211_v50 = vld [vmem:[#allocation55_spill] sm:$0xff] }
 0x3db   : > { %11203 = vst [vmem:[#allocation182_spill] sm:$0xff] %v6848_v56  ;;  %v11212_v56 = vld [vmem:[#allocation53_spill] sm:$0xff] }
 0x3de   : > { %1740 = vrot.lane.b32.xlu2 %v11204_v12, %s3837_s26  ;;  %1738 = vrot.lane.b32.xlu1 %v11205_v55, %s3837_s26 }
 0x3df   : > { %1736 = vrot.lane.b32.xlu0 %v11206_v44, %s3837_s26  ;;  %v1468_v44 = vsel %vm544_vm0, %v11212_v56, %v6103_v24  ;;  %v11219_v56 = vld [vmem:[#allocation84_spill] sm:$0xff] }
 0x3e0   : > { %v6856_v6 = vpop.permute.xlu2 %1674  ;;  %v6858_v31 = vpop.permute.xlu1 %1654 }
 0x3e1   : > { %11207 = vst [vmem:[#allocation132_spill] sm:$0xff] %v6856_v6  ;;  %v6860_v53 = vpop.permute.xlu0 %1652  ;;  %v11213_v6 = vld [vmem:[#allocation50_spill] sm:$0xff] }
 0x3e2   : > { %11208 = vst [vmem:[#allocation184_spill] sm:$0xff] %v6858_v31  ;;  %v1471_v31 = vsel %vm544_vm0, %v11213_v6, %v6154_v19  ;;  %v1480_v19 = vsel %vm544_vm0, %v11219_v56, %v6307_v42  ;;  %v11220_v6 = vld [vmem:[#allocation119_spill] sm:$0xff]  ;;  %v1483_v42 = vsel %vm544_vm0, %v6001_v29, %v6358_v17 }
 0x3e3   : > { %11209 = vst [vmem:[#allocation149_spill] sm:$0xff] %v6860_v53  ;;  %v11214_v53 = vld [vmem:[#allocation145_spill] sm:$0xff] }
 0x3e4   : > { %v1474_v55 = vsel %vm544_vm0, %v11214_v53, %v6205_v0  ;;  %v1470_v0 = vsel %vm544_vm0, %v11220_v6, %v6309_v4  ;;  %v6903_v53 = vadd.f32 %v1468_v44, %v11155_v8  ;;  %v11227_v44 = vld [vmem:[#allocation51_spill] sm:$0xff] }
 0x3e6   : > { %1746 = vrot.lane.b32.xlu2 %v11210_v38, %s3837_s26  ;;  %1744 = vrot.lane.b32.xlu1 %v11211_v50, %s3837_s26  ;;  %11222 = vst [vmem:[#allocation113_spill] sm:$0xff] %v6903_v53 }
 0x3e7   : > { %1742 = vrot.lane.b32.xlu0 %v5984_v54, %s3837_s26  ;;  %v11217_v54 = vld [vmem:[#allocation18_spill] sm:$0xff] }
 0x3e8   : > { %v6880_v38 = vpop.permute.xlu2 %1680  ;;  %v6882_v50 = vpop.permute.xlu1 %1660  ;;  %v1477_v46 = vsel %vm544_vm0, %v11217_v54, %v6256_v16  ;;  %v6909_v54 = vadd.f32 %v1474_v55, %v11168_v1  ;;  %v11226_v16 = vld [vmem:[#allocation125_spill] sm:$0xff]  ;;  %v6927_v1 = vadd.f32 %v1480_v19, %v11180_v37  ;;  %v1486_v55 = vsel %vm544_vm0, %v6052_v32, %v6409_v47 }
 0x3e9   : > { %11215 = vst [vmem:[#allocation215_spill] sm:$0xff] %v6880_v38  ;;  %v6888_v24 = vpop.permute.xlu0 %1658  ;;  %v11221_v38 = vld [vmem:[#allocation79_spill] sm:$0xff]  ;;  %v6912_v56 = vadd.f32 %v1477_v46, %v11174_v20  ;;  %v1473_v8 = vsel %vm544_vm0, %v11226_v16, %v6360_v45  ;;  %v6930_v46 = vadd.f32 %v1470_v0, %v11163_v48  ;;  %v6956_v0 = vadd.f32 %v1483_v42, %v11186_v23 }
 0x3ea   : > { %11216 = vst [vmem:[#allocation24_spill] sm:$0xff] %v6882_v50  ;;  %v1469_v50 = vsel %vm544_vm0, %v11221_v38, %v6311_v25  ;;  %v6959_v37 = vadd.f32 %v1473_v8, %v11169_v59  ;;  %v1492_v59 = vsel %vm544_vm0, %v6158_v9, %v6511_v18  ;;  %v11239_v8 = vld [vmem:[#allocation151_spill] sm:$0xff] }
 0x3eb   : > { %11218 = vst [vmem:[#allocation216_spill] sm:$0xff] %v6888_v24  ;;  %v6906_v24 = vadd.f32 %v1471_v31, %v11162_v28  ;;  %v1472_v31 = vsel %vm544_vm0, %v11227_v44, %v6362_v14  ;;  %v6933_v20 = vadd.f32 %v1469_v50, %v11164_v27  ;;  %v11231_v28 = vld [vmem:[#allocation131_spill] sm:$0xff]  ;;  %v1489_v50 = vsel %vm544_vm0, %v6107_v62, %v6460_v30  ;;  %v11236_v27 = vld [vmem:[#allocation46_spill] sm:$0xff] }
 0x3ec   : > { %11224 = vst [vmem:[#allocation128_spill] sm:$0xff] %v6909_v54  ;;  %v11232_v54 = vld [vmem:[#allocation59_spill] sm:$0xff]  ;;  %v6962_v48 = vadd.f32 %v1472_v31, %v11170_v39  ;;  %v11238_v39 = vld [vmem:[#allocation228_spill] sm:$0xff]  ;;  %v1481_v31 = vsel %vm544_vm0, %v11239_v8, %v6515_v63 }
 0x3ed   : > { %11223 = vst [vmem:[#allocation129_spill] sm:$0xff] %v6906_v24  ;;  %v1475_v19 = vsel %vm544_vm0, %v11232_v54, %v6413_v33  ;;  %v1482_v23 = vsel %vm544_vm0, %v11238_v39, %v6513_v10  ;;  %v6991_v24 = vadd.f32 %v1486_v55, %v11192_v5  ;;  %v1495_v5 = vsel %vm544_vm0, %v6209_v15, %v6562_v7  ;;  %v11248_v55 = vld [vmem:[#allocation85_spill] sm:$0xff] }
 0x3ee   : > { %11225 = vst [vmem:[#allocation204_spill] sm:$0xff] %v6912_v56  ;;  %v1476_v56 = vsel %vm544_vm0, %v11231_v28, %v6411_v34  ;;  %1752 = vrot.lane.b32.xlu2 %v6017_v61, %s3837_s26  ;;  %1750 = vrot.lane.b32.xlu1 %v6021_v58, %s3837_s26 }
 0x3ef   : > { %11228 = vst [vmem:[#allocation115_spill] sm:$0xff] %v6927_v1  ;;  %v1479_v1 = vsel %vm544_vm0, %v11236_v27, %v6462_v52  ;;  %1748 = vrot.lane.b32.xlu0 %v6036_v35, %s3837_s26  ;;  %v6994_v53 = vadd.f32 %v1476_v56, %v11175_v13  ;;  %v1485_v13 = vsel %vm544_vm0, %v11248_v55, %v6564_v3 }
 0x3f0   : > { %11229 = vst [vmem:[#allocation130_spill] sm:$0xff] %v6930_v46  ;;  %v11237_v46 = vld [vmem:[#allocation56_spill] sm:$0xff]  ;;  %v7005_v63 = vadd.f32 %v1479_v1, %v11181_v60  ;;  %v7023_v60 = vadd.f32 %v1492_v59, %v11204_v12  ;;  %v7026_v56 = vadd.f32 %v1482_v23, %v11187_v22  ;;  %v7029_v1 = vadd.f32 %v1481_v31, %v11188_v40  ;;  %v11256_v22 = vld [vmem:[#allocation199_spill] sm:$0xff]  ;;  %v11257_v59 = vld [vmem:[#allocation226_spill] sm:$0xff] }
 0x3f1   : > { %11230 = vst [vmem:[#allocation177_spill] sm:$0xff] %v6933_v20  ;;  %v1478_v42 = vsel %vm544_vm0, %v11237_v46, %v6464_v26  ;;  %v7000_v20 = vadd.f32 %v1489_v50, %v11198_v41  ;;  %v7002_v18 = vpop.permute.xlu0 %1664  ;;  %v1484_v41 = vsel %vm544_vm0, %v5999_v51, %v6566_v2  ;;  %v11253_v50 = vld [vmem:[#allocation57_spill] sm:$0xff]  ;;  %v1501_v40 = vsel %vm544_vm0, %v11256_v22, %v11221_v38  ;;  %v11259_v31 = vld [vmem:[#allocation230_spill] sm:$0xff] }
 0x3f2   : > { %11233 = vst [vmem:[#allocation185_spill] sm:$0xff] %v6956_v0  ;;  %v6986_v0 = vpop.permute.xlu2 %1686  ;;  %v11254_v2 = vld [vmem:[#allocation197_spill] sm:$0xff]  ;;  %v7048_v23 = vadd.f32 %v1495_v5, %v11257_v59 }
 0x3f3   : > { %11234 = vst [vmem:[#allocation138_spill] sm:$0xff] %v6959_v37  ;;  %v6988_v37 = vpop.permute.xlu1 %1666  ;;  %v11265_v38 = vld [vmem:[#allocation93_spill] sm:$0xff] }
 0x3f4   : > { %11235 = vst [vmem:[#allocation187_spill] sm:$0xff] %v6962_v48  ;;  %v6997_v48 = vadd.f32 %v1475_v19, %v11176_v11  ;;  %v7020_v11 = vadd.f32 %v1478_v42, %v11182_v43  ;;  %v1498_v19 = vsel %vm544_vm0, %v6260_v21, %v6586_v36  ;;  %v1488_v43 = vsel %vm544_vm0, %v11253_v50, %v6588_v57  ;;  %v11255_v42 = vld [vmem:[#allocation48_spill] sm:$0xff]  ;;  %v11268_v59 = vld [vmem:[#allocation89_spill] sm:$0xff] }
 0x3f5   : > { %11240 = vst [vmem:[#allocation152_spill] sm:$0xff] %v6986_v0  ;;  %v1487_v12 = vsel %vm544_vm0, %v11255_v42, %v11254_v2  ;;  %v1437_v2 = vsel %vm544_vm0, %v6311_v25, %v11256_v22  ;;  %v11272_v25 = vld [vmem:[#allocation225_spill] sm:$0xff] }
 0x3f6   : > { %11241 = vst [vmem:[#allocation217_spill] sm:$0xff] %v6988_v37  ;;  %v7080_v22 = vadd.f32 %v1488_v43, %v11272_v25  ;;  %v11280_v43 = vld [vmem:[#allocation62_spill] sm:$0xff]  ;;  %v11302_v37 = vld [vmem:[#allocation157_spill] sm:$0xff] }
 0x3f7   : > { %11242 = vst [vmem:[#allocation218_spill] sm:$0xff] %v6991_v24  ;;  %v11263_v24 = vld [vmem:[#allocation53_spill] sm:$0xff] }
 0x3f8   : > { %11243 = vst [vmem:[#allocation102_spill] sm:$0xff] %v6994_v53  ;;  %v11266_v53 = vld [vmem:[#allocation65_spill] sm:$0xff] }
 0x3f9   : > { %11244 = vst [vmem:[#allocation135_spill] sm:$0xff] %v6997_v48  ;;  %v1491_v5 = vsel %vm544_vm0, %v11266_v53, %v11265_v38 }
 0x3fa   : > { %11245 = vst [vmem:[#allocation134_spill] sm:$0xff] %v7000_v20  ;;  %v11261_v20 = vld [vmem:[#allocation52_spill] sm:$0xff] }
 0x3fb   : > { %11246 = vst [vmem:[#allocation207_spill] sm:$0xff] %v7002_v18  ;;  %v7054_v36 = vadd.f32 %v1484_v41, %v11261_v20  ;;  %v11269_v41 = vld [vmem:[#allocation64_spill] sm:$0xff]  ;;  %v7105_v25 = vpop.permute.xlu1 %1672 }
 0x3fc   : > { %11247 = vst [vmem:[#allocation121_spill] sm:$0xff] %v7005_v63  ;;  %1758 = vrot.lane.b32.xlu2 %v11269_v41, %s3837_s26 }
 0x3fd   : > { %11249 = vst [vmem:[#allocation136_spill] sm:$0xff] %v7020_v11 }
 0x3fe   : > { %11250 = vst [vmem:[#allocation180_spill] sm:$0xff] %v7023_v60  ;;  %v7051_v60 = vadd.f32 %v1485_v13, %v11259_v31  ;;  %v11267_v13 = vld [vmem:[#allocation92_spill] sm:$0xff]  ;;  %v7077_v31 = vadd.f32 %v1498_v19, %v6017_v61  ;;  %v11279_v19 = vld [vmem:[#allocation94_spill] sm:$0xff] }
 0x3ff   : > { %11251 = vst [vmem:[#allocation188_spill] sm:$0xff] %v7026_v56  ;;  %v11264_v56 = vld [vmem:[#allocation99_spill] sm:$0xff]  ;;  %v1490_v20 = vsel %vm544_vm0, %v11268_v59, %v11267_v13 }
 0x400   : > { %11252 = vst [vmem:[#allocation190_spill] sm:$0xff] %v7029_v1  ;;  %v1500_v63 = vsel %vm544_vm0, %v11264_v56, %v11263_v24  ;;  %v11270_v24 = vld [vmem:[#allocation97_spill] sm:$0xff]  ;;  %v11277_v13 = vld [vmem:[#allocation71_spill] sm:$0xff]  ;;  %v11278_v1 = vld [vmem:[#allocation186_spill] sm:$0xff] }
 0x401   : > { %11258 = vst [vmem:[#allocation155_spill] sm:$0xff] %v7048_v23  ;;  %1756 = vrot.lane.b32.xlu1 %v11270_v24, %s3837_s26  ;;  %v11274_v23 = vld [vmem:[#allocation231_spill] sm:$0xff]  ;;  %1754 = vrot.lane.b32.xlu0 %v11277_v13, %s3837_s26  ;;  %v1440_v11 = vsel %vm544_vm0, %v6362_v14, %v11278_v1  ;;  %v1504_v61 = vsel %vm544_vm0, %v11278_v1, %v11227_v44  ;;  %v11285_v14 = vld [vmem:[#allocation58_spill] sm:$0xff]  ;;  %v11289_v44 = vld [vmem:[#allocation212_spill] sm:$0xff] }
 0x402   : > { %11260 = vst [vmem:[#allocation219_spill] sm:$0xff] %v7051_v60  ;;  %v7083_v60 = vadd.f32 %v1487_v12, %v11274_v23  ;;  %v1494_v12 = vsel %vm544_vm0, %v11280_v43, %v11279_v19  ;;  %v7103_v23 = vpop.permute.xlu2 %1692  ;;  %v7120_v19 = vpop.permute.xlu0 %1670 }
 0x403   : > { %11262 = vst [vmem:[#allocation220_spill] sm:$0xff] %v7054_v36  ;;  %v11276_v36 = vld [vmem:[#allocation35_spill] sm:$0xff]  ;;  %v1852_v1 = vsel %vm833_vm1, %v11289_v44, %v7103_v23 }
 0x404   : > { %11271 = vst [vmem:[#allocation108_spill] sm:$0xff] %v7077_v31  ;;  %v7086_v7 = vadd.f32 %v1501_v40, %v11276_v36  ;;  %v11281_v36 = vld [vmem:[#allocation39_spill] sm:$0xff]  ;;  %v7108_v31 = vadd.f32 %v1437_v2, %v11269_v41 }
 0x405   : > { %11273 = vst [vmem:[#allocation141_spill] sm:$0xff] %v7080_v22  ;;  %v1532_v40 = vadd.f32 %v1500_v63, %v11281_v36  ;;  %v7111_v22 = vadd.f32 %v1491_v5, %v11285_v14  ;;  %v11291_v63 = vld [vmem:[#allocation159_spill] sm:$0xff]  ;;  %v11292_v36 = vld [vmem:[#allocation8_spill] sm:$0xff] }
 0x406   : > { %11275 = vst [vmem:[#allocation140_spill] sm:$0xff] %v7083_v60  ;;  %v11287_v60 = vld [vmem:[#allocation91_spill] sm:$0xff]  ;;  %v1493_v48 = vsel %vm544_vm0, %v11292_v36, %v11291_v63  ;;  %v11299_v63 = vld [vmem:[#allocation169_spill] sm:$0xff] }
 0x407   : > { %11282 = vst [vmem:[#allocation210_spill] sm:$0xff] %v7103_v23  ;;  %v7114_v0 = vadd.f32 %v1490_v20, %v11287_v60  ;;  %v11293_v2 = vld [vmem:[#allocation167_spill] sm:$0xff]  ;;  %v1916_v20 = vadd.f32 %v1852_v1, %v1532_v40  ;;  %v11303_v40 = vld [vmem:[#allocation202_spill] sm:$0xff] }
 0x408   : > { %11283 = vst [vmem:[#allocation127_spill] sm:$0xff] %v7105_v25  ;;  %v1443_v5 = vsel %vm544_vm0, %v6413_v33, %v11293_v2  ;;  %v1507_v60 = vsel %vm544_vm0, %v11293_v2, %v11232_v54  ;;  %v11294_v41 = vld [vmem:[#allocation43_spill] sm:$0xff]  ;;  %v11300_v25 = vld [vmem:[#allocation21_spill] sm:$0xff] }
 0x409   : > { %11284 = vst [vmem:[#allocation142_spill] sm:$0xff] %v7108_v31  ;;  %v7135_v14 = vadd.f32 %v1504_v61, %v11294_v41  ;;  %v11297_v44 = vld [vmem:[#allocation55_spill] sm:$0xff]  ;;  %v1497_v33 = vsel %vm544_vm0, %v11300_v25, %v11299_v63  ;;  %v11301_v31 = vld [vmem:[#allocation200_spill] sm:$0xff]  ;;  %v1446_v61 = vsel %vm544_vm0, %v6464_v26, %v11303_v40  ;;  %v11309_v63 = vld [vmem:[#allocation50_spill] sm:$0xff] }
 0x40a   : > { %11286 = vst [vmem:[#allocation183_spill] sm:$0xff] %v7111_v22  ;;  %v11295_v22 = vld [vmem:[#allocation229_spill] sm:$0xff]  ;;  %v7141_v23 = vadd.f32 %v1494_v12, %v11297_v44  ;;  %v1496_v54 = vsel %vm544_vm0, %v11302_v37, %v11301_v31  ;;  %v7159_v12 = vmax.f32 %v1916_v20, 1e-24  ;;  %v11304_v44 = vld [vmem:[#allocation63_spill] sm:$0xff]  ;;  %v7175_v25 = vadd.f32 %v1497_v33, %v6021_v58  ;;  %v11313_v20 = vld [vmem:[#allocation98_spill] sm:$0xff] }
 0x40b   : > { %11288 = vst [vmem:[#allocation191_spill] sm:$0xff] %v7114_v0  ;;  %v7138_v0 = vadd.f32 %v1440_v11, %v11295_v22  ;;  %v1510_v11 = vsel %vm544_vm0, %v11303_v40, %v11237_v46  ;;  %v7162_v1 = vadd.f32 %v1493_v48, %v11304_v44  ;;  %v11306_v2 = vld [vmem:[#allocation47_spill] sm:$0xff]  ;;  %v11312_v46 = vld [vmem:[#allocation154_spill] sm:$0xff]  ;;  %1764 = vrot.lane.b32.xlu2 %v11295_v22, %s3837_s26  ;;  %v11322_v22 = vld [vmem:[#allocation68_spill] sm:$0xff] }
 0x40c   : > { %11290 = vst [vmem:[#allocation193_spill] sm:$0xff] %v7120_v19  ;;  %v7165_v41 = vadd.f32 %v1507_v60, %v11306_v2  ;;  %v1436_v48 = vsel %vm544_vm0, %v11312_v46, %v11264_v56  ;;  %v11314_v40 = vld [vmem:[#allocation74_spill] sm:$0xff]  ;;  %3427 = vrsqrt.f32 %v7159_v12  ;;  %v7191_v58 = vadd.f32 %v1496_v54, %v6036_v35  ;;  %v11318_v56 = vld [vmem:[#allocation95_spill] sm:$0xff]  ;;  %v11320_v2 = vld [vmem:[#allocation189_spill] sm:$0xff] }
 0x40d   : > { %11296 = vst [vmem:[#allocation221_spill] sm:$0xff] %v7138_v0  ;;  %v11310_v0 = vld [vmem:[#allocation100_spill] sm:$0xff]  ;;  %v1499_v60 = vsel %vm544_vm0, %v11314_v40, %v11313_v20  ;;  %v7197_v44 = vadd.f32 %v1446_v61, %v11318_v56  ;;  %v1513_v46 = vsel %vm544_vm0, %v11320_v2, %v11239_v8  ;;  %v11321_v20 = vld [vmem:[#allocation69_spill] sm:$0xff]  ;;  %v7220_v2 = vpop.permute.xlu1 %1678  ;;  %vm2114_vm12 = vweird.f32 %v7159_v12 }
 0x40e   : > { %11298 = vst [vmem:[#allocation222_spill] sm:$0xff] %v7141_v23  ;;  %v11307_v23 = vld [vmem:[#allocation70_spill] sm:$0xff]  ;;  %v1503_v26 = vsel %vm544_vm0, %v11310_v0, %v11309_v63  ;;  %v11317_v63 = vld [vmem:[#allocation236_spill] sm:$0xff]  ;;  %1760 = vrot.lane.b32.xlu0 %v11321_v20, %s3837_s26  ;;  %v1439_v35 = vsel %vm544_vm0, %v11322_v22, %v11310_v0  ;;  %v11323_v54 = vld [vmem:[#allocation61_spill] sm:$0xff]  ;;  %v7226_v0 = vadd.f32 %v1499_v60, %v11277_v13 }
 0x40f   : > { %11305 = vst [vmem:[#allocation114_spill] sm:$0xff] %v7162_v1  ;;  %v7168_v31 = vadd.f32 %v1443_v5, %v11307_v23  ;;  %v11315_v5 = vld [vmem:[#allocation54_spill] sm:$0xff]  ;;  %v7194_v33 = vadd.f32 %v1510_v11, %v11317_v63  ;;  %v7218_v63 = vpop.permute.xlu2 %1698  ;;  %v11330_v22 = vld [vmem:[#allocation123_spill] sm:$0xff]  ;;  %v11336_v13 = vld [vmem:[#allocation145_spill] sm:$0xff] }
 0x410   : > { %11311 = vst [vmem:[#allocation146_spill] sm:$0xff] %v7175_v25  ;;  %1762 = vrot.lane.b32.xlu1 %v11315_v5, %s3837_s26  ;;  %v1541_v25 = vadd.f32 %v1503_v26, %v11323_v54  ;;  %v11324_v11 = vld [vmem:[#allocation170_spill] sm:$0xff]  ;;  %v11329_v26 = vld [vmem:[#allocation172_spill] sm:$0xff]  ;;  %v7236_v54 = vpop.permute.xlu0 %1676  ;;  %v11337_v60 = vld [vmem:[#allocation203_spill] sm:$0xff] }
 0x411   : > { %11308 = vst [vmem:[#allocation147_spill] sm:$0xff] %v7168_v31  ;;  %v1438_v61 = vsel %vm544_vm0, %v6309_v4, %v11324_v11  ;;  %v1502_v8 = vsel %vm544_vm0, %v11324_v11, %v11220_v6  ;;  %v1516_v4 = vsel %vm544_vm0, %v11329_v26, %v5999_v51  ;;  %v1855_v6 = vsel %vm833_vm1, %v11330_v22, %v7218_v63  ;;  %v11332_v11 = vld [vmem:[#allocation13_spill] sm:$0xff] }
 0x412   : > { %11316 = vst [vmem:[#allocation213_spill] sm:$0xff] %v7191_v58  ;;  %v7223_v58 = vadd.f32 %v1436_v48, %v11270_v24  ;;  %v7239_v1 = vadd.f32 %v1513_v46, %v11332_v11  ;;  %v11333_v24 = vld [vmem:[#allocation234_spill] sm:$0xff]  ;;  %v1925_v51 = vadd.f32 %v1855_v6, %v1541_v25  ;;  %v7250_v26 = vadd.f32 %v1439_v35, %v11315_v5  ;;  %v11341_v46 = vld [vmem:[#allocation77_spill] sm:$0xff]  ;;  %v11344_v25 = vld [vmem:[#allocation83_spill] sm:$0xff] }
 0x413   : > { %11319 = vst [vmem:[#allocation133_spill] sm:$0xff] %v7197_v44  ;;  %v11334_v48 = vld [vmem:[#allocation162_spill] sm:$0xff]  ;;  %v11339_v44 = vld [vmem:[#allocation49_spill] sm:$0xff]  ;;  %v1442_v11 = vsel %vm544_vm0, %v11341_v46, %v11337_v60  ;;  %v11350_v46 = vld [vmem:[#allocation144_spill] sm:$0xff]  ;;  %1770 = vrot.lane.b32.xlu2 %v11307_v23, %s3837_s26 }
 0x414   : > { %11325 = vst [vmem:[#allocation148_spill] sm:$0xff] %v7218_v63  ;;  %v7253_v22 = vadd.f32 %v1502_v8, %v11339_v44  ;;  %v7256_v63 = vadd.f32 %v1438_v61, %v11321_v20  ;;  %v11345_v6 = vld [vmem:[#allocation205_spill] sm:$0xff]  ;;  %v7275_v35 = vmax.f32 %v1925_v51, 1e-24  ;;  %v11348_v61 = vld [vmem:[#allocation67_spill] sm:$0xff] }
 0x415   : > { %11326 = vst [vmem:[#allocation29_spill] sm:$0xff] %v7220_v2  ;;  %v7269_v5 = vadd.f32 %v11345_v6, %v11344_v25  ;;  %v11347_v44 = vld [vmem:[#allocation105_spill] sm:$0xff]  ;;  %v7289_v6 = vadd.f32 %v1442_v11, %v11350_v46  ;;  %v11353_v51 = vld [vmem:[#allocation75_spill] sm:$0xff] }
 0x416   : > { %11327 = vst [vmem:[#allocation33_spill] sm:$0xff] %v7223_v58  ;;  %v7243_v58 = vadd.f32 %v11334_v48, %v11333_v24  ;;  %v7262_v48 = vpop.eup %3427  ;;  %v1505_v20 = vsel %vm544_vm0, %v11347_v44, %v11226_v16  ;;  %v11352_v16 = vld [vmem:[#allocation192_spill] sm:$0xff]  ;;  %3429 = vrsqrt.f32 %v7275_v35  ;;  %v11357_v23 = vld [vmem:[#allocation103_spill] sm:$0xff]  ;;  %vm2204_vm15 = vweird.f32 %v7275_v35 }
 0x417   : > { %11328 = vst [vmem:[#allocation32_spill] sm:$0xff] %v7226_v0  ;;  %v1506_v0 = vsel %vm544_vm0, %v11337_v60, %v11336_v13  ;;  %v1441_v13 = vsel %vm544_vm0, %v6360_v45, %v11347_v44  ;;  %v2109_v60 = vmul.f32 %v7262_v48, %v7159_v12  ;;  %v11356_v44 = vld [vmem:[#allocation165_spill] sm:$0xff]  ;;  %1766 = vrot.lane.b32.xlu0 %v11357_v23, %s3837_s26  ;;  %vm2115_vm11 = vweird.f32 %v7262_v48  ;;  %v11388_v12 = vld [vmem:[#allocation23_spill] sm:$0xff] }
 0x418   : > { %11331 = vst [vmem:[#allocation34_spill] sm:$0xff] %v7236_v54  ;;  %v1550_v8 = vadd.f32 %v1506_v0, %v11348_v61  ;;  %v1445_v0 = vsel %vm544_vm0, %v11353_v51, %v11352_v16  ;;  %v11354_v61 = vld [vmem:[#allocation18_spill] sm:$0xff]  ;;  %1768 = vrot.lane.b32.xlu1 %v11350_v46, %s3837_s26  ;;  %v7319_v46 = vadd.f32 %v1441_v13, %v11357_v23  ;;  %v11368_v13 = vld [vmem:[#allocation232_spill] sm:$0xff]  ;;  %vm2116_vm13 = vmor %vm2114_vm12, %vm2115_vm11 }
 0x419   : > { %11335 = vst [vmem:[#allocation37_spill] sm:$0xff] %v7243_v58  ;;  %v11342_v58 = vld [vmem:[#allocation16_spill] sm:$0xff]  ;;  %v1509_v45 = vsel %vm544_vm0, %v11352_v16, %v11354_v61  ;;  %v1508_v16 = vsel %vm544_vm0, %v11356_v44, %v11231_v28  ;;  %v2110_v51 = vmul.f32 %v7262_v48, %v2109_v60  ;;  %v7334_v60 = vpop.permute.xlu1 %1684  ;;  %v7338_v23 = vadd.f32 %v1445_v0, %v11368_v13 }
 0x41a   : > { %11338 = vst [vmem:[#allocation36_spill] sm:$0xff] %v7250_v26  ;;  %v7265_v31 = vadd.f32 %v1516_v4, %v11342_v58  ;;  %v11349_v58 = vld [vmem:[#allocation104_spill] sm:$0xff] }
 0x41b   : > { %11340 = vst [vmem:[#allocation38_spill] sm:$0xff] %v7256_v63  ;;  %v1519_v4 = vsel %vm544_vm0, %v11349_v58, %v11255_v42  ;;  %v11355_v42 = vld [vmem:[#allocation60_spill] sm:$0xff]  ;;  %v1444_v58 = vsel %vm544_vm0, %v6411_v34, %v11356_v44  ;;  %v11364_v34 = vld [vmem:[#allocation173_spill] sm:$0xff]  ;;  %v7332_v44 = vpop.permute.xlu2 %1704  ;;  %1776 = vrot.lane.b32.xlu2 %v11318_v56, %s3837_s26 }
 0x41c   : > { %11343 = vst [vmem:[#allocation41_spill] sm:$0xff] %v7265_v31  ;;  %v7305_v11 = vadd.f32 %v1505_v20, %v11355_v42  ;;  %v11359_v20 = vld [vmem:[#allocation19_spill] sm:$0xff]  ;;  %v11361_v42 = vld [vmem:[#allocation10_spill] sm:$0xff]  ;;  %v1522_v28 = vsel %vm544_vm0, %v11364_v34, %v11268_v59  ;;  %v11367_v63 = vld [vmem:[#allocation237_spill] sm:$0xff] }
 0x41d   : > { %11346 = vst [vmem:[#allocation40_spill] sm:$0xff] %v7269_v5  ;;  %v7322_v61 = vadd.f32 %v1519_v4, %v11359_v20  ;;  %v1559_v26 = vadd.f32 %v1509_v45, %v11367_v63  ;;  %v2111_v4 = vmul.f32 0.5, %v2110_v51  ;;  %v11370_v20 = vld [vmem:[#allocation30_spill] sm:$0xff]  ;;  %v11373_v59 = vld [vmem:[#allocation9_spill] sm:$0xff]  ;;  %v11382_v31 = vld [vmem:[#allocation208_spill] sm:$0xff] }
 0x41e   : > { %11351 = vst [vmem:[#allocation42_spill] sm:$0xff] %v7289_v6  ;;  %v11362_v6 = vld [vmem:[#allocation106_spill] sm:$0xff]  ;;  %v7350_v34 = vadd.f32 %v1444_v58, %v11373_v59  ;;  %v11379_v58 = vld [vmem:[#allocation235_spill] sm:$0xff]  ;;  %v11389_v56 = vld [vmem:[#allocation73_spill] sm:$0xff] }
 0x41f   : > { %11358 = vst [vmem:[#allocation45_spill] sm:$0xff] %v7319_v46  ;;  %v7326_v5 = vadd.f32 %v11362_v6, %v11361_v42  ;;  %v1858_v6 = vsel %vm833_vm1, %v11370_v20, %v7332_v44  ;;  %v11372_v46 = vld [vmem:[#allocation66_spill] sm:$0xff]  ;;  %1772 = vrot.lane.b32.xlu0 %v11373_v59, %s3837_s26  ;;  %v1450_v59 = vsel %vm544_vm0, %v6513_v10, %v11388_v12 }
 0x420   : > { %11360 = vst [vmem:[#allocation44_spill] sm:$0xff] %v7322_v61  ;;  %v7347_v2 = vadd.f32 %v1508_v16, %v11372_v46  ;;  %v11376_v61 = vld [vmem:[#allocation158_spill] sm:$0xff]  ;;  %v1934_v0 = vadd.f32 %v1858_v6, %v1550_v8  ;;  %v7364_v16 = vpop.eup %3429  ;;  %v1447_v8 = vsel %vm544_vm0, %v6462_v52, %v11382_v31  ;;  %1774 = vrot.lane.b32.xlu1 %v11368_v13, %s3837_s26 }
 0x421   : > { %11363 = vst [vmem:[#allocation227_spill] sm:$0xff] %v7326_v5  ;;  %v7344_v5 = vpop.permute.xlu0 %1682  ;;  %v11377_v45 = vld [vmem:[#allocation22_spill] sm:$0xff]  ;;  %v2199_v6 = vmul.f32 %v7364_v16, %v7275_v35  ;;  %vm2205_vm14 = vweird.f32 %v7364_v16 }
 0x422   : > { %11365 = vst [vmem:[#allocation139_spill] sm:$0xff] %v7332_v44  ;;  %v7357_v51 = vadd.f32 %v1522_v28, %v11377_v45  ;;  %v2112_v44 = vsub.f32 1.5, %v2111_v4  ;;  %v11380_v46 = vld [vmem:[#allocation206_spill] sm:$0xff]  ;;  %v7378_v28 = vmax.f32 %v1934_v0, 1e-24  ;;  %vm2206_vm2 = vmor %vm2204_vm15, %vm2205_vm14 }
 0x423   : > { %11366 = vst [vmem:[#allocation72_spill] sm:$0xff] %v7334_v60  ;;  %v11375_v60 = vld [vmem:[#allocation175_spill] sm:$0xff]  ;;  %v11384_v52 = vld [vmem:[#allocation238_spill] sm:$0xff]  ;;  %1782 = vrot.lane.b32.xlu2 %v11333_v24, %s3837_s26 }
 0x424   : > { %11369 = vst [vmem:[#allocation224_spill] sm:$0xff] %v7338_v23  ;;  %v1448_v63 = vsel %vm544_vm0, %v11376_v61, %v11375_v60  ;;  %v11378_v23 = vld [vmem:[#allocation84_spill] sm:$0xff]  ;;  %v1511_v61 = vsel %vm544_vm0, %v11382_v31, %v11236_v27  ;;  %v2113_v4 = vmul.f32 %v7262_v48, %v2112_v44  ;;  %v11387_v31 = vld [vmem:[#allocation110_spill] sm:$0xff]  ;;  %3431 = vrsqrt.f32 %v7378_v28 }
 0x425   : > { %11371 = vst [vmem:[#allocation15_spill] sm:$0xff] %v7344_v5  ;;  %v1512_v20 = vsel %vm544_vm0, %v11375_v60, %v11378_v23  ;;  %v11383_v60 = vld [vmem:[#allocation111_spill] sm:$0xff]  ;;  %v1451_v0 = vsel %vm544_vm0, %v6358_v17, %v11387_v31  ;;  %v1514_v44 = vsel %vm544_vm0, %v11388_v12, %v11238_v39  ;;  %v7416_v13 = vadd.f32 %v1511_v61, %v11389_v56  ;;  %v7425_v39 = vpop.permute.xlu2 %1710  ;;  %v11397_v61 = vld [vmem:[#allocation182_spill] sm:$0xff]  ;;  %v11403_v12 = vld [vmem:[#allocation112_spill] sm:$0xff] }
 0x426   : > { %11374 = vst [vmem:[#allocation78_spill] sm:$0xff] %v7350_v34  ;;  %v7368_v34 = vadd.f32 %v11380_v46, %v11379_v58  ;;  %v1525_v23 = vsel %vm544_vm0, %v11383_v60, %v11292_v36  ;;  %v7389_v45 = vadd.f32 %v1512_v20, %v11384_v52  ;;  %v11385_v46 = vld [vmem:[#allocation76_spill] sm:$0xff]  ;;  %v1515_v36 = vsel %vm544_vm0, %v11387_v31, %v6001_v29  ;;  %v11392_v29 = vld [vmem:[#allocation242_spill] sm:$0xff]  ;;  %v11399_v56 = vld [vmem:[#allocation239_spill] sm:$0xff] }
 0x427   : > { %v7392_v27 = vadd.f32 %v1448_v63, %v11385_v46  ;;  %v2117_v17 = vsel %vm2116_vm13, %v7262_v48, %v2113_v4  ;;  %v2200_v20 = vmul.f32 %v7364_v16, %v2199_v6  ;;  %v11390_v63 = vld [vmem:[#allocation150_spill] sm:$0xff]  ;;  %v7422_v52 = vadd.f32 %v1525_v23, %v11392_v29  ;;  %v3619_v31 = vld [vmem:[%s3957_s28] sm:$0xff]  ;;  %11393 = vst [vmem:[#allocation125_spill] sm:$0xff] %v7425_v39  ;;  %v7427_v48 = vpop.permute.xlu1 %1690  ;;  %v11394_v4 = vld [vmem:[#allocation161_spill] sm:$0xff] }
 0x428   : > { %11381 = vst [vmem:[#allocation233_spill] sm:$0xff] %v7368_v34  ;;  %v7419_v60 = vadd.f32 %v1447_v8, %v11390_v63  ;;  %v11395_v6 = vld [vmem:[#allocation195_spill] sm:$0xff]  ;;  %v1861_v23 = vsel %vm833_vm1, %v11397_v61, %v7425_v39  ;;  %v7444_v29 = vadd.f32 %v1515_v36, %v11399_v56  ;;  %v11404_v36 = vld [vmem:[#allocation168_spill] sm:$0xff]  ;;  %1780 = vrot.lane.b32.xlu1 %v11385_v46, %s3837_s26  ;;  %v11416_v24 = vld [vmem:[#allocation14_spill] sm:$0xff]  ;;  %vm2294_vm4 = vweird.f32 %v7378_v28 }
 0x429   : > { %11386 = vst [vmem:[#allocation119_spill] sm:$0xff] %v7392_v27  ;;  %v3068_v27 = vmul.f32 %v3619_v31, %v2117_v17  ;;  %v7431_v34 = vadd.f32 %v11395_v6, %v11394_v4  ;;  %v2201_v8 = vmul.f32 0.5, %v2200_v20  ;;  %v7441_v17 = vpop.permute.xlu0 %1688  ;;  %v11400_v31 = vld [vmem:[#allocation160_spill] sm:$0xff]  ;;  %v11402_v6 = vld [vmem:[#allocation223_spill] sm:$0xff]  ;;  %v1943_v10 = vadd.f32 %v1861_v23, %v1559_v26  ;;  %1778 = vrot.lane.b32.xlu0 %v11390_v63, %s3837_s26 }
 0x42a   : > { %11391 = vst [vmem:[#allocation79_spill] sm:$0xff] %v7419_v60  ;;  %v7447_v60 = vadd.f32 %v1451_v0, %v11400_v31  ;;  %v1528_v20 = vsel %vm544_vm0, %v11403_v12, %v11302_v37  ;;  %v1518_v0 = vsel %vm544_vm0, %v11404_v36, %v6052_v32  ;;  %v1454_v26 = vsel %vm544_vm0, %v6409_v47, %v11404_v36  ;;  %v11408_v47 = vld [vmem:[#allocation90_spill] sm:$0xff]  ;;  %v11409_v36 = vld [vmem:[#allocation196_spill] sm:$0xff] }
 0x42b   : > { %11396 = vst [vmem:[#allocation51_spill] sm:$0xff] %v7431_v34  ;;  %v7450_v34 = vadd.f32 %v1514_v44, %v11402_v6  ;;  %v2202_v56 = vsub.f32 1.5, %v2201_v8  ;;  %v7466_v44 = vpop.eup %3431  ;;  %v11405_v6 = vld [vmem:[#allocation101_spill] sm:$0xff]  ;;  %v7479_v23 = vmax.f32 %v1943_v10, 1e-24  ;;  %v7490_v12 = vadd.f32 %v1528_v20, %v11408_v47  ;;  %v11415_v20 = vld [vmem:[#allocation178_spill] sm:$0xff]  ;;  %1788 = vrot.lane.b32.xlu2 %v11344_v25, %s3837_s26 }
 0x42c   : > { %11398 = vst [vmem:[#allocation131_spill] sm:$0xff] %v7441_v17  ;;  %v2289_v8 = vmul.f32 %v7466_v44, %v7378_v28  ;;  %v11417_v46 = vld [vmem:[#allocation80_spill] sm:$0xff]  ;;  %vm2295_vm3 = vweird.f32 %v7466_v44  ;;  %v11434_v28 = vld [vmem:[#allocation17_spill] sm:$0xff]  ;;  %v11437_v25 = vld [vmem:[#allocation194_spill] sm:$0xff] }
 0x42d   : > { %11401 = vst [vmem:[#allocation59_spill] sm:$0xff] %v7447_v60  ;;  %v7469_v60 = vadd.f32 %v1450_v59, %v11405_v6  ;;  %v2203_v59 = vmul.f32 %v7364_v16, %v2202_v56  ;;  %3433 = vrsqrt.f32 %v7479_v23  ;;  %v1531_v56 = vsel %vm544_vm0, %v11415_v20, %v11314_v40  ;;  %v3620_v40 = vld [vmem:[%s3957_s28 + $0x48] sm:$0xff]  ;;  %vm2296_vm5 = vmor %vm2294_vm4, %vm2295_vm3 }
 0x42e   : > { %3164 = vst [vmem:[%s7454_s30] sm:$0xff] %v3068_v27  ;;  %v11407_v27 = vld [vmem:[#allocation120_spill] sm:$0xff]  ;;  %vm2384_vm7 = vweird.f32 %v7479_v23 }
 0x42f   : > { %11406 = vst [vmem:[#allocation46_spill] sm:$0xff] %v7469_v60  ;;  %v1453_v37 = vsel %vm544_vm0, %v6564_v3, %v11407_v27  ;;  %v1517_v32 = vsel %vm544_vm0, %v11407_v27, %v11248_v55  ;;  %v11410_v3 = vld [vmem:[#allocation176_spill] sm:$0xff]  ;;  %v11413_v55 = vld [vmem:[#allocation81_spill] sm:$0xff] }
 0x430   : > { %v7494_v10 = vadd.f32 %v11410_v3, %v11409_v36  ;;  %v11412_v60 = vld [vmem:[#allocation240_spill] sm:$0xff]  ;;  %v7505_v35 = vadd.f32 %v1454_v26, %v11413_v55  ;;  %v7516_v27 = vadd.f32 %v1517_v32, %v11416_v24  ;;  %v7519_v47 = vadd.f32 %v1453_v37, %v11417_v46  ;;  %v11419_v26 = vld [vmem:[#allocation137_spill] sm:$0xff]  ;;  %v11423_v24 = vld [vmem:[#allocation27_spill] sm:$0xff]  ;;  %1786 = vrot.lane.b32.xlu1 %v11400_v31, %s3837_s26 }
 0x431   : > { %v7497_v61 = vadd.f32 %v1518_v0, %v11412_v60  ;;  %v2207_v60 = vsel %vm2206_vm2, %v7364_v16, %v2203_v59  ;;  %v2290_v0 = vmul.f32 %v7466_v44, %v2289_v8  ;;  %v1457_v3 = vsel %vm544_vm0, %v6460_v30, %v11419_v26  ;;  %v7526_v16 = vpop.permute.xlu2 %1716  ;;  %v7528_v59 = vpop.permute.xlu1 %1696  ;;  %v11422_v37 = vld [vmem:[#allocation149_spill] sm:$0xff]  ;;  %1784 = vrot.lane.b32.xlu0 %v11405_v6, %s3837_s26 }
 0x432   : > { %11411 = vst [vmem:[#allocation56_spill] sm:$0xff] %v7494_v10  ;;  %v3077_v20 = vmul.f32 %v3620_v40, %v2207_v60  ;;  %v1521_v63 = vsel %vm544_vm0, %v11419_v26, %v6107_v62  ;;  %v1864_v8 = vsel %vm833_vm1, %v11422_v37, %v7526_v16  ;;  %v1854_v30 = vsel %vm833_vm1, %v11423_v24, %v7528_v59  ;;  %v7542_v60 = vpop.permute.xlu0 %1694  ;;  %v11424_v40 = vld [vmem:[#allocation31_spill] sm:$0xff]  ;;  %v11426_v10 = vld [vmem:[#allocation88_spill] sm:$0xff]  ;;  %v11427_v37 = vld [vmem:[#allocation209_spill] sm:$0xff] }
 0x433   : > { %11414 = vst [vmem:[#allocation228_spill] sm:$0xff] %v7505_v35  ;;  %v2291_v32 = vmul.f32 0.5, %v2290_v0  ;;  %v1952_v35 = vadd.f32 %v1864_v8, %v7389_v45  ;;  %v1922_v62 = vadd.f32 %v1854_v30, %v7253_v22  ;;  %v11425_v0 = vld [vmem:[#allocation143_spill] sm:$0xff]  ;;  %1794 = vrot.lane.b32.xlu2 %v11361_v42, %s3837_s26 }
 0x434   : > { %11418 = vst [vmem:[#allocation151_spill] sm:$0xff] %v7519_v47  ;;  %v7545_v47 = vadd.f32 %v1531_v56, %v11424_v40  ;;  %v1853_v26 = vsel %vm833_vm1, %v11425_v0, %v7542_v60  ;;  %v7560_v40 = vpop.eup %3433  ;;  %v3622_v42 = vld [vmem:[%s3957_s28 + $0xd8] sm:$0xff] }
 0x435   : > { %11420 = vst [vmem:[#allocation85_spill] sm:$0xff] %v7526_v16  ;;  %v7556_v16 = vadd.f32 %v11427_v37, %v11426_v10  ;;  %v2292_v39 = vsub.f32 1.5, %v2291_v32  ;;  %v1919_v56 = vadd.f32 %v1853_v26, %v7086_v7  ;;  %v7570_v8 = vmax.f32 %v1952_v35, 1e-24 }
 0x436   : > { %11421 = vst [vmem:[#allocation57_spill] sm:$0xff] %v7528_v59  ;;  %v7572_v37 = vmax.f32 %v1922_v62, 1e-24  ;;  %v2379_v7 = vmul.f32 %v7560_v40, %v7479_v23  ;;  %vm2385_vm6 = vweird.f32 %v7560_v40 }
 0x437   : > { %3173 = vst [vmem:[%s7454_s30 + $0x48] sm:$0xff] %v3077_v20  ;;  %v11429_v20 = vld [vmem:[#allocation211_spill] sm:$0xff]  ;;  %v2293_v32 = vmul.f32 %v7466_v44, %v2292_v39  ;;  %v7578_v30 = vmax.f32 %v1919_v56, 1e-24  ;;  %3435 = vrsqrt.f32 %v7570_v8  ;;  %v3621_v56 = vld [vmem:[%s3957_s28 + $0x90] sm:$0xff]  ;;  %vm2386_vm8 = vmor %vm2384_vm7, %vm2385_vm6  ;;  %vm2474_vm9 = vweird.f32 %v7570_v8 }
 0x438   : > { %11428 = vst [vmem:[#allocation197_spill] sm:$0xff] %v7556_v16  ;;  %v1456_v22 = vsel %vm544_vm0, %v6588_v57, %v11429_v20  ;;  %v1520_v45 = vsel %vm544_vm0, %v11429_v20, %v11253_v50  ;;  %v11430_v57 = vld [vmem:[#allocation241_spill] sm:$0xff]  ;;  %v11431_v16 = vld [vmem:[#allocation82_spill] sm:$0xff]  ;;  %3437 = vrsqrt.f32 %v7572_v37  ;;  %1792 = vrot.lane.b32.xlu1 %v11413_v55, %s3837_s26  ;;  %vm2174_vm11 = vweird.f32 %v7572_v37 }
 0x439   : > { %v7581_v26 = vadd.f32 %v1521_v63, %v11430_v57  ;;  %v7584_v24 = vadd.f32 %v1457_v3, %v11431_v16  ;;  %v11433_v50 = vld [vmem:[#allocation117_spill] sm:$0xff]  ;;  %v7596_v39 = vadd.f32 %v1520_v45, %v11434_v28  ;;  %v2297_v3 = vsel %vm2296_vm5, %v7466_v44, %v2293_v32  ;;  %v7612_v44 = vpop.permute.xlu2 %1722  ;;  %v7614_v45 = vpop.permute.xlu1 %1702  ;;  %v11440_v32 = vld [vmem:[#allocation243_spill] sm:$0xff]  ;;  %v11442_v28 = vld [vmem:[#allocation198_spill] sm:$0xff]  ;;  %1790 = vrot.lane.b32.xlu0 %v11417_v46, %s3837_s26 }
 0x43a   : > { %v1524_v35 = vsel %vm544_vm0, %v11433_v50, %v6158_v9  ;;  %v2380_v63 = vmul.f32 %v7560_v40, %v2379_v7  ;;  %v11435_v9 = vld [vmem:[#allocation153_spill] sm:$0xff]  ;;  %v1460_v31 = vsel %vm544_vm0, %v11437_v25, %v11433_v50  ;;  %v3086_v20 = vmul.f32 %v3621_v56, %v2297_v3  ;;  %11438 = vst [vmem:[#allocation226_spill] sm:$0xff] %v7612_v44  ;;  %v7627_v3 = vpop.permute.xlu0 %1700  ;;  %v11443_v25 = vld [vmem:[#allocation116_spill] sm:$0xff] }
 0x43b   : > { %11432 = vst [vmem:[#allocation48_spill] sm:$0xff] %v7584_v24  ;;  %v7604_v62 = vadd.f32 %v1456_v22, %v11435_v9  ;;  %3439 = vrsqrt.f32 %v7578_v30  ;;  %v7617_v7 = vadd.f32 %v1524_v35, %v11440_v32  ;;  %v11441_v22 = vld [vmem:[#allocation216_spill] sm:$0xff]  ;;  %v1857_v50 = vsel %vm833_vm1, %v11442_v28, %v7614_v45  ;;  %v11444_v32 = vld [vmem:[#allocation109_spill] sm:$0xff]  ;;  %v11445_v24 = vld [vmem:[#allocation26_spill] sm:$0xff]  ;;  %1800 = vrot.lane.b32.xlu2 %v11379_v58, %s3837_s26 }
 0x43c   : > { %11439 = vst [vmem:[#allocation230_spill] sm:$0xff] %v7614_v45  ;;  %v2381_v6 = vmul.f32 0.5, %v2380_v63  ;;  %v1867_v57 = vsel %vm833_vm1, %v11441_v22, %v7612_v44  ;;  %v1523_v56 = vsel %vm544_vm0, %v11443_v25, %v11266_v53  ;;  %v1931_v63 = vadd.f32 %v1857_v50, %v7305_v11 }
 0x43d   : > { %11436 = vst [vmem:[#allocation199_spill] sm:$0xff] %v7604_v62  ;;  %v1961_v35 = vadd.f32 %v1867_v57, %v7444_v29  ;;  %v1856_v62 = vsel %vm833_vm1, %v11444_v32, %v7627_v3  ;;  %v1527_v22 = vsel %vm544_vm0, %v11445_v24, %v6209_v15  ;;  %v11446_v29 = vld [vmem:[#allocation163_spill] sm:$0xff]  ;;  %v7655_v11 = vsel %vm544_vm0, %v11265_v38, %v11443_v25  ;;  %v11448_v38 = vld [vmem:[#allocation20_spill] sm:$0xff] }
 0x43e   : > { %3182 = vst [vmem:[%s7454_s30 + $0x90] sm:$0xff] %v3086_v20  ;;  %v2382_v44 = vsub.f32 1.5, %v2381_v6  ;;  %v1928_v53 = vadd.f32 %v1856_v62, %v7135_v14  ;;  %v7646_v20 = vpop.eup %3435  ;;  %v7649_v57 = vadd.f32 %v1460_v31, %v11446_v29  ;;  %v7659_v28 = vmax.f32 %v1931_v63, 1e-24 }
 0x43f   : > { %v7657_v50 = vmax.f32 %v1961_v35, 1e-24  ;;  %v7661_v15 = vpop.eup %3437  ;;  %v2469_v14 = vmul.f32 %v7646_v20, %v7570_v8  ;;  %v7672_v25 = vadd.f32 %v1523_v56, %v11448_v38  ;;  %v11449_v35 = vld [vmem:[#allocation107_spill] sm:$0xff]  ;;  %vm2475_vm10 = vweird.f32 %v7646_v20 }
 0x440   : > { %11447 = vst [vmem:[#allocation52_spill] sm:$0xff] %v7649_v57  ;;  %v2383_v6 = vmul.f32 %v7560_v40, %v2382_v44  ;;  %v7667_v62 = vmax.f32 %v1928_v53, 1e-24  ;;  %v7675_v63 = vadd.f32 %v1527_v22, %v11449_v35  ;;  %v2169_v23 = vmul.f32 %v7661_v15, %v7572_v37  ;;  %v11450_v44 = vld [vmem:[#allocation179_spill] sm:$0xff]  ;;  %v11453_v57 = vld [vmem:[#allocation201_spill] sm:$0xff]  ;;  %vm2476_vm14 = vmor %vm2474_vm9, %vm2475_vm10  ;;  %1798 = vrot.lane.b32.xlu1 %v11431_v16, %s3837_s26 }
 0x441   : > { %v7669_v31 = vpop.eup %3439  ;;  %3441 = vrsqrt.f32 %v7657_v50  ;;  %v7690_v22 = vsel %vm544_vm0, %v11450_v44, %v6260_v21  ;;  %v2470_v53 = vmul.f32 %v7646_v20, %v2469_v14  ;;  %v7702_v21 = vpop.permute.xlu2 %1728  ;;  %vm2175_vm12 = vweird.f32 %v7661_v15  ;;  %1796 = vrot.lane.b32.xlu0 %v11435_v9, %s3837_s26  ;;  %v3623_v16 = vld [vmem:[%s3957_s28 + $0x120] sm:$0xff]  ;;  %v3624_v9 = vld [vmem:[%s3957_s28 + $0x30] sm:$0xff] }
 0x442   : > { %v2387_v56 = vsel %vm2386_vm8, %v7560_v40, %v2383_v6  ;;  %v2139_v38 = vmul.f32 %v7669_v31, %v7578_v30  ;;  %v2170_v55 = vmul.f32 %v7661_v15, %v2169_v23  ;;  %3443 = vrsqrt.f32 %v7659_v28  ;;  %11451 = vst [vmem:[#allocation53_spill] sm:$0xff] %v7702_v21  ;;  %v7704_v40 = vpop.permute.xlu1 %1708  ;;  %v7709_v46 = vpop.permute.xlu0 %1706  ;;  %vm2176_vm2 = vmor %vm2174_vm11, %vm2175_vm12 }
 0x443   : > { %v3095_v35 = vmul.f32 %v3622_v42, %v2387_v56  ;;  %v2471_v6 = vmul.f32 0.5, %v2470_v53  ;;  %3445 = vrsqrt.f32 %v7667_v62  ;;  %v1870_v23 = vsel %vm833_vm1, %v7002_v18, %v7702_v21  ;;  %v11452_v42 = vld [vmem:[#allocation171_spill] sm:$0xff]  ;;  %1806 = vrot.lane.b32.xlu2 %v11394_v4, %s3837_s26 }
 0x444   : > { %v2140_v14 = vmul.f32 %v7669_v31, %v2139_v38  ;;  %v2171_v56 = vmul.f32 0.5, %v2170_v55  ;;  %v1860_v53 = vsel %vm833_vm1, %v11452_v42, %v7704_v40  ;;  %v1859_v38 = vsel %vm833_vm1, %v11453_v57, %v7709_v46 }
 0x445   : > { %3191 = vst [vmem:[%s7454_s30 + $0xd8] sm:$0xff] %v3095_v35  ;;  %v2472_v44 = vsub.f32 1.5, %v2471_v6  ;;  %v1970_v35 = vadd.f32 %v1870_v23, %v7497_v61  ;;  %v1940_v55 = vadd.f32 %v1860_v53, %v7347_v2  ;;  %v1937_v18 = vadd.f32 %v1859_v38, %v7165_v41 }
 0x446   : > { %v2141_v45 = vmul.f32 0.5, %v2140_v14  ;;  %v2172_v24 = vsub.f32 1.5, %v2171_v56  ;;  %vm2145_vm13 = vweird.f32 %v7669_v31  ;;  %vm2144_vm15 = vweird.f32 %v7578_v30  ;;  %v3625_v30 = vld [vmem:[%s3957_s28 + $0x18] sm:$0xff] }
 0x447   : > { %v7726_v59 = vpop.eup %3441  ;;  %v2473_v21 = vmul.f32 %v7646_v20, %v2472_v44  ;;  %v7743_v41 = vmax.f32 %v1970_v35, 1e-24  ;;  %vm2146_vm3 = vmor %vm2144_vm15, %vm2145_vm13  ;;  %vm2564_vm4 = vweird.f32 %v7657_v50  ;;  %vm2264_vm9 = vweird.f32 %v7659_v28 }
 0x448   : > { %v2142_v42 = vsub.f32 1.5, %v2141_v45  ;;  %v2559_v6 = vmul.f32 %v7726_v59, %v7657_v50  ;;  %v7735_v61 = vpop.eup %3443  ;;  %v2173_v2 = vmul.f32 %v7661_v15, %v2172_v24  ;;  %v7745_v45 = vmax.f32 %v1940_v55, 1e-24  ;;  %1804 = vrot.lane.b32.xlu1 %v11446_v29, %s3837_s26 }
 0x449   : > { %v7751_v44 = vpop.eup %3445  ;;  %v2477_v8 = vsel %vm2476_vm14, %v7646_v20, %v2473_v21  ;;  %v2259_v58 = vmul.f32 %v7735_v61, %v7659_v28  ;;  %v7772_v21 = vmax.f32 %v1937_v18, 1e-24  ;;  %v7774_v23 = vpop.permute.xlu2 %1734  ;;  %3447 = vrsqrt.f32 %v7743_v41 }
 0x44a   : > { %v2143_v24 = vmul.f32 %v7669_v31, %v2142_v42  ;;  %v2560_v14 = vmul.f32 %v7726_v59, %v2559_v6  ;;  %v3104_v56 = vmul.f32 %v3623_v16, %v2477_v8  ;;  %v2177_v20 = vsel %vm2176_vm2, %v7661_v15, %v2173_v2  ;;  %11454 = vst [vmem:[#allocation99_spill] sm:$0xff] %v7774_v23  ;;  %v7776_v42 = vpop.permute.xlu1 %1714  ;;  %v7786_v6 = vpop.permute.xlu0 %1712  ;;  %v11455_v16 = vld [vmem:[#allocation181_spill] sm:$0xff] }
 0x44b   : > { %v2229_v37 = vmul.f32 %v7751_v44, %v7667_v62  ;;  %v3074_v53 = vmul.f32 %v3624_v9, %v2177_v20  ;;  %v2260_v35 = vmul.f32 %v7735_v61, %v2259_v58  ;;  %vm2565_vm5 = vweird.f32 %v7726_v59  ;;  %1812 = vrot.lane.b32.xlu2 %v11409_v36, %s3837_s26 }
 0x44c   : > { %v2147_v15 = vsel %vm2146_vm3, %v7669_v31, %v2143_v24  ;;  %v2561_v38 = vmul.f32 0.5, %v2560_v14  ;;  %3200 = vst [vmem:[%s7454_s30 + $0x120] sm:$0xff] %v3104_v56  ;;  %3449 = vrsqrt.f32 %v7745_v45  ;;  %vm2265_vm6 = vweird.f32 %v7735_v61  ;;  %vm2566_vm8 = vmor %vm2564_vm4, %vm2565_vm5 }
 0x44d   : > { %v3071_v55 = vmul.f32 %v3625_v30, %v2147_v15  ;;  %v2230_v18 = vmul.f32 %v7751_v44, %v2229_v37  ;;  %3170 = vst [vmem:[%s7454_s30 + $0x30] sm:$0xff] %v3074_v53  ;;  %v2261_v8 = vmul.f32 0.5, %v2260_v35  ;;  %vm2235_vm7 = vweird.f32 %v7751_v44  ;;  %v11456_v53 = vld [vmem:[#allocation174_spill] sm:$0xff]  ;;  %v3626_v30 = vld [vmem:[%s3957_s28 + $0x168] sm:$0xff]  ;;  %vm2266_vm10 = vmor %vm2264_vm9, %vm2265_vm6 }
 0x44e   : > { %v2562_v2 = vsub.f32 1.5, %v2561_v38  ;;  %3451 = vrsqrt.f32 %v7772_v21  ;;  %v1873_v58 = vsel %vm833_vm1, %v7120_v19, %v7774_v23  ;;  %v1863_v56 = vsel %vm833_vm1, %v11455_v16, %v7776_v42  ;;  %v3636_v23 = vld [vmem:[%s3957_s28 + $0x150] sm:$0xff] }
 0x44f   : > { %3167 = vst [vmem:[%s7454_s30 + $0x18] sm:$0xff] %v3071_v55  ;;  %v2231_v31 = vmul.f32 0.5, %v2230_v18  ;;  %v2262_v14 = vsub.f32 1.5, %v2261_v8  ;;  %v1979_v37 = vadd.f32 %v1873_v58, %v7581_v26  ;;  %v1949_v9 = vadd.f32 %v1863_v56, %v7416_v13  ;;  %v11457_v13 = vld [vmem:[#allocation87_spill] sm:$0xff]  ;;  %v7822_v35 = vpop.eup %3447  ;;  %v11459_v18 = vld [vmem:[#allocation118_spill] sm:$0xff] }
 0x450   : > { %v2563_v24 = vmul.f32 %v7726_v59, %v2562_v2  ;;  %v1862_v15 = vsel %vm833_vm1, %v11456_v53, %v7786_v6  ;;  %1802 = vrot.lane.b32.xlu0 %v11457_v13, %s3837_s26  ;;  %vm2234_vm11 = vweird.f32 %v7667_v62  ;;  %v7841_v2 = vsel %vm544_vm0, %v11459_v18, %v11280_v43 }
 0x451   : > { %v2232_v20 = vsub.f32 1.5, %v2231_v31  ;;  %v2263_v50 = vmul.f32 %v7735_v61, %v2262_v14  ;;  %v1946_v26 = vadd.f32 %v1862_v15, %v7194_v33  ;;  %v7829_v29 = vmax.f32 %v1979_v37, 1e-24  ;;  %v7831_v28 = vpop.permute.xlu2 %1740  ;;  %vm2236_vm12 = vmor %vm2234_vm11, %vm2235_vm7  ;;  %v3627_v14 = vld [vmem:[%s3957_s28 + $0x78] sm:$0xff]  ;;  %v3628_v15 = vld [vmem:[%s3957_s28 + $0x60] sm:$0xff] }
 0x452   : > { %v2567_v38 = vsel %vm2566_vm8, %v7726_v59, %v2563_v24  ;;  %11458 = vst [vmem:[#allocation93_spill] sm:$0xff] %v7831_v28  ;;  %v7833_v33 = vpop.permute.xlu1 %1720  ;;  %v7835_v55 = vpop.eup %3449  ;;  %v2649_v62 = vmul.f32 %v7822_v35, %v7743_v41  ;;  %v7848_v31 = vmax.f32 %v1949_v9, 1e-24  ;;  %vm2654_vm13 = vweird.f32 %v7743_v41 }
 0x453   : > { %v3113_v4 = vmul.f32 %v3626_v30, %v2567_v38  ;;  %v2233_v59 = vmul.f32 %v7751_v44, %v2232_v20  ;;  %v2267_v8 = vsel %vm2266_vm10, %v7735_v61, %v2263_v50  ;;  %v2349_v61 = vmul.f32 %v7835_v55, %v7745_v45  ;;  %v11460_v20 = vld [vmem:[#allocation96_spill] sm:$0xff]  ;;  %v11461_v30 = vld [vmem:[#allocation21_spill] sm:$0xff]  ;;  %1818 = vrot.lane.b32.xlu2 %v11426_v10, %s3837_s26 }
 0x454   : > { %v7850_v24 = vpop.eup %3451  ;;  %v3083_v58 = vmul.f32 %v3627_v14, %v2267_v8  ;;  %v7857_v56 = vmax.f32 %v1946_v26, 1e-24  ;;  %v7861_v37 = vadd.f32 %v7690_v22, %v11460_v20  ;;  %v2650_v38 = vmul.f32 %v7822_v35, %v2649_v62  ;;  %v7877_v22 = vpop.permute.xlu0 %1718 }
 0x455   : > { %3209 = vst [vmem:[%s7454_s30 + $0x168] sm:$0xff] %v3113_v4  ;;  %v2237_v43 = vsel %vm2236_vm12, %v7751_v44, %v2233_v59  ;;  %v2319_v50 = vmul.f32 %v7850_v24, %v7772_v21  ;;  %v11462_v4 = vld [vmem:[#allocation126_spill] sm:$0xff]  ;;  %v2350_v26 = vmul.f32 %v7835_v55, %v2349_v61  ;;  %3453 = vrsqrt.f32 %v7829_v29  ;;  %v11464_v61 = vld [vmem:[#allocation12_spill] sm:$0xff] }
 0x456   : > { %v3080_v9 = vmul.f32 %v3628_v15, %v2237_v43  ;;  %v7871_v44 = vsel %vm544_vm0, %v11462_v4, %v11461_v30  ;;  %3179 = vst [vmem:[%s7454_s30 + $0x78] sm:$0xff] %v3083_v58  ;;  %v2651_v59 = vmul.f32 0.5, %v2650_v38  ;;  %vm2655_vm14 = vweird.f32 %v7822_v35  ;;  %v11463_v58 = vld [vmem:[#allocation214_spill] sm:$0xff]  ;;  %1810 = vrot.lane.b32.xlu1 %v11464_v61, %s3837_s26 }
 0x457   : > { %v2320_v8 = vmul.f32 %v7850_v24, %v2319_v50  ;;  %3455 = vrsqrt.f32 %v7848_v31  ;;  %v2351_v62 = vmul.f32 0.5, %v2350_v26  ;;  %v1876_v14 = vsel %vm833_vm1, %v7236_v54, %v7831_v28  ;;  %v11465_v50 = vld [vmem:[#allocation86_spill] sm:$0xff]  ;;  %v11466_v26 = vld [vmem:[#allocation184_spill] sm:$0xff]  ;;  %vm2656_vm5 = vmor %vm2654_vm13, %vm2655_vm14 }
 0x458   : > { %3176 = vst [vmem:[%s7454_s30 + $0x60] sm:$0xff] %v3080_v9  ;;  %3457 = vrsqrt.f32 %v7857_v56  ;;  %v1866_v43 = vsel %vm833_vm1, %v11463_v58, %v7833_v33  ;;  %v2652_v20 = vsub.f32 1.5, %v2651_v59  ;;  %v1988_v9 = vadd.f32 %v1876_v14, %v7617_v7  ;;  %1808 = vrot.lane.b32.xlu0 %v11465_v50, %s3837_s26 }
 0x459   : > { %v2321_v15 = vmul.f32 0.5, %v2320_v8  ;;  %v1958_v38 = vadd.f32 %v1866_v43, %v7450_v34  ;;  %v2352_v30 = vsub.f32 1.5, %v2351_v62  ;;  %vm2354_vm15 = vweird.f32 %v7745_v45  ;;  %v7906_v54 = vpop.permute.xlu2 %1746 }
 0x45a   : > { %vm2355_vm2 = vweird.f32 %v7835_v55  ;;  %v1865_v36 = vsel %vm833_vm1, %v11466_v26, %v7877_v22  ;;  %11467 = vst [vmem:[#allocation65_spill] sm:$0xff] %v7906_v54  ;;  %v2653_v59 = vmul.f32 %v7822_v35, %v2652_v20  ;;  %vm2324_vm3 = vweird.f32 %v7772_v21  ;;  %v7911_v34 = vpop.permute.xlu1 %1726  ;;  %v3631_v21 = vld [vmem:[%s3957_s28 + $0xa8] sm:$0xff] }
 0x45b   : > { %v2322_v7 = vsub.f32 1.5, %v2321_v15  ;;  %vm2325_vm4 = vweird.f32 %v7850_v24  ;;  %v7913_v8 = vpop.eup %3453  ;;  %v2353_v62 = vmul.f32 %v7835_v55, %v2352_v30  ;;  %v7920_v14 = vmax.f32 %v1988_v9, 1e-24  ;;  %vm2356_vm6 = vmor %vm2354_vm15, %vm2355_vm2 }
 0x45c   : > { %v7922_v43 = vmax.f32 %v1958_v38, 1e-24  ;;  %v1955_v20 = vadd.f32 %v1865_v36, %v7239_v1  ;;  %v2657_v28 = vsel %vm2656_vm5, %v7822_v35, %v2653_v59  ;;  %v2739_v9 = vmul.f32 %v7913_v8, %v7829_v29  ;;  %v3629_v35 = vld [vmem:[%s3957_s28 + $0x1b0] sm:$0xff]  ;;  %vm2326_vm7 = vmor %vm2324_vm3, %vm2325_vm4  ;;  %v7963_v19 = vpop.permute.xlu0 %1724 }
 0x45d   : > { %v7925_v15 = vpop.eup %3455  ;;  %v2323_v41 = vmul.f32 %v7850_v24, %v2322_v7  ;;  %v1879_v1 = vsel %vm833_vm1, %v7344_v5, %v7906_v54  ;;  %v3122_v30 = vmul.f32 %v3629_v35, %v2657_v28  ;;  %v2357_v36 = vsel %vm2356_vm6, %v7835_v55, %v2353_v62  ;;  %v11468_v59 = vld [vmem:[#allocation122_spill] sm:$0xff]  ;;  %v3630_v5 = vld [vmem:[%s3957_s28 + $0xc0] sm:$0xff] }
 0x45e   : > { %v7939_v38 = vpop.eup %3457  ;;  %v2439_v45 = vmul.f32 %v7925_v15, %v7848_v31  ;;  %v1869_v7 = vsel %vm833_vm1, %v11468_v59, %v7911_v34  ;;  %v3092_v54 = vmul.f32 %v3630_v5, %v2357_v36  ;;  %v2740_v55 = vmul.f32 %v7913_v8, %v2739_v9  ;;  %v11469_v5 = vld [vmem:[#allocation156_spill] sm:$0xff] }
 0x45f   : > { %v2327_v28 = vsel %vm2326_vm7, %v7850_v24, %v2323_v41  ;;  %v2409_v62 = vmul.f32 %v7939_v38, %v7857_v56  ;;  %3218 = vst [vmem:[%s7454_s30 + $0x1b0] sm:$0xff] %v3122_v30  ;;  %vm2744_vm8 = vweird.f32 %v7829_v29  ;;  %3459 = vrsqrt.f32 %v7920_v14  ;;  %1816 = vrot.lane.b32.xlu1 %v11469_v5, %s3837_s26  ;;  %v11470_v9 = vld [vmem:[#allocation164_spill] sm:$0xff] }
 0x460   : > { %v3089_v35 = vmul.f32 %v3631_v21, %v2327_v28  ;;  %v2440_v4 = vmul.f32 %v7925_v15, %v2439_v45  ;;  %3188 = vst [vmem:[%s7454_s30 + $0xc0] sm:$0xff] %v3092_v54  ;;  %v2741_v24 = vmul.f32 0.5, %v2740_v55  ;;  %vm2444_vm9 = vweird.f32 %v7848_v31  ;;  %1814 = vrot.lane.b32.xlu0 %v11470_v9, %s3837_s26  ;;  %v11471_v55 = vld [vmem:[#allocation24_spill] sm:$0xff] }
 0x461   : > { %v2410_v41 = vmul.f32 %v7939_v38, %v2409_v62  ;;  %3461 = vrsqrt.f32 %v7922_v43  ;;  %vm2745_vm10 = vweird.f32 %v7913_v8  ;;  %v7977_v36 = vmax.f32 %v1955_v20, 1e-24  ;;  %v3635_v5 = vld [vmem:[%s3957_s28 + $0x240] sm:$0xff] }
 0x462   : > { %3185 = vst [vmem:[%s7454_s30 + $0xa8] sm:$0xff] %v3089_v35  ;;  %v2441_v30 = vmul.f32 0.5, %v2440_v4  ;;  %v1997_v10 = vadd.f32 %v1879_v1, %v7675_v63  ;;  %v2742_v45 = vsub.f32 1.5, %v2741_v24  ;;  %v1967_v28 = vadd.f32 %v1869_v7, %v7516_v27  ;;  %v7993_v27 = vpop.permute.xlu2 %1752  ;;  %vm2746_vm13 = vmor %vm2744_vm8, %vm2745_vm10  ;;  %v11473_v24 = vld [vmem:[#allocation41_spill] sm:$0xff] }
 0x463   : > { %v2411_v54 = vmul.f32 0.5, %v2410_v41  ;;  %v1868_v62 = vsel %vm833_vm1, %v11471_v55, %v7963_v19  ;;  %vm2445_vm11 = vweird.f32 %v7925_v15  ;;  %3463 = vrsqrt.f32 %v7977_v36  ;;  %11472 = vst [vmem:[#allocation92_spill] sm:$0xff] %v7993_v27 }
 0x464   : > { %v2442_v21 = vsub.f32 1.5, %v2441_v30  ;;  %v7987_v35 = vmax.f32 %v1997_v10, 1e-24  ;;  %v2743_v4 = vmul.f32 %v7913_v8, %v2742_v45  ;;  %vm2415_vm12 = vweird.f32 %v7939_v38  ;;  %vm2446_vm15 = vmor %vm2444_vm9, %vm2445_vm11 }
 0x465   : > { %v2412_v20 = vsub.f32 1.5, %v2411_v54  ;;  %v7991_v63 = vmax.f32 %v1967_v28, 1e-24  ;;  %v7995_v1 = vpop.eup %3459  ;;  %vm2414_vm14 = vweird.f32 %v7857_v56  ;;  %v1964_v41 = vadd.f32 %v1868_v62, %v11473_v24  ;;  %v3632_v56 = vld [vmem:[%s3957_s28 + $0x1f8] sm:$0xff]  ;;  %v3633_v62 = vld [vmem:[%s3957_s28 + $0x108] sm:$0xff]  ;;  %v3634_v24 = vld [vmem:[%s3957_s28 + $0xf0] sm:$0xff] }
 0x466   : > { %v2443_v7 = vmul.f32 %v7925_v15, %v2442_v21  ;;  %3465 = vrsqrt.f32 %v7987_v35  ;;  %v2747_v10 = vsel %vm2746_vm13, %v7913_v8, %v2743_v4  ;;  %v2829_v45 = vmul.f32 %v7995_v1, %v7920_v14  ;;  %vm2416_vm3 = vmor %vm2414_vm14, %vm2415_vm12 }
 0x467   : > { %v8005_v30 = vpop.eup %3461  ;;  %v2413_v29 = vmul.f32 %v7939_v38, %v2412_v20  ;;  %vm2834_vm2 = vweird.f32 %v7920_v14  ;;  %v3131_v54 = vmul.f32 %v3632_v56, %v2747_v10  ;;  %v1882_v8 = vsel %vm833_vm1, %v7441_v17, %v7993_v27 }
 0x468   : > { %v2447_v28 = vsel %vm2446_vm15, %v7925_v15, %v2443_v7  ;;  %v2529_v31 = vmul.f32 %v8005_v30, %v7922_v43  ;;  %v2830_v20 = vmul.f32 %v7995_v1, %v2829_v45  ;;  %3467 = vrsqrt.f32 %v7991_v63  ;;  %v8030_v15 = vpop.permute.xlu1 %1732 }
 0x469   : > { %v3101_v21 = vmul.f32 %v3633_v62, %v2447_v28  ;;  %v2417_v4 = vsel %vm2416_vm3, %v7939_v38, %v2413_v29  ;;  %11474 = vst [vmem:[#allocation89_spill] sm:$0xff] %v8030_v15  ;;  %v8032_v7 = vpop.eup %3463  ;;  %vm2534_vm4 = vweird.f32 %v7922_v43  ;;  %v8038_v17 = vmax.f32 %v1964_v41, 1e-24  ;;  %v8045_v28 = vpop.permute.xlu0 %1730  ;;  %v11475_v41 = vld [vmem:[#allocation124_spill] sm:$0xff] }
 0x46a   : > { %3227 = vst [vmem:[%s7454_s30 + $0x1f8] sm:$0xff] %v3131_v54  ;;  %v3098_v10 = vmul.f32 %v3634_v24, %v2417_v4  ;;  %v2530_v56 = vmul.f32 %v8005_v30, %v2529_v31  ;;  %v2831_v38 = vmul.f32 0.5, %v2830_v20  ;;  %v2499_v29 = vmul.f32 %v8032_v7, %v7977_v36 }
 0x46b   : > { %3197 = vst [vmem:[%s7454_s30 + $0x108] sm:$0xff] %v3101_v21  ;;  %vm2504_vm5 = vweird.f32 %v7977_v36  ;;  %v2006_v45 = vadd.f32 %v1882_v8, %v7861_v37  ;;  %vm2835_vm6 = vweird.f32 %v7995_v1  ;;  %3469 = vrsqrt.f32 %v8038_v17 }
 0x46c   : > { %v8047_v54 = vpop.eup %3465  ;;  %3194 = vst [vmem:[%s7454_s30 + $0xf0] sm:$0xff] %v3098_v10  ;;  %v2531_v31 = vmul.f32 0.5, %v2530_v56  ;;  %v1872_v62 = vsel %vm833_vm1, %v11475_v41, %v8030_v15  ;;  %v2832_v21 = vsub.f32 1.5, %v2831_v38  ;;  %vm2535_vm7 = vweird.f32 %v8005_v30  ;;  %v11476_v10 = vld [vmem:[#allocation217_spill] sm:$0xff]  ;;  %vm2836_vm9 = vmor %vm2834_vm2, %vm2835_vm6 }
 0x46d   : > { %v2500_v37 = vmul.f32 %v8032_v7, %v2499_v29  ;;  %v2919_v8 = vmul.f32 %v8047_v54, %v7987_v35  ;;  %v8060_v20 = vmax.f32 %v2006_v45, 1e-24  ;;  %v1976_v24 = vadd.f32 %v1872_v62, %v7596_v39  ;;  %vm2536_vm11 = vmor %vm2534_vm4, %vm2535_vm7 }
 0x46e   : > { %v2532_v4 = vsub.f32 1.5, %v2531_v31  ;;  %v1871_v56 = vsel %vm833_vm1, %v11476_v10, %v8045_v28  ;;  %v8067_v27 = vpop.eup %3467  ;;  %v2833_v38 = vmul.f32 %v7995_v1, %v2832_v21  ;;  %vm2505_vm8 = vweird.f32 %v8032_v7  ;;  %v11477_v21 = vld [vmem:[#allocation44_spill] sm:$0xff] }
 0x46f   : > { %v2501_v9 = vmul.f32 0.5, %v2500_v37  ;;  %v2920_v29 = vmul.f32 %v8047_v54, %v2919_v8  ;;  %vm2925_vm10 = vweird.f32 %v8047_v54  ;;  %v2619_v45 = vmul.f32 %v8067_v27, %v7991_v63  ;;  %v1759_v8 = vpop.permute.xlu2 %1758  ;;  %vm2506_vm12 = vmor %vm2504_vm5, %vm2505_vm8 }
 0x470   : > { %v2533_v39 = vmul.f32 %v8005_v30, %v2532_v4  ;;  %3471 = vrsqrt.f32 %v8060_v20  ;;  %v2837_v31 = vsel %vm2836_vm9, %v7995_v1, %v2833_v38  ;;  %v1973_v37 = vadd.f32 %v1871_v56, %v11477_v21  ;;  %v8127_v21 = vpop.permute.xlu1 %1738 }
 0x471   : > { %v2502_v14 = vsub.f32 1.5, %v2501_v9  ;;  %v2921_v62 = vmul.f32 0.5, %v2920_v29  ;;  %v8087_v4 = vpop.eup %3469  ;;  %v3140_v41 = vmul.f32 %v3635_v5, %v2837_v31  ;;  %v2620_v1 = vmul.f32 %v8067_v27, %v2619_v45 }
 0x472   : > { %v2537_v15 = vsel %vm2536_vm11, %v8005_v30, %v2533_v39  ;;  %v8092_v38 = vmax.f32 %v1976_v24, 1e-24  ;;  %v2589_v56 = vmul.f32 %v8087_v4, %v8038_v17  ;;  %vm2924_vm13 = vweird.f32 %v7987_v35  ;;  %v3637_v24 = vld [vmem:[%s3957_s28 + $0x138] sm:$0xff] }
 0x473   : > { %v3110_v43 = vmul.f32 %v3636_v23, %v2537_v15  ;;  %v2503_v9 = vmul.f32 %v8032_v7, %v2502_v14  ;;  %v2922_v29 = vsub.f32 1.5, %v2921_v62  ;;  %3236 = vst [vmem:[%s7454_s30 + $0x240] sm:$0xff] %v3140_v41  ;;  %v2621_v5 = vmul.f32 0.5, %v2620_v1  ;;  %vm2926_vm15 = vmor %vm2924_vm13, %vm2925_vm10  ;;  %v3638_v1 = vld [vmem:[%s3957_s28 + $0x288] sm:$0xff] }
 0x474   : > { %vm2625_vm14 = vweird.f32 %v8067_v27  ;;  %3473 = vrsqrt.f32 %v8092_v38  ;;  %v2590_v15 = vmul.f32 %v8087_v4, %v2589_v56  ;;  %v8110_v41 = vmax.f32 %v1973_v37, 1e-24  ;;  %v8129_v37 = vpop.permute.xlu0 %1736 }
 0x475   : > { %3206 = vst [vmem:[%s7454_s30 + $0x150] sm:$0xff] %v3110_v43  ;;  %v2507_v23 = vsel %vm2506_vm12, %v8032_v7, %v2503_v9  ;;  %v2923_v30 = vmul.f32 %v8047_v54, %v2922_v29  ;;  %v2622_v39 = vsub.f32 1.5, %v2621_v5  ;;  %v1821_v7 = vsel %vm833_vm1, %v7542_v60, %v1759_v8  ;;  %v11479_v9 = vld [vmem:[#allocation142_spill] sm:$0xff] }
 0x476   : > { %v8112_v36 = vpop.eup %3471  ;;  %v3107_v35 = vmul.f32 %v3637_v24, %v2507_v23  ;;  %v1885_v45 = vsel %vm833_vm1, %v1759_v8, %v11425_v0  ;;  %vm2624_vm2 = vweird.f32 %v7991_v63  ;;  %v2591_v14 = vmul.f32 0.5, %v2590_v15  ;;  %v11480_v23 = vld [vmem:[#allocation132_spill] sm:$0xff]  ;;  %v11481_v15 = vld [vmem:[#allocation127_spill] sm:$0xff] }
 0x477   : > { %v2927_v31 = vsel %vm2926_vm15, %v8047_v54, %v2923_v30  ;;  %v3009_v62 = vmul.f32 %v8112_v36, %v8060_v20  ;;  %v2623_v43 = vmul.f32 %v8067_v27, %v2622_v39  ;;  %vm2595_vm3 = vweird.f32 %v8087_v4  ;;  %vm2626_vm4 = vmor %vm2624_vm2, %vm2625_vm14  ;;  %v11478_v54 = vld [vmem:[#allocation177_spill] sm:$0xff] }
 0x478   : > { %3203 = vst [vmem:[%s7454_s30 + $0x138] sm:$0xff] %v3107_v35  ;;  %v3149_v60 = vmul.f32 %v3638_v1, %v2927_v31  ;;  %3475 = vrsqrt.f32 %v8110_v41  ;;  %v2592_v0 = vsub.f32 1.5, %v2591_v14  ;;  %v1920_v8 = vadd.f32 %v1821_v7, %v11478_v54  ;;  %v3639_v35 = vld [vmem:[%s3957_s28 + $0x198] sm:$0xff]  ;;  %v3640_v54 = vld [vmem:[%s3957_s28 + $0x180] sm:$0xff] }
 0x479   : > { %v3010_v63 = vmul.f32 %v8112_v36, %v3009_v62  ;;  %v1921_v29 = vadd.f32 %v1885_v45, %v11479_v9  ;;  %v2627_v5 = vsel %vm2626_vm4, %v8067_v27, %v2623_v43  ;;  %vm2594_vm5 = vweird.f32 %v8038_v17  ;;  %v1765_v17 = vpop.permute.xlu2 %1764 }
 0x47a   : > { %v8141_v56 = vpop.eup %3473  ;;  %3245 = vst [vmem:[%s7454_s30 + $0x288] sm:$0xff] %v3149_v60  ;;  %v1875_v30 = vsel %vm833_vm1, %v11480_v23, %v8127_v21  ;;  %v1874_v24 = vsel %vm833_vm1, %v11481_v15, %v8129_v37  ;;  %v3119_v39 = vmul.f32 %v3639_v35, %v2627_v5  ;;  %v2593_v7 = vmul.f32 %v8087_v4, %v2592_v0  ;;  %vm2596_vm6 = vmor %vm2594_vm5, %vm2595_vm3  ;;  %v11482_v35 = vld [vmem:[#allocation187_spill] sm:$0xff] }
 0x47b   : > { %v3011_v45 = vmul.f32 0.5, %v3010_v63  ;;  %v2709_v27 = vmul.f32 %v8141_v56, %v8092_v38  ;;  %vm3015_vm7 = vweird.f32 %v8112_v36  ;;  %v8161_v31 = vmax.f32 %v1920_v8, 1e-24 }
 0x47c   : > { %v8163_v14 = vmax.f32 %v1921_v29, 1e-24  ;;  %v1985_v62 = vadd.f32 %v1875_v30, %v7672_v25  ;;  %3215 = vst [vmem:[%s7454_s30 + $0x198] sm:$0xff] %v3119_v39  ;;  %v2597_v1 = vsel %vm2596_vm6, %v8087_v4, %v2593_v7  ;;  %v1982_v0 = vadd.f32 %v1874_v24, %v7357_v51  ;;  %v8196_v7 = vpop.permute.xlu1 %1744 }
 0x47d   : > { %v3012_v60 = vsub.f32 1.5, %v3011_v45  ;;  %v2710_v43 = vmul.f32 %v8141_v56, %v2709_v27  ;;  %v3116_v9 = vmul.f32 %v3640_v54, %v2597_v1  ;;  %vm3014_vm8 = vweird.f32 %v8060_v20  ;;  %v11483_v45 = vld [vmem:[#allocation25_spill] sm:$0xff]  ;;  %v11485_v54 = vld [vmem:[#allocation28_spill] sm:$0xff] }
 0x47e   : > { %v8170_v63 = vpop.eup %3475  ;;  %3477 = vrsqrt.f32 %v8161_v31  ;;  %v1824_v25 = vsel %vm833_vm1, %v7627_v3, %v1765_v17  ;;  %vm2715_vm9 = vweird.f32 %v8141_v56  ;;  %vm3016_vm10 = vmor %vm3014_vm8, %vm3015_vm7  ;;  %v8186_v20 = vmax.f32 %v1985_v62, 1e-24  ;;  %v3641_v62 = vld [vmem:[%s3957_s28 + $0x2d0] sm:$0xff] }
 0x47f   : > { %v3013_v8 = vmul.f32 %v8112_v36, %v3012_v60  ;;  %v2711_v4 = vmul.f32 0.5, %v2710_v43  ;;  %v2679_v51 = vmul.f32 %v8170_v63, %v8110_v41  ;;  %3212 = vst [vmem:[%s7454_s30 + $0x180] sm:$0xff] %v3116_v9  ;;  %3479 = vrsqrt.f32 %v8163_v14  ;;  %v11484_v60 = vld [vmem:[#allocation221_spill] sm:$0xff]  ;;  %v11486_v9 = vld [vmem:[#allocation215_spill] sm:$0xff] }
 0x480   : > { %v8188_v29 = vmax.f32 %v1982_v0, 1e-24  ;;  %v1888_v3 = vsel %vm833_vm1, %v1765_v17, %v11444_v32  ;;  %v1929_v39 = vadd.f32 %v1824_v25, %v11482_v35  ;;  %v1610_v27 = vadd.f32 %v7841_v2, %v11483_v45  ;;  %v8203_v32 = vpop.permute.xlu0 %1742 }
 0x481   : > { %v3017_v5 = vsel %vm3016_vm10, %v8112_v36, %v3013_v8  ;;  %v2712_v30 = vsub.f32 1.5, %v2711_v4  ;;  %v2680_v24 = vmul.f32 %v8170_v63, %v2679_v51  ;;  %vm2714_vm11 = vweird.f32 %v8092_v38  ;;  %v11487_v51 = vld [vmem:[#allocation29_spill] sm:$0xff] }
 0x482   : > { %v3158_v1 = vmul.f32 %v3641_v62, %v3017_v5  ;;  %3481 = vrsqrt.f32 %v8186_v20  ;;  %v1930_v43 = vadd.f32 %v1888_v3, %v11484_v60  ;;  %v8212_v2 = vadd.f32 %v7871_v44, %v11485_v54  ;;  %vm2716_vm12 = vmor %vm2714_vm11, %vm2715_vm9  ;;  %v1771_v62 = vpop.permute.xlu2 %1770 }
 0x483   : > { %v2713_v36 = vmul.f32 %v8141_v56, %v2712_v30  ;;  %v2681_v17 = vmul.f32 0.5, %v2680_v24  ;;  %3483 = vrsqrt.f32 %v8188_v29  ;;  %vm2685_vm13 = vweird.f32 %v8170_v63  ;;  %v3642_v30 = vld [vmem:[%s3957_s28 + $0x1e0] sm:$0xff] }
 0x484   : > { %v8208_v0 = vpop.eup %3477  ;;  %3254 = vst [vmem:[%s7454_s30 + $0x2d0] sm:$0xff] %v3158_v1  ;;  %v8218_v38 = vmax.f32 %v1929_v39, 1e-24  ;;  %v1878_v25 = vsel %vm833_vm1, %v11486_v9, %v8196_v7  ;;  %v1877_v3 = vsel %vm833_vm1, %v11487_v51, %v8203_v32  ;;  %vm2684_vm14 = vweird.f32 %v8110_v41 }
 0x485   : > { %v2717_v8 = vsel %vm2716_vm12, %v8141_v56, %v2713_v36  ;;  %v2682_v4 = vsub.f32 1.5, %v2681_v17  ;;  %v2149_v44 = vmul.f32 %v8208_v0, %v8161_v31  ;;  %v8231_v5 = vpop.eup %3479  ;;  %v8235_v35 = vmax.f32 %v1930_v43, 1e-24  ;;  %vm2686_vm2 = vmor %vm2684_vm14, %vm2685_vm13 }
 0x486   : > { %v3128_v24 = vmul.f32 %v3642_v30, %v2717_v8  ;;  %3485 = vrsqrt.f32 %v8218_v38  ;;  %vm2154_vm15 = vweird.f32 %v8161_v31  ;;  %v2159_v45 = vmul.f32 %v8231_v5, %v8163_v14  ;;  %v3644_v31 = vld [vmem:[%s3957_s28 + $0x20] sm:$0xff] }
 0x487   : > { %v2683_v56 = vmul.f32 %v8170_v63, %v2682_v4  ;;  %v2150_v39 = vmul.f32 %v8208_v0, %v2149_v44  ;;  %vm2164_vm3 = vweird.f32 %v8163_v14  ;;  %3487 = vrsqrt.f32 %v8235_v35  ;;  %v3643_v4 = vld [vmem:[%s3957_s28 + $0x1c8] sm:$0xff]  ;;  %v8305_v14 = vpop.permute.xlu1 %1750 }
 0x488   : > { %v8243_v1 = vpop.eup %3481  ;;  %3224 = vst [vmem:[%s7454_s30 + $0x1e0] sm:$0xff] %v3128_v24  ;;  %v1994_v41 = vadd.f32 %v1878_v25, %v1610_v27  ;;  %v1991_v36 = vadd.f32 %v1877_v3, %v7422_v52  ;;  %v2160_v54 = vmul.f32 %v8231_v5, %v2159_v45  ;;  %vm2804_vm4 = vweird.f32 %v8186_v20 }
 0x489   : > { %v8251_v17 = vpop.eup %3483  ;;  %v2687_v60 = vsel %vm2686_vm2, %v8170_v63, %v2683_v56  ;;  %v2151_v43 = vmul.f32 0.5, %v2150_v39  ;;  %v2799_v8 = vmul.f32 %v8243_v1, %v8186_v20  ;;  %vm2155_vm5 = vweird.f32 %v8208_v0 }
 0x48a   : > { %v3125_v44 = vmul.f32 %v3643_v4, %v2687_v60  ;;  %v2769_v52 = vmul.f32 %v8251_v17, %v8188_v29  ;;  %vm2774_vm6 = vweird.f32 %v8188_v29  ;;  %v1827_v63 = vsel %vm833_vm1, %v7709_v46, %v1771_v62  ;;  %vm2156_vm9 = vmor %vm2154_vm15, %vm2155_vm5 }
 0x48b   : > { %v2152_v27 = vsub.f32 1.5, %v2151_v43  ;;  %v2161_v25 = vmul.f32 0.5, %v2160_v54  ;;  %v2800_v3 = vmul.f32 %v8243_v1, %v2799_v8  ;;  %v8267_v30 = vmax.f32 %v1994_v41, 1e-24 }
 0x48c   : > { %v8269_v24 = vpop.eup %3485  ;;  %3221 = vst [vmem:[%s7454_s30 + $0x1c8] sm:$0xff] %v3125_v44  ;;  %vm2165_vm7 = vweird.f32 %v8231_v5  ;;  %vm2805_vm8 = vweird.f32 %v8243_v1  ;;  %v2770_v56 = vmul.f32 %v8251_v17, %v2769_v52  ;;  %v8275_v39 = vmax.f32 %v1991_v36, 1e-24  ;;  %v11488_v36 = vld [vmem:[#allocation135_spill] sm:$0xff] }
 0x48d   : > { %v2153_v46 = vmul.f32 %v8208_v0, %v2152_v27  ;;  %v2162_v45 = vsub.f32 1.5, %v2161_v25  ;;  %v2801_v60 = vmul.f32 0.5, %v2800_v3  ;;  %v2239_v41 = vmul.f32 %v8269_v24, %v8218_v38  ;;  %v8280_v43 = vpop.eup %3487  ;;  %vm2166_vm11 = vmor %vm2164_vm3, %vm2165_vm7 }
 0x48e   : > { %v2771_v54 = vmul.f32 0.5, %v2770_v56  ;;  %vm2775_vm10 = vweird.f32 %v8251_v17  ;;  %3489 = vrsqrt.f32 %v8267_v30  ;;  %v1938_v8 = vadd.f32 %v1827_v63, %v11488_v36  ;;  %vm2806_vm12 = vmor %vm2804_vm4, %vm2805_vm8  ;;  %v11489_v36 = vld [vmem:[#allocation147_spill] sm:$0xff] }
 0x48f   : > { %v2157_v4 = vsel %vm2156_vm9, %v8208_v0, %v2153_v46  ;;  %v2163_v44 = vmul.f32 %v8231_v5, %v2162_v45  ;;  %v2802_v52 = vsub.f32 1.5, %v2801_v60  ;;  %v2240_v27 = vmul.f32 %v8269_v24, %v2239_v41  ;;  %v3645_v60 = vld [vmem:[%s3957_s28 + $0x28] sm:$0xff]  ;;  %vm2776_vm14 = vmor %vm2774_vm6, %vm2775_vm10 }
 0x490   : > { %v3072_v25 = vmul.f32 %v3644_v31, %v2157_v4  ;;  %v2772_v3 = vsub.f32 1.5, %v2771_v54  ;;  %v2249_v63 = vmul.f32 %v8280_v43, %v8235_v35  ;;  %v1891_v0 = vsel %vm833_vm1, %v1771_v62, %v11453_v57 }
 0x491   : > { %v2167_v56 = vsel %vm2166_vm11, %v8231_v5, %v2163_v44  ;;  %v2803_v46 = vmul.f32 %v8243_v1, %v2802_v52  ;;  %v2241_v45 = vmul.f32 0.5, %v2240_v27  ;;  %3491 = vrsqrt.f32 %v8275_v39  ;;  %v3646_v52 = vld [vmem:[%s3957_s28 + $0x228] sm:$0xff] }
 0x492   : > { %v3073_v41 = vmul.f32 %v3645_v60, %v2167_v56  ;;  %3168 = vst [vmem:[%s7454_s30 + $0x20] sm:$0xff] %v3072_v25  ;;  %v2773_v57 = vmul.f32 %v8251_v17, %v2772_v3  ;;  %vm2245_vm13 = vweird.f32 %v8269_v24  ;;  %v2250_v5 = vmul.f32 %v8280_v43, %v2249_v63  ;;  %v11490_v25 = vld [vmem:[#allocation152_spill] sm:$0xff]  ;;  %v8333_v3 = vpop.permute.xlu0 %1748  ;;  %v3647_v63 = vld [vmem:[%s3957_s28 + $0x210] sm:$0xff] }
 0x493   : > { %v2807_v62 = vsel %vm2806_vm12, %v8243_v1, %v2803_v46  ;;  %v2242_v54 = vsub.f32 1.5, %v2241_v45  ;;  %v1939_v4 = vadd.f32 %v1891_v0, %v11489_v36  ;;  %v8322_v20 = vmax.f32 %v1938_v8, 1e-24  ;;  %v3648_v36 = vld [vmem:[%s3957_s28 + $0x68] sm:$0xff] }
 0x494   : > { %v8324_v44 = vpop.eup %3489  ;;  %3169 = vst [vmem:[%s7454_s30 + $0x28] sm:$0xff] %v3073_v41  ;;  %v3137_v27 = vmul.f32 %v3646_v52, %v2807_v62  ;;  %v2777_v31 = vsel %vm2776_vm14, %v8251_v17, %v2773_v57  ;;  %v2251_v1 = vmul.f32 0.5, %v2250_v5  ;;  %v1881_v29 = vsel %vm833_vm1, %v11490_v25, %v8305_v14  ;;  %v11491_v57 = vld [vmem:[#allocation72_spill] sm:$0xff]  ;;  %v1777_v62 = vpop.permute.xlu2 %1776 }
 0x495   : > { %v3134_v0 = vmul.f32 %v3647_v63, %v2777_v31  ;;  %v2243_v8 = vmul.f32 %v8269_v24, %v2242_v54  ;;  %vm2244_vm15 = vweird.f32 %v8218_v38  ;;  %v2889_v56 = vmul.f32 %v8324_v44, %v8267_v30 }
 0x496   : > { %3233 = vst [vmem:[%s7454_s30 + $0x228] sm:$0xff] %v3137_v27  ;;  %vm2246_vm2 = vmor %vm2244_vm15, %vm2245_vm13  ;;  %v2252_v17 = vsub.f32 1.5, %v2251_v1  ;;  %vm2255_vm3 = vweird.f32 %v8280_v43  ;;  %v8344_v46 = vmax.f32 %v1939_v4, 1e-24  ;;  %3493 = vrsqrt.f32 %v8322_v20 }
 0x497   : > { %v8347_v45 = vpop.eup %3491  ;;  %3230 = vst [vmem:[%s7454_s30 + $0x210] sm:$0xff] %v3134_v0  ;;  %v2247_v38 = vsel %vm2246_vm2, %v8269_v24, %v2243_v8  ;;  %v2890_v60 = vmul.f32 %v8324_v44, %v2889_v56  ;;  %v2003_v41 = vadd.f32 %v1881_v29, %v8212_v2  ;;  %v1880_v5 = vsel %vm833_vm1, %v11491_v57, %v8333_v3  ;;  %v11492_v56 = vld [vmem:[#allocation136_spill] sm:$0xff] }
 0x498   : > { %v2253_v54 = vmul.f32 %v8280_v43, %v2252_v17  ;;  %vm2254_vm4 = vweird.f32 %v8235_v35  ;;  %v3081_v4 = vmul.f32 %v3648_v36, %v2247_v38  ;;  %v2859_v24 = vmul.f32 %v8347_v45, %v8275_v39 }
 0x499   : > { %v8364_v52 = vadd.f32 %v7655_v11, %v11457_v13  ;;  %vm2256_vm5 = vmor %vm2254_vm4, %vm2255_vm3  ;;  %v2891_v2 = vmul.f32 0.5, %v2890_v60  ;;  %3495 = vrsqrt.f32 %v8344_v46  ;;  %v8369_v27 = vmax.f32 %v2003_v41, 1e-24  ;;  %v3649_v13 = vld [vmem:[%s3957_s28 + $0x70] sm:$0xff]  ;;  %v11493_v60 = vld [vmem:[#allocation133_spill] sm:$0xff] }
 0x49a   : > { %v2257_v35 = vsel %vm2256_vm5, %v8280_v43, %v2253_v54  ;;  %3177 = vst [vmem:[%s7454_s30 + $0x68] sm:$0xff] %v3081_v4  ;;  %v2860_v31 = vmul.f32 %v8347_v45, %v2859_v24  ;;  %v2000_v1 = vadd.f32 %v1880_v5, %v7490_v12  ;;  %v1830_v11 = vsel %vm833_vm1, %v7786_v6, %v1777_v62  ;;  %v3650_v24 = vld [vmem:[%s3957_s28 + $0x270] sm:$0xff] }
 0x49b   : > { %v3082_v29 = vmul.f32 %v3649_v13, %v2257_v35  ;;  %v2892_v63 = vsub.f32 1.5, %v2891_v2  ;;  %vm2895_vm6 = vweird.f32 %v8324_v44  ;;  %3497 = vrsqrt.f32 %v8369_v27 }
 0x49c   : > { %v8381_v0 = vpop.eup %3493  ;;  %v2861_v8 = vmul.f32 0.5, %v2860_v31  ;;  %v8383_v43 = vmax.f32 %v2000_v1, 1e-24  ;;  %v1894_v12 = vsel %vm833_vm1, %v1777_v62, %v11456_v53  ;;  %v1947_v17 = vadd.f32 %v1830_v11, %v11492_v56  ;;  %v1757_v62 = vpop.permute.xlu1 %1756 }
 0x49d   : > { %3178 = vst [vmem:[%s7454_s30 + $0x70] sm:$0xff] %v3082_v29  ;;  %v2893_v6 = vmul.f32 %v8324_v44, %v2892_v63  ;;  %vm2894_vm7 = vweird.f32 %v8267_v30  ;;  %v2329_v38 = vmul.f32 %v8381_v0, %v8322_v20  ;;  %v1948_v41 = vadd.f32 %v1894_v12, %v11493_v60 }
 0x49e   : > { %vm2896_vm8 = vmor %vm2894_vm7, %vm2895_vm6  ;;  %v2862_v5 = vsub.f32 1.5, %v2861_v8  ;;  %vm2865_vm9 = vweird.f32 %v8347_v45  ;;  %3499 = vrsqrt.f32 %v8383_v43  ;;  %v8397_v53 = vmax.f32 %v1947_v17, 1e-24  ;;  %v3651_v8 = vld [vmem:[%s3957_s28 + $0x258] sm:$0xff]  ;;  %v11495_v17 = vld [vmem:[#allocation212_spill] sm:$0xff] }
 0x49f   : > { %v8399_v54 = vpop.eup %3495  ;;  %v2897_v36 = vsel %vm2896_vm8, %v8324_v44, %v2893_v6  ;;  %vm2864_vm10 = vweird.f32 %v8275_v39  ;;  %v2330_v30 = vmul.f32 %v8381_v0, %v2329_v38  ;;  %v8404_v4 = vmax.f32 %v1948_v41, 1e-24  ;;  %v11494_v44 = vld [vmem:[#allocation210_spill] sm:$0xff] }
 0x4a0   : > { %v3146_v2 = vmul.f32 %v3650_v24, %v2897_v36  ;;  %v2863_v35 = vmul.f32 %v8347_v45, %v2862_v5  ;;  %vm2334_vm11 = vweird.f32 %v8322_v20  ;;  %v2339_v31 = vmul.f32 %v8399_v54, %v8344_v46  ;;  %vm2866_vm12 = vmor %vm2864_vm10, %vm2865_vm9  ;;  %v11496_v5 = vld [vmem:[#allocation113_spill] sm:$0xff] }
 0x4a1   : > { %v8411_v1 = vpop.eup %3497  ;;  %v2331_v39 = vmul.f32 0.5, %v2330_v30  ;;  %vm2344_vm13 = vweird.f32 %v8344_v46  ;;  %3501 = vrsqrt.f32 %v8397_v53  ;;  %v1820_v11 = vsel %vm833_vm1, %v11494_v44, %v1757_v62  ;;  %v11497_v30 = vld [vmem:[#allocation33_spill] sm:$0xff] }
 0x4a2   : > { %3242 = vst [vmem:[%s7454_s30 + $0x270] sm:$0xff] %v3146_v2  ;;  %v2867_v13 = vsel %vm2866_vm12, %v8347_v45, %v2863_v35  ;;  %vm2335_vm14 = vweird.f32 %v8381_v0  ;;  %v2340_v29 = vmul.f32 %v8399_v54, %v2339_v31  ;;  %v2979_v63 = vmul.f32 %v8411_v1, %v8369_v27  ;;  %v8432_v45 = vpop.permute.xlu0 %1754 }
 0x4a3   : > { %vm2984_vm15 = vweird.f32 %v8369_v27  ;;  %v3143_v12 = vmul.f32 %v3651_v8, %v2867_v13  ;;  %v2332_v56 = vsub.f32 1.5, %v2331_v39  ;;  %3503 = vrsqrt.f32 %v8404_v4  ;;  %vm2336_vm4 = vmor %vm2334_vm11, %vm2335_vm14  ;;  %v3652_v8 = vld [vmem:[%s3957_s28 + $0xb0] sm:$0xff] }
 0x4a4   : > { %v1884_v6 = vsel %vm833_vm1, %v1757_v62, %v11495_v17  ;;  %v8434_v38 = vpop.eup %3499  ;;  %v2341_v60 = vmul.f32 0.5, %v2340_v29  ;;  %v2980_v41 = vmul.f32 %v8411_v1, %v2979_v63  ;;  %v1917_v36 = vadd.f32 %v1820_v11, %v11496_v5 }
 0x4a5   : > { %v1918_v24 = vadd.f32 %v1884_v6, %v11497_v30  ;;  %3239 = vst [vmem:[%s7454_s30 + $0x258] sm:$0xff] %v3143_v12  ;;  %v2333_v2 = vmul.f32 %v8381_v0, %v2332_v56  ;;  %vm2345_vm2 = vweird.f32 %v8399_v54  ;;  %v2949_v62 = vmul.f32 %v8434_v38, %v8383_v43  ;;  %v1783_v6 = vpop.permute.xlu2 %1782 }
 0x4a6   : > { %vm2954_vm3 = vweird.f32 %v8383_v43  ;;  %v2342_v35 = vsub.f32 1.5, %v2341_v60  ;;  %v2981_v31 = vmul.f32 0.5, %v2980_v41  ;;  %v8449_v39 = vmax.f32 %v1917_v36, 1e-24  ;;  %vm2346_vm7 = vmor %vm2344_vm13, %vm2345_vm2 }
 0x4a7   : > { %v1883_v44 = vsel %vm833_vm1, %v7427_v48, %v8432_v45  ;;  %v8455_v11 = vpop.eup %3501  ;;  %v2337_v13 = vsel %vm2336_vm4, %v8381_v0, %v2333_v2  ;;  %vm2985_vm5 = vweird.f32 %v8411_v1  ;;  %v2950_v29 = vmul.f32 %v8434_v38, %v2949_v62 }
 0x4a8   : > { %v8460_v20 = vmax.f32 %v1918_v24, 1e-24  ;;  %v2343_v63 = vmul.f32 %v8399_v54, %v2342_v35  ;;  %v3090_v12 = vmul.f32 %v3652_v8, %v2337_v13  ;;  %v2982_v56 = vsub.f32 1.5, %v2981_v31  ;;  %v3653_v24 = vld [vmem:[%s3957_s28 + $0xb8] sm:$0xff]  ;;  %vm2986_vm9 = vmor %vm2984_vm15, %vm2985_vm5  ;;  %v11498_v8 = vld [vmem:[#allocation190_spill] sm:$0xff] }
 0x4a9   : > { %v2419_v17 = vmul.f32 %v8455_v11, %v8397_v53  ;;  %vm2424_vm6 = vweird.f32 %v8397_v53  ;;  %v8467_v0 = vpop.eup %3503  ;;  %v2951_v60 = vmul.f32 0.5, %v2950_v29  ;;  %vm2955_vm8 = vweird.f32 %v8434_v38 }
 0x4aa   : > { %3505 = vrsqrt.f32 %v8449_v39  ;;  %v2009_v41 = vadd.f32 %v1883_v44, %v7545_v47  ;;  %v2347_v5 = vsel %vm2346_vm7, %v8399_v54, %v2343_v63  ;;  %3186 = vst [vmem:[%s7454_s30 + $0xb0] sm:$0xff] %v3090_v12  ;;  %v2983_v36 = vmul.f32 %v8411_v1, %v2982_v56  ;;  %v3654_v44 = vld [vmem:[%s3957_s28 + $0x2b8] sm:$0xff]  ;;  %vm2956_vm11 = vmor %vm2954_vm3, %vm2955_vm8  ;;  %v11499_v56 = vld [vmem:[#allocation37_spill] sm:$0xff] }
 0x4ab   : > { %v2420_v30 = vmul.f32 %v8455_v11, %v2419_v17  ;;  %v2429_v46 = vmul.f32 %v8467_v0, %v8404_v4  ;;  %v3091_v2 = vmul.f32 %v3653_v24, %v2347_v5  ;;  %v2952_v47 = vsub.f32 1.5, %v2951_v60  ;;  %v1763_v60 = vpop.permute.xlu1 %1762 }
 0x4ac   : > { %3507 = vrsqrt.f32 %v8460_v20  ;;  %v1833_v54 = vsel %vm833_vm1, %v7877_v22, %v1783_v6  ;;  %v2987_v62 = vsel %vm2986_vm9, %v8411_v1, %v2983_v36  ;;  %vm2425_vm10 = vweird.f32 %v8455_v11 }
 0x4ad   : > { %v2421_v35 = vmul.f32 0.5, %v2420_v30  ;;  %v2430_v31 = vmul.f32 %v8467_v0, %v2429_v46  ;;  %3187 = vst [vmem:[%s7454_s30 + $0xb8] sm:$0xff] %v3091_v2  ;;  %v3155_v13 = vmul.f32 %v3654_v44, %v2987_v62  ;;  %v2953_v27 = vmul.f32 %v8434_v38, %v2952_v47  ;;  %vm2426_vm14 = vmor %vm2424_vm6, %vm2425_vm10  ;;  %v11500_v2 = vld [vmem:[#allocation148_spill] sm:$0xff] }
 0x4ae   : > { %v8497_v29 = vmax.f32 %v2009_v41, 1e-24  ;;  %v1897_v22 = vsel %vm833_vm1, %v1783_v6, %v11466_v26  ;;  %v1956_v12 = vadd.f32 %v1833_v54, %v11498_v8  ;;  %vm2434_vm12 = vweird.f32 %v8404_v4  ;;  %v3655_v26 = vld [vmem:[%s3957_s28 + $0x2a0] sm:$0xff]  ;;  %v11501_v54 = vld [vmem:[#allocation123_spill] sm:$0xff] }
 0x4af   : > { %v2422_v1 = vsub.f32 1.5, %v2421_v35  ;;  %v2431_v63 = vmul.f32 0.5, %v2430_v31  ;;  %v1957_v17 = vadd.f32 %v1897_v22, %v11499_v56  ;;  %3251 = vst [vmem:[%s7454_s30 + $0x2b8] sm:$0xff] %v3155_v13  ;;  %v2957_v41 = vsel %vm2956_vm11, %v8434_v38, %v2953_v27  ;;  %v11502_v13 = vld [vmem:[#allocation26_spill] sm:$0xff]  ;;  %v11503_v27 = vld [vmem:[#allocation11_spill] sm:$0xff]  ;;  %v1761_v56 = vpop.permute.xlu0 %1760 }
 0x4b0   : > { %v8508_v5 = vpop.eup %3505  ;;  %vm2435_vm13 = vweird.f32 %v8467_v0  ;;  %3509 = vrsqrt.f32 %v8497_v29  ;;  %v3152_v43 = vmul.f32 %v3655_v26, %v2957_v41  ;;  %v8525_v38 = vmax.f32 %v1956_v12, 1e-24  ;;  %v11504_v41 = vld [vmem:[#allocation129_spill] sm:$0xff] }
 0x4b1   : > { %v2423_v6 = vmul.f32 %v8455_v11, %v2422_v1  ;;  %v2432_v36 = vsub.f32 1.5, %v2431_v63  ;;  %v2119_v30 = vmul.f32 %v8508_v5, %v8449_v39  ;;  %v8527_v24 = vmax.f32 %v1957_v17, 1e-24  ;;  %vm2436_vm15 = vmor %vm2434_vm12, %vm2435_vm13 }
 0x4b2   : > { %v8519_v46 = vpop.eup %3507  ;;  %v1823_v47 = vsel %vm833_vm1, %v11500_v2, %v1763_v60  ;;  %v1887_v62 = vsel %vm833_vm1, %v1763_v60, %v11501_v54  ;;  %3248 = vst [vmem:[%s7454_s30 + $0x2a0] sm:$0xff] %v3152_v43  ;;  %v8545_v22 = vsel %vm544_vm0, %v11503_v27, %v11502_v13  ;;  %vm2124_vm2 = vweird.f32 %v8449_v39  ;;  %v3657_v60 = vld [vmem:[%s3957_s28 + $0x100] sm:$0xff]  ;;  %v11506_v54 = vld [vmem:[#allocation57_spill] sm:$0xff] }
 0x4b3   : > { %v2427_v35 = vsel %vm2426_vm14, %v8455_v11, %v2423_v6  ;;  %v2433_v31 = vmul.f32 %v8467_v0, %v2432_v36  ;;  %v2120_v53 = vmul.f32 %v8508_v5, %v2119_v30  ;;  %v2129_v44 = vmul.f32 %v8519_v46, %v8460_v20  ;;  %v3656_v11 = vld [vmem:[%s3957_s28 + $0xf8] sm:$0xff]  ;;  %v11505_v43 = vld [vmem:[#allocation36_spill] sm:$0xff] }
 0x4b4   : > { %v3099_v1 = vmul.f32 %v3656_v11, %v2427_v35  ;;  %3511 = vrsqrt.f32 %v8525_v38  ;;  %vm2134_vm3 = vweird.f32 %v8460_v20  ;;  %v1926_v26 = vadd.f32 %v1823_v47, %v11504_v41  ;;  %v11508_v11 = vld [vmem:[#allocation130_spill] sm:$0xff]  ;;  %v3658_v41 = vld [vmem:[%s3957_s28 + $0x8] sm:$0xff] }
 0x4b5   : > { %v2437_v63 = vsel %vm2436_vm15, %v8467_v0, %v2433_v31  ;;  %v2121_v8 = vmul.f32 0.5, %v2120_v53  ;;  %v2130_v12 = vmul.f32 %v8519_v46, %v2129_v44  ;;  %3513 = vrsqrt.f32 %v8527_v24  ;;  %v11507_v31 = vld [vmem:[#allocation27_spill] sm:$0xff]  ;;  %v3659_v20 = vld [vmem:[%s3957_s28 + $0x10] sm:$0xff] }
 0x4b6   : > { %v8557_v17 = vpop.eup %3509  ;;  %v3100_v4 = vmul.f32 %v3657_v60, %v2437_v63  ;;  %3195 = vst [vmem:[%s7454_s30 + $0xf8] sm:$0xff] %v3099_v1  ;;  %v1927_v6 = vadd.f32 %v1887_v62, %v11505_v43  ;;  %vm2125_vm4 = vweird.f32 %v8508_v5  ;;  %vm2135_vm5 = vweird.f32 %v8519_v46  ;;  %v11509_v63 = vld [vmem:[#allocation38_spill] sm:$0xff]  ;;  %v1789_v43 = vpop.permute.xlu2 %1788 }
 0x4b7   : > { %v2122_v36 = vsub.f32 1.5, %v2121_v8  ;;  %v2131_v0 = vmul.f32 0.5, %v2130_v12  ;;  %v3039_v30 = vmul.f32 %v8557_v17, %v8497_v29  ;;  %v8569_v2 = vmax.f32 %v1926_v26, 1e-24  ;;  %vm2126_vm6 = vmor %vm2124_vm2, %vm2125_vm4 }
 0x4b8   : > { %3196 = vst [vmem:[%s7454_s30 + $0x100] sm:$0xff] %v3100_v4  ;;  %v1822_v35 = vsel %vm833_vm1, %v11506_v54, %v1761_v56  ;;  %v1886_v47 = vsel %vm833_vm1, %v1761_v56, %v11507_v31  ;;  %v8579_v13 = vmax.f32 %v1927_v6, 1e-24  ;;  %vm3044_vm7 = vweird.f32 %v8497_v29  ;;  %vm2136_vm8 = vmor %vm2134_vm3, %vm2135_vm5  ;;  %v3660_v29 = vld [vmem:[%s3957_s28 + $0x2e8] sm:$0xff] }
 0x4b9   : > { %v2123_v62 = vmul.f32 %v8508_v5, %v2122_v36  ;;  %v2132_v53 = vsub.f32 1.5, %v2131_v0  ;;  %v3040_v44 = vmul.f32 %v8557_v17, %v3039_v30  ;;  %3515 = vrsqrt.f32 %v8569_v2 }
 0x4ba   : > { %v8581_v27 = vpop.eup %3511  ;;  %v1923_v1 = vadd.f32 %v1822_v35, %v11508_v11  ;;  %v1924_v8 = vadd.f32 %v1886_v47, %v11509_v63  ;;  %vm3045_vm9 = vweird.f32 %v8557_v17  ;;  %vm2514_vm10 = vweird.f32 %v8525_v38 }
 0x4bb   : > { %v8589_v12 = vpop.eup %3513  ;;  %v2127_v56 = vsel %vm2126_vm6, %v8508_v5, %v2123_v62  ;;  %v2133_v60 = vmul.f32 %v8519_v46, %v2132_v53  ;;  %v3041_v4 = vmul.f32 0.5, %v3040_v44  ;;  %v2509_v39 = vmul.f32 %v8581_v27, %v8525_v38  ;;  %vm3046_vm12 = vmor %vm3044_vm7, %vm3045_vm9 }
 0x4bc   : > { %v3069_v26 = vmul.f32 %v3658_v41, %v2127_v56  ;;  %v2519_v5 = vmul.f32 %v8589_v12, %v8527_v24  ;;  %3517 = vrsqrt.f32 %v8579_v13  ;;  %v8610_v35 = vmax.f32 %v1923_v1, 1e-24 }
 0x4bd   : > { %v2137_v6 = vsel %vm2136_vm8, %v8519_v46, %v2133_v60  ;;  %v3042_v36 = vsub.f32 1.5, %v3041_v4  ;;  %v2510_v0 = vmul.f32 %v8581_v27, %v2509_v39  ;;  %v8612_v31 = vmax.f32 %v1924_v8, 1e-24  ;;  %v11510_v60 = vld [vmem:[#allocation220_spill] sm:$0xff]  ;;  %v1769_v39 = vpop.permute.xlu1 %1768 }
 0x4be   : > { %v3070_v30 = vmul.f32 %v3659_v20, %v2137_v6  ;;  %3165 = vst [vmem:[%s7454_s30 + $0x8] sm:$0xff] %v3069_v26  ;;  %v2520_v54 = vmul.f32 %v8589_v12, %v2519_v5  ;;  %vm2524_vm11 = vweird.f32 %v8527_v24  ;;  %v1836_v46 = vsel %vm833_vm1, %v7963_v19, %v1789_v43  ;;  %v11511_v26 = vld [vmem:[#allocation40_spill] sm:$0xff]  ;;  %v3662_v24 = vld [vmem:[%s3957_s28 + $0x148] sm:$0xff] }
 0x4bf   : > { %v3043_v47 = vmul.f32 %v8557_v17, %v3042_v36  ;;  %v2511_v62 = vmul.f32 0.5, %v2510_v0  ;;  %v8619_v53 = vpop.eup %3515  ;;  %vm2515_vm13 = vweird.f32 %v8581_v27  ;;  %3519 = vrsqrt.f32 %v8610_v35 }
 0x4c0   : > { %3166 = vst [vmem:[%s7454_s30 + $0x10] sm:$0xff] %v3070_v30  ;;  %v2521_v44 = vmul.f32 0.5, %v2520_v54  ;;  %v1900_v11 = vsel %vm833_vm1, %v1789_v43, %v11471_v55  ;;  %vm2525_vm14 = vweird.f32 %v8589_v12  ;;  %v2209_v63 = vmul.f32 %v8619_v53, %v8569_v2  ;;  %vm2516_vm2 = vmor %vm2514_vm10, %vm2515_vm13  ;;  %v11512_v30 = vld [vmem:[#allocation139_spill] sm:$0xff] }
 0x4c1   : > { %v3047_v19 = vsel %vm3046_vm12, %v8557_v17, %v3043_v47  ;;  %v2512_v1 = vsub.f32 1.5, %v2511_v62  ;;  %3521 = vrsqrt.f32 %v8612_v31  ;;  %v1965_v4 = vadd.f32 %v1836_v46, %v11510_v60  ;;  %vm2526_vm4 = vmor %vm2524_vm11, %vm2525_vm14  ;;  %v3661_v46 = vld [vmem:[%s3957_s28 + $0x140] sm:$0xff] }
 0x4c2   : > { %v3161_v8 = vmul.f32 %v3660_v29, %v3047_v19  ;;  %v2522_v56 = vsub.f32 1.5, %v2521_v44  ;;  %v8638_v41 = vpop.eup %3517  ;;  %v2210_v17 = vmul.f32 %v8619_v53, %v2209_v63  ;;  %vm2214_vm15 = vweird.f32 %v8569_v2  ;;  %v11513_v63 = vld [vmem:[#allocation30_spill] sm:$0xff] }
 0x4c3   : > { %v2513_v55 = vmul.f32 %v8581_v27, %v2512_v1  ;;  %v1966_v5 = vadd.f32 %v1900_v11, %v11511_v26  ;;  %vm2215_vm3 = vweird.f32 %v8619_v53  ;;  %v2219_v6 = vmul.f32 %v8638_v41, %v8579_v13  ;;  %v11515_v26 = vld [vmem:[#allocation42_spill] sm:$0xff] }
 0x4c4   : > { %3257 = vst [vmem:[%s7454_s30 + $0x2e8] sm:$0xff] %v3161_v8  ;;  %v2523_v43 = vmul.f32 %v8589_v12, %v2522_v56  ;;  %v8653_v36 = vmax.f32 %v1965_v4, 1e-24  ;;  %v2211_v38 = vmul.f32 0.5, %v2210_v17  ;;  %v1826_v54 = vsel %vm833_vm1, %v11512_v30, %v1769_v39  ;;  %vm2216_vm8 = vmor %vm2214_vm15, %vm2215_vm3 }
 0x4c5   : > { %v2517_v0 = vsel %vm2516_vm2, %v8581_v27, %v2513_v55  ;;  %v8660_v20 = vmax.f32 %v1966_v5, 1e-24  ;;  %v8665_v47 = vpop.eup %3519  ;;  %v2220_v44 = vmul.f32 %v8638_v41, %v2219_v6  ;;  %v1890_v29 = vsel %vm833_vm1, %v1769_v39, %v11513_v63  ;;  %v11514_v55 = vld [vmem:[#allocation128_spill] sm:$0xff] }
 0x4c6   : > { %v2527_v62 = vsel %vm2526_vm4, %v8589_v12, %v2523_v43  ;;  %v3108_v27 = vmul.f32 %v3661_v46, %v2517_v0  ;;  %3523 = vrsqrt.f32 %v8653_v36  ;;  %v2212_v19 = vsub.f32 1.5, %v2211_v38  ;;  %v1767_v43 = vpop.permute.xlu0 %1766 }
 0x4c7   : > { %v3109_v11 = vmul.f32 %v3662_v24, %v2527_v62  ;;  %v2179_v1 = vmul.f32 %v8665_v47, %v8610_v35  ;;  %v8677_v8 = vpop.eup %3521  ;;  %v2221_v12 = vmul.f32 0.5, %v2220_v44  ;;  %vm2224_vm5 = vweird.f32 %v8579_v13  ;;  %v3663_v62 = vld [vmem:[%s3957_s28 + $0x50] sm:$0xff] }
 0x4c8   : > { %3204 = vst [vmem:[%s7454_s30 + $0x140] sm:$0xff] %v3108_v27  ;;  %vm2184_vm6 = vweird.f32 %v8610_v35  ;;  %3525 = vrsqrt.f32 %v8660_v20  ;;  %v2213_v56 = vmul.f32 %v8619_v53, %v2212_v19  ;;  %v2189_v4 = vmul.f32 %v8677_v8, %v8612_v31  ;;  %v11517_v13 = vld [vmem:[#allocation198_spill] sm:$0xff] }
 0x4c9   : > { %3205 = vst [vmem:[%s7454_s30 + $0x148] sm:$0xff] %v3109_v11  ;;  %v2180_v60 = vmul.f32 %v8665_v47, %v2179_v1  ;;  %vm2194_vm7 = vweird.f32 %v8612_v31  ;;  %v2222_v39 = vsub.f32 1.5, %v2221_v12  ;;  %vm2225_vm9 = vweird.f32 %v8638_v41  ;;  %v11516_v11 = vld [vmem:[#allocation230_spill] sm:$0xff]  ;;  %v3664_v12 = vld [vmem:[%s3957_s28 + $0x58] sm:$0xff] }
 0x4ca   : > { %v1935_v17 = vadd.f32 %v1826_v54, %v11514_v55  ;;  %v1936_v5 = vadd.f32 %v1890_v29, %v11515_v26  ;;  %v2217_v6 = vsel %vm2216_vm8, %v8619_v53, %v2213_v56  ;;  %vm2185_vm10 = vweird.f32 %v8665_v47  ;;  %vm2226_vm11 = vmor %vm2224_vm5, %vm2225_vm9  ;;  %v1795_v55 = vpop.permute.xlu2 %1794 }
 0x4cb   : > { %v2181_v0 = vmul.f32 0.5, %v2180_v60  ;;  %v2190_v38 = vmul.f32 %v8677_v8, %v2189_v4  ;;  %v2223_v2 = vmul.f32 %v8638_v41, %v2222_v39  ;;  %v3078_v46 = vmul.f32 %v3663_v62, %v2217_v6  ;;  %vm2186_vm13 = vmor %vm2184_vm6, %vm2185_vm10 }
 0x4cc   : > { %v8699_v30 = vpop.eup %3523  ;;  %v8703_v27 = vmax.f32 %v1935_v17, 1e-24  ;;  %v8705_v54 = vmax.f32 %v1936_v5, 1e-24  ;;  %v1825_v19 = vsel %vm833_vm1, %v11516_v11, %v1767_v43  ;;  %vm2195_vm12 = vweird.f32 %v8677_v8  ;;  %v11518_v17 = vld [vmem:[#allocation138_spill] sm:$0xff] }
 0x4cd   : > { %v2182_v53 = vsub.f32 1.5, %v2181_v0  ;;  %v2191_v44 = vmul.f32 0.5, %v2190_v38  ;;  %v2599_v24 = vmul.f32 %v8699_v30, %v8653_v36  ;;  %v2227_v63 = vsel %vm2226_vm11, %v8638_v41, %v2223_v2  ;;  %3174 = vst [vmem:[%s7454_s30 + $0x50] sm:$0xff] %v3078_v46  ;;  %v11519_v0 = vld [vmem:[#allocation45_spill] sm:$0xff]  ;;  %vm2196_vm15 = vmor %vm2194_vm7, %vm2195_vm12  ;;  %v3665_v38 = vld [vmem:[%s3957_s28 + $0x38] sm:$0xff] }
 0x4ce   : > { %v8714_v1 = vpop.eup %3525  ;;  %3527 = vrsqrt.f32 %v8703_v27  ;;  %v1889_v29 = vsel %vm833_vm1, %v1767_v43, %v11517_v13  ;;  %v3079_v56 = vmul.f32 %v3664_v12, %v2227_v63  ;;  %vm2605_vm14 = vweird.f32 %v8699_v30 }
 0x4cf   : > { %v2183_v60 = vmul.f32 %v8665_v47, %v2182_v53  ;;  %v2192_v4 = vsub.f32 1.5, %v2191_v44  ;;  %v2600_v39 = vmul.f32 %v8699_v30, %v2599_v24  ;;  %v2609_v41 = vmul.f32 %v8714_v1, %v8660_v20 }
 0x4d0   : > { %3529 = vrsqrt.f32 %v8705_v54  ;;  %v1932_v26 = vadd.f32 %v1825_v19, %v11518_v17  ;;  %3175 = vst [vmem:[%s7454_s30 + $0x58] sm:$0xff] %v3079_v56  ;;  %v1933_v35 = vadd.f32 %v1889_v29, %v11519_v0  ;;  %v1903_v31 = vsel %vm833_vm1, %v1795_v55, %v11476_v10  ;;  %v3666_v19 = vld [vmem:[%s3957_s28 + $0x40] sm:$0xff]  ;;  %v11521_v56 = vld [vmem:[#allocation227_spill] sm:$0xff] }
 0x4d1   : > { %v2187_v5 = vsel %vm2186_vm13, %v8665_v47, %v2183_v60  ;;  %v2193_v43 = vmul.f32 %v8677_v8, %v2192_v4  ;;  %v2601_v6 = vmul.f32 0.5, %v2600_v39  ;;  %v2610_v62 = vmul.f32 %v8714_v1, %v2609_v41  ;;  %v11520_v29 = vld [vmem:[#allocation140_spill] sm:$0xff]  ;;  %v1775_v41 = vpop.permute.xlu1 %1774 }
 0x4d2   : > { %v3075_v2 = vmul.f32 %v3665_v38, %v2187_v5  ;;  %v8745_v46 = vmax.f32 %v1932_v26, 1e-24  ;;  %v1839_v47 = vsel %vm833_vm1, %v8045_v28, %v1795_v55  ;;  %v8751_v24 = vmax.f32 %v1933_v35, 1e-24  ;;  %v3667_v26 = vld [vmem:[%s3957_s28 + $0x188] sm:$0xff] }
 0x4d3   : > { %v2197_v53 = vsel %vm2196_vm15, %v8677_v8, %v2193_v43  ;;  %v2602_v44 = vsub.f32 1.5, %v2601_v6  ;;  %vm2604_vm2 = vweird.f32 %v8653_v36  ;;  %v2611_v13 = vmul.f32 0.5, %v2610_v62  ;;  %v11523_v62 = vld [vmem:[#allocation182_spill] sm:$0xff] }
 0x4d4   : > { %v8756_v11 = vpop.eup %3527  ;;  %v3076_v63 = vmul.f32 %v3666_v19, %v2197_v53  ;;  %3171 = vst [vmem:[%s7454_s30 + $0x38] sm:$0xff] %v3075_v2  ;;  %3531 = vrsqrt.f32 %v8745_v46  ;;  %vm2614_vm3 = vweird.f32 %v8660_v20  ;;  %vm2606_vm4 = vmor %vm2604_vm2, %vm2605_vm14  ;;  %vm2615_vm5 = vweird.f32 %v8714_v1  ;;  %v11522_v2 = vld [vmem:[#allocation125_spill] sm:$0xff] }
 0x4d5   : > { %v2603_v28 = vmul.f32 %v8699_v30, %v2602_v44  ;;  %v2299_v8 = vmul.f32 %v8756_v11, %v8703_v27  ;;  %3533 = vrsqrt.f32 %v8751_v24  ;;  %v2612_v36 = vsub.f32 1.5, %v2611_v13  ;;  %vm2616_vm7 = vmor %vm2614_vm3, %vm2615_vm5  ;;  %v3668_v44 = vld [vmem:[%s3957_s28 + $0x190] sm:$0xff]  ;;  %v1773_v13 = vpop.permute.xlu0 %1772 }
 0x4d6   : > { %v8767_v10 = vpop.eup %3529  ;;  %3172 = vst [vmem:[%s7454_s30 + $0x40] sm:$0xff] %v3076_v63  ;;  %v1974_v12 = vadd.f32 %v1839_v47, %v11520_v29  ;;  %v1975_v60 = vadd.f32 %v1903_v31, %v11521_v56  ;;  %vm2304_vm6 = vweird.f32 %v8703_v27  ;;  %vm2305_vm8 = vweird.f32 %v8756_v11 }
 0x4d7   : > { %v2607_v4 = vsel %vm2606_vm4, %v8699_v30, %v2603_v28  ;;  %v2300_v39 = vmul.f32 %v8756_v11, %v2299_v8  ;;  %v2309_v55 = vmul.f32 %v8767_v10, %v8705_v54  ;;  %v2613_v17 = vmul.f32 %v8714_v1, %v2612_v36  ;;  %vm2306_vm12 = vmor %vm2304_vm6, %vm2305_vm8 }
 0x4d8   : > { %v3117_v5 = vmul.f32 %v3667_v26, %v2607_v4  ;;  %v8782_v43 = vmax.f32 %v1974_v12, 1e-24  ;;  %v8784_v6 = vmax.f32 %v1975_v60, 1e-24  ;;  %vm2314_vm9 = vweird.f32 %v8705_v54  ;;  %v11524_v12 = vld [vmem:[#allocation204_spill] sm:$0xff] }
 0x4d9   : > { %v2301_v30 = vmul.f32 0.5, %v2300_v39  ;;  %v2310_v0 = vmul.f32 %v8767_v10, %v2309_v55  ;;  %v2617_v38 = vsel %vm2616_vm7, %v8714_v1, %v2613_v17  ;;  %v1829_v20 = vsel %vm833_vm1, %v11522_v2, %v1775_v41  ;;  %v11525_v4 = vld [vmem:[#allocation224_spill] sm:$0xff] }
 0x4da   : > { %v8791_v35 = vpop.eup %3531  ;;  %3213 = vst [vmem:[%s7454_s30 + $0x188] sm:$0xff] %v3117_v5  ;;  %3535 = vrsqrt.f32 %v8782_v43  ;;  %v1893_v47 = vsel %vm833_vm1, %v1775_v41, %v11523_v62  ;;  %v3118_v31 = vmul.f32 %v3668_v44, %v2617_v38  ;;  %vm2315_vm10 = vweird.f32 %v8767_v10  ;;  %v11527_v44 = vld [vmem:[#allocation102_spill] sm:$0xff] }
 0x4db   : > { %v8802_v53 = vpop.eup %3533  ;;  %v2302_v19 = vsub.f32 1.5, %v2301_v30  ;;  %v2311_v63 = vmul.f32 0.5, %v2310_v0  ;;  %v2269_v1 = vmul.f32 %v8791_v35, %v8745_v46  ;;  %vm2274_vm11 = vweird.f32 %v8745_v46  ;;  %vm2316_vm14 = vmor %vm2314_vm9, %vm2315_vm10  ;;  %v3669_v30 = vld [vmem:[%s3957_s28 + $0x98] sm:$0xff] }
 0x4dc   : > { %v2279_v28 = vmul.f32 %v8802_v53, %v8751_v24  ;;  %3537 = vrsqrt.f32 %v8784_v6  ;;  %3214 = vst [vmem:[%s7454_s30 + $0x190] sm:$0xff] %v3118_v31  ;;  %v1944_v56 = vadd.f32 %v1829_v20, %v11524_v12  ;;  %vm2275_vm13 = vweird.f32 %v8791_v35 }
 0x4dd   : > { %v2303_v8 = vmul.f32 %v8756_v11, %v2302_v19  ;;  %v2312_v36 = vsub.f32 1.5, %v2311_v63  ;;  %v2270_v29 = vmul.f32 %v8791_v35, %v2269_v1  ;;  %v1945_v39 = vadd.f32 %v1893_v47, %v11525_v4  ;;  %v3670_v19 = vld [vmem:[%s3957_s28 + $0xa0] sm:$0xff]  ;;  %vm2276_vm3 = vmor %vm2274_vm11, %vm2275_vm13 }
 0x4de   : > { %v2280_v60 = vmul.f32 %v8802_v53, %v2279_v28  ;;  %v1828_v55 = vsel %vm833_vm1, %v7704_v40, %v1773_v13  ;;  %v8828_v5 = vmax.f32 %v1944_v56, 1e-24  ;;  %vm2285_vm15 = vweird.f32 %v8802_v53 }
 0x4df   : > { %v2307_v41 = vsel %vm2306_vm12, %v8756_v11, %v2303_v8  ;;  %v2313_v17 = vmul.f32 %v8767_v10, %v2312_v36  ;;  %v2271_v26 = vmul.f32 0.5, %v2270_v29  ;;  %v8837_v40 = vmax.f32 %v1945_v39, 1e-24  ;;  %v11526_v11 = vld [vmem:[#allocation171_spill] sm:$0xff]  ;;  %v1801_v8 = vpop.permute.xlu2 %1800  ;;  %v3671_v39 = vld [vmem:[%s3957_s28 + $0x80] sm:$0xff] }
 0x4e0   : > { %v8830_v27 = vpop.eup %3535  ;;  %v3087_v0 = vmul.f32 %v3669_v30, %v2307_v41  ;;  %v2281_v38 = vmul.f32 0.5, %v2280_v60  ;;  %v1892_v2 = vsel %vm833_vm1, %v1773_v13, %v11526_v11  ;;  %v1941_v31 = vadd.f32 %v1828_v55, %v11527_v44 }
 0x4e1   : > { %v2317_v20 = vsel %vm2316_vm14, %v8767_v10, %v2313_v17  ;;  %v2272_v62 = vsub.f32 1.5, %v2271_v26  ;;  %v2689_v47 = vmul.f32 %v8830_v27, %v8782_v43  ;;  %3539 = vrsqrt.f32 %v8828_v5  ;;  %v3672_v26 = vld [vmem:[%s3957_s28 + $0x88] sm:$0xff] }
 0x4e2   : > { %v8846_v54 = vpop.eup %3537  ;;  %v3088_v63 = vmul.f32 %v3670_v19, %v2317_v20  ;;  %3183 = vst [vmem:[%s7454_s30 + $0x98] sm:$0xff] %v3087_v0  ;;  %v2282_v1 = vsub.f32 1.5, %v2281_v38  ;;  %vm2284_vm2 = vweird.f32 %v8751_v24  ;;  %vm2695_vm4 = vweird.f32 %v8830_v27  ;;  %v11528_v24 = vld [vmem:[#allocation78_spill] sm:$0xff]  ;;  %v1781_v38 = vpop.permute.xlu1 %1780  ;;  %v11532_v19 = vld [vmem:[#allocation85_spill] sm:$0xff] }
 0x4e3   : > { %v2273_v13 = vmul.f32 %v8791_v35, %v2272_v62  ;;  %v2690_v10 = vmul.f32 %v8830_v27, %v2689_v47  ;;  %v2699_v28 = vmul.f32 %v8846_v54, %v8784_v6  ;;  %3541 = vrsqrt.f32 %v8837_v40  ;;  %vm2286_vm5 = vmor %vm2284_vm2, %vm2285_vm15 }
 0x4e4   : > { %3184 = vst [vmem:[%s7454_s30 + $0xa0] sm:$0xff] %v3088_v63  ;;  %v2283_v36 = vmul.f32 %v8802_v53, %v2282_v1  ;;  %v1942_v29 = vadd.f32 %v1892_v2, %v11528_v24  ;;  %v8868_v4 = vmax.f32 %v1941_v31, 1e-24  ;;  %v1842_v17 = vsel %vm833_vm1, %v8129_v37, %v1801_v8 }
 0x4e5   : > { %v2277_v12 = vsel %vm2276_vm3, %v8791_v35, %v2273_v13  ;;  %v2691_v56 = vmul.f32 0.5, %v2690_v10  ;;  %v2700_v60 = vmul.f32 %v8846_v54, %v2699_v28  ;;  %vm2694_vm6 = vweird.f32 %v8782_v43  ;;  %v11530_v43 = vld [vmem:[#allocation191_spill] sm:$0xff] }
 0x4e6   : > { %v2287_v46 = vsel %vm2286_vm5, %v8802_v53, %v2283_v36  ;;  %v3084_v55 = vmul.f32 %v3671_v39, %v2277_v12  ;;  %v8872_v41 = vmax.f32 %v1942_v29, 1e-24  ;;  %3543 = vrsqrt.f32 %v8868_v4  ;;  %v11529_v53 = vld [vmem:[#allocation94_spill] sm:$0xff]  ;;  %vm2696_vm8 = vmor %vm2694_vm6, %vm2695_vm4 }
 0x4e7   : > { %v3085_v35 = vmul.f32 %v3672_v26, %v2287_v46  ;;  %v2692_v30 = vsub.f32 1.5, %v2691_v56  ;;  %v2701_v0 = vmul.f32 0.5, %v2700_v60  ;;  %v8879_v11 = vpop.eup %3539  ;;  %v8885_v2 = vsel %vm544_vm0, %v11529_v53, %v11459_v18  ;;  %v11533_v60 = vld [vmem:[#allocation149_spill] sm:$0xff] }
 0x4e8   : > { %3180 = vst [vmem:[%s7454_s30 + $0x80] sm:$0xff] %v3084_v55  ;;  %3545 = vrsqrt.f32 %v8872_v41  ;;  %v1906_v37 = vsel %vm833_vm1, %v1801_v8, %v11481_v15  ;;  %vm2705_vm7 = vweird.f32 %v8846_v54  ;;  %v2389_v18 = vmul.f32 %v8879_v11, %v8828_v5  ;;  %v11531_v15 = vld [vmem:[#allocation233_spill] sm:$0xff]  ;;  %v3674_v55 = vld [vmem:[%s3957_s28 + $0x1d8] sm:$0xff] }
 0x4e9   : > { %3181 = vst [vmem:[%s7454_s30 + $0x88] sm:$0xff] %v3085_v35  ;;  %v2693_v20 = vmul.f32 %v8830_v27, %v2692_v30  ;;  %v2702_v62 = vsub.f32 1.5, %v2701_v0  ;;  %v8898_v47 = vpop.eup %3541  ;;  %vm2704_vm9 = vweird.f32 %v8784_v6  ;;  %v1983_v44 = vadd.f32 %v1842_v17, %v11530_v43  ;;  %v3673_v6 = vld [vmem:[%s3957_s28 + $0x1d0] sm:$0xff]  ;;  %v11534_v35 = vld [vmem:[#allocation115_spill] sm:$0xff] }
 0x4ea   : > { %v1984_v31 = vadd.f32 %v1906_v37, %v11531_v15  ;;  %v1832_v63 = vsel %vm833_vm1, %v11532_v19, %v1781_v38  ;;  %v2390_v10 = vmul.f32 %v8879_v11, %v2389_v18  ;;  %v2399_v28 = vmul.f32 %v8898_v47, %v8837_v40  ;;  %vm2706_vm10 = vmor %vm2704_vm9, %vm2705_vm7  ;;  %v11535_v18 = vld [vmem:[#allocation119_spill] sm:$0xff] }
 0x4eb   : > { %v2697_v1 = vsel %vm2696_vm8, %v8830_v27, %v2693_v20  ;;  %v2703_v13 = vmul.f32 %v8846_v54, %v2702_v62  ;;  %vm2394_vm11 = vweird.f32 %v8828_v5  ;;  %v8915_v36 = vmax.f32 %v1983_v44, 1e-24  ;;  %v1779_v44 = vpop.permute.xlu0 %1778  ;;  %v3675_v5 = vld [vmem:[%s3957_s28 + $0xe0] sm:$0xff] }
 0x4ec   : > { %v3126_v8 = vmul.f32 %v3673_v6, %v2697_v1  ;;  %v8917_v24 = vmax.f32 %v1984_v31, 1e-24  ;;  %v8919_v29 = vpop.eup %3543  ;;  %v2391_v12 = vmul.f32 0.5, %v2390_v10  ;;  %v2400_v56 = vmul.f32 %v8898_v47, %v2399_v28 }
 0x4ed   : > { %v2707_v27 = vsel %vm2706_vm10, %v8846_v54, %v2703_v13  ;;  %v1896_v46 = vsel %vm833_vm1, %v1781_v38, %v11533_v60  ;;  %v2359_v26 = vmul.f32 %v8919_v29, %v8868_v4  ;;  %3547 = vrsqrt.f32 %v8915_v36 }
 0x4ee   : > { %v8926_v39 = vpop.eup %3545  ;;  %v3127_v17 = vmul.f32 %v3674_v55, %v2707_v27  ;;  %3222 = vst [vmem:[%s7454_s30 + $0x1d0] sm:$0xff] %v3126_v8  ;;  %v1953_v30 = vadd.f32 %v1832_v63, %v11534_v35  ;;  %v2392_v54 = vsub.f32 1.5, %v2391_v12  ;;  %vm2395_vm12 = vweird.f32 %v8879_v11 }
 0x4ef   : > { %v2401_v0 = vmul.f32 0.5, %v2400_v56  ;;  %v2369_v53 = vmul.f32 %v8926_v39, %v8872_v41  ;;  %vm2404_vm13 = vweird.f32 %v8837_v40  ;;  %vm2405_vm14 = vweird.f32 %v8898_v47  ;;  %vm2396_vm15 = vmor %vm2394_vm11, %vm2395_vm12  ;;  %v1807_v56 = vpop.permute.xlu2 %1806 }
 0x4f0   : > { %3223 = vst [vmem:[%s7454_s30 + $0x1d8] sm:$0xff] %v3127_v17  ;;  %v2360_v38 = vmul.f32 %v8919_v29, %v2359_v26  ;;  %3549 = vrsqrt.f32 %v8917_v24  ;;  %v2393_v37 = vmul.f32 %v8879_v11, %v2392_v54  ;;  %v1954_v43 = vadd.f32 %v1896_v46, %v11535_v18  ;;  %vm2406_vm4 = vmor %vm2404_vm13, %vm2405_vm14  ;;  %v3676_v46 = vld [vmem:[%s3957_s28 + $0xe8] sm:$0xff] }
 0x4f1   : > { %v2402_v20 = vsub.f32 1.5, %v2401_v0  ;;  %v2370_v62 = vmul.f32 %v8926_v39, %v2369_v53  ;;  %vm2365_vm2 = vweird.f32 %v8919_v29  ;;  %vm2375_vm3 = vweird.f32 %v8926_v39  ;;  %v3677_v53 = vld [vmem:[%s3957_s28 + $0xc8] sm:$0xff] }
 0x4f2   : > { %v2361_v15 = vmul.f32 0.5, %v2360_v38  ;;  %v8949_v31 = vmax.f32 %v1953_v30, 1e-24  ;;  %v2397_v19 = vsel %vm2396_vm15, %v8879_v11, %v2393_v37  ;;  %v8953_v13 = vmax.f32 %v1954_v43, 1e-24  ;;  %v11537_v30 = vld [vmem:[#allocation79_spill] sm:$0xff] }
 0x4f3   : > { %v2403_v63 = vmul.f32 %v8898_v47, %v2402_v20  ;;  %v2371_v1 = vmul.f32 0.5, %v2370_v62  ;;  %v8955_v10 = vpop.eup %3547  ;;  %v3096_v28 = vmul.f32 %v3675_v5, %v2397_v19  ;;  %v1831_v11 = vsel %vm833_vm1, %v7776_v42, %v1779_v44  ;;  %v3678_v62 = vld [vmem:[%s3957_s28 + $0xd0] sm:$0xff] }
 0x4f4   : > { %v2362_v6 = vsub.f32 1.5, %v2361_v15  ;;  %3551 = vrsqrt.f32 %v8949_v31  ;;  %v2779_v12 = vmul.f32 %v8955_v10, %v8915_v36  ;;  %v1895_v40 = vsel %vm833_vm1, %v1779_v44, %v11455_v16 }
 0x4f5   : > { %v2407_v8 = vsel %vm2406_vm4, %v8898_v47, %v2403_v63  ;;  %v2372_v27 = vsub.f32 1.5, %v2371_v1  ;;  %3192 = vst [vmem:[%s7454_s30 + $0xe0] sm:$0xff] %v3096_v28  ;;  %vm2364_vm5 = vweird.f32 %v8868_v4  ;;  %3553 = vrsqrt.f32 %v8953_v13  ;;  %v11536_v4 = vld [vmem:[#allocation121_spill] sm:$0xff]  ;;  %v11538_v1 = vld [vmem:[#allocation114_spill] sm:$0xff] }
 0x4f6   : > { %v8972_v60 = vpop.eup %3549  ;;  %v3097_v55 = vmul.f32 %v3676_v46, %v2407_v8  ;;  %v2363_v42 = vmul.f32 %v8919_v29, %v2362_v6  ;;  %vm2366_vm6 = vmor %vm2364_vm5, %vm2365_vm2  ;;  %vm2374_vm7 = vweird.f32 %v8872_v41  ;;  %v2780_v16 = vmul.f32 %v8955_v10, %v2779_v12  ;;  %v1787_v12 = vpop.permute.xlu1 %1786 }
 0x4f7   : > { %v2373_v47 = vmul.f32 %v8926_v39, %v2372_v27  ;;  %v2789_v17 = vmul.f32 %v8972_v60, %v8917_v24  ;;  %vm2376_vm8 = vmor %vm2374_vm7, %vm2375_vm3  ;;  %v1950_v35 = vadd.f32 %v1831_v11, %v11536_v4  ;;  %v1951_v54 = vadd.f32 %v1895_v40, %v11537_v30  ;;  %v3680_v30 = vld [vmem:[%s3957_s28 + $0x220] sm:$0xff] }
 0x4f8   : > { %3193 = vst [vmem:[%s7454_s30 + $0xe8] sm:$0xff] %v3097_v55  ;;  %v2367_v26 = vsel %vm2366_vm6, %v8919_v29, %v2363_v42  ;;  %v1845_v41 = vsel %vm833_vm1, %v8203_v32, %v1807_v56  ;;  %v2781_v37 = vmul.f32 0.5, %v2780_v16  ;;  %vm2785_vm9 = vweird.f32 %v8955_v10 }
 0x4f9   : > { %v2377_v0 = vsel %vm2376_vm8, %v8926_v39, %v2373_v47  ;;  %v3093_v38 = vmul.f32 %v3677_v53, %v2367_v26  ;;  %v2790_v29 = vmul.f32 %v8972_v60, %v2789_v17  ;;  %v9002_v43 = vmax.f32 %v1950_v35, 1e-24  ;;  %v11540_v26 = vld [vmem:[#allocation226_spill] sm:$0xff] }
 0x4fa   : > { %v8998_v20 = vpop.eup %3551  ;;  %v3094_v18 = vmul.f32 %v3678_v62, %v2377_v0  ;;  %v9004_v44 = vmax.f32 %v1951_v54, 1e-24  ;;  %v2782_v32 = vsub.f32 1.5, %v2781_v37  ;;  %v1909_v19 = vsel %vm833_vm1, %v1807_v56, %v11487_v51  ;;  %v1785_v37 = vpop.permute.xlu0 %1784 }
 0x4fb   : > { %3189 = vst [vmem:[%s7454_s30 + $0xc8] sm:$0xff] %v3093_v38  ;;  %v2791_v15 = vmul.f32 0.5, %v2790_v29  ;;  %v2479_v39 = vmul.f32 %v8998_v20, %v8949_v31  ;;  %v9012_v63 = vpop.eup %3553  ;;  %vm2784_vm10 = vweird.f32 %v8915_v36  ;;  %vm2795_vm11 = vweird.f32 %v8972_v60  ;;  %v11539_v36 = vld [vmem:[#allocation51_spill] sm:$0xff] }
 0x4fc   : > { %3190 = vst [vmem:[%s7454_s30 + $0xd0] sm:$0xff] %v3094_v18  ;;  %3555 = vrsqrt.f32 %v9002_v43  ;;  %v1992_v5 = vadd.f32 %v1845_v41, %v11538_v1  ;;  %v2783_v28 = vmul.f32 %v8955_v10, %v2782_v32  ;;  %v2489_v51 = vmul.f32 %v9012_v63, %v8953_v13  ;;  %vm2786_vm12 = vmor %vm2784_vm10, %vm2785_vm9  ;;  %v11541_v41 = vld [vmem:[#allocation216_spill] sm:$0xff]  ;;  %v11543_v18 = vld [vmem:[#allocation59_spill] sm:$0xff] }
 0x4fd   : > { %v2792_v6 = vsub.f32 1.5, %v2791_v15  ;;  %v2480_v11 = vmul.f32 %v8998_v20, %v2479_v39  ;;  %vm2794_vm13 = vweird.f32 %v8917_v24  ;;  %3557 = vrsqrt.f32 %v9004_v44  ;;  %v3679_v24 = vld [vmem:[%s3957_s28 + $0x218] sm:$0xff] }
 0x4fe   : > { %v1993_v8 = vadd.f32 %v1909_v19, %v11539_v36  ;;  %v9028_v27 = vmax.f32 %v1992_v5, 1e-24  ;;  %v2787_v40 = vsel %vm2786_vm12, %v8955_v10, %v2783_v28  ;;  %v2490_v55 = vmul.f32 %v9012_v63, %v2489_v51  ;;  %vm2796_vm14 = vmor %vm2794_vm13, %vm2795_vm11  ;;  %v3681_v5 = vld [vmem:[%s3957_s28 + $0x128] sm:$0xff] }
 0x4ff   : > { %v2793_v56 = vmul.f32 %v8972_v60, %v2792_v6  ;;  %v2481_v46 = vmul.f32 0.5, %v2480_v11  ;;  %v3135_v42 = vmul.f32 %v3679_v24, %v2787_v40  ;;  %vm2485_vm15 = vweird.f32 %v8998_v20 }
 0x500   : > { %v9037_v47 = vmax.f32 %v1993_v8, 1e-24  ;;  %3559 = vrsqrt.f32 %v9028_v27  ;;  %v2491_v17 = vmul.f32 0.5, %v2490_v55  ;;  %v1835_v4 = vsel %vm833_vm1, %v11540_v26, %v1787_v12 }
 0x501   : > { %v2797_v16 = vsel %vm2796_vm14, %v8972_v60, %v2793_v56  ;;  %v2482_v10 = vsub.f32 1.5, %v2481_v46  ;;  %3231 = vst [vmem:[%s7454_s30 + $0x218] sm:$0xff] %v3135_v42  ;;  %vm2484_vm2 = vweird.f32 %v8949_v31  ;;  %v1899_v60 = vsel %vm833_vm1, %v1787_v12, %v11541_v41  ;;  %v11542_v31 = vld [vmem:[#allocation185_spill] sm:$0xff]  ;;  %v3682_v56 = vld [vmem:[%s3957_s28 + $0x130] sm:$0xff] }
 0x502   : > { %v9044_v35 = vpop.eup %3555  ;;  %v3136_v54 = vmul.f32 %v3680_v30, %v2797_v16  ;;  %3561 = vrsqrt.f32 %v9037_v47  ;;  %v2492_v53 = vsub.f32 1.5, %v2491_v17  ;;  %vm2495_vm3 = vweird.f32 %v9012_v63  ;;  %vm2486_vm4 = vmor %vm2484_vm2, %vm2485_vm15  ;;  %v1813_v16 = vpop.permute.xlu2 %1812 }
 0x503   : > { %v2483_v0 = vmul.f32 %v8998_v20, %v2482_v10  ;;  %v2449_v38 = vmul.f32 %v9044_v35, %v9002_v43  ;;  %v9057_v29 = vpop.eup %3557  ;;  %vm2494_vm5 = vweird.f32 %v8953_v13  ;;  %vm2454_vm6 = vweird.f32 %v9002_v43  ;;  %v11544_v10 = vld [vmem:[#allocation188_spill] sm:$0xff] }
 0x504   : > { %3232 = vst [vmem:[%s7454_s30 + $0x220] sm:$0xff] %v3136_v54  ;;  %v1962_v62 = vadd.f32 %v1835_v4, %v11542_v31  ;;  %v1963_v32 = vadd.f32 %v1899_v60, %v11543_v18  ;;  %v2493_v39 = vmul.f32 %v9012_v63, %v2492_v53  ;;  %v2459_v1 = vmul.f32 %v9057_v29, %v9004_v44  ;;  %vm2496_vm8 = vmor %vm2494_vm5, %vm2495_vm3  ;;  %v11545_v54 = vld [vmem:[#allocation46_spill] sm:$0xff] }
 0x505   : > { %v2487_v15 = vsel %vm2486_vm4, %v8998_v20, %v2483_v0  ;;  %v2450_v19 = vmul.f32 %v9044_v35, %v2449_v38  ;;  %vm2464_vm7 = vweird.f32 %v9004_v44  ;;  %v1834_v11 = vsel %vm833_vm1, %v7833_v33, %v1785_v37 }
 0x506   : > { %v9072_v13 = vpop.eup %3559  ;;  %v3105_v28 = vmul.f32 %v3681_v5, %v2487_v15  ;;  %v9077_v6 = vmax.f32 %v1962_v62, 1e-24  ;;  %v9079_v20 = vmax.f32 %v1963_v32, 1e-24  ;;  %v2497_v51 = vsel %vm2496_vm8, %v9012_v63, %v2493_v39  ;;  %v3683_v62 = vld [vmem:[%s3957_s28 + $0x110] sm:$0xff]  ;;  %v3684_v5 = vld [vmem:[%s3957_s28 + $0x118] sm:$0xff] }
 0x507   : > { %v2451_v36 = vmul.f32 0.5, %v2450_v19  ;;  %v2460_v8 = vmul.f32 %v9057_v29, %v2459_v1  ;;  %v2869_v12 = vmul.f32 %v9072_v13, %v9028_v27  ;;  %vm2874_vm9 = vweird.f32 %v9028_v27 }
 0x508   : > { %v9089_v40 = vpop.eup %3561  ;;  %v3106_v46 = vmul.f32 %v3682_v56, %v2497_v51  ;;  %3201 = vst [vmem:[%s7454_s30 + $0x128] sm:$0xff] %v3105_v28  ;;  %vm2455_vm10 = vweird.f32 %v9044_v35  ;;  %3563 = vrsqrt.f32 %v9077_v6  ;;  %v1898_v33 = vsel %vm833_vm1, %v1785_v37, %v11463_v58 }
 0x509   : > { %v2452_v63 = vsub.f32 1.5, %v2451_v36  ;;  %v2461_v55 = vmul.f32 0.5, %v2460_v8  ;;  %v2870_v24 = vmul.f32 %v9072_v13, %v2869_v12  ;;  %v2879_v42 = vmul.f32 %v9089_v40, %v9037_v47  ;;  %vm2456_vm13 = vmor %vm2454_vm6, %vm2455_vm10  ;;  %v11547_v8 = vld [vmem:[#allocation56_spill] sm:$0xff] }
 0x50a   : > { %3202 = vst [vmem:[%s7454_s30 + $0x130] sm:$0xff] %v3106_v46  ;;  %vm2465_vm11 = vweird.f32 %v9057_v29  ;;  %vm2875_vm12 = vweird.f32 %v9072_v13  ;;  %3565 = vrsqrt.f32 %v9079_v20  ;;  %v1959_v17 = vadd.f32 %v1834_v11, %v11544_v10 }
 0x50b   : > { %v2453_v58 = vmul.f32 %v9044_v35, %v2452_v63  ;;  %v2462_v26 = vsub.f32 1.5, %v2461_v55  ;;  %v2871_v4 = vmul.f32 0.5, %v2870_v24  ;;  %v2880_v30 = vmul.f32 %v9089_v40, %v2879_v42  ;;  %vm2466_vm15 = vmor %vm2464_vm7, %vm2465_vm11  ;;  %v11548_v63 = vld [vmem:[#allocation53_spill] sm:$0xff] }
 0x50c   : > { %vm2885_vm14 = vweird.f32 %v9089_v40  ;;  %v1960_v41 = vadd.f32 %v1898_v33, %v11545_v54  ;;  %v9114_v60 = vmax.f32 %v1959_v17, 1e-24  ;;  %v1848_v0 = vsel %vm833_vm1, %v8333_v3, %v1813_v16  ;;  %vm2876_vm2 = vmor %vm2874_vm9, %vm2875_vm12  ;;  %v3686_v55 = vld [vmem:[%s3957_s28 + $0x268] sm:$0xff] }
 0x50d   : > { %v2457_v53 = vsel %vm2456_vm13, %v9044_v35, %v2453_v58  ;;  %v2463_v38 = vmul.f32 %v9057_v29, %v2462_v26  ;;  %v2872_v37 = vsub.f32 1.5, %v2871_v4  ;;  %v2881_v31 = vmul.f32 0.5, %v2880_v30  ;;  %v11549_v58 = vld [vmem:[#allocation207_spill] sm:$0xff]  ;;  %v11550_v30 = vld [vmem:[#allocation218_spill] sm:$0xff] }
 0x50e   : > { %v9121_v43 = vpop.eup %3563  ;;  %v3102_v18 = vmul.f32 %v3683_v62, %v2457_v53  ;;  %v9128_v32 = vmax.f32 %v1960_v41, 1e-24  ;;  %3567 = vrsqrt.f32 %v9114_v60  ;;  %v1912_v3 = vsel %vm833_vm1, %v1813_v16, %v11491_v57  ;;  %v1793_v57 = vpop.permute.xlu1 %1792 }
 0x50f   : > { %v2467_v35 = vsel %vm2466_vm15, %v9057_v29, %v2463_v38  ;;  %v2873_v15 = vmul.f32 %v9072_v13, %v2872_v37  ;;  %v2882_v39 = vsub.f32 1.5, %v2881_v31  ;;  %v2569_v44 = vmul.f32 %v9121_v43, %v9077_v6  ;;  %v1791_v62 = vpop.permute.xlu0 %1790 }
 0x510   : > { %v9138_v19 = vpop.eup %3565  ;;  %v9142_v1 = vadd.f32 %v8545_v22, %v11464_v61  ;;  %v3103_v28 = vmul.f32 %v3684_v5, %v2467_v35  ;;  %3198 = vst [vmem:[%s7454_s30 + $0x110] sm:$0xff] %v3102_v18  ;;  %vm2884_vm3 = vweird.f32 %v9037_v47  ;;  %3569 = vrsqrt.f32 %v9128_v32  ;;  %v3685_v47 = vld [vmem:[%s3957_s28 + $0x260] sm:$0xff] }
 0x511   : > { %v2877_v29 = vsel %vm2876_vm2, %v9072_v13, %v2873_v15  ;;  %v2883_v11 = vmul.f32 %v9089_v40, %v2882_v39  ;;  %v2570_v61 = vmul.f32 %v9121_v43, %v2569_v44  ;;  %v2579_v22 = vmul.f32 %v9138_v19, %v9079_v20  ;;  %vm2886_vm4 = vmor %vm2884_vm3, %vm2885_vm14  ;;  %v11546_v13 = vld [vmem:[#allocation213_spill] sm:$0xff] }
 0x512   : > { %v9159_v27 = vadd.f32 %v8885_v2, %v11465_v50  ;;  %3199 = vst [vmem:[%s7454_s30 + $0x118] sm:$0xff] %v3103_v28  ;;  %v3144_v51 = vmul.f32 %v3685_v47, %v2877_v29  ;;  %v2001_v36 = vadd.f32 %v1848_v0, %v11546_v13  ;;  %v2002_v12 = vadd.f32 %v1912_v3, %v11547_v8 }
 0x513   : > { %v2887_v56 = vsel %vm2886_vm4, %v9089_v40, %v2883_v11  ;;  %v2571_v46 = vmul.f32 0.5, %v2570_v61  ;;  %v2580_v33 = vmul.f32 %v9138_v19, %v2579_v22  ;;  %v1838_v50 = vsel %vm833_vm1, %v11548_v63, %v1793_v57  ;;  %v3688_v11 = vld [vmem:[%s3957_s28 + $0x178] sm:$0xff] }
 0x514   : > { %v9172_v2 = vpop.eup %3567  ;;  %v3145_v24 = vmul.f32 %v3686_v55, %v2887_v56  ;;  %3240 = vst [vmem:[%s7454_s30 + $0x260] sm:$0xff] %v3144_v51  ;;  %vm2575_vm5 = vweird.f32 %v9121_v43  ;;  %v9177_v42 = vmax.f32 %v2001_v36, 1e-24  ;;  %v9179_v16 = vmax.f32 %v2002_v12, 1e-24  ;;  %v1819_v51 = vpop.permute.xlu2 %1818  ;;  %v11553_v36 = vld [vmem:[#allocation151_spill] sm:$0xff] }
 0x515   : > { %v2572_v40 = vsub.f32 1.5, %v2571_v46  ;;  %v2581_v10 = vmul.f32 0.5, %v2580_v33  ;;  %v2539_v17 = vmul.f32 %v9172_v2, %v9114_v60  ;;  %v1902_v26 = vsel %vm833_vm1, %v1793_v57, %v11549_v58  ;;  %v3689_v63 = vld [vmem:[%s3957_s28 + $0x158] sm:$0xff] }
 0x516   : > { %v9186_v4 = vpop.eup %3569  ;;  %3241 = vst [vmem:[%s7454_s30 + $0x268] sm:$0xff] %v3145_v24  ;;  %vm2574_vm6 = vweird.f32 %v9077_v6  ;;  %vm2585_vm7 = vweird.f32 %v9138_v19  ;;  %3571 = vrsqrt.f32 %v9177_v42  ;;  %v1971_v54 = vadd.f32 %v1838_v50, %v11550_v30  ;;  %v11551_v6 = vld [vmem:[#allocation228_spill] sm:$0xff] }
 0x517   : > { %v2573_v41 = vmul.f32 %v9121_v43, %v2572_v40  ;;  %v2582_v0 = vsub.f32 1.5, %v2581_v10  ;;  %v2540_v53 = vmul.f32 %v9172_v2, %v2539_v17  ;;  %v2549_v38 = vmul.f32 %v9186_v4, %v9128_v32  ;;  %vm2576_vm8 = vmor %vm2574_vm6, %vm2575_vm5  ;;  %v3690_v30 = vld [vmem:[%s3957_s28 + $0x160] sm:$0xff] }
 0x518   : > { %vm2584_vm9 = vweird.f32 %v9079_v20  ;;  %3573 = vrsqrt.f32 %v9179_v16  ;;  %v1972_v37 = vadd.f32 %v1902_v26, %v11551_v6  ;;  %v9202_v31 = vmax.f32 %v1971_v54, 1e-24  ;;  %v3687_v20 = vld [vmem:[%s3957_s28 + $0x170] sm:$0xff]  ;;  %v11554_v6 = vld [vmem:[#allocation32_spill] sm:$0xff] }
 0x519   : > { %v2577_v18 = vsel %vm2576_vm8, %v9121_v43, %v2573_v41  ;;  %v2583_v3 = vmul.f32 %v9138_v19, %v2582_v0  ;;  %v2541_v35 = vmul.f32 0.5, %v2540_v53  ;;  %v2550_v15 = vmul.f32 %v9186_v4, %v2549_v38  ;;  %vm2586_vm10 = vmor %vm2584_vm9, %vm2585_vm7  ;;  %v1799_v38 = vpop.permute.xlu1 %1798 }
 0x51a   : > { %v3114_v39 = vmul.f32 %v3687_v20, %v2577_v18  ;;  %vm2545_vm11 = vweird.f32 %v9172_v2  ;;  %v9211_v44 = vmax.f32 %v1972_v37, 1e-24  ;;  %3575 = vrsqrt.f32 %v9202_v31 }
 0x51b   : > { %v2587_v5 = vsel %vm2586_vm10, %v9138_v19, %v2583_v3  ;;  %v2542_v43 = vsub.f32 1.5, %v2541_v35  ;;  %v2551_v28 = vmul.f32 0.5, %v2550_v15  ;;  %v1837_v57 = vsel %vm833_vm1, %v7911_v34, %v1791_v62  ;;  %v11555_v35 = vld [vmem:[#allocation197_spill] sm:$0xff] }
 0x51c   : > { %v9218_v29 = vpop.eup %3571  ;;  %v3115_v61 = vmul.f32 %v3688_v11, %v2587_v5  ;;  %3210 = vst [vmem:[%s7454_s30 + $0x170] sm:$0xff] %v3114_v39  ;;  %vm2544_vm12 = vweird.f32 %v9114_v60  ;;  %3577 = vrsqrt.f32 %v9211_v44  ;;  %v1901_v19 = vsel %vm833_vm1, %v1791_v62, %v11468_v59  ;;  %v11552_v59 = vld [vmem:[#allocation219_spill] sm:$0xff] }
 0x51d   : > { %v2543_v22 = vmul.f32 %v9172_v2, %v2542_v43  ;;  %v2552_v47 = vsub.f32 1.5, %v2551_v28  ;;  %vm2555_vm13 = vweird.f32 %v9186_v4  ;;  %v2959_v34 = vmul.f32 %v9218_v29, %v9177_v42  ;;  %vm2546_vm14 = vmor %vm2544_vm12, %vm2545_vm11  ;;  %v11556_v39 = vld [vmem:[#allocation99_spill] sm:$0xff] }
 0x51e   : > { %v9231_v13 = vpop.eup %3573  ;;  %3211 = vst [vmem:[%s7454_s30 + $0x178] sm:$0xff] %v3115_v61  ;;  %vm2554_vm15 = vweird.f32 %v9128_v32  ;;  %vm2964_vm2 = vweird.f32 %v9177_v42  ;;  %v1968_v60 = vadd.f32 %v1837_v57, %v11552_v59  ;;  %v1969_v8 = vadd.f32 %v1901_v19, %v11553_v36  ;;  %v3691_v61 = vld [vmem:[%s3957_s28 + $0x2a8] sm:$0xff]  ;;  %v11558_v36 = vld [vmem:[#allocation179_spill] sm:$0xff] }
 0x51f   : > { %v2547_v12 = vsel %vm2546_vm14, %v9172_v2, %v2543_v22  ;;  %v2553_v56 = vmul.f32 %v9186_v4, %v2552_v47  ;;  %v2960_v46 = vmul.f32 %v9218_v29, %v2959_v34  ;;  %v2969_v33 = vmul.f32 %v9231_v13, %v9179_v16  ;;  %vm2556_vm4 = vmor %vm2554_vm15, %vm2555_vm13 }
 0x520   : > { %vm2974_vm3 = vweird.f32 %v9179_v16  ;;  %v9246_v32 = vpop.eup %3575  ;;  %v3111_v50 = vmul.f32 %v3689_v63, %v2547_v12  ;;  %v9251_v55 = vmax.f32 %v1968_v60, 1e-24  ;;  %v9253_v2 = vmax.f32 %v1969_v8, 1e-24  ;;  %v11559_v8 = vld [vmem:[#allocation166_spill] sm:$0xff] }
 0x521   : > { %v1851_v24 = vsel %vm833_vm1, %v8432_v45, %v1819_v51  ;;  %v2557_v40 = vsel %vm2556_vm4, %v9186_v4, %v2553_v56  ;;  %v2961_v10 = vmul.f32 0.5, %v2960_v46  ;;  %v2970_v17 = vmul.f32 %v9231_v13, %v2969_v33  ;;  %v3692_v56 = vld [vmem:[%s3957_s28 + $0x2b0] sm:$0xff] }
 0x522   : > { %v2659_v58 = vmul.f32 %v9246_v32, %v9202_v31  ;;  %vm2664_vm5 = vweird.f32 %v9202_v31  ;;  %v9263_v26 = vpop.eup %3577  ;;  %v3112_v54 = vmul.f32 %v3690_v30, %v2557_v40  ;;  %3207 = vst [vmem:[%s7454_s30 + $0x158] sm:$0xff] %v3111_v50  ;;  %vm2965_vm6 = vweird.f32 %v9218_v29  ;;  %v11560_v40 = vld [vmem:[#allocation126_spill] sm:$0xff]  ;;  %v11563_v30 = vld [vmem:[#allocation48_spill] sm:$0xff] }
 0x523   : > { %3579 = vrsqrt.f32 %v9251_v55  ;;  %v1915_v45 = vsel %vm833_vm1, %v1819_v51, %v7427_v48  ;;  %v2962_v4 = vsub.f32 1.5, %v2961_v10  ;;  %v2971_v41 = vmul.f32 0.5, %v2970_v17  ;;  %vm2966_vm9 = vmor %vm2964_vm2, %vm2965_vm6  ;;  %v11561_v10 = vld [vmem:[#allocation169_spill] sm:$0xff]  ;;  %v11562_v17 = vld [vmem:[#allocation134_spill] sm:$0xff] }
 0x524   : > { %v2660_v0 = vmul.f32 %v9246_v32, %v2659_v58  ;;  %v2669_v53 = vmul.f32 %v9263_v26, %v9211_v44  ;;  %3208 = vst [vmem:[%s7454_s30 + $0x160] sm:$0xff] %v3112_v54  ;;  %vm2975_vm7 = vweird.f32 %v9231_v13  ;;  %vm2665_vm8 = vweird.f32 %v9246_v32 }
 0x525   : > { %3581 = vrsqrt.f32 %v9253_v2  ;;  %v2010_v37 = vadd.f32 %v1851_v24, %v11554_v6  ;;  %v2963_v48 = vmul.f32 %v9218_v29, %v2962_v4  ;;  %v2972_v62 = vsub.f32 1.5, %v2971_v41  ;;  %vm2976_vm11 = vmor %vm2974_vm3, %vm2975_vm7  ;;  %v3694_v6 = vld [vmem:[%s3957_s28 + $0x1c0] sm:$0xff] }
 0x526   : > { %v2661_v18 = vmul.f32 0.5, %v2660_v0  ;;  %v2670_v3 = vmul.f32 %v9263_v26, %v2669_v53  ;;  %vm2675_vm10 = vweird.f32 %v9263_v26  ;;  %v2011_v15 = vadd.f32 %v1915_v45, %v11555_v35  ;;  %vm2666_vm12 = vmor %vm2664_vm5, %vm2665_vm8  ;;  %v11564_v0 = vld [vmem:[#allocation89_spill] sm:$0xff]  ;;  %v11565_v35 = vld [vmem:[#allocation124_spill] sm:$0xff] }
 0x527   : > { %v9288_v20 = vmax.f32 %v2010_v37, 1e-24  ;;  %v1841_v5 = vsel %vm833_vm1, %v11556_v39, %v1799_v38  ;;  %v2967_v43 = vsel %vm2966_vm9, %v9218_v29, %v2963_v48  ;;  %v2973_v28 = vmul.f32 %v9231_v13, %v2972_v62  ;;  %v11557_v29 = vld [vmem:[#allocation193_spill] sm:$0xff] }
 0x528   : > { %v2662_v57 = vsub.f32 1.5, %v2661_v18  ;;  %v2671_v11 = vmul.f32 0.5, %v2670_v3  ;;  %v3153_v19 = vmul.f32 %v3691_v61, %v2967_v43  ;;  %v9302_v22 = vmax.f32 %v2011_v15, 1e-24 }
 0x529   : > { %v9295_v42 = vpop.eup %3579  ;;  %3583 = vrsqrt.f32 %v9288_v20  ;;  %v1905_v47 = vsel %vm833_vm1, %v1799_v38, %v11557_v29  ;;  %v2977_v34 = vsel %vm2976_vm11, %v9231_v13, %v2973_v28  ;;  %v9318_v12 = vsel %vm544_vm0, %v11559_v8, %v11558_v36  ;;  %v1797_v13 = vpop.permute.xlu0 %1796 }
 0x52a   : > { %v2663_v51 = vmul.f32 %v9246_v32, %v2662_v57  ;;  %v2672_v59 = vsub.f32 1.5, %v2671_v11  ;;  %v2629_v16 = vmul.f32 %v9295_v42, %v9251_v55  ;;  %v3154_v46 = vmul.f32 %v3692_v56, %v2977_v34  ;;  %3249 = vst [vmem:[%s7454_s30 + $0x2a8] sm:$0xff] %v3153_v19 }
 0x52b   : > { %v9312_v60 = vpop.eup %3581  ;;  %vm2674_vm13 = vweird.f32 %v9211_v44  ;;  %3585 = vrsqrt.f32 %v9302_v22  ;;  %v9337_v31 = vsel %vm544_vm0, %v11561_v10, %v11560_v40  ;;  %v3693_v44 = vld [vmem:[%s3957_s28 + $0x1b8] sm:$0xff]  ;;  %v1980_v58 = vadd.f32 %v1841_v5, %v11562_v17  ;;  %v11566_v5 = vld [vmem:[#allocation141_spill] sm:$0xff]  ;;  %v11569_v40 = vld [vmem:[#allocation34_spill] sm:$0xff] }
 0x52c   : > { %v2667_v33 = vsel %vm2666_vm12, %v9246_v32, %v2663_v51  ;;  %v2673_v63 = vmul.f32 %v9263_v26, %v2672_v59  ;;  %v2630_v50 = vmul.f32 %v9295_v42, %v2629_v16  ;;  %v2639_v24 = vmul.f32 %v9312_v60, %v9253_v2  ;;  %3250 = vst [vmem:[%s7454_s30 + $0x2b0] sm:$0xff] %v3154_v46  ;;  %vm2676_vm14 = vmor %vm2674_vm13, %vm2675_vm10 }
 0x52d   : > { %v3123_v32 = vmul.f32 %v3693_v44, %v2667_v33  ;;  %v1981_v54 = vadd.f32 %v1905_v47, %v11563_v30  ;;  %v1840_v53 = vsel %vm833_vm1, %v11564_v0, %v1797_v13  ;;  %vm2635_vm0 = vweird.f32 %v9295_v42  ;;  %v1805_v47 = vpop.permute.xlu1 %1804 }
 0x52e   : > { %v2677_v45 = vsel %vm2676_vm14, %v9263_v26, %v2673_v63  ;;  %v2631_v4 = vmul.f32 0.5, %v2630_v50  ;;  %v2640_v41 = vmul.f32 %v9312_v60, %v2639_v24  ;;  %v9355_v48 = vmax.f32 %v1980_v58, 1e-24  ;;  %v3696_v50 = vld [vmem:[%s3957_s28 + $0x1a8] sm:$0xff] }
 0x52f   : > { %v9350_v38 = vpop.eup %3583  ;;  %v3124_v37 = vmul.f32 %v3694_v6, %v2677_v45  ;;  %3219 = vst [vmem:[%s7454_s30 + $0x1b8] sm:$0xff] %v3123_v32  ;;  %v9357_v62 = vmax.f32 %v1981_v54, 1e-24  ;;  %v1904_v15 = vsel %vm833_vm1, %v1797_v13, %v11565_v35  ;;  %vm2634_vm15 = vweird.f32 %v9251_v55  ;;  %v11567_v55 = vld [vmem:[#allocation199_spill] sm:$0xff]  ;;  %v11568_v13 = vld [vmem:[#allocation93_spill] sm:$0xff]  ;;  %v11571_v54 = vld [vmem:[#allocation52_spill] sm:$0xff] }
 0x530   : > { %v2632_v26 = vsub.f32 1.5, %v2631_v4  ;;  %v2641_v18 = vmul.f32 0.5, %v2640_v41  ;;  %v3049_v3 = vmul.f32 %v9350_v38, %v9288_v20  ;;  %vm2645_vm2 = vweird.f32 %v9312_v60  ;;  %vm2636_vm3 = vmor %vm2634_vm15, %vm2635_vm0  ;;  %v3697_v6 = vld [vmem:[%s3957_s28 + $0x2f0] sm:$0xff] }
 0x531   : > { %v9364_v39 = vpop.eup %3585  ;;  %3220 = vst [vmem:[%s7454_s30 + $0x1c0] sm:$0xff] %v3124_v37  ;;  %3587 = vrsqrt.f32 %v9355_v48  ;;  %v1977_v43 = vadd.f32 %v1840_v53, %v11566_v5  ;;  %vm2644_vm4 = vweird.f32 %v9253_v2  ;;  %v1978_v19 = vadd.f32 %v1904_v15, %v11567_v55  ;;  %v3695_v2 = vld [vmem:[%s3957_s28 + $0x1a0] sm:$0xff]  ;;  %v1803_v17 = vpop.permute.xlu0 %1802 }
 0x532   : > { %v2633_v28 = vmul.f32 %v9295_v42, %v2632_v26  ;;  %v2642_v57 = vsub.f32 1.5, %v2641_v18  ;;  %v3050_v11 = vmul.f32 %v9350_v38, %v3049_v3  ;;  %v3059_v61 = vmul.f32 %v9364_v39, %v9302_v22  ;;  %vm2646_vm5 = vmor %vm2644_vm4, %vm2645_vm2 }
 0x533   : > { %3589 = vrsqrt.f32 %v9357_v62  ;;  %v9380_v29 = vmax.f32 %v1977_v43, 1e-24  ;;  %vm3055_vm6 = vweird.f32 %v9350_v38  ;;  %v9389_v8 = vmax.f32 %v1978_v19, 1e-24 }
 0x534   : > { %v2637_v34 = vsel %vm2636_vm3, %v9295_v42, %v2633_v28  ;;  %v2643_v51 = vmul.f32 %v9312_v60, %v2642_v57  ;;  %v3051_v59 = vmul.f32 0.5, %v3050_v11  ;;  %v3060_v16 = vmul.f32 %v9364_v39, %v3059_v61  ;;  %v3698_v28 = vld [vmem:[%s3957_s28 + $0x2f8] sm:$0xff] }
 0x535   : > { %v3120_v36 = vmul.f32 %v3695_v2, %v2637_v34  ;;  %3591 = vrsqrt.f32 %v9380_v29  ;;  %v1844_v33 = vsel %vm833_vm1, %v11568_v13, %v1805_v47  ;;  %vm3054_vm7 = vweird.f32 %v9288_v20  ;;  %v11570_v20 = vld [vmem:[#allocation180_spill] sm:$0xff]  ;;  %v1811_v19 = vpop.permute.xlu1 %1810 }
 0x536   : > { %v2647_v56 = vsel %vm2646_vm5, %v9312_v60, %v2643_v51  ;;  %v3052_v42 = vsub.f32 1.5, %v3051_v59  ;;  %v3061_v46 = vmul.f32 0.5, %v3060_v16  ;;  %3593 = vrsqrt.f32 %v9389_v8  ;;  %vm3056_vm9 = vmor %vm3054_vm7, %vm3055_vm6 }
 0x537   : > { %v9396_v63 = vpop.eup %3587  ;;  %v3121_v24 = vmul.f32 %v3696_v50, %v2647_v56  ;;  %3216 = vst [vmem:[%s7454_s30 + $0x1a0] sm:$0xff] %v3120_v36  ;;  %v1908_v60 = vsel %vm833_vm1, %v1805_v47, %v11569_v40  ;;  %vm3065_vm8 = vweird.f32 %v9364_v39  ;;  %vm3064_vm10 = vweird.f32 %v9302_v22  ;;  %v11572_v47 = vld [vmem:[#allocation183_spill] sm:$0xff]  ;;  %v11573_v56 = vld [vmem:[#allocation65_spill] sm:$0xff] }
 0x538   : > { %v3053_v10 = vmul.f32 %v9350_v38, %v3052_v42  ;;  %v3062_v44 = vsub.f32 1.5, %v3061_v46  ;;  %v2749_v32 = vmul.f32 %v9396_v63, %v9355_v48  ;;  %vm2754_vm11 = vweird.f32 %v9355_v48  ;;  %vm3066_vm13 = vmor %vm3064_vm10, %vm3065_vm8 }
 0x539   : > { %v9409_v58 = vpop.eup %3589  ;;  %3217 = vst [vmem:[%s7454_s30 + $0x1a8] sm:$0xff] %v3121_v24  ;;  %v1989_v30 = vadd.f32 %v1844_v33, %v11570_v20  ;;  %v1990_v45 = vadd.f32 %v1908_v60, %v11571_v54  ;;  %vm2764_vm12 = vweird.f32 %v9357_v62  ;;  %v1843_v18 = vsel %vm833_vm1, %v8127_v21, %v1803_v17  ;;  %v11575_v20 = vld [vmem:[#allocation156_spill] sm:$0xff]  ;;  %v3700_v54 = vld [vmem:[%s3957_s28 + $0x208] sm:$0xff] }
 0x53a   : > { %v3057_v4 = vsel %vm3056_vm9, %v9350_v38, %v3053_v10  ;;  %v3063_v41 = vmul.f32 %v9364_v39, %v3062_v44  ;;  %v2750_v0 = vmul.f32 %v9396_v63, %v2749_v32  ;;  %v2759_v53 = vmul.f32 %v9409_v58, %v9357_v62 }
 0x53b   : > { %v9424_v22 = vpop.eup %3591  ;;  %v3162_v37 = vmul.f32 %v3697_v6, %v3057_v4  ;;  %v9429_v26 = vmax.f32 %v1989_v30, 1e-24  ;;  %v9431_v38 = vmax.f32 %v1990_v45, 1e-24  ;;  %vm2724_vm14 = vweird.f32 %v9380_v29 }
 0x53c   : > { %v3067_v3 = vsel %vm3066_vm13, %v9364_v39, %v3063_v41  ;;  %v2751_v35 = vmul.f32 0.5, %v2750_v0  ;;  %v2760_v15 = vmul.f32 %v9409_v58, %v2759_v53  ;;  %v2719_v5 = vmul.f32 %v9424_v22, %v9380_v29  ;;  %v9441_v43 = vpop.eup %3593  ;;  %v11576_v53 = vld [vmem:[#allocation164_spill] sm:$0xff] }
 0x53d   : > { %v3163_v57 = vmul.f32 %v3698_v28, %v3067_v3  ;;  %3258 = vst [vmem:[%s7454_s30 + $0x2f0] sm:$0xff] %v3162_v37  ;;  %vm2755_vm0 = vweird.f32 %v9396_v63  ;;  %3595 = vrsqrt.f32 %v9429_v26  ;;  %v1907_v21 = vsel %vm833_vm1, %v1803_v17, %v11480_v23  ;;  %v3702_v28 = vld [vmem:[%s3957_s28 + $0x1f0] sm:$0xff] }
 0x53e   : > { %v2752_v39 = vsub.f32 1.5, %v2751_v35  ;;  %v2761_v11 = vmul.f32 0.5, %v2760_v15  ;;  %v2720_v61 = vmul.f32 %v9424_v22, %v2719_v5  ;;  %v2729_v55 = vmul.f32 %v9441_v43, %v9389_v8  ;;  %vm2756_vm3 = vmor %vm2754_vm11, %vm2755_vm0 }
 0x53f   : > { %3259 = vst [vmem:[%s7454_s30 + $0x2f8] sm:$0xff] %v3163_v57  ;;  %vm2765_vm15 = vweird.f32 %v9409_v58  ;;  %vm2725_vm2 = vweird.f32 %v9424_v22  ;;  %3597 = vrsqrt.f32 %v9431_v38  ;;  %v1986_v34 = vadd.f32 %v1843_v18, %v11572_v47 }
 0x540   : > { %v2753_v23 = vmul.f32 %v9396_v63, %v2752_v39  ;;  %v2762_v51 = vsub.f32 1.5, %v2761_v11  ;;  %v2721_v59 = vmul.f32 0.5, %v2720_v61  ;;  %v2730_v16 = vmul.f32 %v9441_v43, %v2729_v55  ;;  %vm2766_vm5 = vmor %vm2764_vm12, %vm2765_vm15  ;;  %v11578_v55 = vld [vmem:[#allocation222_spill] sm:$0xff] }
 0x541   : > { %vm2735_vm4 = vweird.f32 %v9441_v43  ;;  %v1987_v2 = vadd.f32 %v1907_v21, %v8364_v52  ;;  %v9466_v36 = vmax.f32 %v1986_v34, 1e-24  ;;  %v1847_v42 = vsel %vm833_vm1, %v11573_v56, %v1811_v19  ;;  %v3699_v52 = vld [vmem:[%s3957_s28 + $0x200] sm:$0xff]  ;;  %vm2726_vm6 = vmor %vm2724_vm14, %vm2725_vm2 }
 0x542   : > { %v2757_v46 = vsel %vm2756_vm3, %v9396_v63, %v2753_v23  ;;  %v2763_v13 = vmul.f32 %v9409_v58, %v2762_v51  ;;  %v2722_v33 = vsub.f32 1.5, %v2721_v59  ;;  %v2731_v50 = vmul.f32 0.5, %v2730_v16  ;;  %v11574_v63 = vld [vmem:[#allocation15_spill] sm:$0xff]  ;;  %v1817_v59 = vpop.permute.xlu1 %1816 }
 0x543   : > { %v9473_v48 = vpop.eup %3595  ;;  %v3132_v24 = vmul.f32 %v3699_v52, %v2757_v46  ;;  %v9480_v40 = vmax.f32 %v1987_v2, 1e-24  ;;  %3599 = vrsqrt.f32 %v9466_v36  ;;  %v1911_v60 = vsel %vm833_vm1, %v1811_v19, %v11574_v63  ;;  %v3704_v63 = vld [vmem:[%s3957_s28 + $0x250] sm:$0xff] }
 0x544   : > { %v2767_v10 = vsel %vm2766_vm5, %v9409_v58, %v2763_v13  ;;  %v2723_v44 = vmul.f32 %v9424_v22, %v2722_v33  ;;  %v2732_v32 = vsub.f32 1.5, %v2731_v50  ;;  %v2839_v62 = vmul.f32 %v9473_v48, %v9429_v26  ;;  %v1809_v58 = vpop.permute.xlu0 %1808 }
 0x545   : > { %v9490_v17 = vpop.eup %3597  ;;  %v9494_v30 = vadd.f32 %v9318_v12, %v11575_v20  ;;  %v3133_v45 = vmul.f32 %v3700_v54, %v2767_v10  ;;  %3228 = vst [vmem:[%s7454_s30 + $0x200] sm:$0xff] %v3132_v24  ;;  %vm2734_vm7 = vweird.f32 %v9389_v8  ;;  %3601 = vrsqrt.f32 %v9480_v40  ;;  %v3701_v8 = vld [vmem:[%s3957_s28 + $0x1e8] sm:$0xff]  ;;  %v11580_v10 = vld [vmem:[#allocation131_spill] sm:$0xff] }
 0x546   : > { %v2727_v4 = vsel %vm2726_vm6, %v9424_v22, %v2723_v44  ;;  %v2733_v41 = vmul.f32 %v9441_v43, %v2732_v32  ;;  %v2840_v12 = vmul.f32 %v9473_v48, %v2839_v62  ;;  %v2849_v0 = vmul.f32 %v9490_v17, %v9431_v38  ;;  %vm2736_vm8 = vmor %vm2734_vm7, %vm2735_vm4  ;;  %v11577_v22 = vld [vmem:[#allocation155_spill] sm:$0xff] }
 0x547   : > { %v9511_v29 = vadd.f32 %v9337_v31, %v11576_v53  ;;  %3229 = vst [vmem:[%s7454_s30 + $0x208] sm:$0xff] %v3133_v45  ;;  %v3129_v6 = vmul.f32 %v3701_v8, %v2727_v4  ;;  %v1998_v37 = vadd.f32 %v1847_v42, %v11577_v22  ;;  %v1999_v18 = vadd.f32 %v1911_v60, %v9142_v1 }
 0x548   : > { %v2737_v3 = vsel %vm2736_vm8, %v9441_v43, %v2733_v41  ;;  %v2841_v35 = vmul.f32 0.5, %v2840_v12  ;;  %v2850_v15 = vmul.f32 %v9490_v17, %v2849_v0  ;;  %v1846_v31 = vsel %vm833_vm1, %v8196_v7, %v1809_v58 }
 0x549   : > { %v9524_v5 = vpop.eup %3599  ;;  %v3130_v57 = vmul.f32 %v3702_v28, %v2737_v3  ;;  %3225 = vst [vmem:[%s7454_s30 + $0x1e8] sm:$0xff] %v3129_v6  ;;  %vm2845_vm9 = vweird.f32 %v9473_v48  ;;  %v9529_v21 = vmax.f32 %v1998_v37, 1e-24  ;;  %v9531_v1 = vmax.f32 %v1999_v18, 1e-24 }
 0x54a   : > { %v2842_v43 = vsub.f32 1.5, %v2841_v35  ;;  %v2851_v39 = vmul.f32 0.5, %v2850_v15  ;;  %v2809_v11 = vmul.f32 %v9524_v5, %v9466_v36  ;;  %v1910_v7 = vsel %vm833_vm1, %v1809_v58, %v11486_v9 }
 0x54b   : > { %v9538_v61 = vpop.eup %3601  ;;  %3226 = vst [vmem:[%s7454_s30 + $0x1f0] sm:$0xff] %v3130_v57  ;;  %vm2844_vm10 = vweird.f32 %v9429_v26  ;;  %vm2855_vm11 = vweird.f32 %v9490_v17  ;;  %3603 = vrsqrt.f32 %v9529_v21  ;;  %v1995_v19 = vadd.f32 %v1846_v31, %v11578_v55  ;;  %v3706_v31 = vld [vmem:[%s3957_s28 + $0x238] sm:$0xff] }
 0x54c   : > { %v2843_v47 = vmul.f32 %v9473_v48, %v2842_v43  ;;  %v2852_v34 = vsub.f32 1.5, %v2851_v39  ;;  %v2810_v23 = vmul.f32 %v9524_v5, %v2809_v11  ;;  %v2819_v9 = vmul.f32 %v9538_v61, %v9480_v40  ;;  %vm2846_vm12 = vmor %vm2844_vm10, %vm2845_vm9  ;;  %v1815_v20 = vpop.permute.xlu0 %1814  ;;  %v11582_v11 = vld [vmem:[#allocation146_spill] sm:$0xff] }
 0x54d   : > { %vm2854_vm13 = vweird.f32 %v9431_v38  ;;  %3605 = vrsqrt.f32 %v9531_v1  ;;  %v1996_v26 = vadd.f32 %v1910_v7, %v9159_v27  ;;  %v9554_v51 = vmax.f32 %v1995_v19, 1e-24  ;;  %v3703_v38 = vld [vmem:[%s3957_s28 + $0x248] sm:$0xff] }
 0x54e   : > { %v2847_v16 = vsel %vm2846_vm12, %v9473_v48, %v2843_v47  ;;  %v2853_v2 = vmul.f32 %v9490_v17, %v2852_v34  ;;  %v2811_v56 = vmul.f32 0.5, %v2810_v23  ;;  %v2820_v42 = vmul.f32 %v9538_v61, %v2819_v9  ;;  %vm2856_vm14 = vmor %vm2854_vm13, %vm2855_vm11  ;;  %v11579_v48 = vld [vmem:[#allocation92_spill] sm:$0xff] }
 0x54f   : > { %v3141_v46 = vmul.f32 %v3703_v38, %v2847_v16  ;;  %vm2815_vm0 = vweird.f32 %v9524_v5  ;;  %v9563_v27 = vmax.f32 %v1996_v26, 1e-24  ;;  %3607 = vrsqrt.f32 %v9554_v51 }
 0x550   : > { %v2857_v13 = vsel %vm2856_vm14, %v9490_v17, %v2853_v2  ;;  %v2812_v33 = vsub.f32 1.5, %v2811_v56  ;;  %v2821_v50 = vmul.f32 0.5, %v2820_v42  ;;  %v1850_v52 = vsel %vm833_vm1, %v11579_v48, %v1817_v59 }
 0x551   : > { %v9570_v24 = vpop.eup %3603  ;;  %v3142_v60 = vmul.f32 %v3704_v63, %v2857_v13  ;;  %3237 = vst [vmem:[%s7454_s30 + $0x248] sm:$0xff] %v3141_v46  ;;  %vm2814_vm15 = vweird.f32 %v9466_v36  ;;  %3609 = vrsqrt.f32 %v9563_v27  ;;  %v1914_v44 = vsel %vm833_vm1, %v1817_v59, %v11580_v10  ;;  %v11581_v36 = vld [vmem:[#allocation108_spill] sm:$0xff]  ;;  %v3708_v13 = vld [vmem:[%s3957_s28 + $0x298] sm:$0xff] }
 0x552   : > { %v2813_v32 = vmul.f32 %v9524_v5, %v2812_v33  ;;  %v2822_v62 = vsub.f32 1.5, %v2821_v50  ;;  %vm2825_vm2 = vweird.f32 %v9538_v61  ;;  %v2929_v17 = vmul.f32 %v9570_v24, %v9529_v21  ;;  %vm2816_vm3 = vmor %vm2814_vm15, %vm2815_vm0 }
 0x553   : > { %v9583_v54 = vpop.eup %3605  ;;  %3238 = vst [vmem:[%s7454_s30 + $0x250] sm:$0xff] %v3142_v60  ;;  %vm2824_vm4 = vweird.f32 %v9480_v40  ;;  %vm2934_vm5 = vweird.f32 %v9529_v21  ;;  %v2007_v45 = vadd.f32 %v1850_v52, %v11581_v36  ;;  %v2008_v58 = vadd.f32 %v1914_v44, %v9494_v30  ;;  %v3705_v40 = vld [vmem:[%s3957_s28 + $0x230] sm:$0xff] }
 0x554   : > { %v2817_v4 = vsel %vm2816_vm3, %v9524_v5, %v2813_v32  ;;  %v2823_v41 = vmul.f32 %v9538_v61, %v2822_v62  ;;  %v2930_v12 = vmul.f32 %v9570_v24, %v2929_v17  ;;  %v2939_v0 = vmul.f32 %v9583_v54, %v9531_v1  ;;  %vm2826_vm6 = vmor %vm2824_vm4, %vm2825_vm2  ;;  %v3707_v21 = vld [vmem:[%s3957_s28 + $0x290] sm:$0xff] }
 0x555   : > { %v9597_v53 = vpop.eup %3607  ;;  %v3138_v8 = vmul.f32 %v3705_v40, %v2817_v4  ;;  %v9602_v6 = vmax.f32 %v2007_v45, 1e-24  ;;  %v9604_v30 = vmax.f32 %v2008_v58, 1e-24  ;;  %v1849_v22 = vsel %vm833_vm1, %v8305_v14, %v1815_v20  ;;  %v3711_v40 = vld [vmem:[%s3957_s28 + $0x2d8] sm:$0xff] }
 0x556   : > { %v2827_v37 = vsel %vm2826_vm6, %v9538_v61, %v2823_v41  ;;  %v2931_v18 = vmul.f32 0.5, %v2930_v12  ;;  %v2940_v3 = vmul.f32 %v9583_v54, %v2939_v0  ;;  %v2899_v35 = vmul.f32 %v9597_v53, %v9554_v51 }
 0x557   : > { %v3610_v15 = vpop.eup %3609  ;;  %v3139_v5 = vmul.f32 %v3706_v31, %v2827_v37  ;;  %3234 = vst [vmem:[%s7454_s30 + $0x230] sm:$0xff] %v3138_v8  ;;  %vm2935_vm7 = vweird.f32 %v9570_v24  ;;  %3611 = vrsqrt.f32 %v9602_v6  ;;  %v1913_v14 = vsel %vm833_vm1, %v1815_v20, %v11490_v25 }
 0x558   : > { %v2932_v28 = vsub.f32 1.5, %v2931_v18  ;;  %v2941_v57 = vmul.f32 0.5, %v2940_v3  ;;  %v2900_v43 = vmul.f32 %v9597_v53, %v2899_v35  ;;  %v2909_v39 = vmul.f32 %v3610_v15, %v9563_v27  ;;  %vm2936_vm1 = vmor %vm2934_vm5, %vm2935_vm7  ;;  %v3712_v18 = vld [vmem:[%s3957_s28 + $0x2e0] sm:$0xff] }
 0x559   : > { %3235 = vst [vmem:[%s7454_s30 + $0x238] sm:$0xff] %v3139_v5  ;;  %vm2944_vm8 = vweird.f32 %v9531_v1  ;;  %vm2945_vm9 = vweird.f32 %v9583_v54  ;;  %3613 = vrsqrt.f32 %v9604_v30  ;;  %v2004_v7 = vadd.f32 %v1849_v22, %v11582_v11  ;;  %v3713_v5 = vld [vmem:[%s3957_s28 + $0x2c0] sm:$0xff] }
 0x55a   : > { %v2933_v61 = vmul.f32 %v9570_v24, %v2932_v28  ;;  %v2942_v49 = vsub.f32 1.5, %v2941_v57  ;;  %v2901_v25 = vmul.f32 0.5, %v2900_v43  ;;  %v2910_v55 = vmul.f32 %v3610_v15, %v2909_v39  ;;  %vm2946_vm12 = vmor %vm2944_vm8, %vm2945_vm9  ;;  %v3714_v57 = vld [vmem:[%s3957_s28 + $0x2c8] sm:$0xff] }
 0x55b   : > { %vm2904_vm10 = vweird.f32 %v9554_v51  ;;  %vm2905_vm11 = vweird.f32 %v9597_v53  ;;  %v2005_v19 = vadd.f32 %v1913_v14, %v9511_v29  ;;  %v9635_v47 = vmax.f32 %v2004_v7, 1e-24 }
 0x55c   : > { %v2937_v34 = vsel %vm2936_vm1, %v9570_v24, %v2933_v61  ;;  %v2943_v23 = vmul.f32 %v9583_v54, %v2942_v49  ;;  %v2902_v9 = vsub.f32 1.5, %v2901_v25  ;;  %v2911_v26 = vmul.f32 0.5, %v2910_v55  ;;  %vm2906_vm14 = vmor %vm2904_vm10, %vm2905_vm11  ;;  %v3709_v24 = vld [vmem:[%s3957_s28 + $0x278] sm:$0xff] }
 0x55d   : > { %v3612_v59 = vpop.eup %3611  ;;  %v3150_v16 = vmul.f32 %v3707_v21, %v2937_v34  ;;  %vm2915_vm13 = vweird.f32 %v3610_v15  ;;  %v9644_v29 = vmax.f32 %v2005_v19, 1e-24  ;;  %3615 = vrsqrt.f32 %v9635_v47 }
 0x55e   : > { %v2947_v2 = vsel %vm2946_vm12, %v9583_v54, %v2943_v23  ;;  %v2903_v56 = vmul.f32 %v9597_v53, %v2902_v9  ;;  %v2912_v42 = vsub.f32 1.5, %v2911_v26  ;;  %v3019_v38 = vmul.f32 %v3612_v59, %v9602_v6 }
 0x55f   : > { %v3614_v46 = vpop.eup %3613  ;;  %v3151_v1 = vmul.f32 %v3708_v13, %v2947_v2  ;;  %3246 = vst [vmem:[%s7454_s30 + $0x290] sm:$0xff] %v3150_v16  ;;  %vm2914_vm0 = vweird.f32 %v9563_v27  ;;  %3617 = vrsqrt.f32 %v9644_v29  ;;  %v3710_v27 = vld [vmem:[%s3957_s28 + $0x280] sm:$0xff]  ;;  %vm3025_vm2 = vweird.f32 %v3612_v59 }
 0x560   : > { %v2907_v33 = vsel %vm2906_vm14, %v9597_v53, %v2903_v56  ;;  %v2913_v50 = vmul.f32 %v3610_v15, %v2912_v42  ;;  %v3020_v48 = vmul.f32 %v3612_v59, %v3019_v38  ;;  %v3029_v52 = vmul.f32 %v3614_v46, %v9604_v30  ;;  %vm2916_vm15 = vmor %vm2914_vm0, %vm2915_vm13 }
 0x561   : > { %3247 = vst [vmem:[%s7454_s30 + $0x298] sm:$0xff] %v3151_v1  ;;  %v3147_v63 = vmul.f32 %v3709_v24, %v2907_v33  ;;  %vm3024_vm3 = vweird.f32 %v9602_v6  ;;  %vm3035_vm4 = vweird.f32 %v3614_v46  ;;  %vm3034_vm6 = vweird.f32 %v9604_v30 }
 0x562   : > { %v2917_v51 = vsel %vm2916_vm15, %v3610_v15, %v2913_v50  ;;  %v3021_v60 = vmul.f32 0.5, %v3020_v48  ;;  %v3030_v10 = vmul.f32 %v3614_v46, %v3029_v52  ;;  %vm3026_vm5 = vmor %vm3024_vm3, %vm3025_vm2  ;;  %vm2994_vm9 = vweird.f32 %v9635_v47 }
 0x563   : > { %v3616_v44 = vpop.eup %3615  ;;  %v3148_v32 = vmul.f32 %v3710_v27, %v2917_v51  ;;  %3243 = vst [vmem:[%s7454_s30 + $0x278] sm:$0xff] %v3147_v63  ;;  %vm3036_vm7 = vmor %vm3034_vm6, %vm3035_vm4  ;;  %vm3004_vm11 = vweird.f32 %v9644_v29 }
 0x564   : > { %v3022_v62 = vsub.f32 1.5, %v3021_v60  ;;  %v3031_v17 = vmul.f32 0.5, %v3030_v10  ;;  %v2989_v20 = vmul.f32 %v3616_v44, %v9635_v47  ;;  %vm2995_vm8 = vweird.f32 %v3616_v44 }
 0x565   : > { %v3618_v54 = vpop.eup %3617  ;;  %3244 = vst [vmem:[%s7454_s30 + $0x280] sm:$0xff] %v3148_v32  ;;  %vm2996_vm10 = vmor %vm2994_vm9, %vm2995_vm8 }
 0x566   : > { %v3023_v36 = vmul.f32 %v3612_v59, %v3022_v62  ;;  %v3032_v45 = vsub.f32 1.5, %v3031_v17  ;;  %v2990_v58 = vmul.f32 %v3616_v44, %v2989_v20  ;;  %v2999_v4 = vmul.f32 %v3618_v54, %v9644_v29 }
 0x567   : > { %vm3005_vm1 = vweird.f32 %v3618_v54 }
 0x568   : > { %v3027_v41 = vsel %vm3026_vm5, %v3612_v59, %v3023_v36  ;;  %v3033_v12 = vmul.f32 %v3614_v46, %v3032_v45  ;;  %v2991_v0 = vmul.f32 0.5, %v2990_v58  ;;  %v3000_v53 = vmul.f32 %v3618_v54, %v2999_v4  ;;  %vm3006_vm12 = vmor %vm3004_vm11, %vm3005_vm1 }
 0x569   : > { %v3159_v8 = vmul.f32 %v3711_v40, %v3027_v41 }
 0x56a   : > { %v3037_v6 = vsel %vm3036_vm7, %v3614_v46, %v3033_v12  ;;  %v2992_v22 = vsub.f32 1.5, %v2991_v0  ;;  %v3001_v37 = vmul.f32 0.5, %v3000_v53 }
 0x56b   : > { %v3160_v3 = vmul.f32 %v3712_v18, %v3037_v6  ;;  %3255 = vst [vmem:[%s7454_s30 + $0x2d8] sm:$0xff] %v3159_v8 }
 0x56c   : > { %v2993_v35 = vmul.f32 %v3616_v44, %v2992_v22  ;;  %v3002_v30 = vsub.f32 1.5, %v3001_v37 }
 0x56d   : > { %3256 = vst [vmem:[%s7454_s30 + $0x2e0] sm:$0xff] %v3160_v3 }
 0x56e   : > { %v2997_v15 = vsel %vm2996_vm10, %v3616_v44, %v2993_v35  ;;  %v3003_v31 = vmul.f32 %v3618_v54, %v3002_v30 }
 0x56f   : > { %v3156_v14 = vmul.f32 %v3713_v5, %v2997_v15  ;;  %3267 = sbr.rel (!%p3895_p9) target bundleno = 1432 (0x598), region = 32 }
 0x570   : > { %v3007_v28 = vsel %vm3006_vm12, %v3618_v54, %v3003_v31 }
 0x571   : > { %v3157_v43 = vmul.f32 %v3714_v57, %v3007_v28  ;;  %3252 = vst [vmem:[%s7454_s30 + $0x2c0] sm:$0xff] %v3156_v14 }
 0x573   : > { %3253 = vst [vmem:[%s7454_s30 + $0x2c8] sm:$0xff] %v3157_v43 }
 0x574   : > { %s11594_s22 = smov (!%p3270_p6, %s3269_s22), 32 }
 0x575   : > { %s3371_s23 = smul.u32 24, %s11594_s22 }
 0x577   : > { %s3274_s24 = ssub.s32 768, %s3371_s23 }
 0x578   : > { %s3275_s25 = sshll.u32 %s3274_s24, 4 }
 0x579   : > { %3276 = vsyncadd %s3261_s2, %s3275_s25  ;;  %p9686_p11 = scmp.ne.s32.totalorder %s3371_s23, 0  ;;  %s3381_s29 = smul.u32 768, %s3872_s10 }
 0x57a   : > { %s3282_s17 = sshll.u32 %s7454_s30, 4  ;;  %s9692_s3 = smul.u32 384, %s11594_s22  ;;  %s9697_s17 = int_to_ptr.vmem [resolvable:$true] %s3282_s17 }
 0x57b   : > { %s3280_s13 = scalar_lea.hbm %s9741_s1, %s3381_s29  ;;  %s3754_s20 = sshra.s32 %s9697_s17, 4  ;;  %s3755_s20 = int_to_ptr.vmem [resolvable:$true] %s3754_s20 }
 0x57c   : > { %s3284_s14 = sshll.u32 %s3280_s13, 4  ;;  %s3756_s21 = sshrl.u32 %s9692_s3, 4  ;;  %s9699_s14 = int_to_ptr.hbm [resolvable:$true] %s3284_s14 }
 0x57d   : > { %s3792_s10 = sshll.u32 %s3756_s21, 4  ;;  %s3759_s28 = sadd.s32 1, %s3756_s21 }
 0x57e   : > { %p3758_p9 = scmp.ne.s32.totalorder %s3792_s10, %s9692_s3  ;;  %s3838_s26 = smov [#allocation5]  }
 0x57f   : > { %s3765_s30 = scalar_lea.vmem %s3838_s26, 1536 }
 0x580   : > { %s11596_s28 = smov (!%p3758_p9, %s3759_s28), %s3756_s21 }
 0x581   : > { %s3761_s16 = scalar_lea.vmem %s3755_s20, %s11596_s28 }
 0x582   : > { %p3762_p13 = scmp.ne.s32.totalorder %s3755_s20, %s3761_s16  ;;  %p3767_p12 = scmp.lt.s32.totalorder %s3765_s30, %s3761_s16 }
 0x584   : > { %p3763_p7 = pnand %p3762_p13, %p9686_p11 }
 0x586   : > { %p3764_p8 = pneg %p3763_p7 }
 0x588   : > { %p3769_p0 = pnand %p3767_p12, %p3764_p8 }
 0x58a   : > { %3772 = shalt.err (!%p3769_p0)
}
 0x58b   : > { %s3773_s11 = sshra.s32 %s9699_s14, 4  ;;  %s3784_s25 = scalar_lea.hbm %s9741_s1, 960  ;;  %s3774_s11 = int_to_ptr.hbm [resolvable:$true] %s3773_s11 }
 0x58c   : > { %s3780_s22 = scalar_lea.hbm %s3774_s11, %s11596_s28  ;;  %p3785_p4 = scmp.lt.s32.totalorder %s3774_s11, %s9741_s1 }
 0x58d   : > { %p3781_p1 = scmp.ne.s32.totalorder %s3774_s11, %s3780_s22  ;;  %p3786_p5 = scmp.lt.s32.totalorder %s3784_s25, %s3780_s22 }
 0x58f   : > { %p3782_p2 = pnand %p3781_p1, %p9686_p11  ;;  %p3787_p6 = por %p3786_p5, %p3785_p4 }
 0x591   : > { %p3783_p3 = pneg %p3782_p2 }
 0x593   : > { %p3788_p9 = pnand %p3787_p6, %p3783_p3 }
 0x595   : > { %3791 = shalt.err (!%p3788_p9)
}
 0x596   : > { %s3839_s5 = smov 384   ;;  %s3840_s13 = smov 24  }
 0x597   : > { %3290 = dma.vmem_to_hbm [thread:$0]  (%p9686_p11), %s9697_s17, %s9692_s3, %s9699_s14, %s3261_s2, %s3839_s5, %s3839_s5, %s3840_s13  }
 0x598 PF: > { %s3299_s20 = sand.u32 1, %s3819_s6   ;;  %p11584_p13 = scmp.ge.s32.totalorder %s3831_s9, 2 }
 0x599   : > { %s3300_s21 = scalar_lea.sflag [#allocation4], %s3299_s20 }
 0x59a   : > { %p3385_p7 = pnand %p11584_p13, %p3899_p10 }
 0x59c   : > { %p3386_p8 = pneg %p3385_p7 }
 0x59e   : > { %3814 = dma.done.wait (%p3386_p8), %s3300_s21, 12288  }
 0x59f   : > { %3816 = vsyncadd (%p3386_p8), %s3300_s21, 4294955008  ;;  %p14_p12 = scmp.ge.s32.totalorder %s3876_s12, 4   ;;  %s11585_s6 = smov %s3823_s7 }
 0x5a0   : > { %s11586_s7 = smov %s3827_s8  ;;  %s11587_s8 = smov %s3888_s15 }
 0x5a1   : > { %s11588_s9 = smov %s3876_s12  ;;  %16 = sbr.rel (!%p14_p12) target bundleno = 5 (0x5), region = 69 }
 0x5a6   :  { %3306 = vsyncpa [#allocation3], 1 }
 0x5a7   :  { %3308 = vsyncpa [#allocation3 + $0x1], 1 }
 0x5a8   :  { %3309 = vsyncpa [#allocation4], 1 }
 0x5a9   :  { %3311 = vsyncpa [#allocation4 + $0x1], 1 }

</bundles_post_ra>
